<compile_context>
chip_gen: v7x
topology: tpu7x:2x2x1
jax: 0.10.0
libtpu: 0.0.40
codegen_flags: <defaults>
</compile_context>

<pallas_src>
import functools
import math

import jax
import jax.numpy as jnp
from jax.experimental import pallas as pl
from jax.experimental.pallas import tpu as pltpu


# --------------------------------------------------------------------------- #
# Pallas kernels
# --------------------------------------------------------------------------- #
def transformer_block_kernel(
    xq_ref, xf_ref,
    wq_ref, bq_ref, wkv_ref, bkv_ref, wo_ref, bo_ref,
    g1_ref, be1_ref,
    w1_ref, b1_ref, w2_ref, b2_ref,
    g2_ref, be2_ref,
    o_ref,
    *, num_heads, head_dim,
):
    f32 = jnp.float32
    bf16 = jnp.bfloat16
    E = num_heads * head_dim

    xq = xq_ref[...]                       # (tq, E) f32 : query-row tile
    xf = xf_ref[...]                       # (S,  E) f32 : full sequence (for K/V)
    tq = xq.shape[0]
    S = xf.shape[0]

    xq_b = xq.astype(bf16)
    xf_b = xf.astype(bf16)

    # ---- projections (bf16 MXU, f32 accumulation) ------------------------
    # Q for this tile only; fold 1/sqrt(d) into Q (cheaper than scaling scores).
    q = jnp.dot(xq_b, wq_ref[...], preferred_element_type=f32) + bq_ref[...]
    q = q * (1.0 / math.sqrt(head_dim))
    # Fused K/V projection for the whole sequence.
    kv = jnp.dot(xf_b, wkv_ref[...], preferred_element_type=f32) + bkv_ref[...]
    k = kv[:, :E]
    v = kv[:, E:]

    # ---- batched multi-head attention ------------------------------------
    # (rows, E) -> (H, rows, d); no per-head loop / slicing / concat.
    qh = jnp.swapaxes(q.reshape(tq, num_heads, head_dim), 0, 1).astype(bf16)
    kh = jnp.swapaxes(k.reshape(S, num_heads, head_dim), 0, 1).astype(bf16)
    vh = jnp.swapaxes(v.reshape(S, num_heads, head_dim), 0, 1).astype(bf16)

    # scores: contract on d directly (no materialized k.T).
    s = jnp.einsum("hqd,hkd->hqk", qh, kh, preferred_element_type=f32)  # (H,tq,S)
    s = s - jnp.max(s, axis=-1, keepdims=True)
    p = jnp.exp(s)
    p = p * pl.reciprocal(jnp.sum(p, axis=-1, keepdims=True), approx=True)

    ctx = jnp.einsum("hqk,hkd->hqd", p.astype(bf16), vh,
                     preferred_element_type=f32)                         # (H,tq,d)
    attn = jnp.swapaxes(ctx, 0, 1).reshape(tq, E)                        # (tq, E)

    attn = jnp.dot(attn.astype(bf16), wo_ref[...],
                   preferred_element_type=f32) + bo_ref[...]

    # ---- dropout1 (identity) + residual + LayerNorm1 (f32, biased var) ----
    h1 = xq + attn
    mu1 = jnp.mean(h1, axis=-1, keepdims=True)
    var1 = jnp.mean((h1 - mu1) ** 2, axis=-1, keepdims=True)
    h1 = (h1 - mu1) * jax.lax.rsqrt(var1 + 1e-5) * g1_ref[...] + be1_ref[...]

    # ---- feed-forward: Linear -> ReLU -> Linear ---------------------------
    ff = jnp.dot(h1.astype(bf16), w1_ref[...], preferred_element_type=f32) + b1_ref[...]
    ff = jnp.maximum(ff, 0.0)
    ff = jnp.dot(ff.astype(bf16), w2_ref[...], preferred_element_type=f32) + b2_ref[...]

    # ---- dropout2 (identity) + residual + LayerNorm2 ----------------------
    h2 = h1 + ff
    mu2 = jnp.mean(h2, axis=-1, keepdims=True)
    var2 = jnp.mean((h2 - mu2) ** 2, axis=-1, keepdims=True)
    out = (h2 - mu2) * jax.lax.rsqrt(var2 + 1e-5) * g2_ref[...] + be2_ref[...]

    o_ref[...] = out.astype(o_ref.dtype)


def final_linear_kernel(x_ref, w_ref, b_ref, o_ref):
    o_ref[...] = (
        jnp.dot(x_ref[...].astype(jnp.bfloat16), w_ref[...],
                preferred_element_type=jnp.float32) + b_ref[...]
    ).astype(o_ref.dtype)


# --------------------------------------------------------------------------- #
# Wrappers
# --------------------------------------------------------------------------- #
def _resident_spec(arr):
    """Full-array block whose index never changes -> stays VMEM-resident."""
    return pl.BlockSpec(arr.shape, lambda i, _n=arr.ndim: (0,) * _n)


def transformer_block(x, layer, num_heads, *, tq=128):
    S, E = x.shape
    assert S % tq == 0 and E % num_heads == 0
    head_dim = E // num_heads
    hidden = layer["w1"].shape[1]

    weight_args = (
        layer["wq"], layer["bq"], layer["wkv"], layer["bkv"],
        layer["wo"], layer["bo"],
        layer["g1"], layer["be1"],
        layer["w1"], layer["b1"], layer["w2"], layer["b2"],
        layer["g2"], layer["be2"],
    )

    in_specs = [
        pl.BlockSpec((tq, E), lambda i: (i, 0)),   # query-row tile (pipelined)
        pl.BlockSpec((S, E), lambda i: (0, 0)),    # full sequence (resident, for K/V)
    ] + [_resident_spec(w) for w in weight_args]

    flops = (
        2 * S * E * E            # Q projection
        + 2 * S * E * (2 * E)    # fused K/V projection
        + 2 * 2 * S * S * E      # Q@K^T and P@V
        + 2 * S * E * E          # output projection
        + 2 * 2 * S * E * hidden # FFN
    )
    bytes_accessed = 3 * int(x.nbytes) + sum(int(w.nbytes) for w in weight_args)
    cost = pl.CostEstimate(flops=flops,
                           transcendentals=num_heads * S * S,
                           bytes_accessed=bytes_accessed)

    return pl.pallas_call(
        functools.partial(transformer_block_kernel,
                          num_heads=num_heads, head_dim=head_dim),
        out_shape=jax.ShapeDtypeStruct((S, E), x.dtype),
        grid=(S // tq,),
        in_specs=in_specs,
        out_specs=pl.BlockSpec((tq, E), lambda i: (i, 0)),
        compiler_params=pltpu.CompilerParams(
            dimension_semantics=("parallel",),
            vmem_limit_bytes=32 * 1024 * 1024,
        ),
        cost_estimate=cost,
    )(x, x, *weight_args)


def final_linear(x, w, b, *, tq=128):
    S, E = x.shape
    V = w.shape[1]
    return pl.pallas_call(
        final_linear_kernel,
        out_shape=jax.ShapeDtypeStruct((S, V), x.dtype),
        grid=(S // tq,),
        in_specs=[
            pl.BlockSpec((tq, E), lambda i: (i, 0)),
            pl.BlockSpec((E, V), lambda i: (0, 0)),
            pl.BlockSpec((1, V), lambda i: (0, 0)),
        ],
        out_specs=pl.BlockSpec((tq, V), lambda i: (i, 0)),
        compiler_params=pltpu.CompilerParams(dimension_semantics=("parallel",)),
    )(x, w, b)


def transformer_forward(token_ids, params, num_heads):
    """Matches Transformer.forward: squeeze(0) -> embed -> unsqueeze(0) -> PE ->
    blocks -> vocab projection. Batch must be 1 (as the PyTorch module assumes)."""
    assert token_ids.shape[0] == 1, "module's residual broadcast requires batch=1"
    S = token_ids.shape[1]
    ids = token_ids.reshape(S)

    # TODO(synk): embedding row-gather + positional-encoding add are left in plain
    # JAX (data-dependent row gather; a scalar-prefetch pl.Element BlockSpec kernel
    # is possible but not worth it for this memory-bound lookup).
    x = jnp.take(params["embed"], ids, axis=0)          # (S, E) f32
    x = x + params["pos_enc"][:S, :]

    for layer in params["layers"]:
        x = transformer_block(x, layer, num_heads)

    logits = final_linear(x, params["w_out"], params["b_out"])   # (S, vocab)
    return logits[None, :, :]                                    # (1, S, vocab)


# --------------------------------------------------------------------------- #
# Parameter initialization (deterministic)
# --------------------------------------------------------------------------- #
def init_params(key, vocab_size, embed_dim, num_heads, hidden_dim, num_layers,
                max_seq_len=700):
    keys = jax.random.split(key, num_layers + 2)

    # nn.Embedding init ~ N(0, 1)
    embed = jax.random.normal(keys[0], (vocab_size, embed_dim), jnp.float32)

    # PositionalEncoding init (sin / cos)
    pos = jnp.arange(max_seq_len, dtype=jnp.float32)[:, None]
    div = jnp.exp(jnp.arange(0, embed_dim, 2, dtype=jnp.float32)
                  * (-math.log(10000.0) / embed_dim))
    pe = jnp.zeros((max_seq_len, embed_dim), jnp.float32)
    pe = pe.at[:, 0::2].set(jnp.sin(pos * div))
    pe = pe.at[:, 1::2].set(jnp.cos(pos * div))

    def lin(k, fan_in, fan_out):
        """nn.Linear init; weight stored (in, out) so the kernel does x @ W + b.
        Weights in bf16 (MXU operands), biases in f32 (post-accumulation adds)."""
        kw, kb = jax.random.split(k)
        bound = 1.0 / math.sqrt(fan_in)
        w = jax.random.uniform(kw, (fan_in, fan_out), jnp.float32, -bound, bound)
        b = jax.random.uniform(kb, (1, fan_out), jnp.float32, -bound, bound)
        return w.astype(jnp.bfloat16), b

    layers = []
    for l in range(num_layers):
        lk = jax.random.split(keys[1 + l], 6)
        wq, bq = lin(lk[0], embed_dim, embed_dim)
        wk, bk = lin(lk[1], embed_dim, embed_dim)
        wv, bv = lin(lk[2], embed_dim, embed_dim)
        wo, bo = lin(lk[3], embed_dim, embed_dim)
        w1, b1 = lin(lk[4], embed_dim, hidden_dim)
        w2, b2 = lin(lk[5], hidden_dim, embed_dim)
        layers.append(dict(
            wq=wq, bq=bq,
            wkv=jnp.concatenate([wk, wv], axis=1),   # fused K/V weight (E, 2E) bf16
            bkv=jnp.concatenate([bk, bv], axis=1),   # fused K/V bias   (1, 2E) f32
            wo=wo, bo=bo,
            w1=w1, b1=b1, w2=w2, b2=b2,
            g1=jnp.ones((1, embed_dim), jnp.float32),
            be1=jnp.zeros((1, embed_dim), jnp.float32),
            g2=jnp.ones((1, embed_dim), jnp.float32),
            be2=jnp.zeros((1, embed_dim), jnp.float32),
        ))

    w_out, b_out = lin(keys[-1], embed_dim, vocab_size)
    return dict(embed=embed, pos_enc=pe, layers=layers, w_out=w_out, b_out=b_out)


# --------------------------------------------------------------------------- #
# Demo
# --------------------------------------------------------------------------- #
if __name__ == "__main__":
    # Lane-dense small shapes: E=256 (2 heads x head_dim=128), hidden=512,
    # vocab=512, S=256 (two 128-row query tiles -> 2-step parallel grid).
    vocab_size, embed_dim, num_heads, hidden_dim, num_layers = 512, 256, 2, 512, 2
    batch, seq = 1, 256

    key = jax.random.PRNGKey(0)
    k_tok, k_par = jax.random.split(key)
    token_ids = jax.random.randint(k_tok, (batch, seq), 0, vocab_size, jnp.int32)
    params = init_params(k_par, vocab_size, embed_dim, num_heads, hidden_dim,
                         num_layers)

    y = transformer_forward(token_ids, params, num_heads)
    jax.block_until_ready(y)
    assert y.shape == (batch, seq, vocab_size)
    assert bool(jnp.all(jnp.isfinite(y)))
    print("KERNEL_OK")
</pallas_src>

<mosaic_0001>
module attributes {stable_mosaic.version = 11 : i64} {
  func.func @transformer_block_kernel(%arg0: i32, %arg1: memref<128x256xf32, #tpu.memory_space<vmem>>, %arg2: memref<256x256xf32, #tpu.memory_space<vmem>>, %arg3: memref<256x256xbf16, #tpu.memory_space<vmem>>, %arg4: memref<1x256xf32, #tpu.memory_space<vmem>>, %arg5: memref<256x512xbf16, #tpu.memory_space<vmem>>, %arg6: memref<1x512xf32, #tpu.memory_space<vmem>>, %arg7: memref<256x256xbf16, #tpu.memory_space<vmem>>, %arg8: memref<1x256xf32, #tpu.memory_space<vmem>>, %arg9: memref<1x256xf32, #tpu.memory_space<vmem>>, %arg10: memref<1x256xf32, #tpu.memory_space<vmem>>, %arg11: memref<256x512xbf16, #tpu.memory_space<vmem>>, %arg12: memref<1x512xf32, #tpu.memory_space<vmem>>, %arg13: memref<512x256xbf16, #tpu.memory_space<vmem>>, %arg14: memref<1x256xf32, #tpu.memory_space<vmem>>, %arg15: memref<1x256xf32, #tpu.memory_space<vmem>>, %arg16: memref<1x256xf32, #tpu.memory_space<vmem>>, %arg17: memref<128x256xf32, #tpu.memory_space<vmem>>) attributes {dimension_semantics = [#tpu.dimension_semantics<parallel>], iteration_bounds = array<i64: 2>, scalar_prefetch = 0 : i64, scratch_operands = 0 : i64, tpu.core_type = #tpu.core_type<tc>, window_params = [{transform_indices = @transform_0, window_bounds = array<i64: 128, 256>}, {pipeline_mode = #tpu.pipeline_mode<synchronous>, transform_indices = @transform_1, window_bounds = array<i64: 256, 256>}, {pipeline_mode = #tpu.pipeline_mode<synchronous>, transform_indices = @transform_2, window_bounds = array<i64: 256, 256>}, {pipeline_mode = #tpu.pipeline_mode<synchronous>, transform_indices = @transform_3, window_bounds = array<i64: 1, 256>}, {pipeline_mode = #tpu.pipeline_mode<synchronous>, transform_indices = @transform_4, window_bounds = array<i64: 256, 512>}, {pipeline_mode = #tpu.pipeline_mode<synchronous>, transform_indices = @transform_5, window_bounds = array<i64: 1, 512>}, {pipeline_mode = #tpu.pipeline_mode<synchronous>, transform_indices = @transform_6, window_bounds = array<i64: 256, 256>}, {pipeline_mode = #tpu.pipeline_mode<synchronous>, transform_indices = @transform_7, window_bounds = array<i64: 1, 256>}, {pipeline_mode = #tpu.pipeline_mode<synchronous>, transform_indices = @transform_8, window_bounds = array<i64: 1, 256>}, {pipeline_mode = #tpu.pipeline_mode<synchronous>, transform_indices = @transform_9, window_bounds = array<i64: 1, 256>}, {pipeline_mode = #tpu.pipeline_mode<synchronous>, transform_indices = @transform_10, window_bounds = array<i64: 256, 512>}, {pipeline_mode = #tpu.pipeline_mode<synchronous>, transform_indices = @transform_11, window_bounds = array<i64: 1, 512>}, {pipeline_mode = #tpu.pipeline_mode<synchronous>, transform_indices = @transform_12, window_bounds = array<i64: 512, 256>}, {pipeline_mode = #tpu.pipeline_mode<synchronous>, transform_indices = @transform_13, window_bounds = array<i64: 1, 256>}, {pipeline_mode = #tpu.pipeline_mode<synchronous>, transform_indices = @transform_14, window_bounds = array<i64: 1, 256>}, {pipeline_mode = #tpu.pipeline_mode<synchronous>, transform_indices = @transform_15, window_bounds = array<i64: 1, 256>}, {transform_indices = @transform_16, window_bounds = array<i64: 128, 256>}]} {
    %c0 = arith.constant 0 : index
    %c0_0 = arith.constant 0 : index
    %0 = vector.load %arg1[%c0, %c0_0] : memref<128x256xf32, #tpu.memory_space<vmem>>, vector<128x256xf32>
    %c0_1 = arith.constant 0 : index
    %c0_2 = arith.constant 0 : index
    %1 = vector.load %arg2[%c0_1, %c0_2] : memref<256x256xf32, #tpu.memory_space<vmem>>, vector<256x256xf32>
    %2 = arith.truncf %0 : vector<128x256xf32> to vector<128x256xbf16>
    %3 = arith.truncf %1 : vector<256x256xf32> to vector<256x256xbf16>
    %c0_3 = arith.constant 0 : index
    %c0_4 = arith.constant 0 : index
    %4 = vector.load %arg3[%c0_3, %c0_4] : memref<256x256xbf16, #tpu.memory_space<vmem>>, vector<256x256xbf16>
    %cst = arith.constant dense<0.000000e+00> : vector<128x256xf32>
    %5 = tpu.matmul %2, %4, %cst {dimension_numbers = #tpu.dot_dimension_numbers<[1], [0], [0], [1], [0, 0, 1, 1], [], []>} : vector<128x256xbf16>, vector<256x256xbf16>, vector<128x256xf32> -> vector<128x256xf32>
    %c0_5 = arith.constant 0 : index
    %c0_6 = arith.constant 0 : index
    %6 = vector.load %arg4[%c0_5, %c0_6] : memref<1x256xf32, #tpu.memory_space<vmem>>, vector<1x256xf32>
    %7 = vector.broadcast %6 : vector<1x256xf32> to vector<128x256xf32>
    %8 = arith.addf %5, %7 : vector<128x256xf32>
    %cst_7 = arith.constant 0.0883883461 : f32
    %9 = vector.broadcast %cst_7 : f32 to vector<128x256xf32>
    %10 = arith.mulf %8, %9 : vector<128x256xf32>
    %c0_8 = arith.constant 0 : index
    %c0_9 = arith.constant 0 : index
    %11 = vector.load %arg5[%c0_8, %c0_9] : memref<256x512xbf16, #tpu.memory_space<vmem>>, vector<256x512xbf16>
    %cst_10 = arith.constant dense<0.000000e+00> : vector<256x512xf32>
    %12 = tpu.matmul %3, %11, %cst_10 {dimension_numbers = #tpu.dot_dimension_numbers<[1], [0], [0], [1], [0, 0, 1, 1], [], []>} : vector<256x256xbf16>, vector<256x512xbf16>, vector<256x512xf32> -> vector<256x512xf32>
    %c0_11 = arith.constant 0 : index
    %c0_12 = arith.constant 0 : index
    %13 = vector.load %arg6[%c0_11, %c0_12] : memref<1x512xf32, #tpu.memory_space<vmem>>, vector<1x512xf32>
    %14 = vector.broadcast %13 : vector<1x512xf32> to vector<256x512xf32>
    %15 = arith.addf %12, %14 : vector<256x512xf32>
    %16 = vector.extract_strided_slice %15 {offsets = [0, 0], sizes = [256, 256], strides = [1, 1]} : vector<256x512xf32> to vector<256x256xf32>
    %17 = vector.extract_strided_slice %15 {offsets = [0, 256], sizes = [256, 256], strides = [1, 1]} : vector<256x512xf32> to vector<256x256xf32>
    %18 = vector.shape_cast %10 : vector<128x256xf32> to vector<128x2x128xf32>
    %19 = tpu.transpose %18, [1, 0, 2] : vector<128x2x128xf32> -> vector<2x128x128xf32>
    %20 = arith.truncf %19 : vector<2x128x128xf32> to vector<2x128x128xbf16>
    %21 = vector.shape_cast %16 : vector<256x256xf32> to vector<256x2x128xf32>
    %22 = tpu.transpose %21, [1, 0, 2] : vector<256x2x128xf32> -> vector<2x256x128xf32>
    %23 = arith.truncf %22 : vector<2x256x128xf32> to vector<2x256x128xbf16>
    %24 = vector.shape_cast %17 : vector<256x256xf32> to vector<256x2x128xf32>
    %25 = tpu.transpose %24, [1, 0, 2] : vector<256x2x128xf32> -> vector<2x256x128xf32>
    %26 = arith.truncf %25 : vector<2x256x128xf32> to vector<2x256x128xbf16>
    "tpu.trace_start"() <{level = 10 : i32, message = "hqd,hkd->hqk"}> : () -> ()
    %cst_13 = arith.constant dense<0.000000e+00> : vector<2x128x256xf32>
    %27 = tpu.matmul %20, %23, %cst_13 {dimension_numbers = #tpu.dot_dimension_numbers<[2], [2], [1], [1], [0, 0, 0, 1, 1, 1], [0], [0]>} : vector<2x128x128xbf16>, vector<2x256x128xbf16>, vector<2x128x256xf32> -> vector<2x128x256xf32>
    "tpu.trace_stop"() : () -> ()
    %cst_14 = arith.constant dense<0xFF800000> : vector<2x128xf32>
    %28 = vector.multi_reduction <maximumf>, %27, %cst_14 [2] : vector<2x128x256xf32> to vector<2x128xf32>
    %29 = vector.shape_cast %28 : vector<2x128xf32> to vector<2x128x1xf32>
    %30 = vector.broadcast %29 : vector<2x128x1xf32> to vector<2x128x256xf32>
    %31 = arith.subf %27, %30 : vector<2x128x256xf32>
    %32 = math.exp %31 : vector<2x128x256xf32>
    %cst_15 = arith.constant dense<0.000000e+00> : vector<2x128xf32>
    %33 = vector.multi_reduction <add>, %32, %cst_15 [2] : vector<2x128x256xf32> to vector<2x128xf32>
    %34 = vector.shape_cast %33 : vector<2x128xf32> to vector<2x128x1xf32>
    %35 = tpu.reciprocal %34 {approx = true} : vector<2x128x1xf32> -> vector<2x128x1xf32>
    %36 = vector.broadcast %35 : vector<2x128x1xf32> to vector<2x128x256xf32>
    %37 = arith.mulf %32, %36 : vector<2x128x256xf32>
    %38 = arith.truncf %37 : vector<2x128x256xf32> to vector<2x128x256xbf16>
    "tpu.trace_start"() <{level = 10 : i32, message = "hqk,hkd->hqd"}> : () -> ()
    %cst_16 = arith.constant dense<0.000000e+00> : vector<2x128x128xf32>
    %39 = tpu.matmul %38, %26, %cst_16 {dimension_numbers = #tpu.dot_dimension_numbers<[2], [1], [1], [2], [0, 0, 0, 1, 1, 2], [0], [0]>} : vector<2x128x256xbf16>, vector<2x256x128xbf16>, vector<2x128x128xf32> -> vector<2x128x128xf32>
    "tpu.trace_stop"() : () -> ()
    %40 = tpu.transpose %39, [1, 0, 2] : vector<2x128x128xf32> -> vector<128x2x128xf32>
    %41 = vector.shape_cast %40 : vector<128x2x128xf32> to vector<128x256xf32>
    %42 = arith.truncf %41 : vector<128x256xf32> to vector<128x256xbf16>
    %c0_17 = arith.constant 0 : index
    %c0_18 = arith.constant 0 : index
    %43 = vector.load %arg7[%c0_17, %c0_18] : memref<256x256xbf16, #tpu.memory_space<vmem>>, vector<256x256xbf16>
    %cst_19 = arith.constant dense<0.000000e+00> : vector<128x256xf32>
    %44 = tpu.matmul %42, %43, %cst_19 {dimension_numbers = #tpu.dot_dimension_numbers<[1], [0], [0], [1], [0, 0, 1, 1], [], []>} : vector<128x256xbf16>, vector<256x256xbf16>, vector<128x256xf32> -> vector<128x256xf32>
    %c0_20 = arith.constant 0 : index
    %c0_21 = arith.constant 0 : index
    %45 = vector.load %arg8[%c0_20, %c0_21] : memref<1x256xf32, #tpu.memory_space<vmem>>, vector<1x256xf32>
    %46 = vector.broadcast %45 : vector<1x256xf32> to vector<128x256xf32>
    %47 = arith.addf %44, %46 : vector<128x256xf32>
    %48 = arith.addf %0, %47 : vector<128x256xf32>
    %cst_22 = arith.constant dense<0.000000e+00> : vector<128xf32>
    %49 = vector.multi_reduction <add>, %48, %cst_22 [1] : vector<128x256xf32> to vector<128xf32>
    %50 = vector.shape_cast %49 : vector<128xf32> to vector<128x1xf32>
    %cst_23 = arith.constant 2.560000e+02 : f32
    %51 = vector.broadcast %cst_23 : f32 to vector<128x1xf32>
    %52 = arith.divf %50, %51 : vector<128x1xf32>
    %53 = vector.broadcast %52 : vector<128x1xf32> to vector<128x256xf32>
    %54 = arith.subf %48, %53 : vector<128x256xf32>
    %55 = arith.mulf %54, %54 : vector<128x256xf32>
    %cst_24 = arith.constant dense<0.000000e+00> : vector<128xf32>
    %56 = vector.multi_reduction <add>, %55, %cst_24 [1] : vector<128x256xf32> to vector<128xf32>
    %57 = vector.shape_cast %56 : vector<128xf32> to vector<128x1xf32>
    %cst_25 = arith.constant 2.560000e+02 : f32
    %58 = vector.broadcast %cst_25 : f32 to vector<128x1xf32>
    %59 = arith.divf %57, %58 : vector<128x1xf32>
    %60 = vector.broadcast %52 : vector<128x1xf32> to vector<128x256xf32>
    %61 = arith.subf %48, %60 : vector<128x256xf32>
    %cst_26 = arith.constant 9.99999974E-6 : f32
    %62 = vector.broadcast %cst_26 : f32 to vector<128x1xf32>
    %63 = arith.addf %59, %62 : vector<128x1xf32>
    %64 = math.rsqrt %63 : vector<128x1xf32>
    %65 = vector.broadcast %64 : vector<128x1xf32> to vector<128x256xf32>
    %66 = arith.mulf %61, %65 : vector<128x256xf32>
    %c0_27 = arith.constant 0 : index
    %c0_28 = arith.constant 0 : index
    %67 = vector.load %arg9[%c0_27, %c0_28] : memref<1x256xf32, #tpu.memory_space<vmem>>, vector<1x256xf32>
    %68 = vector.broadcast %67 : vector<1x256xf32> to vector<128x256xf32>
    %69 = arith.mulf %66, %68 : vector<128x256xf32>
    %c0_29 = arith.constant 0 : index
    %c0_30 = arith.constant 0 : index
    %70 = vector.load %arg10[%c0_29, %c0_30] : memref<1x256xf32, #tpu.memory_space<vmem>>, vector<1x256xf32>
    %71 = vector.broadcast %70 : vector<1x256xf32> to vector<128x256xf32>
    %72 = arith.addf %69, %71 : vector<128x256xf32>
    %73 = arith.truncf %72 : vector<128x256xf32> to vector<128x256xbf16>
    %c0_31 = arith.constant 0 : index
    %c0_32 = arith.constant 0 : index
    %74 = vector.load %arg11[%c0_31, %c0_32] : memref<256x512xbf16, #tpu.memory_space<vmem>>, vector<256x512xbf16>
    %cst_33 = arith.constant dense<0.000000e+00> : vector<128x512xf32>
    %75 = tpu.matmul %73, %74, %cst_33 {dimension_numbers = #tpu.dot_dimension_numbers<[1], [0], [0], [1], [0, 0, 1, 1], [], []>} : vector<128x256xbf16>, vector<256x512xbf16>, vector<128x512xf32> -> vector<128x512xf32>
    %c0_34 = arith.constant 0 : index
    %c0_35 = arith.constant 0 : index
    %76 = vector.load %arg12[%c0_34, %c0_35] : memref<1x512xf32, #tpu.memory_space<vmem>>, vector<1x512xf32>
    %77 = vector.broadcast %76 : vector<1x512xf32> to vector<128x512xf32>
    %78 = arith.addf %75, %77 : vector<128x512xf32>
    %cst_36 = arith.constant 0.000000e+00 : f32
    %79 = vector.broadcast %cst_36 : f32 to vector<128x512xf32>
    %80 = arith.maximumf %78, %79 : vector<128x512xf32>
    %81 = arith.truncf %80 : vector<128x512xf32> to vector<128x512xbf16>
    %c0_37 = arith.constant 0 : index
    %c0_38 = arith.constant 0 : index
    %82 = vector.load %arg13[%c0_37, %c0_38] : memref<512x256xbf16, #tpu.memory_space<vmem>>, vector<512x256xbf16>
    %cst_39 = arith.constant dense<0.000000e+00> : vector<128x256xf32>
    %83 = tpu.matmul %81, %82, %cst_39 {dimension_numbers = #tpu.dot_dimension_numbers<[1], [0], [0], [1], [0, 0, 1, 1], [], []>} : vector<128x512xbf16>, vector<512x256xbf16>, vector<128x256xf32> -> vector<128x256xf32>
    %c0_40 = arith.constant 0 : index
    %c0_41 = arith.constant 0 : index
    %84 = vector.load %arg14[%c0_40, %c0_41] : memref<1x256xf32, #tpu.memory_space<vmem>>, vector<1x256xf32>
    %85 = vector.broadcast %84 : vector<1x256xf32> to vector<128x256xf32>
    %86 = arith.addf %83, %85 : vector<128x256xf32>
    %87 = arith.addf %72, %86 : vector<128x256xf32>
    %cst_42 = arith.constant dense<0.000000e+00> : vector<128xf32>
    %88 = vector.multi_reduction <add>, %87, %cst_42 [1] : vector<128x256xf32> to vector<128xf32>
    %89 = vector.shape_cast %88 : vector<128xf32> to vector<128x1xf32>
    %cst_43 = arith.constant 2.560000e+02 : f32
    %90 = vector.broadcast %cst_43 : f32 to vector<128x1xf32>
    %91 = arith.divf %89, %90 : vector<128x1xf32>
    %92 = vector.broadcast %91 : vector<128x1xf32> to vector<128x256xf32>
    %93 = arith.subf %87, %92 : vector<128x256xf32>
    %94 = arith.mulf %93, %93 : vector<128x256xf32>
    %cst_44 = arith.constant dense<0.000000e+00> : vector<128xf32>
    %95 = vector.multi_reduction <add>, %94, %cst_44 [1] : vector<128x256xf32> to vector<128xf32>
    %96 = vector.shape_cast %95 : vector<128xf32> to vector<128x1xf32>
    %cst_45 = arith.constant 2.560000e+02 : f32
    %97 = vector.broadcast %cst_45 : f32 to vector<128x1xf32>
    %98 = arith.divf %96, %97 : vector<128x1xf32>
    %99 = vector.broadcast %91 : vector<128x1xf32> to vector<128x256xf32>
    %100 = arith.subf %87, %99 : vector<128x256xf32>
    %cst_46 = arith.constant 9.99999974E-6 : f32
    %101 = vector.broadcast %cst_46 : f32 to vector<128x1xf32>
    %102 = arith.addf %98, %101 : vector<128x1xf32>
    %103 = math.rsqrt %102 : vector<128x1xf32>
    %104 = vector.broadcast %103 : vector<128x1xf32> to vector<128x256xf32>
    %105 = arith.mulf %100, %104 : vector<128x256xf32>
    %c0_47 = arith.constant 0 : index
    %c0_48 = arith.constant 0 : index
    %106 = vector.load %arg15[%c0_47, %c0_48] : memref<1x256xf32, #tpu.memory_space<vmem>>, vector<1x256xf32>
    %107 = vector.broadcast %106 : vector<1x256xf32> to vector<128x256xf32>
    %108 = arith.mulf %105, %107 : vector<128x256xf32>
    %c0_49 = arith.constant 0 : index
    %c0_50 = arith.constant 0 : index
    %109 = vector.load %arg16[%c0_49, %c0_50] : memref<1x256xf32, #tpu.memory_space<vmem>>, vector<1x256xf32>
    %110 = vector.broadcast %109 : vector<1x256xf32> to vector<128x256xf32>
    %111 = arith.addf %108, %110 : vector<128x256xf32>
    %c0_51 = arith.constant 0 : index
    %c0_52 = arith.constant 0 : index
    %112 = vector.load %arg17[%c0_51, %c0_52] : memref<128x256xf32, #tpu.memory_space<vmem>>, vector<128x256xf32>
    tpu.vector_store %arg17[%c0_51, %c0_52], %111 {strides = array<i32>} : memref<128x256xf32, #tpu.memory_space<vmem>>, vector<128x256xf32>,
    return
  }
  func.func @transform_0(%arg0: i32) -> (i32, i32) {
    %c0_i32 = arith.constant 0 : i32
    %c0_i32_0 = arith.constant 0 : i32
    return %arg0, %c0_i32 : i32, i32
  }
  func.func @transform_1(%arg0: i32) -> (i32, i32) {
    %c0_i32 = arith.constant 0 : i32
    %c0_i32_0 = arith.constant 0 : i32
    %c0_i32_1 = arith.constant 0 : i32
    return %c0_i32, %c0_i32_0 : i32, i32
  }
  func.func @transform_2(%arg0: i32) -> (i32, i32) {
    %c0_i32 = arith.constant 0 : i32
    %c0_i32_0 = arith.constant 0 : i32
    %c0_i32_1 = arith.constant 0 : i32
    return %c0_i32, %c0_i32_0 : i32, i32
  }
  func.func @transform_3(%arg0: i32) -> (i32, i32) {
    %c0_i32 = arith.constant 0 : i32
    %c0_i32_0 = arith.constant 0 : i32
    %c0_i32_1 = arith.constant 0 : i32
    return %c0_i32, %c0_i32_0 : i32, i32
  }
  func.func @transform_4(%arg0: i32) -> (i32, i32) {
    %c0_i32 = arith.constant 0 : i32
    %c0_i32_0 = arith.constant 0 : i32
    %c0_i32_1 = arith.constant 0 : i32
    return %c0_i32, %c0_i32_0 : i32, i32
  }
  func.func @transform_5(%arg0: i32) -> (i32, i32) {
    %c0_i32 = arith.constant 0 : i32
    %c0_i32_0 = arith.constant 0 : i32
    %c0_i32_1 = arith.constant 0 : i32
    return %c0_i32, %c0_i32_0 : i32, i32
  }
  func.func @transform_6(%arg0: i32) -> (i32, i32) {
    %c0_i32 = arith.constant 0 : i32
    %c0_i32_0 = arith.constant 0 : i32
    %c0_i32_1 = arith.constant 0 : i32
    return %c0_i32, %c0_i32_0 : i32, i32
  }
  func.func @transform_7(%arg0: i32) -> (i32, i32) {
    %c0_i32 = arith.constant 0 : i32
    %c0_i32_0 = arith.constant 0 : i32
    %c0_i32_1 = arith.constant 0 : i32
    return %c0_i32, %c0_i32_0 : i32, i32
  }
  func.func @transform_8(%arg0: i32) -> (i32, i32) {
    %c0_i32 = arith.constant 0 : i32
    %c0_i32_0 = arith.constant 0 : i32
    %c0_i32_1 = arith.constant 0 : i32
    return %c0_i32, %c0_i32_0 : i32, i32
  }
  func.func @transform_9(%arg0: i32) -> (i32, i32) {
    %c0_i32 = arith.constant 0 : i32
    %c0_i32_0 = arith.constant 0 : i32
    %c0_i32_1 = arith.constant 0 : i32
    return %c0_i32, %c0_i32_0 : i32, i32
  }
  func.func @transform_10(%arg0: i32) -> (i32, i32) {
    %c0_i32 = arith.constant 0 : i32
    %c0_i32_0 = arith.constant 0 : i32
    %c0_i32_1 = arith.constant 0 : i32
    return %c0_i32, %c0_i32_0 : i32, i32
  }
  func.func @transform_11(%arg0: i32) -> (i32, i32) {
    %c0_i32 = arith.constant 0 : i32
    %c0_i32_0 = arith.constant 0 : i32
    %c0_i32_1 = arith.constant 0 : i32
    return %c0_i32, %c0_i32_0 : i32, i32
  }
  func.func @transform_12(%arg0: i32) -> (i32, i32) {
    %c0_i32 = arith.constant 0 : i32
    %c0_i32_0 = arith.constant 0 : i32
    %c0_i32_1 = arith.constant 0 : i32
    return %c0_i32, %c0_i32_0 : i32, i32
  }
  func.func @transform_13(%arg0: i32) -> (i32, i32) {
    %c0_i32 = arith.constant 0 : i32
    %c0_i32_0 = arith.constant 0 : i32
    %c0_i32_1 = arith.constant 0 : i32
    return %c0_i32, %c0_i32_0 : i32, i32
  }
  func.func @transform_14(%arg0: i32) -> (i32, i32) {
    %c0_i32 = arith.constant 0 : i32
    %c0_i32_0 = arith.constant 0 : i32
    %c0_i32_1 = arith.constant 0 : i32
    return %c0_i32, %c0_i32_0 : i32, i32
  }
  func.func @transform_15(%arg0: i32) -> (i32, i32) {
    %c0_i32 = arith.constant 0 : i32
    %c0_i32_0 = arith.constant 0 : i32
    %c0_i32_1 = arith.constant 0 : i32
    return %c0_i32, %c0_i32_0 : i32, i32
  }
  func.func @transform_16(%arg0: i32) -> (i32, i32) {
    %c0_i32 = arith.constant 0 : i32
    %c0_i32_0 = arith.constant 0 : i32
    return %arg0, %c0_i32 : i32, i32
  }
}

</mosaic_0001>

<bundles_post_ra>
// kernel: tpu_custom_call.1
= control target key start
LH: loop header
LB: loop body
LE: loop exit
PB: predicated region body
PF: predicated region fallthrough
CT: control target
= control target key end

     0   :  { %s24773_s0 = inlined_call_operand.hbm [shape: f32[256,256], index: 0, kind: input, shape index: {}]   ;;  %s24774_s1 = inlined_call_operand.hbm [shape: f32[256,256], index: 1, kind: input, shape index: {}]   ;;  %s24775_s2 = inlined_call_operand.hbm [shape: bf16[256,256], index: 2, kind: input, shape index: {}]   ;;  %s24776_s3 = inlined_call_operand.vmem [shape: f32[1,256], index: 3, kind: input, shape index: {}]   ;;  %s24777_s4 = inlined_call_operand.hbm [shape: bf16[256,512], index: 4, kind: input, shape index: {}]   ;;  %s24778_s5 = inlined_call_operand.vmem [shape: f32[1,512], index: 5, kind: input, shape index: {}]   ;;  %s24779_s6 = inlined_call_operand.hbm [shape: bf16[256,256], index: 6, kind: input, shape index: {}]   ;;  %s24780_s7 = inlined_call_operand.vmem [shape: f32[1,256], index: 7, kind: input, shape index: {}]   ;;  %s24781_s8 = inlined_call_operand.vmem [shape: f32[1,256], index: 8, kind: input, shape index: {}]   ;;  %s24782_s9 = inlined_call_operand.vmem [shape: f32[1,256], index: 9, kind: input, shape index: {}]   ;;  %s24783_s10 = inlined_call_operand.hbm [shape: bf16[256,512], index: 10, kind: input, shape index: {}]   ;;  %s24784_s11 = inlined_call_operand.vmem [shape: f32[1,512], index: 11, kind: input, shape index: {}]   ;;  %s24785_s12 = inlined_call_operand.hbm [shape: bf16[512,256], index: 12, kind: input, shape index: {}]   ;;  %s24786_s13 = inlined_call_operand.vmem [shape: f32[1,256], index: 13, kind: input, shape index: {}]   ;;  %s24787_s14 = inlined_call_operand.vmem [shape: f32[1,256], index: 14, kind: input, shape index: {}]   ;;  %s24788_s15 = inlined_call_operand.vmem [shape: f32[1,256], index: 15, kind: input, shape index: {}]   ;;  %s24789_s16 = inlined_call_operand.hbm [shape: f32[256,256], index: 16, kind: output, shape index: {}]  }
   0x1   :  { %24991 = sst [smem:[#allocation148_spill]] %s24773_s0 }
   0x2   :  { %24992 = sst [smem:[#allocation149_spill]] %s24774_s1 }
   0x3   :  { %24993 = sst [smem:[#allocation150_spill]] %s24781_s8 }
   0x4   :  { %24994 = sst [smem:[#allocation151_spill]] %s24782_s9 }
   0x5   :  { %24995 = sst [smem:[#allocation152_spill]] %s24784_s11 }
   0x6   :  { %24996 = sst [smem:[#allocation153_spill]] %s24786_s13 }
   0x7   :  { %24997 = sst [smem:[#allocation154_spill]] %s24787_s14 }
   0x8   :  { %24998 = sst [smem:[#allocation155_spill]] %s24788_s15 }
   0x9   :  { %24999 = sst [smem:[#allocation156_spill]] %s24789_s16 }
   0xa   :  { %21 = vsyncpa [#allocation3], 0 }
   0xb   :  { %23 = vsyncpa [#allocation3 + $0x1], 0 }
   0xc   :  { %24 = vsyncpa [#allocation6], 0 }
   0xd   :  { %25 = vsyncpa [#allocation9], 0 }
   0xe   :  { %26 = vsyncpa [#allocation12], 0 }
   0xf   :  { %27 = vsyncpa [#allocation4], 0 }
  0x10   :  { %29 = vsyncpa [#allocation4 + $0x1], 0  ;;  %s18597_s21 = smov 0   ;;  %s18599_s22 = smov 0  }
  0x11   :  { %s18601_s23 = smov 0   ;;  %s18603_s24 = smov 0  }
  0x12 LB: > { %s18495_s25 = smov [#allocation5]   ;;  %s18618_s27 = sadd.s32 4294967295, %s18493_s24   ;;  %s18493_s24 = sphi %s18603_s24, %s25712_s24   ;;  %s18489_s23 = sphi %s18601_s23, %s25711_s23   ;;  %s18485_s22 = sphi %s18599_s22, %s25710_s22   ;;  %s18481_s21 = sphi %s18597_s21, %s25709_s21  }
  0x13   : > { %s419_s26 = sshll.u32 %s18495_s25, 4  ;;  %p16694_p0 = scmp.ge.s32.totalorder %s18493_s24, 1  ;;  %s18623_s26 = int_to_ptr.vmem [resolvable:$true] %s419_s26 }
  0x14   : > { %p24792_p1 = scmp.eq.s32.totalorder %s18618_s27, 0  ;;  %p407_p2 = scmp.lt.s32.totalorder %s18493_s24, 3 }
  0x15   : > { %s18496_s29 = smov [#allocation8]   ;;  %s18497_s17 = smov [#allocation11]  }
  0x16   : > { %p18625_p3 = pnand %p16694_p0, %p407_p2  ;;  %s448_s30 = sshll.u32 %s18496_s29, 4  ;;  %s18638_s30 = int_to_ptr.vmem [resolvable:$true] %s448_s30 }
  0x17   : > { %s486_s18 = sshll.u32 %s18497_s17, 4  ;;  %s25002_s1 = sld [smem:[#allocation149_spill]]  ;;  %s18640_s18 = int_to_ptr.vmem [resolvable:$true] %s486_s18 }
  0x18   : > { %s25000_s28 = scalar_select %p18625_p3, 1, 0 }
  0x19   : > { %p17457_p5 = pneg %p18625_p3 }
  0x1b   : > { %p18634_p6 = pnand %p17457_p5, %p24792_p1 }
  0x1d   : > { %s18217_s25 = scalar_lea.hbm %s25002_s1, 8192  ;;  %p18650_p8 = pneg %p18634_p6 }
  0x1e   : > { %p18218_p7 = scmp.ne.s32.totalorder %s25002_s1, %s18217_s25  ;;  %p18224_p11 = scmp.lt.u32.totalorder %s18217_s25, %s25002_s1 }
  0x20   : > { %p18220_p9 = pnand %p18650_p8, %p18218_p7 }
  0x22   : > { %p18221_p10 = pneg %p18220_p9 }
  0x24   : > { %p18226_p12 = pnand %p18224_p11, %p18221_p10 }
  0x26   : > { %18229 = shalt.err (!%p18226_p12)
}
  0x27   : > { %s18230_s15 = scalar_lea.vmem %s18623_s26, 8192  ;;  %p18238_p5 = scmp.lt.s32.totalorder %s18623_s26, %s18623_s26 }
  0x28   : > { %p18231_p13 = scmp.ne.s32.totalorder %s18623_s26, %s18230_s15  ;;  %p18239_p4 = scmp.lt.s32.totalorder %s18230_s15, %s18230_s15 }
  0x2a   : > { %p18233_p0 = pnand %p18231_p13, %p18650_p8  ;;  %p18240_p7 = por %p18239_p4, %p18238_p5 }
  0x2c   : > { %p18234_p2 = pneg %p18233_p0 }
  0x2e   : > { %p18241_p9 = pnand %p18240_p7, %p18234_p2 }
  0x30   : > { %18244 = shalt.err (!%p18241_p9)
}
  0x31   : > { %s24794_s16 = smov 256   ;;  %s24795_s14 = smov 16  }
  0x32   : > { %17460 = dma.hbm_to_vmem [thread:$0]  (!%p18634_p6), %s25002_s1, 8192, %s18623_s26, [#allocation6], %s24794_s16, %s24794_s16, %s24795_s14  }
  0x33   : > { %s18245_s15 = scalar_lea.hbm %s24777_s4, 8192 }
  0x34   : > { %p18246_p4 = scmp.ne.s32.totalorder %s24777_s4, %s18245_s15  ;;  %p18252_p12 = scmp.lt.u32.totalorder %s18245_s15, %s24777_s4 }
  0x36   : > { %p18248_p10 = pnand %p18246_p4, %p18650_p8 }
  0x38   : > { %p18249_p11 = pneg %p18248_p10 }
  0x3a   : > { %p18254_p13 = pnand %p18252_p12, %p18249_p11 }
  0x3c   : > { %18257 = shalt.err (!%p18254_p13)
}
  0x3d   : > { %s18258_s26 = scalar_lea.vmem %s18638_s30, 8192  ;;  %p18266_p7 = scmp.lt.s32.totalorder %s18638_s30, %s18638_s30 }
  0x3e   : > { %p18259_p0 = scmp.ne.s32.totalorder %s18638_s30, %s18258_s26  ;;  %p18267_p9 = scmp.lt.s32.totalorder %s18258_s26, %s18258_s26 }
  0x40   : > { %p18261_p2 = pnand %p18259_p0, %p18650_p8  ;;  %p18268_p4 = por %p18267_p9, %p18266_p7 }
  0x42   : > { %p18262_p5 = pneg %p18261_p2 }
  0x44   : > { %p18269_p10 = pnand %p18268_p4, %p18262_p5 }
  0x46   : > { %18272 = shalt.err (!%p18269_p10)
}
  0x47   : > { %17466 = dma.hbm_to_vmem [thread:$0]  (!%p18634_p6), %s24777_s4, 8192, %s18638_s30, [#allocation9], %s24794_s16, %s24794_s16, %s24795_s14  }
  0x48   : > { %s18273_s19 = scalar_lea.hbm %s24783_s10, 8192 }
  0x49   : > { %p18274_p11 = scmp.ne.s32.totalorder %s24783_s10, %s18273_s19  ;;  %p18280_p0 = scmp.lt.u32.totalorder %s18273_s19, %s24783_s10 }
  0x4b   : > { %p18276_p12 = pnand %p18274_p11, %p18650_p8 }
  0x4d   : > { %p18277_p13 = pneg %p18276_p12 }
  0x4f   : > { %p18282_p2 = pnand %p18280_p0, %p18277_p13 }
  0x51   : > { %18285 = shalt.err (!%p18282_p2)
}
  0x52   : > { %s18286_s30 = scalar_lea.vmem %s18640_s18, 8192  ;;  %p18294_p4 = scmp.lt.s32.totalorder %s18640_s18, %s18640_s18 }
  0x53   : > { %p18287_p5 = scmp.ne.s32.totalorder %s18640_s18, %s18286_s30  ;;  %p18295_p10 = scmp.lt.s32.totalorder %s18286_s30, %s18286_s30 }
  0x55   : > { %p18289_p7 = pnand %p18287_p5, %p18650_p8  ;;  %p18296_p11 = por %p18295_p10, %p18294_p4 }
  0x57   : > { %p18290_p9 = pneg %p18289_p7 }
  0x59   : > { %p18297_p12 = pnand %p18296_p11, %p18290_p9 }
  0x5b   : > { %18300 = shalt.err (!%p18297_p12)
}
  0x5c   : > { %17472 = dma.hbm_to_vmem [thread:$0]  (!%p18634_p6), %s24783_s10, 8192, %s18640_s18, [#allocation12], %s24794_s16, %s24794_s16, %s24795_s14  }
  0x5d   : > { %s18500_s9 = smov [#allocation7]   ;;  %s18301_s20 = scalar_lea.hbm %s24775_s2, 4096 }
  0x5e   : > { %s432_s11 = sshll.u32 %s18500_s9, 4  ;;  %p18302_p13 = scmp.ne.s32.totalorder %s24775_s2, %s18301_s20  ;;  %s433_s11 = int_to_ptr.vmem [resolvable:$true] %s432_s11 }
  0x5f   : > { %p18308_p5 = scmp.lt.u32.totalorder %s18301_s20, %s24775_s2 }
  0x60   : > { %p18304_p0 = pnand %p18302_p13, %p18650_p8 }
  0x62   : > { %p18305_p2 = pneg %p18304_p0 }
  0x64   : > { %p18310_p7 = pnand %p18308_p5, %p18305_p2 }
  0x66   : > { %18313 = shalt.err (!%p18310_p7)
}
  0x67   : > { %s18314_s18 = scalar_lea.vmem %s433_s11, 4096  ;;  %p18322_p11 = scmp.lt.s32.totalorder %s433_s11, %s433_s11 }
  0x68   : > { %p18315_p9 = scmp.ne.s32.totalorder %s433_s11, %s18314_s18  ;;  %p18323_p12 = scmp.lt.s32.totalorder %s18314_s18, %s18314_s18 }
  0x6a   : > { %p18317_p4 = pnand %p18315_p9, %p18650_p8  ;;  %p18324_p1 = por %p18323_p12, %p18322_p11 }
  0x6c   : > { %p18318_p10 = pneg %p18317_p4 }
  0x6e   : > { %p18325_p3 = pnand %p18324_p1, %p18318_p10 }
  0x70   : > { %18328 = shalt.err (!%p18325_p3)
}
  0x71   : > { %s18501_s26 = smov 128   ;;  %s18502_s8 = smov 8  }
  0x72   : > { %17463 = dma.hbm_to_vmem [thread:$0]  (!%p18634_p6), %s24775_s2, 4096, %s433_s11, [#allocation6], %s18501_s26, %s18501_s26, %s18502_s8  }
  0x73   : > { %s18503_s19 = smov [#allocation10]   ;;  %s18504_s25 = smov [#allocation13]  }
  0x74   : > { %s464_s20 = sshll.u32 %s18503_s19, 4  ;;  %s502_s17 = sshll.u32 %s18504_s25, 4  ;;  %s465_s20 = int_to_ptr.vmem [resolvable:$true] %s464_s20  ;;  %s18747_s17 = int_to_ptr.vmem [resolvable:$true] %s502_s17 }
  0x75   : > { %s18329_s18 = scalar_lea.hbm %s24779_s6, 4096 }
  0x76   : > { %p18330_p1 = scmp.ne.s32.totalorder %s24779_s6, %s18329_s18  ;;  %p18336_p0 = scmp.lt.u32.totalorder %s18329_s18, %s24779_s6 }
  0x78   : > { %p18332_p3 = pnand %p18330_p1, %p18650_p8 }
  0x7a   : > { %p18333_p13 = pneg %p18332_p3 }
  0x7c   : > { %p18338_p2 = pnand %p18336_p0, %p18333_p13 }
  0x7e   : > { %18341 = shalt.err (!%p18338_p2)
}
  0x7f   : > { %s18342_s13 = scalar_lea.vmem %s465_s20, 4096  ;;  %p18350_p4 = scmp.lt.s32.totalorder %s465_s20, %s465_s20 }
  0x80   : > { %p18343_p5 = scmp.ne.s32.totalorder %s465_s20, %s18342_s13  ;;  %p18351_p10 = scmp.lt.s32.totalorder %s18342_s13, %s18342_s13 }
  0x82   : > { %p18345_p7 = pnand %p18343_p5, %p18650_p8  ;;  %p18352_p11 = por %p18351_p10, %p18350_p4 }
  0x84   : > { %p18346_p9 = pneg %p18345_p7 }
  0x86   : > { %p18353_p12 = pnand %p18352_p11, %p18346_p9 }
  0x88   : > { %18356 = shalt.err (!%p18353_p12)
}
  0x89   : > { %17469 = dma.hbm_to_vmem [thread:$0]  (!%p18634_p6), %s24779_s6, 4096, %s465_s20, [#allocation9], %s18501_s26, %s18501_s26, %s18502_s8  }
  0x8a   : > { %s18357_s15 = scalar_lea.hbm %s24785_s12, 8192 }
  0x8b   : > { %p18358_p1 = scmp.ne.s32.totalorder %s24785_s12, %s18357_s15  ;;  %p18364_p0 = scmp.lt.u32.totalorder %s18357_s15, %s24785_s12 }
  0x8d   : > { %p18360_p3 = pnand %p18358_p1, %p18650_p8 }
  0x8f   : > { %p18361_p13 = pneg %p18360_p3 }
  0x91   : > { %p18366_p2 = pnand %p18364_p0, %p18361_p13 }
  0x93   : > { %18369 = shalt.err (!%p18366_p2)
}
  0x94   : > { %s18370_s20 = scalar_lea.vmem %s18747_s17, 8192  ;;  %p18378_p4 = scmp.lt.s32.totalorder %s18747_s17, %s18747_s17 }
  0x95   : > { %p18371_p5 = scmp.ne.s32.totalorder %s18747_s17, %s18370_s20  ;;  %p18379_p10 = scmp.lt.s32.totalorder %s18370_s20, %s18370_s20 }
  0x97   : > { %p18373_p7 = pnand %p18371_p5, %p18650_p8  ;;  %p18380_p11 = por %p18379_p10, %p18378_p4 }
  0x99   : > { %p18374_p9 = pneg %p18373_p7 }
  0x9b   : > { %p18381_p12 = pnand %p18380_p11, %p18374_p9 }
  0x9d   : > { %18384 = shalt.err (!%p18381_p12)
}
  0x9e   : > { %17475 = dma.hbm_to_vmem [thread:$0]  (!%p18634_p6), %s24785_s12, 8192, %s18747_s17, [#allocation12], %s18501_s26, %s18501_s26, %s18502_s8  }
  0x9f   : > { %s16693_s0 = sadd.s32 4294967294, %s18493_s24   ;;  %s18798_s29 = sadd.s32 1, %s18493_s24  }
  0xa0   : > { %s39_s14 = ssub.s32 %s18493_s24, %s18798_s29  ;;  %s42_s19 = sadd.s32 1, %s18489_s23 }
  0xa1   : > { %p40_p8 = scmp.eq.s32.totalorder %s39_s14, 0  ;;  %p49_p1 = scmp.ne.s32.totalorder %s18489_s23, %s18485_s22 }
  0xa2   : > { %p50_p3 = scmp.eq.s32.totalorder %s18493_s24, 0  ;;  %p55_p13 = scmp.ne.s32.totalorder %s18485_s22, %s18481_s21 }
  0xa3   : > { %s18809_s25 = scalar_select %p40_p8, %s18489_s23, %s42_s19  }
  0xa4   : > { %p18811_p0 = por %p50_p3, %p49_p1  ;;  %p25005_p2 = scmp.eq.s32.totalorder %s18618_s27, 0 }
  0xa5   : > { %p394_p5 = scmp.eq.s32.totalorder %s18618_s27, 1  ;;  %p400_p7 = scmp.eq.s32.totalorder %s16693_s0, 1 }
  0xa6   : > { %p18817_p6 = por %p25005_p2, %p55_p13  ;;  %p17490_p9 = scmp.lt.s32.totalorder %s18493_s24, 2 }
  0xa7   : > { %s525_s8 = sand.u32 1, %s18489_s23   ;;  %p18824_p4 = por %p394_p5, %p49_p1 }
  0xa8   : > { %p18828_p10 = por %p400_p7, %p55_p13  ;;  %s16702_s18 = sshll.u32 %s525_s8, 8 }
  0xa9   : > { %s25007_s17 = scalar_select %p18824_p4, 1, 0 }
  0xaa   : > { %s25008_s30 = scalar_select %p18828_p10, 1, 0 }
  0xab   : > { %s17170_s9 = sshll.u32 %s18493_s24, 12  ;;  %s25009_s13 = sld [smem:[#allocation148_spill]] }
  0xac   : > { %s529_s0 = scalar_lea.vmem [#allocation2], %s16702_s18  ;;  %p18842_p11 = pnand %p17490_p9, %p18811_p0 }
  0xad   : > { %s537_s14 = sshll.u32 %s529_s0, 4  ;;  %s18846_s1 = scalar_lea.sflag [#allocation3], %s525_s8  ;;  %s18838_s14 = int_to_ptr.vmem [resolvable:$true] %s537_s14 }
  0xae   : > { %p18387_p8 = pneg %p18842_p11 }
  0xb1   : > { %s18836_s16 = scalar_lea.hbm %s25009_s13, %s17170_s9  ;;  %s18390_s15 = scalar_lea.hbm %s25009_s13, 8192 }
  0xb2   : > { %s18385_s11 = scalar_lea.hbm %s18836_s16, 4096  ;;  %p18391_p13 = scmp.lt.u32.totalorder %s18836_s16, %s25009_s13 }
  0xb3   : > { %p18386_p12 = scmp.ne.s32.totalorder %s18836_s16, %s18385_s11  ;;  %p18392_p0 = scmp.lt.u32.totalorder %s18390_s15, %s18385_s11 }
  0xb4   : > { %p18394_p5 = scmp.lt.u32.totalorder %s18385_s11, %s18836_s16 }
  0xb5   : > { %p18388_p1 = pnand %p18387_p8, %p18386_p12  ;;  %p18393_p2 = por %p18392_p0, %p18391_p13 }
  0xb7   : > { %p18389_p3 = pneg %p18388_p1  ;;  %p18395_p7 = por %p18394_p5, %p18393_p2 }
  0xb9   : > { %p18396_p9 = pnand %p18395_p7, %p18389_p3 }
  0xbb   : > { %18399 = shalt.err (!%p18396_p9)
}
  0xbc   : > { %s18400_s8 = scalar_lea.vmem %s18838_s14, 4096  ;;  %s18505_s18 = smov [#allocation2]  }
  0xbd   : > { %p18401_p12 = scmp.ne.s32.totalorder %s18838_s14, %s18400_s8  ;;  %s18405_s9 = sshll.u32 %s18505_s18, 4  ;;  %s18406_s9 = int_to_ptr.vmem [resolvable:$false] %s18405_s9 }
  0xbe   : > { %s18407_s20 = scalar_lea.vmem %s18406_s9, 8192  ;;  %p18408_p4 = scmp.lt.s32.totalorder %s18838_s14, %s18406_s9 }
  0xbf   : > { %p18403_p1 = pnand %p18401_p12, %p18387_p8  ;;  %p18409_p13 = scmp.lt.s32.totalorder %s18407_s20, %s18400_s8 }
  0xc1   : > { %p18404_p10 = pneg %p18403_p1  ;;  %p18410_p0 = por %p18409_p13, %p18408_p4 }
  0xc3   : > { %p18411_p2 = pnand %p18410_p0, %p18404_p10 }
  0xc5   : > { %18414 = shalt.err (!%p18411_p2)
}
  0xc6   : > { %s25011_s11 = smov 16   ;;  %s25012_s15 = smov 256  }
  0xc7   : > { %17479 = dma.hbm_to_vmem [thread:$0]  (!%p18842_p11), %s18836_s16, 4096, %s18838_s14, %s18846_s1, %s25012_s15, %s25012_s15, %s25011_s11  }
  0xc8   : > { %p25013_p8 = scmp.ne.s32.totalorder %s25000_s28, 0 }
  0xca   : > { %549 = sbr.rel (%p25013_p8) target bundleno = 3196 (0xc7c), region = 84 }
  0xd1   : > { %s18880_s0 = sand.u32 1, %s18485_s22  }
  0xd2   : > { %s16707_s8 = sshll.u32 %s18880_s0, 8  ;;  %s552_s18 = scalar_lea.sflag [#allocation3], %s18880_s0 }
  0xd3   : > { %s18886_s19 = scalar_lea.vmem [#allocation2], %s16707_s8 }
  0xd4   : > { %18460 = dma.done.wait (%p18817_p6), %s552_s18, 4096  }
  0xd5   : > { %18462 = vsyncadd (%p18817_p6), %s552_s18, 4294963200  ;;  %p25014_p4 = scmp.eq.s32.totalorder %s18618_s27, 0 }
  0xd7   : > { %18464 = dma.done.wait (%p25014_p4), [#allocation6], 12288   ;;  %p25015_p10 = pmov %p25014_p4 }
  0xd8   : > { %p25016_p11 = pmov %p25014_p4 }
  0xd9   : > { %18466 = vsyncadd (%p25015_p10), [#allocation6], 4294955008 }
  0xda   : > { %18468 = dma.done.wait (%p25016_p11), [#allocation9], 12288   ;;  %p25017_p3 = pmov %p25014_p4 }
  0xdc   : > { %18470 = vsyncadd (%p25017_p3), [#allocation9], 4294955008  ;;  %p25018_p5 = pmov %p25017_p3 }
  0xdd   : > { %p25019_p7 = pmov %p25017_p3 }
  0xde   : > { %18472 = dma.done.wait (%p25018_p5), [#allocation12], 16384  }
  0xdf   : > { %18474 = vsyncadd (%p25019_p7), [#allocation12], 4294950912  ;;  %v17545_v0 = vld [vmem:[#allocation7 + $0x4] ss:$8 sps:$4 sm:$0xff]   ;;  %v17547_v1 = vld [vmem:[#allocation7] ss:$8 sps:$4 sm:$0xff]  }
  0xe0   : > { %979 = vmatprep.subr.bf16.mxu1 %v17545_v0  ;;  %v17548_v2 = vld [vmem:[#allocation7 + $0x14] ss:$8 sps:$4 sm:$0xff]   ;;  %v17550_v3 = vld [vmem:[#allocation7 + $0x10] ss:$8 sps:$4 sm:$0xff]   ;;  %v17551_v4 = vld [vmem:[#allocation7 + $0x24] ss:$8 sps:$4 sm:$0xff]  }
  0xe1   : > { %980 = vmatpush1.bf16.msra.mxu1 %v17547_v1  ;;  %v17553_v5 = vld [vmem:[#allocation7 + $0x20] ss:$8 sps:$4 sm:$0xff]   ;;  %v17554_v6 = vld [vmem:[#allocation7 + $0x34] ss:$8 sps:$4 sm:$0xff]   ;;  %v17556_v7 = vld [vmem:[#allocation7 + $0x30] ss:$8 sps:$4 sm:$0xff]  }
  0xe2   : > { %981 = vmatprep.subr.bf16.mxu1 %v17548_v2  ;;  %v17557_v8 = vld [vmem:[#allocation7 + $0x44] ss:$8 sps:$4 sm:$0xff]   ;;  %v17559_v9 = vld [vmem:[#allocation7 + $0x40] ss:$8 sps:$4 sm:$0xff]   ;;  %v17560_v10 = vld [vmem:[#allocation7 + $0x54] ss:$8 sps:$4 sm:$0xff]  }
  0xe3   : > { %v17562_v11 = vld [vmem:[#allocation7 + $0x50] ss:$8 sps:$4 sm:$0xff]   ;;  %v17563_v12 = vld [vmem:[#allocation7 + $0x64] ss:$8 sps:$4 sm:$0xff]   ;;  %v17565_v16 = vld [vmem:[#allocation7 + $0x60] ss:$8 sps:$4 sm:$0xff]  }
  0xe4   : > { %v632_v13 = vld [vmem:[%s18886_s19 + $0x8] sm:$0xff]  ;;  %v634_v14 = vld [vmem:[%s18886_s19 + $0x18] sm:$0xff]  ;;  %v631_v40 = vld [vmem:[%s18886_s19] sm:$0xff]  ;;  %s25672_s15 = sld [smem:[#allocation150_spill]]  ;;  %s25673_s1 = sld [smem:[#allocation151_spill]] }
  0xe5   : > { %982 = vmatpush1.bf16.msra.mxu1 %v17550_v3  ;;  %v728_v15 = vpack.c.bf16 %v634_v14, %v632_v13  ;;  %v17566_v17 = vld [vmem:[#allocation7 + $0x74] ss:$8 sps:$4 sm:$0xff]   ;;  %v17568_v18 = vld [vmem:[#allocation7 + $0x70] ss:$8 sps:$4 sm:$0xff]   ;;  %v17569_v19 = vld [vmem:[#allocation7 + $0x84] ss:$8 sps:$4 sm:$0xff]  }
  0xe6   : > { %983 = vmatprep.subr.bf16.mxu1 %v17551_v4  ;;  %v17571_v20 = vld [vmem:[#allocation7 + $0x80] ss:$8 sps:$4 sm:$0xff]   ;;  %v17572_v21 = vld [vmem:[#allocation7 + $0x94] ss:$8 sps:$4 sm:$0xff]   ;;  %v17574_v22 = vld [vmem:[#allocation7 + $0x90] ss:$8 sps:$4 sm:$0xff]  }
  0xe7   : > { %1011 = vmatprep.mubr.bf16.mxu1 %v728_v15  ;;  %v17575_v23 = vld [vmem:[#allocation7 + $0xa4] ss:$8 sps:$4 sm:$0xff]   ;;  %v17577_v24 = vld [vmem:[#allocation7 + $0xa0] ss:$8 sps:$4 sm:$0xff]   ;;  %v17578_v25 = vld [vmem:[#allocation7 + $0xb4] ss:$8 sps:$4 sm:$0xff]  }
  0xe8   : > { %v17580_v26 = vld [vmem:[#allocation7 + $0xb0] ss:$8 sps:$4 sm:$0xff]   ;;  %v17581_v27 = vld [vmem:[#allocation7 + $0xc4] ss:$8 sps:$4 sm:$0xff]   ;;  %v17583_v28 = vld [vmem:[#allocation7 + $0xc0] ss:$8 sps:$4 sm:$0xff]  }
  0xe9   : > { %984 = vmatpush1.bf16.msra.mxu1 %v17553_v5  ;;  %v17584_v29 = vld [vmem:[#allocation7 + $0xd4] ss:$8 sps:$4 sm:$0xff]   ;;  %v17586_v31 = vld [vmem:[#allocation7 + $0xd0] ss:$8 sps:$4 sm:$0xff]   ;;  %v17587_v33 = vld [vmem:[#allocation7 + $0xe4] ss:$8 sps:$4 sm:$0xff]  }
  0xea   : > { %985 = vmatprep.subr.bf16.mxu1 %v17554_v6  ;;  %v17635_v30 = vld [vmem:[#allocation8 + $0xc] ss:$16 sps:$4 sm:$0xff]   ;;  %v17637_v32 = vld [vmem:[#allocation8 + $0x8] ss:$16 sps:$4 sm:$0xff]   ;;  %v633_v44 = vld [vmem:[%s18886_s19 + $0x10] sm:$0xff]  ;;  %s25686_s16 = sld [smem:[#allocation152_spill]] }
  0xeb   : > { %1723 = vmatprep.subr.bf16.mxu0 %v17635_v30  ;;  %v17641_v34 = vld [vmem:[#allocation8 + $0x2c] ss:$16 sps:$4 sm:$0xff]   ;;  %v17643_v35 = vld [vmem:[#allocation8 + $0x28] ss:$16 sps:$4 sm:$0xff]   ;;  %v17595_v45 = vld [vmem:[#allocation8 + $0x4] ss:$16 sps:$4 sm:$0xff]   ;;  %v727_v51 = vpack.c.bf16 %v633_v44, %v631_v40 }
  0xec   : > { %1724 = vmatpush1.bf16.msra.mxu0 %v17637_v32  ;;  %v17589_v36 = vld [vmem:[#allocation7 + $0xe0] ss:$8 sps:$4 sm:$0xff]   ;;  %v17590_v37 = vld [vmem:[#allocation7 + $0xf4] ss:$8 sps:$4 sm:$0xff]   ;;  %v17592_v39 = vld [vmem:[#allocation7 + $0xf0] ss:$8 sps:$4 sm:$0xff]  }
  0xed   : > { %986 = vmatpush1.bf16.msra.mxu1 %v17556_v7  ;;  %1725 = vmatprep.subr.bf16.mxu0 %v17641_v34  ;;  %v17647_v38 = vld [vmem:[#allocation8 + $0x4c] ss:$16 sps:$4 sm:$0xff]   ;;  %v17649_v43 = vld [vmem:[#allocation8 + $0x48] ss:$16 sps:$4 sm:$0xff]   ;;  %v17593_v53 = vld [vmem:[#allocation8] ss:$16 sps:$4 sm:$0xff]  }
  0xee   : > { %987 = vmatprep.subr.bf16.mxu1 %v17557_v8  ;;  %v664_v41 = vld [vmem:[#allocation5 + $0x8] sm:$0xff]  ;;  %v666_v42 = vld [vmem:[#allocation5 + $0x18] sm:$0xff]  ;;  %v17598_v55 = vld [vmem:[#allocation8 + $0x24] ss:$16 sps:$4 sm:$0xff]   ;;  %s25690_s20 = sld [smem:[#allocation153_spill]]  ;;  %s25703_s18 = sld [smem:[#allocation154_spill]] }
  0xef   : > { %v18908_v46 = vpack.c.bf16 %v666_v42, %v664_v41  ;;  %v636_v47 = vld [vmem:[%s18886_s19 + $0x28] sm:$0xff]  ;;  %v638_v49 = vld [vmem:[%s18886_s19 + $0x38] sm:$0xff]  ;;  %v17596_v56 = vld [vmem:[#allocation8 + $0x20] ss:$16 sps:$4 sm:$0xff]   ;;  %s25704_s28 = sld [smem:[#allocation155_spill]]  ;;  %s24602_s26 = scalar_lea.vmem [#allocation14], %s16707_s8 }
  0xf0   : > { %1726 = vmatpush1.bf16.msra.mxu0 %v17643_v35  ;;  %v17650_v48 = vld [vmem:[#allocation8 + $0x6c] ss:$16 sps:$4 sm:$0xff]   ;;  %v17652_v50 = vld [vmem:[#allocation8 + $0x68] ss:$16 sps:$4 sm:$0xff]   ;;  %v730_v54 = vpack.c.bf16 %v638_v49, %v636_v47  ;;  %v635_v57 = vld [vmem:[%s18886_s19 + $0x20] sm:$0xff]  ;;  %s17172_s8 = sshll.u32 %s18618_s27, 12 }
  0xf1   : > { %988 = vmatpush1.bf16.msra.mxu1 %v17559_v9  ;;  %1727 = vmatprep.subr.bf16.mxu0 %v17647_v38  ;;  %v17653_v52 = vld [vmem:[#allocation8 + $0x8c] ss:$16 sps:$4 sm:$0xff]   ;;  %v17655_v58 = vld [vmem:[#allocation8 + $0x88] ss:$16 sps:$4 sm:$0xff]   ;;  %v637_v59 = vld [vmem:[%s18886_s19 + $0x30] sm:$0xff]  ;;  %s16549_s27 = scalar_lea.sflag [#allocation4], %s18880_s0 }
  0xf2   : > { %989 = vmatprep.subr.bf16.mxu1 %v17560_v10  ;;  %1755 = vmatprep.mubr.bf16.mxu0 %v18908_v46  ;;  %v17656_v60 = vld [vmem:[#allocation8 + $0xac] ss:$16 sps:$4 sm:$0xff]   ;;  %v17601_v61 = vld [vmem:[#allocation8 + $0x44] ss:$16 sps:$4 sm:$0xff]   ;;  %v17658_v0 = vld [vmem:[#allocation8 + $0xa8] ss:$16 sps:$4 sm:$0xff]   ;;  %v729_v1 = vpack.c.bf16 %v637_v59, %v635_v57 }
  0xf3   : > { %v640_v62 = vld [vmem:[%s18886_s19 + $0x48] sm:$0xff]  ;;  %v642_v63 = vld [vmem:[%s18886_s19 + $0x58] sm:$0xff]  ;;  %v17599_v3 = vld [vmem:[#allocation8 + $0x40] ss:$16 sps:$4 sm:$0xff]   ;;  %p25706_p9 = scmp.ne.s32.totalorder %s25007_s17, 0 }
  0xf4   : > { %1728 = vmatpush1.bf16.msra.mxu0 %v17649_v43  ;;  %v17659_v2 = vld [vmem:[#allocation8 + $0xcc] ss:$16 sps:$4 sm:$0xff]   ;;  %v732_v4 = vpack.c.bf16 %v642_v63, %v640_v62  ;;  %v17604_v5 = vld [vmem:[#allocation8 + $0x64] ss:$16 sps:$4 sm:$0xff]   ;;  %v17602_v6 = vld [vmem:[#allocation8 + $0x60] ss:$16 sps:$4 sm:$0xff]  }
  0xf5   : > { %990 = vmatpush1.bf16.msra.mxu1 %v17562_v11  ;;  %1729 = vmatprep.subr.bf16.mxu0 %v17650_v48  ;;  %v639_v7 = vld [vmem:[%s18886_s19 + $0x40] sm:$0xff]  ;;  %v17661_v8 = vld [vmem:[#allocation8 + $0xc8] ss:$16 sps:$4 sm:$0xff]   ;;  %v641_v9 = vld [vmem:[%s18886_s19 + $0x50] sm:$0xff] }
  0xf6   : > { %991 = vmatprep.subr.bf16.mxu1 %v17563_v12  ;;  %v17662_v10 = vld [vmem:[#allocation8 + $0xec] ss:$16 sps:$4 sm:$0xff]   ;;  %v17607_v11 = vld [vmem:[#allocation8 + $0x84] ss:$16 sps:$4 sm:$0xff]   ;;  %v17664_v14 = vld [vmem:[#allocation8 + $0xe8] ss:$16 sps:$4 sm:$0xff]   ;;  %v731_v15 = vpack.c.bf16 %v641_v9, %v639_v7 }
  0xf7   : > { %v644_v12 = vld [vmem:[%s18886_s19 + $0x68] sm:$0xff]  ;;  %v646_v13 = vld [vmem:[%s18886_s19 + $0x78] sm:$0xff]  ;;  %v17614_v34 = vld [vmem:[#allocation8 + $0xe0] ss:$16 sps:$4 sm:$0xff]  }
  0xf8   : > { %1730 = vmatpush1.bf16.msra.mxu0 %v17652_v50  ;;  %v17671_v30 = vld [vmem:[#allocation8 + $0x14c] ss:$16 sps:$4 sm:$0xff]   ;;  %v647_v35 = vld [vmem:[%s18886_s19 + $0x80] sm:$0xff]  ;;  %v17676_v42 = vld [vmem:[#allocation8 + $0x168] ss:$16 sps:$4 sm:$0xff]  }
  0xf9   : > { %992 = vmatpush1.bf16.msra.mxu1 %v17565_v16  ;;  %1731 = vmatprep.subr.bf16.mxu0 %v17653_v52  ;;  %v17665_v16 = vld [vmem:[#allocation8 + $0x10c] ss:$16 sps:$4 sm:$0xff]   ;;  %v17619_v38 = vld [vmem:[#allocation8 + $0x104] ss:$16 sps:$4 sm:$0xff]   ;;  %v17617_v44 = vld [vmem:[#allocation8 + $0x100] ss:$16 sps:$4 sm:$0xff]  }
  0xfa   : > { %993 = vmatprep.subr.bf16.mxu1 %v17566_v17  ;;  %v17605_v17 = vld [vmem:[#allocation8 + $0x80] ss:$16 sps:$4 sm:$0xff]   ;;  %v652_v40 = vld [vmem:[%s18886_s19 + $0xa8] sm:$0xff]  ;;  %v654_v41 = vld [vmem:[%s18886_s19 + $0xb8] sm:$0xff] }
  0xfb   : > { %v17677_v43 = vld [vmem:[#allocation8 + $0x18c] ss:$16 sps:$4 sm:$0xff]   ;;  %v17622_v47 = vld [vmem:[#allocation8 + $0x124] ss:$16 sps:$4 sm:$0xff]   ;;  %v738_v48 = vpack.c.bf16 %v654_v41, %v652_v40  ;;  %v17679_v49 = vld [vmem:[#allocation8 + $0x188] ss:$16 sps:$4 sm:$0xff]  }
  0xfc   : > { %1732 = vmatpush1.bf16.msra.mxu0 %v17655_v58  ;;  %v17620_v50 = vld [vmem:[#allocation8 + $0x120] ss:$16 sps:$4 sm:$0xff]   ;;  %v17682_v57 = vld [vmem:[#allocation8 + $0x1a8] ss:$16 sps:$4 sm:$0xff]   ;;  %v17683_v58 = vld [vmem:[#allocation8 + $0x1cc] ss:$16 sps:$4 sm:$0xff]  }
  0xfd   : > { %994 = vmatpush1.bf16.msra.mxu1 %v17568_v18  ;;  %1733 = vmatprep.subr.bf16.mxu0 %v17656_v60  ;;  %v734_v18 = vpack.c.bf16 %v646_v13, %v644_v12  ;;  %v653_v52 = vld [vmem:[%s18886_s19 + $0xb0] sm:$0xff]  ;;  %v17685_v63 = vld [vmem:[#allocation8 + $0x1c8] ss:$16 sps:$4 sm:$0xff]   ;;  %v663_v9 = vld [vmem:[#allocation5] sm:$0xff] }
  0xfe   : > { %995 = vmatprep.subr.bf16.mxu1 %v17569_v19  ;;  %v17610_v19 = vld [vmem:[#allocation8 + $0xa4] ss:$16 sps:$4 sm:$0xff]   ;;  %v17623_v59 = vld [vmem:[#allocation8 + $0x140] ss:$16 sps:$4 sm:$0xff]   ;;  %v17688_v7 = vld [vmem:[#allocation8 + $0x1e8] ss:$16 sps:$4 sm:$0xff]  }
  0xff   : > { %v17634_v12 = vld [vmem:[#allocation8 + $0x1a4] ss:$16 sps:$4 sm:$0xff]   ;;  %v668_v13 = vld [vmem:[#allocation5 + $0x28] sm:$0xff]  ;;  %v682_v41 = vld [vmem:[#allocation5 + $0x98] sm:$0xff] }
 0x100   : > { %1734 = vmatpush1.bf16.msra.mxu0 %v17658_v0  ;;  %v17626_v0 = vld [vmem:[#allocation8 + $0x160] ss:$16 sps:$4 sm:$0xff]   ;;  %v680_v40 = vld [vmem:[#allocation5 + $0x88] sm:$0xff] }
 0x101   : > { %996 = vmatpush1.bf16.msra.mxu1 %v17571_v20  ;;  %1735 = vmatprep.subr.bf16.mxu0 %v17659_v2  ;;  %v17667_v20 = vld [vmem:[#allocation8 + $0x108] ss:$16 sps:$4 sm:$0xff]   ;;  %v657_v2 = vld [vmem:[%s18886_s19 + $0xd0] sm:$0xff] }
 0x102   : > { %997 = vmatprep.subr.bf16.mxu1 %v17572_v21  ;;  %v17608_v21 = vld [vmem:[#allocation8 + $0xa0] ss:$16 sps:$4 sm:$0xff]  }
 0x104   : > { %1736 = vmatpush1.bf16.msra.mxu0 %v17661_v8  ;;  %v17629_v8 = vld [vmem:[#allocation8 + $0x180] ss:$16 sps:$4 sm:$0xff]  }
 0x105   : > { %998 = vmatpush1.bf16.msra.mxu1 %v17574_v22  ;;  %1737 = vmatprep.subr.bf16.mxu0 %v17662_v10  ;;  %v17668_v22 = vld [vmem:[#allocation8 + $0x12c] ss:$16 sps:$4 sm:$0xff]   ;;  %v665_v10 = vld [vmem:[#allocation5 + $0x10] sm:$0xff] }
 0x106   : > { %999 = vmatprep.subr.bf16.mxu1 %v17575_v23  ;;  %v643_v23 = vld [vmem:[%s18886_s19 + $0x60] sm:$0xff] }
 0x108   : > { %1738 = vmatpush1.bf16.msra.mxu0 %v17664_v14  ;;  %v670_v14 = vld [vmem:[#allocation5 + $0x38] sm:$0xff] }
 0x109   : > { %1000 = vmatpush1.bf16.msra.mxu1 %v17577_v24  ;;  %1739 = vmatprep.subr.bf16.mxu0 %v17665_v16  ;;  %v645_v24 = vld [vmem:[%s18886_s19 + $0x70] sm:$0xff] }
 0x10a   : > { %1001 = vmatprep.subr.bf16.mxu1 %v17578_v25  ;;  %v17613_v25 = vld [vmem:[#allocation8 + $0xc4] ss:$16 sps:$4 sm:$0xff]   ;;  %v17632_v16 = vld [vmem:[#allocation8 + $0x1a0] ss:$16 sps:$4 sm:$0xff]  }
 0x10c   : > { %1740 = vmatpush1.bf16.msra.mxu0 %v17667_v20  ;;  %v17640_v20 = vld [vmem:[#allocation8 + $0x1c4] ss:$16 sps:$4 sm:$0xff]  }
 0x10d   : > { %1002 = vmatpush1.bf16.msra.mxu1 %v17580_v26  ;;  %v648_v26 = vld [vmem:[%s18886_s19 + $0x88] sm:$0xff]  ;;  %1741 = vmatprep.subr.bf16.mxu0 %v17668_v22  ;;  %v17638_v22 = vld [vmem:[#allocation8 + $0x1c0] ss:$16 sps:$4 sm:$0xff]  }
 0x10e   : > { %1003 = vmatprep.subr.bf16.mxu1 %v17581_v27  ;;  %v650_v27 = vld [vmem:[%s18886_s19 + $0x98] sm:$0xff] }
 0x10f   : > { %v736_v32 = vpack.c.bf16 %v650_v27, %v648_v26  ;;  %v17646_v26 = vld [vmem:[#allocation8 + $0x1e4] ss:$16 sps:$4 sm:$0xff]   ;;  %v672_v27 = vld [vmem:[#allocation5 + $0x48] sm:$0xff] }
 0x111   : > { %1004 = vmatpush1.bf16.msra.mxu1 %v17583_v28  ;;  %v17670_v28 = vld [vmem:[#allocation8 + $0x128] ss:$16 sps:$4 sm:$0xff]  }
 0x112   : > { %1005 = vmatprep.subr.bf16.mxu1 %v17584_v29  ;;  %v733_v29 = vpack.c.bf16 %v645_v24, %v643_v23  ;;  %1742 = vmatpush1.bf16.msra.mxu0 %v17670_v28  ;;  %v667_v23 = vld [vmem:[#allocation5 + $0x20] sm:$0xff]  ;;  %v669_v24 = vld [vmem:[#allocation5 + $0x30] sm:$0xff]  ;;  %v674_v28 = vld [vmem:[#allocation5 + $0x58] sm:$0xff] }
 0x113   : > { %1743 = vmatprep.subr.bf16.mxu0 %v17671_v30  ;;  %v745_v30 = vpack.c.bf16 %v669_v24, %v667_v23  ;;  %v709_v23 = vld [vmem:[#allocation5 + $0x170] sm:$0xff]  ;;  %v712_v24 = vld [vmem:[#allocation5 + $0x188] sm:$0xff] }
 0x115   : > { %1006 = vmatpush1.bf16.msra.mxu1 %v17586_v31  ;;  %v17611_v31 = vld [vmem:[#allocation8 + $0xc0] ss:$16 sps:$4 sm:$0xff]  }
 0x116   : > { %1007 = vmatprep.subr.bf16.mxu1 %v17587_v33  ;;  %v17616_v33 = vld [vmem:[#allocation8 + $0xe4] ss:$16 sps:$4 sm:$0xff]  }
 0x119   : > { %1008 = vmatpush1.bf16.msra.mxu1 %v17589_v36  ;;  %v17673_v36 = vld [vmem:[#allocation8 + $0x148] ss:$16 sps:$4 sm:$0xff]  }
 0x11a   : > { %1009 = vmatprep.subr.bf16.mxu1 %v17590_v37  ;;  %v649_v37 = vld [vmem:[%s18886_s19 + $0x90] sm:$0xff]  ;;  %1744 = vmatpush1.bf16.msra.mxu0 %v17673_v36 }
 0x11d   : > { %1010 = vmatpush1.bf16.msra.mxu1 %v17592_v39  ;;  %v17674_v39 = vld [vmem:[#allocation8 + $0x16c] ss:$16 sps:$4 sm:$0xff]  }
 0x11e   : > { %1530 = vmatprep.subr.bf16.mxu1 %v17595_v45  ;;  %v735_v45 = vpack.c.bf16 %v649_v37, %v647_v35  ;;  %1745 = vmatprep.subr.bf16.mxu0 %v17674_v39  ;;  %v678_v35 = vld [vmem:[#allocation5 + $0x78] sm:$0xff]  ;;  %v677_v39 = vld [vmem:[#allocation5 + $0x70] sm:$0xff] }
 0x11f   : > { %1746 = vmatpush1.bf16.msra.mxu0 %v17676_v42  ;;  %v752_v42 = vpack.c.bf16 %v682_v41, %v680_v40  ;;  %v719_v40 = vld [vmem:[#allocation5 + $0x1c0] sm:$0xff]  ;;  %v721_v41 = vld [vmem:[#allocation5 + $0x1d0] sm:$0xff] }
 0x120   : > { %1012 = vmatmul.mubr.bf16.vlgmr.msra.gmra.mrb[0].mxu1 %v727_v51  ;;  %v651_v51 = vld [vmem:[%s18886_s19 + $0xa0] sm:$0xff]  ;;  %1747 = vmatprep.subr.bf16.mxu0 %v17677_v43 }
 0x121   : > { %1531 = vmatpush1.bf16.msra.mxu1 %v17593_v53  ;;  %1021 = vmatprep.mubr.bf16.mxu1 %v730_v54  ;;  %v17625_v53 = vld [vmem:[#allocation8 + $0x144] ss:$16 sps:$4 sm:$0xff]   ;;  %v656_v54 = vld [vmem:[%s18886_s19 + $0xc8] sm:$0xff]  ;;  %v737_v60 = vpack.c.bf16 %v653_v52, %v651_v51 }
 0x122   : > { %1532 = vmatprep.subr.bf16.mxu1 %v17598_v55  ;;  %v17680_v55 = vld [vmem:[#allocation8 + $0x1ac] ss:$16 sps:$4 sm:$0xff]   ;;  %v679_v43 = vld [vmem:[#allocation5 + $0x80] sm:$0xff]  ;;  %v685_v51 = vld [vmem:[#allocation5 + $0xb0] sm:$0xff] }
 0x123   : > { %1748 = vmatpush1.bf16.msra.mxu0 %v17679_v49  ;;  %v688_v52 = vld [vmem:[#allocation5 + $0xc8] sm:$0xff] }
 0x124   : > { %1749 = vmatprep.subr.bf16.mxu0 %v17680_v55 }
 0x125   : > { %1533 = vmatpush1.bf16.msra.mxu1 %v17596_v56  ;;  %v658_v56 = vld [vmem:[%s18886_s19 + $0xd8] sm:$0xff] }
 0x126   : > { %1534 = vmatprep.subr.bf16.mxu1 %v17601_v61  ;;  %v17628_v61 = vld [vmem:[#allocation8 + $0x164] ss:$16 sps:$4 sm:$0xff]   ;;  %v740_v62 = vpack.c.bf16 %v658_v56, %v656_v54 }
 0x127   : > { %1750 = vmatpush1.bf16.msra.mxu0 %v17682_v57  ;;  %v687_v56 = vld [vmem:[#allocation5 + $0xc0] sm:$0xff]  ;;  %v689_v57 = vld [vmem:[#allocation5 + $0xd0] sm:$0xff] }
 0x128   : > { %1022 = vmatmul.mubr.bf16.gmra.mrb[4].mxu1 %v729_v1  ;;  %v655_v1 = vld [vmem:[%s18886_s19 + $0xc0] sm:$0xff]  ;;  %1751 = vmatprep.subr.bf16.mxu0 %v17683_v58  ;;  %v692_v58 = vld [vmem:[#allocation5 + $0xe8] sm:$0xff] }
 0x129   : > { %1535 = vmatpush1.bf16.msra.mxu1 %v17599_v3  ;;  %1031 = vmatprep.mubr.bf16.mxu1 %v732_v4  ;;  %v17631_v3 = vld [vmem:[#allocation8 + $0x184] ss:$16 sps:$4 sm:$0xff]   ;;  %v660_v4 = vld [vmem:[%s18886_s19 + $0xe8] sm:$0xff] }
 0x12a   : > { %1536 = vmatprep.subr.bf16.mxu1 %v17604_v5  ;;  %v17686_v5 = vld [vmem:[#allocation8 + $0x1ec] ss:$16 sps:$4 sm:$0xff]  }
 0x12b   : > { %1752 = vmatpush1.bf16.msra.mxu0 %v17685_v63  ;;  %v693_v63 = vld [vmem:[#allocation5 + $0xf0] sm:$0xff] }
 0x12c   : > { %1753 = vmatprep.subr.bf16.mxu0 %v17686_v5  ;;  %v697_v5 = vld [vmem:[#allocation5 + $0x110] sm:$0xff] }
 0x12d   : > { %1537 = vmatpush1.bf16.msra.mxu1 %v17602_v6  ;;  %v662_v6 = vld [vmem:[%s18886_s19 + $0xf8] sm:$0xff] }
 0x12e   : > { %1538 = vmatprep.subr.bf16.mxu1 %v17607_v11  ;;  %v739_v11 = vpack.c.bf16 %v657_v2, %v655_v1  ;;  %v698_v1 = vld [vmem:[#allocation5 + $0x118] sm:$0xff] }
 0x12f   : > { %1754 = vmatpush1.bf16.msra.mxu0 %v17688_v7  ;;  %v702_v7 = vld [vmem:[#allocation5 + $0x138] sm:$0xff] }
 0x130   : > { %1032 = vmatmul.mubr.bf16.gmra.mrb[8].mxu1 %v731_v15  ;;  %v742_v15 = vpack.c.bf16 %v662_v6, %v660_v4  ;;  %v695_v4 = vld [vmem:[#allocation5 + $0x100] sm:$0xff]  ;;  %v700_v6 = vld [vmem:[#allocation5 + $0x128] sm:$0xff] }
 0x131   : > { %1539 = vmatpush1.bf16.msra.mxu1 %v17605_v17  ;;  %1041 = vmatprep.mubr.bf16.mxu1 %v734_v18  ;;  %v659_v17 = vld [vmem:[%s18886_s19 + $0xe0] sm:$0xff]  ;;  %v743_v18 = vpack.c.bf16 %v665_v10, %v663_v9  ;;  %v762_v9 = vpack.c.bf16 %v702_v7, %v700_v6 }
 0x132   : > { %1540 = vmatprep.subr.bf16.mxu1 %v17610_v19  ;;  %v661_v19 = vld [vmem:[%s18886_s19 + $0xf0] sm:$0xff]  ;;  %v699_v10 = vld [vmem:[#allocation5 + $0x120] sm:$0xff] }
 0x133   : > { %1756 = vmatmul.mubr.bf16.vlgmr.msra.gmra.mrb[0].mxu0 %v743_v18 }
 0x135   : > { %1541 = vmatpush1.bf16.msra.mxu1 %v17608_v21  ;;  %v746_v21 = vpack.c.bf16 %v670_v14, %v668_v13  ;;  %v706_v13 = vld [vmem:[#allocation5 + $0x158] sm:$0xff] }
 0x136   : > { %1542 = vmatprep.subr.bf16.mxu1 %v17613_v25  ;;  %v741_v25 = vpack.c.bf16 %v661_v19, %v659_v17  ;;  %v705_v17 = vld [vmem:[#allocation5 + $0x150] sm:$0xff]  ;;  %v710_v19 = vld [vmem:[#allocation5 + $0x178] sm:$0xff] }
 0x137   : > { %1765 = vmatprep.mubr.bf16.mxu0 %v746_v21 }
 0x138   : > { %1042 = vmatmul.mubr.bf16.gmra.mrb[12].mxu1 %v733_v29  ;;  %v17644_v29 = vld [vmem:[#allocation8 + $0x1e0] ss:$16 sps:$4 sm:$0xff]  }
 0x139   : > { %1543 = vmatpush1.bf16.msra.mxu1 %v17611_v31  ;;  %1051 = vmatprep.mubr.bf16.mxu1 %v736_v32  ;;  %v748_v31 = vpack.c.bf16 %v674_v28, %v672_v27  ;;  %v671_v32 = vld [vmem:[#allocation5 + $0x40] sm:$0xff] }
 0x13a   : > { %1544 = vmatprep.subr.bf16.mxu1 %v17616_v33  ;;  %v673_v33 = vld [vmem:[#allocation5 + $0x50] sm:$0xff]  ;;  %v711_v28 = vld [vmem:[#allocation5 + $0x180] sm:$0xff] }
 0x13b   : > { %1766 = vmatmul.mubr.bf16.gmra.mrb[4].mxu0 %v745_v30  ;;  %v747_v36 = vpack.c.bf16 %v673_v33, %v671_v32 }
 0x13c   : > { %1775 = vmatprep.mubr.bf16.mxu0 %v748_v31 }
 0x13d   : > { %1545 = vmatpush1.bf16.msra.mxu1 %v17614_v34  ;;  %v676_v34 = vld [vmem:[#allocation5 + $0x68] sm:$0xff] }
 0x13e   : > { %1546 = vmatprep.subr.bf16.mxu1 %v17619_v38  ;;  %v750_v37 = vpack.c.bf16 %v678_v35, %v676_v34  ;;  %v675_v38 = vld [vmem:[#allocation5 + $0x60] sm:$0xff]  ;;  %v717_v35 = vld [vmem:[#allocation5 + $0x1b0] sm:$0xff] }
 0x13f   : > { %v715_v34 = vld [vmem:[#allocation5 + $0x1a0] sm:$0xff] }
 0x140   : > { %1052 = vmatmul.mubr.bf16.gmra.mrb[16].mxu1 %v735_v45  ;;  %v684_v45 = vld [vmem:[#allocation5 + $0xa8] sm:$0xff] }
 0x141   : > { %1547 = vmatpush1.bf16.msra.mxu1 %v17617_v44  ;;  %1061 = vmatprep.mubr.bf16.mxu1 %v738_v48  ;;  %v681_v44 = vld [vmem:[#allocation5 + $0x90] sm:$0xff] }
 0x142   : > { %1548 = vmatprep.subr.bf16.mxu1 %v17622_v47  ;;  %v686_v47 = vld [vmem:[#allocation5 + $0xb8] sm:$0xff]  ;;  %v751_v48 = vpack.c.bf16 %v681_v44, %v679_v43  ;;  %v771_v43 = vpack.c.bf16 %v721_v41, %v719_v40 }
 0x143   : > { %1776 = vmatmul.mubr.bf16.gmra.mrb[8].mxu0 %v747_v36  ;;  %v754_v49 = vpack.c.bf16 %v686_v47, %v684_v45  ;;  %v723_v45 = vld [vmem:[#allocation5 + $0x1e0] sm:$0xff]  ;;  %v725_v47 = vld [vmem:[#allocation5 + $0x1f0] sm:$0xff] }
 0x144   : > { %1785 = vmatprep.mubr.bf16.mxu0 %v750_v37 }
 0x145   : > { %1549 = vmatpush1.bf16.msra.mxu1 %v17620_v50  ;;  %v683_v50 = vld [vmem:[#allocation5 + $0xa0] sm:$0xff] }
 0x146   : > { %1550 = vmatprep.subr.bf16.mxu1 %v17625_v53  ;;  %v690_v53 = vld [vmem:[#allocation5 + $0xd8] sm:$0xff]  ;;  %v753_v54 = vpack.c.bf16 %v685_v51, %v683_v50 }
 0x147   : > { %v756_v55 = vpack.c.bf16 %v690_v53, %v688_v52  ;;  %v18506_v52 = vmov 1983009808  }
 0x148   : > { %1062 = vmatmul.mubr.bf16.gmra.mrb[20].mxu1 %v737_v60  ;;  %v755_v60 = vpack.c.bf16 %v689_v57, %v687_v56  ;;  %v1918_v53 = vunpack.c.l.s4 %v18506_v52  ;;  %v18507_v56 = vmov 1934713408  }
 0x149   : > { %1551 = vmatpush1.bf16.msra.mxu1 %v17623_v59  ;;  %1071 = vmatprep.mubr.bf16.mxu1 %v740_v62  ;;  %v694_v59 = vld [vmem:[#allocation5 + $0xf8] sm:$0xff]  ;;  %v691_v62 = vld [vmem:[#allocation5 + $0xe0] sm:$0xff]  ;;  %v1949_v57 = vunpack.c.l.s4 %v18507_v56 }
 0x14a   : > { %1552 = vmatprep.subr.bf16.mxu1 %v17628_v61  ;;  %v758_v61 = vpack.c.bf16 %v694_v59, %v692_v58  ;;  %v757_v2 = vpack.c.bf16 %v693_v63, %v691_v62  ;;  %v1919_v59 = vunpack.c.0.s8 %v1918_v53 }
 0x14b   : > { %v1950_v62 = vunpack.c.0.s8 %v1949_v57 }
 0x14d   : > { %1553 = vmatpush1.bf16.msra.mxu1 %v17626_v0  ;;  %v696_v0 = vld [vmem:[#allocation5 + $0x108] sm:$0xff] }
 0x14e   : > { %1554 = vmatprep.subr.bf16.mxu1 %v17631_v3  ;;  %v760_v3 = vpack.c.bf16 %v698_v1, %v696_v0 }
 0x150   : > { %1072 = vmatmul.mubr.bf16.gmra.mrb[24].mxu1 %v739_v11  ;;  %v701_v11 = vld [vmem:[#allocation5 + $0x130] sm:$0xff] }
 0x151   : > { %1555 = vmatpush1.bf16.msra.mxu1 %v17629_v8  ;;  %1081 = vmatprep.mubr.bf16.mxu1 %v742_v15  ;;  %v759_v8 = vpack.c.bf16 %v697_v5, %v695_v4  ;;  %v761_v14 = vpack.c.bf16 %v701_v11, %v699_v10  ;;  %v1188_v11 = vld [vmem:[%s24778_s5] sm:$0xf] }
 0x152   : > { %1556 = vmatprep.subr.bf16.mxu1 %v17634_v12  ;;  %v704_v12 = vld [vmem:[#allocation5 + $0x148] sm:$0xff] }
 0x153   : > { %v764_v15 = vpack.c.bf16 %v706_v13, %v704_v12  ;;  %v24799_v13 = vmov 0.0  }
 0x155   : > { %1557 = vmatpush1.bf16.msra.mxu1 %v17632_v16  ;;  %v703_v16 = vld [vmem:[#allocation5 + $0x140] sm:$0xff] }
 0x156   : > { %1558 = vmatprep.subr.bf16.mxu1 %v17640_v20  ;;  %v763_v20 = vpack.c.bf16 %v705_v17, %v703_v16 }
 0x158   : > { %1082 = vmatmul.mubr.bf16.gmra.mrb[28].mxu1 %v741_v25  ;;  %v714_v25 = vld [vmem:[#allocation5 + $0x198] sm:$0xff] }
 0x159   : > { %1559 = vmatpush1.bf16.msra.mxu1 %v17638_v22  ;;  %1562 = vmatprep.mubr.bf16.mxu1 %v18908_v46  ;;  %v749_v46 = vpack.c.bf16 %v677_v39, %v675_v38  ;;  %v707_v22 = vld [vmem:[#allocation5 + $0x160] sm:$0xff]  ;;  %v768_v27 = vpack.c.bf16 %v714_v25, %v712_v24  ;;  %v769_v38 = vpack.c.bf16 %v717_v35, %v715_v34 }
 0x15a   : > { %1560 = vmatprep.subr.bf16.mxu1 %v17646_v26  ;;  %v765_v26 = vpack.c.bf16 %v709_v23, %v707_v22 }
 0x15b   : > { %1786 = vmatmul.mubr.bf16.gmra.mrb[12].mxu0 %v749_v46 }
 0x15c   : > { %1795 = vmatprep.mubr.bf16.mxu0 %v752_v42 }
 0x15d   : > { %1561 = vmatpush1.bf16.msra.mxu1 %v17644_v29  ;;  %v713_v29 = vld [vmem:[#allocation5 + $0x190] sm:$0xff] }
 0x15e   : > { %v767_v32 = vpack.c.bf16 %v713_v29, %v711_v28 }
 0x160   : > { %1563 = vmatmul.mubr.bf16.vlgmr.msra.gmra.mrb[32].mxu1 %v743_v18  ;;  %v708_v18 = vld [vmem:[#allocation5 + $0x168] sm:$0xff] }
 0x161   : > { %1572 = vmatprep.mubr.bf16.mxu1 %v746_v21  ;;  %v766_v21 = vpack.c.bf16 %v710_v19, %v708_v18 }
 0x163   : > { %1796 = vmatmul.mubr.bf16.gmra.mrb[16].mxu0 %v751_v48 }
 0x164   : > { %1805 = vmatprep.mubr.bf16.mxu0 %v754_v49 }
 0x168   : > { %1573 = vmatmul.mubr.bf16.gmra.mrb[36].mxu1 %v745_v30  ;;  %v716_v30 = vld [vmem:[#allocation5 + $0x1a8] sm:$0xff] }
 0x169   : > { %1582 = vmatprep.mubr.bf16.mxu1 %v748_v31  ;;  %v718_v31 = vld [vmem:[#allocation5 + $0x1b8] sm:$0xff] }
 0x16a   : > { %v770_v33 = vpack.c.bf16 %v718_v31, %v716_v30 }
 0x16b   : > { %1806 = vmatmul.mubr.bf16.gmra.mrb[20].mxu0 %v753_v54 }
 0x16c   : > { %1815 = vmatprep.mubr.bf16.mxu0 %v756_v55 }
 0x170   : > { %1583 = vmatmul.mubr.bf16.gmra.mrb[40].mxu1 %v747_v36  ;;  %v720_v36 = vld [vmem:[#allocation5 + $0x1c8] sm:$0xff] }
 0x171   : > { %1592 = vmatprep.mubr.bf16.mxu1 %v750_v37  ;;  %v722_v37 = vld [vmem:[#allocation5 + $0x1d8] sm:$0xff] }
 0x172   : > { %v772_v39 = vpack.c.bf16 %v722_v37, %v720_v36 }
 0x173   : > { %1816 = vmatmul.mubr.bf16.gmra.mrb[24].mxu0 %v755_v60 }
 0x174   : > { %1825 = vmatprep.mubr.bf16.mxu0 %v758_v61 }
 0x178   : > { %1593 = vmatmul.mubr.bf16.gmra.mrb[44].mxu1 %v749_v46  ;;  %v724_v46 = vld [vmem:[#allocation5 + $0x1e8] sm:$0xff] }
 0x179   : > { %1602 = vmatprep.mubr.bf16.mxu1 %v752_v42  ;;  %v726_v42 = vld [vmem:[#allocation5 + $0x1f8] sm:$0xff] }
 0x17a   : > { %v774_v44 = vpack.c.bf16 %v726_v42, %v724_v46 }
 0x17b   : > { %1826 = vmatmul.mubr.bf16.gmra.mrb[28].mxu0 %v757_v2 }
 0x17c   : > { %1835 = vmatprep.mubr.bf16.mxu0 %v760_v3 }
 0x180   : > { %1603 = vmatmul.mubr.bf16.gmra.mrb[48].mxu1 %v751_v48  ;;  %v773_v48 = vpack.c.bf16 %v725_v47, %v723_v45 }
 0x181   : > { %1612 = vmatprep.mubr.bf16.mxu1 %v754_v49  ;;  %v809_v49 = vlaneseq }
 0x183   : > { %1836 = vmatmul.mubr.bf16.gmra.mrb[32].mxu0 %v759_v8  ;;  %v18940_v50 = vshrl.u32 %v809_v49, 7 }
 0x184   : > { %1845 = vmatprep.mubr.bf16.mxu0 %v762_v9 }
 0x185   : > { %25020 = vst [vmem:[#allocation20_spill] sm:$0xff] %v18940_v50  ;;  %v18943_v51 = vsub.s32 0, %v18940_v50  ;;  %v18959_v0 = vsub.s32 %v1919_v59, %v18940_v50  ;;  %v24797_v5 = vsub.s32 3, %v18940_v50  ;;  %v18966_v10 = vsub.s32 %v1950_v62, %v18940_v50 }
 0x187   : > { %25021 = vst [vmem:[#allocation21_spill] sm:$0xff] %v18943_v51  ;;  %25023 = vst [vmem:[#allocation23_spill] sm:$0xff] %v18959_v0  ;;  %v18988_v25 = vrot.slane %v1188_v11, %v18943_v51 }
 0x188   : > { %1613 = vmatmul.mubr.bf16.gmra.mrb[52].mxu1 %v753_v54  ;;  %v807_v54 = vld [vmem:[%s24776_s3] sm:$0x3]  ;;  %25024 = vst [vmem:[#allocation24_spill] sm:$0xff] %v18966_v10 }
 0x189   : > { %1622 = vmatprep.mubr.bf16.mxu1 %v756_v55  ;;  %v18949_v55 = vsub.s32 1, %v18940_v50  ;;  %v18952_v58 = vrot.slane %v807_v54, %v18943_v51 }
 0x18b   : > { %1846 = vmatmul.mubr.bf16.gmra.mrb[36].mxu0 %v761_v14  ;;  %25022 = vst [vmem:[#allocation22_spill] sm:$0xff] %v18949_v55  ;;  %v18996_v35 = vrot.slane %v1188_v11, %v18949_v55 }
 0x18c   : > { %1855 = vmatprep.mubr.bf16.mxu0 %v764_v15 }
 0x190   : > { %1623 = vmatmul.mubr.bf16.gmra.mrb[56].mxu1 %v755_v60  ;;  %v18955_v60 = vrot.slane %v807_v54, %v18949_v55 }
 0x191   : > { %1632 = vmatprep.mubr.bf16.mxu1 %v758_v61 }
 0x193   : > { %1856 = vmatmul.mubr.bf16.gmra.mrb[40].mxu0 %v763_v20 }
 0x194   : > { %1865 = vmatprep.mubr.bf16.mxu0 %v766_v21 }
 0x198   : > { %1633 = vmatmul.mubr.bf16.gmra.mrb[60].mxu1 %v757_v2  ;;  %v24798_v2 = vsub.s32 2, %v18940_v50 }
 0x199   : > { %1642 = vmatprep.mubr.bf16.mxu1 %v760_v3 }
 0x19a   : > { %v18976_v17 = vrot.slane %v1188_v11, %v24798_v2 }
 0x19b   : > { %1866 = vmatmul.mubr.bf16.gmra.mrb[44].mxu0 %v765_v26 }
 0x19c   : > { %1875 = vmatprep.mubr.bf16.mxu0 %v768_v27  ;;  %25025 = vst [vmem:[#allocation25_spill] sm:$0xff] %v18976_v17 }
 0x1a0   : > { %1643 = vmatmul.mubr.bf16.gmra.mrb[64].mxu1 %v759_v8 }
 0x1a1   : > { %1652 = vmatprep.mubr.bf16.mxu1 %v762_v9 }
 0x1a3   : > { %1876 = vmatmul.mubr.bf16.gmra.mrb[48].mxu0 %v767_v32 }
 0x1a4   : > { %1885 = vmatprep.mubr.bf16.mxu0 %v770_v33 }
 0x1a8   : > { %1653 = vmatmul.mubr.bf16.gmra.mrb[68].mxu1 %v761_v14 }
 0x1a9   : > { %1662 = vmatprep.mubr.bf16.mxu1 %v764_v15 }
 0x1ab   : > { %1886 = vmatmul.mubr.bf16.gmra.mrb[52].mxu0 %v769_v38 }
 0x1ac   : > { %1895 = vmatprep.mubr.bf16.mxu0 %v772_v39 }
 0x1b0   : > { %1663 = vmatmul.mubr.bf16.gmra.mrb[72].mxu1 %v763_v20  ;;  %v18982_v20 = vrot.slane %v1188_v11, %v24797_v5 }
 0x1b1   : > { %1672 = vmatprep.mubr.bf16.mxu1 %v766_v21 }
 0x1b2   : > { %25026 = vst [vmem:[#allocation26_spill] sm:$0xff] %v18982_v20 }
 0x1b3   : > { %1896 = vmatmul.mubr.bf16.gmra.mrb[56].mxu0 %v771_v43 }
 0x1b4   : > { %1905 = vmatprep.mubr.bf16.mxu0 %v774_v44 }
 0x1b8   : > { %1673 = vmatmul.mubr.bf16.gmra.mrb[76].mxu1 %v765_v26 }
 0x1b9   : > { %1682 = vmatprep.mubr.bf16.mxu1 %v768_v27 }
 0x1bb   : > { %1906 = vmatmul.mubr.bf16.gmra.mrb[60].mxu0 %v773_v48 }
 0x1c0   : > { %1683 = vmatmul.mubr.bf16.gmra.mrb[80].mxu1 %v767_v32 }
 0x1c1   : > { %1692 = vmatprep.mubr.bf16.mxu1 %v770_v33 }
 0x1c8   : > { %1693 = vmatmul.mubr.bf16.gmra.mrb[84].mxu1 %v769_v38 }
 0x1c9   : > { %1702 = vmatprep.mubr.bf16.mxu1 %v772_v39 }
 0x1d0   : > { %1703 = vmatmul.mubr.bf16.gmra.mrb[88].mxu1 %v771_v43 }
 0x1d1   : > { %1712 = vmatprep.mubr.bf16.mxu1 %v774_v44 }
 0x1d8   : > { %1713 = vmatmul.mubr.bf16.gmra.mrb[92].mxu1 %v773_v48 }
 0x1f3   : > { %v1013_v61 = vpop.f32.mrb[0].mxu1 }
 0x1f4   : > { %v1014_v63 = vadd.f32 %v1013_v61, %v18952_v58  ;;  %v1015_v1 = vpop.f32.mrb[1].mxu1 }
 0x1f5   : > { %v1016_v3 = vadd.f32 %v1015_v1, %v18955_v60  ;;  %v1017_v4 = vpop.f32.mrb[2].mxu1 }
 0x1f6   : > { %v1092_v6 = vmul.f32 0.088388346, %v1014_v63  ;;  %v1018_v7 = vadd.f32 %v1017_v4, %v18952_v58  ;;  %v1019_v8 = vpop.f32.mrb[3].mxu1 }
 0x1f7   : > { %v1093_v9 = vmul.f32 0.088388346, %v1016_v3  ;;  %v1020_v12 = vadd.f32 %v1019_v8, %v18955_v60 }
 0x1f8   : > { %v1916_v14 = vcombine.high %v1092_v6, %v24799_v13  ;;  %v1923_v15 = vrot.slane %v1092_v6, %v18959_v0  ;;  %v1094_v16 = vmul.f32 0.088388346, %v1018_v7 }
 0x1f9   : > { %v1931_v18 = vcombine.high %v1093_v9, %v24799_v13  ;;  %v1938_v19 = vrot.slane %v1093_v9, %v18959_v0  ;;  %v1095_v21 = vmul.f32 0.088388346, %v1020_v12 }
 0x1fa   : > { %v1930_v22 = vrot.slane %v1916_v14, %v18959_v0  ;;  %v1982_v23 = vcombine.high %v1094_v16, %v24799_v13  ;;  %v1989_v24 = vrot.slane %v1094_v16, %v18959_v0 }
 0x1fb   : > { %v1945_v26 = vrot.slane %v1931_v18, %v18959_v0  ;;  %v1946_v27 = vcombine.low %v1923_v15, %v1938_v19  ;;  %v1947_v28 = vcombine.high %v1923_v15, %v1938_v19  ;;  %v1997_v29 = vcombine.high %v1095_v21, %v24799_v13  ;;  %v1023_v30 = vpop.f32.mrb[4].mxu1 }
 0x1fc   : > { %v1996_v31 = vrot.slane %v1982_v23, %v18959_v0  ;;  %v2004_v32 = vrot.slane %v1095_v21, %v18959_v0  ;;  %v1024_v33 = vadd.f32 %v1023_v30, %v18952_v58  ;;  %v1025_v34 = vpop.f32.mrb[5].mxu1 }
 0x1fd   : > { %v1954_v36 = vrot.slane %v1946_v27, %v18966_v10  ;;  %v1961_v37 = vrot.slane %v1947_v28, %v18966_v10  ;;  %v1962_v38 = vcombine.low %v1930_v22, %v1945_v26  ;;  %v1963_v39 = vcombine.high %v1930_v22, %v1945_v26  ;;  %v1027_v40 = vpop.f32.mrb[6].mxu1 }
 0x1fe   : > { %v2011_v41 = vrot.slane %v1997_v29, %v18959_v0  ;;  %v2012_v46 = vcombine.low %v1989_v24, %v2004_v32  ;;  %v2013_v42 = vcombine.high %v1989_v24, %v2004_v32  ;;  %v1096_v43 = vmul.f32 0.088388346, %v1024_v33  ;;  %v1029_v44 = vpop.f32.mrb[7].mxu1 }
 0x1ff   : > { %v19002_v45 = vrot.slane %v1962_v38, %v18966_v10  ;;  %v19005_v47 = vrot.slane %v1963_v39, %v18966_v10  ;;  %v2972_v48 = vcombine.low %v1954_v36, %v1961_v37  ;;  %v16811_v49 = vcombine.high %v1954_v36, %v1961_v37 }
 0x200   : > { %v2020_v52 = vrot.slane %v2012_v46, %v18966_v10  ;;  %v2027_v53 = vrot.slane %v2013_v42, %v18966_v10  ;;  %v2028_v54 = vcombine.low %v1996_v31, %v2011_v41  ;;  %v2029_v56 = vcombine.high %v1996_v31, %v2011_v41 }
 0x201   : > { %v19010_v57 = vrot.slane %v2972_v48, %v18959_v0  ;;  %v19013_v59 = vrot.slane %v16811_v49, %v18959_v0  ;;  %v2988_v61 = vcombine.low %v19002_v45, %v19005_v47  ;;  %v16812_v62 = vcombine.high %v19002_v45, %v19005_v47 }
 0x202   : > { %v19020_v63 = vrot.slane %v2028_v54, %v18966_v10  ;;  %v19023_v1 = vrot.slane %v2029_v56, %v18966_v10  ;;  %v3022_v3 = vcombine.low %v2020_v52, %v2027_v53  ;;  %v16813_v4 = vcombine.high %v2020_v52, %v2027_v53 }
 0x203   : > { %v2048_v6 = vcombine.high %v1096_v43, %v24799_v13  ;;  %v2055_v7 = vrot.slane %v1096_v43, %v18959_v0  ;;  %v1026_v8 = vadd.f32 %v1025_v34, %v18955_v60  ;;  %v1028_v9 = vadd.f32 %v1027_v40, %v18952_v58  ;;  %v1033_v11 = vpop.f32.mrb[8].mxu1 }
 0x204   : > { %v19030_v12 = vrot.slane %v3022_v3, %v18959_v0  ;;  %v19033_v14 = vrot.slane %v16813_v4, %v18959_v0  ;;  %v3038_v15 = vcombine.low %v19020_v63, %v19023_v1  ;;  %v1035_v18 = vpop.f32.mrb[9].mxu1  ;;  %v1030_v23 = vadd.f32 %v1029_v44, %v18955_v60 }
 0x205   : > { %v2062_v19 = vrot.slane %v2048_v6, %v18959_v0  ;;  %v1097_v21 = vmul.f32 0.088388346, %v1026_v8  ;;  %v1098_v22 = vmul.f32 0.088388346, %v1028_v9  ;;  %v1037_v24 = vpop.f32.mrb[10].mxu1  ;;  %v1034_v26 = vadd.f32 %v1033_v11, %v18952_v58 }
 0x206   : > { %v1036_v27 = vadd.f32 %v1035_v18, %v18955_v60  ;;  %v1038_v28 = vadd.f32 %v1037_v24, %v18952_v58  ;;  %v1039_v29 = vpop.f32.mrb[11].mxu1  ;;  %v19045_v30 = vrot.slane %v2988_v61, %v18959_v0  ;;  %v1099_v36 = vmul.f32 0.088388346, %v1030_v23 }
 0x207   : > { %v2063_v31 = vcombine.high %v1097_v21, %v24799_v13  ;;  %v2070_v32 = vrot.slane %v1097_v21, %v18959_v0  ;;  %v2114_v33 = vcombine.high %v1098_v22, %v24799_v13  ;;  %v2121_v34 = vrot.slane %v1098_v22, %v18959_v0 }
 0x208   : > { %v1100_v37 = vmul.f32 0.088388346, %v1034_v26  ;;  %v1101_v38 = vmul.f32 0.088388346, %v1036_v27  ;;  %v1040_v39 = vadd.f32 %v1039_v29, %v18955_v60  ;;  %v2129_v43 = vcombine.high %v1099_v36, %v24799_v13 }
 0x209   : > { %v2077_v40 = vrot.slane %v2063_v31, %v18959_v0  ;;  %v2078_v41 = vcombine.low %v2055_v7, %v2070_v32  ;;  %v2079_v46 = vcombine.high %v2055_v7, %v2070_v32  ;;  %v2128_v42 = vrot.slane %v2114_v33, %v18959_v0 }
 0x20a   : > { %v2136_v44 = vrot.slane %v1099_v36, %v18959_v0  ;;  %v2180_v48 = vcombine.high %v1100_v37, %v24799_v13  ;;  %v2187_v49 = vrot.slane %v1100_v37, %v18959_v0  ;;  %v2143_v3 = vrot.slane %v2129_v43, %v18959_v0 }
 0x20b   : > { %v2086_v52 = vrot.slane %v2078_v41, %v18966_v10  ;;  %v2093_v53 = vrot.slane %v2079_v46, %v18966_v10  ;;  %v2094_v54 = vcombine.low %v2062_v19, %v2077_v40  ;;  %v2095_v56 = vcombine.high %v2062_v19, %v2077_v40  ;;  %v1043_v61 = vpop.f32.mrb[12].mxu1 }
 0x20c   : > { %v2144_v4 = vcombine.low %v2121_v34, %v2136_v44  ;;  %v2145_v6 = vcombine.high %v2121_v34, %v2136_v44  ;;  %v2194_v7 = vrot.slane %v2180_v48, %v18959_v0  ;;  %v19062_v8 = vpop.f32.mrb[13].mxu1  ;;  %v2160_v24 = vcombine.low %v2128_v42, %v2143_v3 }
 0x20d   : > { %v19065_v9 = vrot.slane %v2094_v54, %v18966_v10  ;;  %v19068_v11 = vrot.slane %v2095_v56, %v18966_v10  ;;  %v3072_v18 = vcombine.low %v2086_v52, %v2093_v53  ;;  %v16815_v21 = vcombine.high %v2086_v52, %v2093_v53  ;;  %v1047_v22 = vpop.f32.mrb[14].mxu1 }
 0x20e   : > { %v2152_v19 = vrot.slane %v2144_v4, %v18966_v10  ;;  %v2159_v23 = vrot.slane %v2145_v6, %v18966_v10  ;;  %v2161_v26 = vcombine.high %v2128_v42, %v2143_v3  ;;  %v1049_v27 = vpop.f32.mrb[15].mxu1  ;;  %v19083_v34 = vrot.slane %v2160_v24, %v18966_v10 }
 0x20f   : > { %25027 = vst [vmem:[#allocation27_spill] sm:$0xff] %v19065_v9  ;;  %25028 = vst [vmem:[#allocation28_spill] sm:$0xff] %v19068_v11  ;;  %v19073_v29 = vrot.slane %v3072_v18, %v18959_v0  ;;  %v19076_v31 = vrot.slane %v16815_v21, %v18959_v0  ;;  %v2195_v41 = vcombine.high %v1101_v38, %v24799_v13  ;;  %v1102_v42 = vmul.f32 0.088388346, %v1038_v28 }
 0x210   : > { %25031 = vst [vmem:[#allocation31_spill] sm:$0xff] %v19083_v34  ;;  %v19086_v36 = vrot.slane %v2161_v26, %v18966_v10  ;;  %v3122_v37 = vcombine.low %v2152_v19, %v2159_v23  ;;  %v16817_v40 = vcombine.high %v2152_v19, %v2159_v23  ;;  %v2202_v46 = vrot.slane %v1101_v38, %v18959_v0 }
 0x211   : > { %25029 = vst [vmem:[#allocation29_spill] sm:$0xff] %v19073_v29  ;;  %25030 = vst [vmem:[#allocation30_spill] sm:$0xff] %v19076_v31  ;;  %v1103_v43 = vmul.f32 0.088388346, %v1040_v39  ;;  %v2209_v54 = vrot.slane %v2195_v41, %v18959_v0  ;;  %v2246_v38 = vcombine.high %v1102_v42, %v24799_v13  ;;  %v2253_v39 = vrot.slane %v1102_v42, %v18959_v0 }
 0x212   : > { %25032 = vst [vmem:[#allocation32_spill] sm:$0xff] %v19086_v36  ;;  %v19091_v44 = vrot.slane %v3122_v37, %v18959_v0  ;;  %v19094_v48 = vrot.slane %v16817_v40, %v18959_v0  ;;  %v2210_v56 = vcombine.low %v2187_v49, %v2202_v46  ;;  %v2211_v3 = vcombine.high %v2187_v49, %v2202_v46 }
 0x213   : > { %v19102_v28 = vpop.f32.mrb[16].mxu1  ;;  %v2261_v4 = vcombine.high %v1103_v43, %v24799_v13  ;;  %v2268_v6 = vrot.slane %v1103_v43, %v18959_v0  ;;  %v1044_v18 = vadd.f32 %v1043_v61, %v18952_v58  ;;  %v2226_v24 = vcombine.low %v2194_v7, %v2209_v54 }
 0x214   : > { %25033 = vst [vmem:[#allocation33_spill] sm:$0xff] %v19091_v44  ;;  %25034 = vst [vmem:[#allocation34_spill] sm:$0xff] %v19094_v48  ;;  %v19108_v21 = vpop.f32.mrb[17].mxu1  ;;  %v2218_v19 = vrot.slane %v2210_v56, %v18966_v10  ;;  %v2225_v23 = vrot.slane %v2211_v3, %v18966_v10  ;;  %v2227_v49 = vcombine.high %v2194_v7, %v2209_v54 }
 0x215   : > { %v19112_v26 = vpop.f32.mrb[18].mxu1  ;;  %v2260_v37 = vrot.slane %v2246_v38, %v18959_v0  ;;  %v2275_v40 = vrot.slane %v2261_v4, %v18959_v0  ;;  %v2276_v41 = vcombine.low %v2253_v39, %v2268_v6  ;;  %v2277_v46 = vcombine.high %v2253_v39, %v2268_v6 }
 0x216   : > { %v19116_v42 = vpop.f32.mrb[19].mxu1  ;;  %v19119_v61 = vrot.slane %v2226_v24, %v18966_v10  ;;  %v19122_v43 = vrot.slane %v2227_v49, %v18966_v10  ;;  %v3172_v56 = vcombine.low %v2218_v19, %v2225_v23  ;;  %v16819_v3 = vcombine.high %v2218_v19, %v2225_v23 }
 0x217   : > { %v2284_v7 = vrot.slane %v2276_v41, %v18966_v10  ;;  %v2291_v54 = vrot.slane %v2277_v46, %v18966_v10  ;;  %v2292_v5 = vcombine.low %v2260_v37, %v2275_v40  ;;  %v2293_v38 = vcombine.high %v2260_v37, %v2275_v40 }
 0x218   : > { %25035 = vst [vmem:[#allocation35_spill] sm:$0xff] %v19119_v61  ;;  %25036 = vst [vmem:[#allocation36_spill] sm:$0xff] %v19122_v43  ;;  %v19127_v4 = vrot.slane %v3172_v56, %v18959_v0  ;;  %v19130_v39 = vrot.slane %v16819_v3, %v18959_v0  ;;  %v1104_v40 = vmul.f32 0.088388346, %v1044_v18  ;;  %v1046_v41 = vadd.f32 %v19062_v8, %v18955_v60 }
 0x219   : > { %v19137_v19 = vrot.slane %v2292_v5, %v18966_v10  ;;  %v19140_v23 = vrot.slane %v2293_v38, %v18966_v10  ;;  %v3222_v49 = vcombine.low %v2284_v7, %v2291_v54  ;;  %v16821_v37 = vcombine.high %v2284_v7, %v2291_v54 }
 0x21a   : > { %25037 = vst [vmem:[#allocation37_spill] sm:$0xff] %v19127_v4  ;;  %25038 = vst [vmem:[#allocation38_spill] sm:$0xff] %v19130_v39  ;;  %v1048_v46 = vadd.f32 %v1047_v22, %v18952_v58  ;;  %v1050_v56 = vadd.f32 %v1049_v27, %v18955_v60  ;;  %v2312_v8 = vcombine.high %v1104_v40, %v24799_v13  ;;  %v1105_v27 = vmul.f32 0.088388346, %v1046_v41 }
 0x21b   : > { %25039 = vst [vmem:[#allocation39_spill] sm:$0xff] %v19137_v19  ;;  %25040 = vst [vmem:[#allocation40_spill] sm:$0xff] %v19140_v23  ;;  %v19146_v3 = vpop.f32.mrb[20].mxu1  ;;  %v19149_v2 = vrot.slane %v3222_v49, %v18959_v0  ;;  %v19152_v5 = vrot.slane %v16821_v37, %v18959_v0  ;;  %v2319_v22 = vrot.slane %v1104_v40, %v18959_v0 }
 0x21c   : > { %v19158_v7 = vpop.f32.mrb[21].mxu1  ;;  %v1106_v54 = vmul.f32 0.088388346, %v1048_v46  ;;  %v1107_v49 = vmul.f32 0.088388346, %v1050_v56  ;;  %v3003_v37 = vrot.slane %v16812_v62, %v18959_v0  ;;  %v3004_v38 = vcombine.low %v19010_v57, %v19013_v59 }
 0x21d   : > { %25041 = vst [vmem:[#allocation41_spill] sm:$0xff] %v19149_v2  ;;  %25042 = vst [vmem:[#allocation42_spill] sm:$0xff] %v19152_v5  ;;  %v19162_v24 = vpop.f32.mrb[22].mxu1  ;;  %v19174_v18 = vrot.slane %v3038_v15, %v18959_v0  ;;  %v2326_v41 = vrot.slane %v2312_v8, %v18959_v0  ;;  %v2327_v46 = vcombine.high %v1105_v27, %v24799_v13 }
 0x21e   : > { %v19176_v40 = vpop.f32.mrb[23].mxu1  ;;  %v2334_v56 = vrot.slane %v1105_v27, %v18959_v0  ;;  %v2378_v45 = vcombine.high %v1106_v54, %v24799_v13  ;;  %v2385_v47 = vrot.slane %v1106_v54, %v18959_v0  ;;  %v2393_v57 = vcombine.high %v1107_v49, %v24799_v13 }
 0x21f   : > { %v2400_v59 = vrot.slane %v1107_v49, %v18959_v0  ;;  %v19186_v62 = vrot.slane %v3004_v38, %v18966_v10  ;;  %v2341_v15 = vrot.slane %v2327_v46, %v18959_v0  ;;  %v3012_v32 = vcombine.low %v19045_v30, %v3003_v37 }
 0x220   : > { %v2342_v6 = vcombine.low %v2319_v22, %v2334_v56  ;;  %v2343_v53 = vcombine.high %v2319_v22, %v2334_v56  ;;  %v2392_v8 = vrot.slane %v2378_v45, %v18959_v0  ;;  %v2407_v52 = vrot.slane %v2393_v57, %v18959_v0 }
 0x221   : > { %v2408_v27 = vcombine.low %v2385_v47, %v2400_v59  ;;  %v2409_v33 = vcombine.high %v2385_v47, %v2400_v59  ;;  %v2358_v49 = vcombine.low %v2326_v41, %v2341_v15  ;;  %v2359_v16 = vcombine.high %v2326_v41, %v2341_v15 }
 0x222   : > { %v2350_v54 = vrot.slane %v2342_v6, %v18966_v10  ;;  %v2357_v13 = vrot.slane %v2343_v53, %v18966_v10  ;;  %v2424_v56 = vcombine.low %v2392_v8, %v2407_v52  ;;  %v2425_v45 = vcombine.high %v2392_v8, %v2407_v52 }
 0x223   : > { %v19194_v38 = vpop.f32.mrb[24].mxu1  ;;  %v2416_v46 = vrot.slane %v2408_v27, %v18966_v10  ;;  %v2423_v22 = vrot.slane %v2409_v33, %v18966_v10  ;;  %v19201_v47 = vrot.slane %v2358_v49, %v18966_v10  ;;  %v19204_v30 = vrot.slane %v2359_v16, %v18966_v10 }
 0x224   : > { %v19198_v50 = vpop.f32.mrb[25].mxu1  ;;  %v3272_v6 = vcombine.low %v2350_v54, %v2357_v13  ;;  %v16823_v53 = vcombine.high %v2350_v54, %v2357_v13  ;;  %v19209_v41 = vrot.slane %v2424_v56, %v18966_v10  ;;  %v19212_v57 = vrot.slane %v2425_v45, %v18966_v10 }
 0x225   : > { %25043 = vst [vmem:[#allocation43_spill] sm:$0xff] %v19201_v47  ;;  %25044 = vst [vmem:[#allocation44_spill] sm:$0xff] %v19204_v30  ;;  %v19206_v37 = vpop.f32.mrb[26].mxu1  ;;  %v3322_v33 = vcombine.low %v2416_v46, %v2423_v22  ;;  %v16825_v52 = vcombine.high %v2416_v46, %v2423_v22  ;;  %v3019_v22 = vrot.slane %v3012_v32, %v18966_v10 }
 0x226   : > { %25045 = vst [vmem:[#allocation45_spill] sm:$0xff] %v19209_v41  ;;  %25046 = vst [vmem:[#allocation46_spill] sm:$0xff] %v19212_v57  ;;  %v19214_v59 = vpop.f32.mrb[27].mxu1  ;;  %v19217_v15 = vrot.slane %v3272_v6, %v18959_v0  ;;  %v19220_v16 = vrot.slane %v16823_v53, %v18959_v0  ;;  %v25051_v56 = vcombine.high %v19020_v63, %v19023_v1 }
 0x227   : > { %v19227_v27 = vrot.slane %v3322_v33, %v18959_v0  ;;  %v19230_v54 = vrot.slane %v16825_v52, %v18959_v0  ;;  %v3054_v6 = vcombine.low %v19030_v12, %v19033_v14  ;;  %v1054_v53 = vadd.f32 %v19102_v28, %v18952_v58 }
 0x228   : > { %25047 = vst [vmem:[#allocation47_spill] sm:$0xff] %v19217_v15  ;;  %25048 = vst [vmem:[#allocation48_spill] sm:$0xff] %v19220_v16  ;;  %v3053_v45 = vrot.slane %v25051_v56, %v18959_v0  ;;  %v1056_v33 = vadd.f32 %v19108_v21, %v18955_v60  ;;  %v1058_v52 = vadd.f32 %v19112_v26, %v18952_v58 }
 0x229   : > { %25049 = vst [vmem:[#allocation49_spill] sm:$0xff] %v19227_v27  ;;  %25050 = vst [vmem:[#allocation50_spill] sm:$0xff] %v19230_v54  ;;  %v1060_v32 = vadd.f32 %v19116_v42, %v18955_v60  ;;  %v1064_v46 = vadd.f32 %v19146_v3, %v18952_v58  ;;  %v3020_v63 = vcombine.low %v19186_v62, %v3019_v22  ;;  %v1108_v21 = vmul.f32 0.088388346, %v1054_v53 }
 0x22a   : > { %v3061_v1 = vrot.slane %v3054_v6, %v18966_v10  ;;  %v3062_v12 = vcombine.low %v19174_v18, %v3053_v45  ;;  %v3021_v14 = vcombine.high %v19186_v62, %v3019_v22  ;;  %v1109_v56 = vmul.f32 0.088388346, %v1056_v33 }
 0x22b   : > { %v19257_v28 = vpop.f32.mrb[28].mxu1  ;;  %v1110_v49 = vmul.f32 0.088388346, %v1058_v52  ;;  %v1066_v26 = vadd.f32 %v19158_v7, %v18955_v60  ;;  %v1111_v8 = vmul.f32 0.088388346, %v1060_v32  ;;  %v1068_v13 = vadd.f32 %v19162_v24, %v18952_v58 }
 0x22c   : > { %v3069_v42 = vrot.slane %v3062_v12, %v18966_v10  ;;  %v1112_v3 = vmul.f32 0.088388346, %v1064_v46  ;;  %v19264_v6 = vpop.f32.mrb[29].mxu1  ;;  %v25052_v18 = vmov 0.0   ;;  %v2451_v62 = vrot.slane %v1108_v21, %v18959_v0 }
 0x22d   : > { %v2444_v45 = vcombine.high %v1108_v21, %v25052_v18  ;;  %v2459_v22 = vcombine.high %v1109_v56, %v25052_v18  ;;  %v2466_v53 = vrot.slane %v1109_v56, %v18959_v0  ;;  %v19270_v33 = vpop.f32.mrb[30].mxu1  ;;  %v2510_v32 = vcombine.high %v1110_v49, %v25052_v18 }
 0x22e   : > { %v3070_v7 = vcombine.low %v3061_v1, %v3069_v42  ;;  %v3071_v52 = vcombine.high %v3061_v1, %v3069_v42  ;;  %v2517_v46 = vrot.slane %v1110_v49, %v18959_v0  ;;  %v19274_v12 = vpop.f32.mrb[31].mxu1  ;;  %v2525_v1 = vcombine.high %v1111_v8, %v25052_v18 }
 0x22f   : > { %v2458_v24 = vrot.slane %v2444_v45, %v18959_v0  ;;  %v2473_v55 = vrot.slane %v2459_v22, %v18959_v0  ;;  %v2474_v51 = vcombine.low %v2451_v62, %v2466_v53  ;;  %v2475_v21 = vcombine.high %v2451_v62, %v2466_v53 }
 0x230   : > { %v19278_v20 = vpack.c.bf16 %v3070_v7, %v3020_v63  ;;  %v19280_v17 = vpack.c.bf16 %v3071_v52, %v3021_v14  ;;  %v2524_v56 = vrot.slane %v2510_v32, %v18959_v0  ;;  %v2532_v45 = vrot.slane %v1111_v8, %v18959_v0 }
 0x231   : > { %v2482_v42 = vrot.slane %v2474_v51, %v18966_v10  ;;  %v2489_v49 = vrot.slane %v2475_v21, %v18966_v10  ;;  %v2490_v27 = vcombine.low %v2458_v24, %v2473_v55  ;;  %v2491_v54 = vcombine.high %v2458_v24, %v2473_v55 }
 0x232   : > { %25053 = vst [vmem:[#allocation51_spill] sm:$0xff] %v19278_v20  ;;  %25054 = vst [vmem:[#allocation52_spill] sm:$0xff] %v19280_v17  ;;  %17189 = vmatprep.mubr.bf16.mxu1 %v19278_v20  ;;  %17221 = vmatprep.mubr.bf16.mxu0 %v19280_v17  ;;  %v2539_v63 = vrot.slane %v2525_v1, %v18959_v0  ;;  %v2576_v14 = vcombine.high %v1112_v3, %v25052_v18  ;;  %v1113_v62 = vmul.f32 0.088388346, %v1066_v26 }
 0x233   : > { %v19291_v22 = vpop.f32.mrb[32].mxu1  ;;  %v19294_v53 = vrot.slane %v2490_v27, %v18966_v10  ;;  %v19297_v51 = vrot.slane %v2491_v54, %v18966_v10  ;;  %v3372_v55 = vcombine.low %v2482_v42, %v2489_v49  ;;  %v16827_v7 = vcombine.high %v2482_v42, %v2489_v49 }
 0x234   : > { %v19299_v52 = vpop.f32.mrb[33].mxu1  ;;  %v2540_v32 = vcombine.low %v2517_v46, %v2532_v45  ;;  %v2541_v24 = vcombine.high %v2517_v46, %v2532_v45  ;;  %v2556_v8 = vcombine.low %v2524_v56, %v2539_v63  ;;  %v2557_v21 = vcombine.high %v2524_v56, %v2539_v63 }
 0x235   : > { %25055 = vst [vmem:[#allocation53_spill] sm:$0xff] %v19294_v53  ;;  %25056 = vst [vmem:[#allocation54_spill] sm:$0xff] %v19297_v51  ;;  %v19301_v1 = vpop.f32.mrb[34].mxu1  ;;  %v19304_v26 = vrot.slane %v3372_v55, %v18959_v0  ;;  %v19307_v17 = vrot.slane %v16827_v7, %v18959_v0  ;;  %v2583_v63 = vrot.slane %v1112_v3, %v18959_v0  ;;  %v1114_v20 = vmul.f32 0.088388346, %v1068_v13 }
 0x236   : > { %v19313_v42 = vpop.f32.mrb[35].mxu1  ;;  %v2548_v46 = vrot.slane %v2540_v32, %v18966_v10  ;;  %v2555_v56 = vrot.slane %v2541_v24, %v18966_v10  ;;  %v19318_v49 = vrot.slane %v2556_v8, %v18966_v10  ;;  %v19321_v45 = vrot.slane %v2557_v21, %v18966_v10 }
 0x237   : > { %25057 = vst [vmem:[#allocation55_spill] sm:$0xff] %v19304_v26  ;;  %25058 = vst [vmem:[#allocation56_spill] sm:$0xff] %v19307_v17  ;;  %v2590_v55 = vrot.slane %v2576_v14, %v18959_v0  ;;  %v2591_v7 = vcombine.high %v1113_v62, %v25052_v18  ;;  %v2598_v54 = vrot.slane %v1113_v62, %v18959_v0 }
 0x238   : > { %25059 = vst [vmem:[#allocation57_spill] sm:$0xff] %v19318_v49  ;;  %25060 = vst [vmem:[#allocation58_spill] sm:$0xff] %v19321_v45  ;;  %v3422_v27 = vcombine.low %v2548_v46, %v2555_v56  ;;  %v16829_v26 = vcombine.high %v2548_v46, %v2555_v56  ;;  %v1070_v62 = vadd.f32 %v19176_v40, %v18955_v60 }
 0x239   : > { %v2605_v8 = vrot.slane %v2591_v7, %v18959_v0  ;;  %v2606_v21 = vcombine.low %v2583_v63, %v2598_v54  ;;  %v2607_v17 = vcombine.high %v2583_v63, %v2598_v54  ;;  %v1074_v46 = vadd.f32 %v19194_v38, %v18952_v58 }
 0x23a   : > { %v19333_v3 = vrot.slane %v3422_v27, %v18959_v0  ;;  %v19336_v14 = vrot.slane %v16829_v26, %v18959_v0  ;;  %v2642_v27 = vcombine.high %v1114_v20, %v25052_v18  ;;  %v2649_v26 = vrot.slane %v1114_v20, %v18959_v0 }
 0x23b   : > { %v19342_v56 = vpop.f32.mrb[36].mxu1  ;;  %v2614_v24 = vrot.slane %v2606_v21, %v18966_v10  ;;  %v2621_v7 = vrot.slane %v2607_v17, %v18966_v10  ;;  %v2622_v54 = vcombine.low %v2590_v55, %v2605_v8  ;;  %v2623_v13 = vcombine.high %v2590_v55, %v2605_v8 }
 0x23c   : > { %25061 = vst [vmem:[#allocation59_spill] sm:$0xff] %v19333_v3  ;;  %25062 = vst [vmem:[#allocation60_spill] sm:$0xff] %v19336_v14  ;;  %v19346_v63 = vpop.f32.mrb[37].mxu1  ;;  %v1115_v32 = vmul.f32 0.088388346, %v1070_v62  ;;  %v2656_v55 = vrot.slane %v2642_v27, %v18959_v0 }
 0x23d   : > { %v1116_v3 = vmul.f32 0.088388346, %v1074_v46  ;;  %v19350_v40 = vpop.f32.mrb[38].mxu1  ;;  %v19353_v38 = vrot.slane %v2622_v54, %v18966_v10  ;;  %v19356_v14 = vrot.slane %v2623_v13, %v18966_v10  ;;  %v3472_v21 = vcombine.low %v2614_v24, %v2621_v7 }
 0x23e   : > { %v16831_v17 = vcombine.high %v2614_v24, %v2621_v7  ;;  %v19358_v45 = vpop.f32.mrb[39].mxu1  ;;  %v2657_v8 = vcombine.high %v1115_v32, %v25052_v18  ;;  %v2664_v20 = vrot.slane %v1115_v32, %v18959_v0  ;;  %v1080_v13 = vadd.f32 %v19214_v59, %v18955_v60 }
 0x23f   : > { %25063 = vst [vmem:[#allocation61_spill] sm:$0xff] %v19353_v38  ;;  %25064 = vst [vmem:[#allocation62_spill] sm:$0xff] %v19356_v14  ;;  %v2708_v62 = vcombine.high %v1116_v3, %v25052_v18  ;;  %v19365_v46 = vrot.slane %v3472_v21, %v18959_v0  ;;  %v2715_v32 = vrot.slane %v1116_v3, %v18959_v0 }
 0x240   : > { %v19368_v54 = vrot.slane %v16831_v17, %v18959_v0  ;;  %v2671_v7 = vrot.slane %v2657_v8, %v18959_v0  ;;  %v2672_v27 = vcombine.low %v2649_v26, %v2664_v20  ;;  %v2673_v49 = vcombine.high %v2649_v26, %v2664_v20 }
 0x241   : > { %25065 = vst [vmem:[#allocation63_spill] sm:$0xff] %v19365_v46  ;;  %v2722_v51 = vrot.slane %v2708_v62, %v18959_v0  ;;  %v1076_v21 = vadd.f32 %v19198_v50, %v18955_v60  ;;  %v1078_v17 = vadd.f32 %v19206_v37, %v18952_v58  ;;  %v1119_v62 = vmul.f32 0.088388346, %v1080_v13 }
 0x242   : > { %25066 = vst [vmem:[#allocation64_spill] sm:$0xff] %v19368_v54  ;;  %v2680_v46 = vrot.slane %v2672_v27, %v18966_v10  ;;  %v2687_v24 = vrot.slane %v2673_v49, %v18966_v10  ;;  %v2688_v8 = vcombine.low %v2656_v55, %v2671_v7  ;;  %v2689_v54 = vcombine.high %v2656_v55, %v2671_v7 }
 0x243   : > { %v19385_v26 = vpop.f32.mrb[40].mxu1  ;;  %v1117_v3 = vmul.f32 0.088388346, %v1076_v21  ;;  %v1118_v20 = vmul.f32 0.088388346, %v1078_v17  ;;  %v1084_v50 = vadd.f32 %v19257_v28, %v18952_v58 }
 0x244   : > { %v19390_v14 = vrot.slane %v2688_v8, %v18966_v10  ;;  %v19393_v37 = vrot.slane %v2689_v54, %v18966_v10  ;;  %v3522_v59 = vcombine.low %v2680_v46, %v2687_v24  ;;  %v16833_v27 = vcombine.high %v2680_v46, %v2687_v24  ;;  %v19395_v38 = vpop.f32.mrb[41].mxu1 }
 0x245   : > { %v2723_v49 = vcombine.high %v1117_v3, %v25052_v18  ;;  %v2730_v55 = vrot.slane %v1117_v3, %v18959_v0  ;;  %v2774_v7 = vcombine.high %v1118_v20, %v25052_v18  ;;  %v2781_v13 = vrot.slane %v1118_v20, %v18959_v0  ;;  %v19401_v21 = vpop.f32.mrb[42].mxu1 }
 0x246   : > { %25067 = vst [vmem:[#allocation65_spill] sm:$0xff] %v19390_v14  ;;  %25068 = vst [vmem:[#allocation66_spill] sm:$0xff] %v19393_v37  ;;  %v19404_v28 = vrot.slane %v3522_v59, %v18959_v0  ;;  %v19407_v54 = vrot.slane %v16833_v27, %v18959_v0  ;;  %v19413_v17 = vpop.f32.mrb[43].mxu1  ;;  %v2789_v59 = vcombine.high %v1119_v62, %v25052_v18  ;;  %v1120_v27 = vmul.f32 0.088388346, %v1084_v50 }
 0x247   : > { %v2737_v8 = vrot.slane %v2723_v49, %v18959_v0  ;;  %v2738_v3 = vcombine.low %v2715_v32, %v2730_v55  ;;  %v2739_v20 = vcombine.high %v2715_v32, %v2730_v55  ;;  %v2788_v53 = vrot.slane %v2774_v7, %v18959_v0 }
 0x248   : > { %25069 = vst [vmem:[#allocation67_spill] sm:$0xff] %v19404_v28  ;;  %25070 = vst [vmem:[#allocation68_spill] sm:$0xff] %v19407_v54  ;;  %v2796_v28 = vrot.slane %v1119_v62, %v18959_v0  ;;  %v1086_v54 = vadd.f32 %v19264_v6, %v18955_v60  ;;  %v2803_v49 = vrot.slane %v2789_v59, %v18959_v0 }
 0x249   : > { %v2746_v46 = vrot.slane %v2738_v3, %v18966_v10  ;;  %v2753_v24 = vrot.slane %v2739_v20, %v18966_v10  ;;  %v2754_v37 = vcombine.low %v2722_v51, %v2737_v8  ;;  %v2755_v14 = vcombine.high %v2722_v51, %v2737_v8 }
 0x24a   : > { %v2804_v57 = vcombine.low %v2781_v13, %v2796_v28  ;;  %v2805_v32 = vcombine.high %v2781_v13, %v2796_v28  ;;  %v2840_v55 = vcombine.high %v1120_v27, %v25052_v18  ;;  %v2820_v20 = vcombine.low %v2788_v53, %v2803_v49 }
 0x24b   : > { %v19425_v7 = vpop.f32.mrb[44].mxu1  ;;  %v19428_v62 = vrot.slane %v2754_v37, %v18966_v10  ;;  %v19431_v50 = vrot.slane %v2755_v14, %v18966_v10  ;;  %v3572_v6 = vcombine.low %v2746_v46, %v2753_v24  ;;  %v16835_v3 = vcombine.high %v2746_v46, %v2753_v24 }
 0x24c   : > { %v19433_v41 = vpop.f32.mrb[45].mxu1  ;;  %v2812_v51 = vrot.slane %v2804_v57, %v18966_v10  ;;  %v2819_v8 = vrot.slane %v2805_v32, %v18966_v10  ;;  %v2821_v13 = vcombine.high %v2788_v53, %v2803_v49  ;;  %v19452_v57 = vrot.slane %v2820_v20, %v18966_v10 }
 0x24d   : > { %25071 = vst [vmem:[#allocation69_spill] sm:$0xff] %v19428_v62  ;;  %25072 = vst [vmem:[#allocation70_spill] sm:$0xff] %v19431_v50  ;;  %v19437_v28 = vpop.f32.mrb[46].mxu1  ;;  %v19440_v59 = vrot.slane %v3572_v6, %v18959_v0  ;;  %v19443_v37 = vrot.slane %v16835_v3, %v18959_v0  ;;  %v2847_v6 = vrot.slane %v1120_v27, %v18959_v0 }
 0x24e   : > { %v19449_v24 = vpop.f32.mrb[47].mxu1  ;;  %25075 = vst [vmem:[#allocation73_spill] sm:$0xff] %v19452_v57  ;;  %v19455_v53 = vrot.slane %v2821_v13, %v18966_v10  ;;  %v3622_v49 = vcombine.low %v2812_v51, %v2819_v8  ;;  %v16837_v32 = vcombine.high %v2812_v51, %v2819_v8  ;;  %v2854_v3 = vrot.slane %v2840_v55, %v18959_v0 }
 0x24f   : > { %25073 = vst [vmem:[#allocation71_spill] sm:$0xff] %v19440_v59  ;;  %25074 = vst [vmem:[#allocation72_spill] sm:$0xff] %v19443_v37  ;;  %v1121_v59 = vmul.f32 0.088388346, %v1086_v54  ;;  %v1088_v14 = vadd.f32 %v19270_v33, %v18952_v58  ;;  %v1090_v58 = vadd.f32 %v19274_v12, %v18955_v60  ;;  %v1565_v33 = vadd.f32 %v19291_v22, %v18988_v25 }
 0x250   : > { %25076 = vst [vmem:[#allocation74_spill] sm:$0xff] %v19455_v53  ;;  %v19462_v46 = vrot.slane %v3622_v49, %v18959_v0  ;;  %v19465_v37 = vrot.slane %v16837_v32, %v18959_v0  ;;  %v1567_v8 = vadd.f32 %v19299_v52, %v18996_v35  ;;  %v1569_v13 = vadd.f32 %v19301_v1, %v18988_v25 }
 0x251   : > { %v2855_v27 = vcombine.high %v1121_v59, %v25052_v18  ;;  %v2862_v55 = vrot.slane %v1121_v59, %v18959_v0  ;;  %v1122_v54 = vmul.f32 0.088388346, %v1088_v14  ;;  %v19483_v49 = vadd.f32 %v19313_v42, %v18996_v35 }
 0x252   : > { %25077 = vst [vmem:[#allocation75_spill] sm:$0xff] %v19462_v46  ;;  %25078 = vst [vmem:[#allocation76_spill] sm:$0xff] %v19465_v37  ;;  %v1123_v52 = vmul.f32 0.088388346, %v1090_v58  ;;  %v3788_v20 = vcombine.high %v1565_v33, %v25052_v18  ;;  %v3795_v1 = vrot.slane %v1565_v33, %v18959_v0 }
 0x253   : > { %v19485_v32 = vpop.f32.mrb[48].mxu1  ;;  %v2869_v59 = vrot.slane %v2855_v27, %v18959_v0  ;;  %v2870_v14 = vcombine.low %v2847_v6, %v2862_v55  ;;  %v2871_v51 = vcombine.high %v2847_v6, %v2862_v55  ;;  %v2906_v60 = vcombine.high %v1122_v54, %v25052_v18 }
 0x254   : > { %v19489_v12 = vpop.f32.mrb[49].mxu1  ;;  %v2913_v22 = vrot.slane %v1122_v54, %v18959_v0  ;;  %v2921_v57 = vcombine.high %v1123_v52, %v25052_v18  ;;  %v2928_v54 = vrot.slane %v1123_v52, %v18959_v0  ;;  %v3802_v58 = vrot.slane %v3788_v20, %v18959_v0 }
 0x255   : > { %v19494_v46 = vpop.f32.mrb[50].mxu1  ;;  %v2878_v42 = vrot.slane %v2870_v14, %v18966_v10  ;;  %v2885_v37 = vrot.slane %v2871_v51, %v18966_v10  ;;  %v2886_v27 = vcombine.low %v2854_v3, %v2869_v59  ;;  %v2887_v53 = vcombine.high %v2854_v3, %v2869_v59 }
 0x256   : > { %v19498_v6 = vpop.f32.mrb[51].mxu1  ;;  %v2920_v55 = vrot.slane %v2906_v60, %v18959_v0  ;;  %v2935_v3 = vrot.slane %v2921_v57, %v18959_v0  ;;  %v2936_v59 = vcombine.low %v2913_v22, %v2928_v54  ;;  %v2937_v62 = vcombine.high %v2913_v22, %v2928_v54 }
 0x257   : > { %v19505_v33 = vrot.slane %v2886_v27, %v18966_v10  ;;  %v19508_v50 = vrot.slane %v2887_v53, %v18966_v10  ;;  %v3672_v14 = vcombine.low %v2878_v42, %v2885_v37  ;;  %v16839_v51 = vcombine.high %v2878_v42, %v2885_v37 }
 0x258   : > { %v3803_v60 = vcombine.high %v1567_v8, %v25052_v18  ;;  %v2944_v37 = vrot.slane %v2936_v59, %v18966_v10  ;;  %v2951_v57 = vrot.slane %v2937_v62, %v18966_v10  ;;  %v2952_v42 = vcombine.low %v2920_v55, %v2935_v3 }
 0x259   : > { %25079 = vst [vmem:[#allocation77_spill] sm:$0xff] %v19505_v33  ;;  %25080 = vst [vmem:[#allocation78_spill] sm:$0xff] %v19508_v50  ;;  %v19513_v15 = vrot.slane %v3672_v14, %v18959_v0  ;;  %v19516_v52 = vrot.slane %v16839_v51, %v18959_v0  ;;  %v2953_v22 = vcombine.high %v2920_v55, %v2935_v3 }
 0x25a   : > { %v3810_v54 = vrot.slane %v1567_v8, %v18959_v0  ;;  %v3817_v14 = vrot.slane %v3803_v60, %v18959_v0  ;;  %v3854_v51 = vcombine.high %v1569_v13, %v25052_v18  ;;  %v19533_v53 = vrot.slane %v2952_v42, %v18966_v10 }
 0x25b   : > { %25081 = vst [vmem:[#allocation79_spill] sm:$0xff] %v19513_v15  ;;  %25082 = vst [vmem:[#allocation80_spill] sm:$0xff] %v19516_v52  ;;  %v19524_v27 = vpop.f32.mrb[52].mxu1  ;;  %v3861_v15 = vrot.slane %v1569_v13, %v18959_v0  ;;  %v19536_v59 = vrot.slane %v2953_v22, %v18966_v10  ;;  %v3722_v62 = vcombine.low %v2944_v37, %v2951_v57 }
 0x25c   : > { %v19530_v20 = vpop.f32.mrb[53].mxu1  ;;  %25083 = vst [vmem:[#allocation81_spill] sm:$0xff] %v19533_v53  ;;  %v16841_v55 = vcombine.high %v2944_v37, %v2951_v57  ;;  %v3818_v52 = vcombine.low %v3795_v1, %v3810_v54  ;;  %v3819_v8 = vcombine.high %v3795_v1, %v3810_v54  ;;  %v3834_v50 = vcombine.low %v3802_v58, %v3817_v14 }
 0x25d   : > { %25084 = vst [vmem:[#allocation82_spill] sm:$0xff] %v19536_v59  ;;  %v19538_v3 = vpop.f32.mrb[54].mxu1  ;;  %v3835_v60 = vcombine.high %v3802_v58, %v3817_v14  ;;  %v19543_v13 = vrot.slane %v3722_v62, %v18959_v0  ;;  %v3868_v54 = vrot.slane %v3854_v51, %v18959_v0  ;;  %v3869_v14 = vcombine.high %v19483_v49, %v25052_v18 }
 0x25e   : > { %v19540_v33 = vpop.f32.mrb[55].mxu1  ;;  %v19546_v16 = vrot.slane %v16841_v55, %v18959_v0  ;;  %v3826_v57 = vrot.slane %v3818_v52, %v18966_v10  ;;  %v3833_v1 = vrot.slane %v3819_v8, %v18966_v10  ;;  %v3842_v58 = vrot.slane %v3834_v50, %v18966_v10 }
 0x25f   : > { %25085 = vst [vmem:[#allocation83_spill] sm:$0xff] %v19543_v13  ;;  %v3849_v22 = vrot.slane %v3835_v60, %v18966_v10  ;;  %v3876_v62 = vrot.slane %v19483_v49, %v18959_v0  ;;  %v1575_v55 = vadd.f32 %v19342_v56, %v18988_v25  ;;  %v3883_v8 = vrot.slane %v3869_v14, %v18959_v0 }
 0x260   : > { %25086 = vst [vmem:[#allocation84_spill] sm:$0xff] %v19546_v16  ;;  %v5900_v37 = vcombine.low %v3826_v57, %v3833_v1  ;;  %v16843_v42 = vcombine.high %v3826_v57, %v3833_v1 }
 0x261   : > { %v5916_v52 = vcombine.low %v3842_v58, %v3849_v22  ;;  %v16844_v13 = vcombine.high %v3842_v58, %v3849_v22  ;;  %v3884_v50 = vcombine.low %v3861_v15, %v3876_v62  ;;  %v3885_v16 = vcombine.high %v3861_v15, %v3876_v62 }
 0x262   : > { %v3920_v60 = vcombine.high %v1575_v55, %v25052_v18  ;;  %v19568_v59 = vrot.slane %v5900_v37, %v18959_v0  ;;  %v19571_v49 = vrot.slane %v16843_v42, %v18959_v0  ;;  %v3900_v22 = vcombine.low %v3868_v54, %v3883_v8 }
 0x263   : > { %v19565_v51 = vpop.f32.mrb[56].mxu1  ;;  %v19574_v56 = vrot.slane %v5916_v52, %v18959_v0  ;;  %v19577_v57 = vrot.slane %v16844_v13, %v18959_v0  ;;  %v3892_v15 = vrot.slane %v3884_v50, %v18966_v10  ;;  %v3899_v58 = vrot.slane %v3885_v16, %v18966_v10 }
 0x264   : > { %v19579_v1 = vpop.f32.mrb[57].mxu1  ;;  %v3901_v14 = vcombine.high %v3868_v54, %v3883_v8  ;;  %v3927_v37 = vrot.slane %v1575_v55, %v18959_v0  ;;  %v3934_v52 = vrot.slane %v3920_v60, %v18959_v0  ;;  %v1577_v13 = vadd.f32 %v19346_v63, %v18996_v35 }
 0x265   : > { %v19583_v62 = vpop.f32.mrb[58].mxu1  ;;  %v3908_v50 = vrot.slane %v3900_v22, %v18966_v10  ;;  %v5950_v30 = vcombine.low %v3892_v15, %v3899_v58  ;;  %v16845_v54 = vcombine.high %v3892_v15, %v3899_v58  ;;  %v1579_v55 = vadd.f32 %v19350_v40, %v18988_v25 }
 0x266   : > { %v19591_v53 = vpop.f32.mrb[59].mxu1  ;;  %v3915_v16 = vrot.slane %v3901_v14, %v18966_v10  ;;  %v3935_v8 = vcombine.high %v1577_v13, %v25052_v18  ;;  %v3942_v47 = vrot.slane %v1577_v13, %v18959_v0  ;;  %v1581_v60 = vadd.f32 %v19358_v45, %v18996_v35 }
 0x267   : > { %v19602_v63 = vrot.slane %v5950_v30, %v18959_v0  ;;  %v19605_v42 = vrot.slane %v16845_v54, %v18959_v0  ;;  %v3986_v13 = vcombine.high %v1579_v55, %v25052_v18  ;;  %v3993_v45 = vrot.slane %v1579_v55, %v18959_v0 }
 0x268   : > { %v5966_v22 = vcombine.low %v3908_v50, %v3915_v16  ;;  %v16846_v14 = vcombine.high %v3908_v50, %v3915_v16  ;;  %v3949_v15 = vrot.slane %v3935_v8, %v18959_v0  ;;  %v3950_v58 = vcombine.low %v3927_v37, %v3942_v47 }
 0x269   : > { %v3951_v2 = vcombine.high %v3927_v37, %v3942_v47  ;;  %v4008_v23 = vrot.slane %v1581_v60, %v18959_v0  ;;  %v1585_v30 = vadd.f32 %v19385_v26, %v18988_v25 }
 0x26a   : > { %v19610_v5 = vrot.slane %v5966_v22, %v18959_v0  ;;  %v19613_v40 = vrot.slane %v16846_v14, %v18959_v0  ;;  %v3958_v50 = vrot.slane %v3950_v58, %v18966_v10  ;;  %v3966_v47 = vcombine.low %v3934_v52, %v3949_v15 }
 0x26b   : > { %v19618_v54 = vpop.f32.mrb[60].mxu1  ;;  %v3965_v16 = vrot.slane %v3951_v2, %v18966_v10  ;;  %v3967_v37 = vcombine.high %v3934_v52, %v3949_v15  ;;  %v4000_v22 = vrot.slane %v3986_v13, %v18959_v0  ;;  %v4001_v14 = vcombine.high %v1581_v60, %v25052_v18 }
 0x26c   : > { %v19622_v8 = vpop.f32.mrb[61].mxu1  ;;  %v3974_v19 = vrot.slane %v3966_v47, %v18966_v10  ;;  %v4016_v13 = vcombine.low %v3993_v45, %v4008_v23  ;;  %v4017_v39 = vcombine.high %v3993_v45, %v4008_v23  ;;  %v4052_v43 = vcombine.high %v1585_v30, %v25052_v18 }
 0x26d   : > { %v19629_v55 = vpop.f32.mrb[62].mxu1  ;;  %v3981_v58 = vrot.slane %v3967_v37, %v18966_v10  ;;  %v6000_v2 = vcombine.low %v3958_v50, %v3965_v16  ;;  %v16847_v4 = vcombine.high %v3958_v50, %v3965_v16  ;;  %v4015_v15 = vrot.slane %v4001_v14, %v18959_v0 }
 0x26e   : > { %v19633_v52 = vpop.f32.mrb[63].mxu1  ;;  %v4024_v37 = vrot.slane %v4016_v13, %v18966_v10  ;;  %v4031_v50 = vrot.slane %v4017_v39, %v18966_v10 }
 0x26f   : > { %v19638_v60 = vrot.slane %v6000_v2, %v18959_v0  ;;  %v19641_v26 = vrot.slane %v16847_v4, %v18959_v0  ;;  %v6016_v61 = vcombine.low %v3974_v19, %v3981_v58  ;;  %v16848_v47 = vcombine.high %v3974_v19, %v3981_v58 }
 0x270   : > { %v4032_v16 = vcombine.low %v4000_v22, %v4015_v15  ;;  %v4033_v44 = vcombine.high %v4000_v22, %v4015_v15  ;;  %v4059_v4 = vrot.slane %v1585_v30, %v18959_v0  ;;  %v6050_v58 = vcombine.low %v4024_v37, %v4031_v50 }
 0x271   : > { %25087 = vst [vmem:[#allocation85_spill] sm:$0xff] %v19638_v60  ;;  %25088 = vst [vmem:[#allocation86_spill] sm:$0xff] %v19641_v26  ;;  %v19646_v14 = vrot.slane %v6016_v61, %v18959_v0  ;;  %v19649_v23 = vrot.slane %v16848_v47, %v18959_v0  ;;  %v16849_v13 = vcombine.high %v4024_v37, %v4031_v50 }
 0x272   : > { %v4040_v2 = vrot.slane %v4032_v16, %v18966_v10  ;;  %v4047_v19 = vrot.slane %v4033_v44, %v18966_v10  ;;  %v4066_v22 = vrot.slane %v4052_v43, %v18959_v0  ;;  %v1587_v61 = vadd.f32 %v19395_v38, %v18996_v35 }
 0x273   : > { %25089 = vst [vmem:[#allocation87_spill] sm:$0xff] %v19646_v14  ;;  %25090 = vst [vmem:[#allocation88_spill] sm:$0xff] %v19649_v23  ;;  %v19656_v39 = vpop.f32.mrb[64].mxu1  ;;  %v1589_v15 = vadd.f32 %v19401_v21, %v18988_v25  ;;  %v1591_v47 = vadd.f32 %v19413_v17, %v18996_v35  ;;  %v19668_v16 = vrot.slane %v6050_v58, %v18959_v0 }
 0x274   : > { %v19665_v30 = vpop.f32.mrb[65].mxu1  ;;  %v19671_v44 = vrot.slane %v16849_v13, %v18959_v0  ;;  %v6066_v37 = vcombine.low %v4040_v2, %v4047_v19  ;;  %v16850_v50 = vcombine.high %v4040_v2, %v4047_v19  ;;  %v4067_v38 = vcombine.high %v1587_v61, %v25052_v18 }
 0x275   : > { %25091 = vst [vmem:[#allocation89_spill] sm:$0xff] %v19668_v16  ;;  %v19673_v43 = vpop.f32.mrb[66].mxu1  ;;  %v4074_v45 = vrot.slane %v1587_v61, %v18959_v0  ;;  %v4118_v21 = vcombine.high %v1589_v15, %v25052_v18  ;;  %v4125_v17 = vrot.slane %v1589_v15, %v18959_v0  ;;  %v4133_v19 = vcombine.high %v1591_v47, %v25052_v18 }
 0x276   : > { %25092 = vst [vmem:[#allocation90_spill] sm:$0xff] %v19671_v44  ;;  %v19679_v48 = vpop.f32.mrb[67].mxu1  ;;  %v19682_v58 = vrot.slane %v6066_v37, %v18959_v0  ;;  %v19685_v13 = vrot.slane %v16850_v50, %v18959_v0  ;;  %v4081_v36 = vrot.slane %v4067_v38, %v18959_v0  ;;  %v4140_v15 = vrot.slane %v1591_v47, %v18959_v0 }
 0x277   : > { %v4082_v61 = vcombine.low %v4059_v4, %v4074_v45  ;;  %v4083_v34 = vcombine.high %v4059_v4, %v4074_v45  ;;  %v4132_v29 = vrot.slane %v4118_v21, %v18959_v0  ;;  %v4147_v31 = vrot.slane %v4133_v19, %v18959_v0 }
 0x278   : > { %25093 = vst [vmem:[#allocation91_spill] sm:$0xff] %v19682_v58  ;;  %25094 = vst [vmem:[#allocation92_spill] sm:$0xff] %v19685_v13  ;;  %v1595_v37 = vadd.f32 %v19425_v7, %v18988_v25  ;;  %v1597_v50 = vadd.f32 %v19433_v41, %v18996_v35  ;;  %v4098_v9 = vcombine.low %v4066_v22, %v4081_v36 }
 0x279   : > { %v4090_v2 = vrot.slane %v4082_v61, %v18966_v10  ;;  %v4097_v11 = vrot.slane %v4083_v34, %v18966_v10  ;;  %v4099_v38 = vcombine.high %v4066_v22, %v4081_v36  ;;  %v4148_v58 = vcombine.low %v4125_v17, %v4140_v15 }
 0x27a   : > { %v4149_v45 = vcombine.high %v4125_v17, %v4140_v15  ;;  %v4164_v4 = vcombine.low %v4132_v29, %v4147_v31  ;;  %v4165_v21 = vcombine.high %v4132_v29, %v4147_v31  ;;  %v4106_v47 = vrot.slane %v4098_v9, %v18966_v10 }
 0x27b   : > { %v19700_v13 = vpop.f32.mrb[68].mxu1  ;;  %v4113_v19 = vrot.slane %v4099_v38, %v18966_v10  ;;  %v6100_v7 = vcombine.low %v4090_v2, %v4097_v11  ;;  %v16851_v44 = vcombine.high %v4090_v2, %v4097_v11  ;;  %v4156_v41 = vrot.slane %v4148_v58, %v18966_v10 }
 0x27c   : > { %v19704_v16 = vpop.f32.mrb[69].mxu1  ;;  %v4163_v34 = vrot.slane %v4149_v45, %v18966_v10  ;;  %v4172_v36 = vrot.slane %v4164_v4, %v18966_v10  ;;  %v4179_v22 = vrot.slane %v4165_v21, %v18966_v10 }
 0x27d   : > { %v19710_v17 = vpop.f32.mrb[70].mxu1  ;;  %v19713_v29 = vrot.slane %v6100_v7, %v18959_v0  ;;  %v19716_v9 = vrot.slane %v16851_v44, %v18959_v0  ;;  %v6116_v31 = vcombine.low %v4106_v47, %v4113_v19  ;;  %v16852_v11 = vcombine.high %v4106_v47, %v4113_v19 }
 0x27e   : > { %v19718_v2 = vpop.f32.mrb[71].mxu1  ;;  %v6150_v61 = vcombine.low %v4156_v41, %v4163_v34  ;;  %v16853_v58 = vcombine.high %v4156_v41, %v4163_v34  ;;  %v6166_v15 = vcombine.low %v4172_v36, %v4179_v22  ;;  %v16854_v38 = vcombine.high %v4172_v36, %v4179_v22 }
 0x27f   : > { %25095 = vst [vmem:[#allocation93_spill] sm:$0xff] %v19713_v29  ;;  %25096 = vst [vmem:[#allocation94_spill] sm:$0xff] %v19716_v9  ;;  %v19721_v45 = vrot.slane %v6116_v31, %v18959_v0  ;;  %v19724_v4 = vrot.slane %v16852_v11, %v18959_v0  ;;  %v4184_v44 = vcombine.high %v1595_v37, %v25052_v18 }
 0x280   : > { %v19730_v7 = vrot.slane %v6150_v61, %v18959_v0  ;;  %v19733_v47 = vrot.slane %v16853_v58, %v18959_v0  ;;  %v19736_v19 = vrot.slane %v6166_v15, %v18959_v0  ;;  %v19739_v41 = vrot.slane %v16854_v38, %v18959_v0 }
 0x281   : > { %25097 = vst [vmem:[#allocation95_spill] sm:$0xff] %v19721_v45  ;;  %25098 = vst [vmem:[#allocation96_spill] sm:$0xff] %v19724_v4  ;;  %v4191_v34 = vrot.slane %v1595_v37, %v18959_v0  ;;  %v4198_v36 = vrot.slane %v4184_v44, %v18959_v0  ;;  %v4199_v22 = vcombine.high %v1597_v50, %v25052_v18 }
 0x282   : > { %25099 = vst [vmem:[#allocation97_spill] sm:$0xff] %v19730_v7  ;;  %25100 = vst [vmem:[#allocation98_spill] sm:$0xff] %v19733_v47  ;;  %v4206_v31 = vrot.slane %v1597_v50, %v18959_v0  ;;  %v1599_v61 = vadd.f32 %v19437_v28, %v18988_v25  ;;  %v1601_v58 = vadd.f32 %v19449_v24, %v18996_v35 }
 0x283   : > { %25101 = vst [vmem:[#allocation99_spill] sm:$0xff] %v19736_v19  ;;  %25102 = vst [vmem:[#allocation100_spill] sm:$0xff] %v19739_v41  ;;  %v1605_v15 = vadd.f32 %v19485_v32, %v18988_v25  ;;  %v19753_v38 = vpop.f32.mrb[72].mxu1  ;;  %v4213_v37 = vrot.slane %v4199_v22, %v18959_v0  ;;  %v1607_v50 = vadd.f32 %v19489_v12, %v18996_v35 }
 0x284   : > { %v4214_v44 = vcombine.low %v4191_v34, %v4206_v31  ;;  %v4215_v21 = vcombine.high %v4191_v34, %v4206_v31  ;;  %v19758_v19 = vpop.f32.mrb[73].mxu1  ;;  %v4250_v11 = vcombine.high %v1599_v61, %v25052_v18  ;;  %v4257_v28 = vrot.slane %v1599_v61, %v18959_v0 }
 0x285   : > { %v4265_v24 = vcombine.high %v1601_v58, %v25052_v18  ;;  %v4272_v41 = vrot.slane %v1601_v58, %v18959_v0  ;;  %v19764_v32 = vpop.f32.mrb[74].mxu1  ;;  %v4230_v34 = vcombine.low %v4198_v36, %v4213_v37  ;;  %v4231_v31 = vcombine.high %v4198_v36, %v4213_v37 }
 0x286   : > { %v4222_v47 = vrot.slane %v4214_v44, %v18966_v10  ;;  %v4229_v22 = vrot.slane %v4215_v21, %v18966_v10  ;;  %v19768_v7 = vpop.f32.mrb[75].mxu1  ;;  %v4264_v12 = vrot.slane %v4250_v11, %v18959_v0 }
 0x287   : > { %v4279_v45 = vrot.slane %v4265_v24, %v18959_v0  ;;  %v4280_v4 = vcombine.low %v4257_v28, %v4272_v41  ;;  %v4281_v61 = vcombine.high %v4257_v28, %v4272_v41  ;;  %v4238_v9 = vrot.slane %v4230_v34, %v18966_v10 }
 0x288   : > { %v4245_v58 = vrot.slane %v4231_v31, %v18966_v10  ;;  %v6200_v29 = vcombine.low %v4222_v47, %v4229_v22  ;;  %v16855_v14 = vcombine.high %v4222_v47, %v4229_v22 }
 0x289   : > { %v4288_v44 = vrot.slane %v4280_v4, %v18966_v10  ;;  %v4295_v21 = vrot.slane %v4281_v61, %v18966_v10  ;;  %v4296_v23 = vcombine.low %v4264_v12, %v4279_v45  ;;  %v4297_v36 = vcombine.high %v4264_v12, %v4279_v45 }
 0x28a   : > { %v19777_v37 = vrot.slane %v6200_v29, %v18959_v0  ;;  %v19780_v11 = vrot.slane %v16855_v14, %v18959_v0  ;;  %v6216_v24 = vcombine.low %v4238_v9, %v4245_v58  ;;  %v16856_v41 = vcombine.high %v4238_v9, %v4245_v58 }
 0x28b   : > { %v4304_v28 = vrot.slane %v4296_v23, %v18966_v10  ;;  %v4311_v34 = vrot.slane %v4297_v36, %v18966_v10  ;;  %v6250_v31 = vcombine.low %v4288_v44, %v4295_v21  ;;  %v16857_v47 = vcombine.high %v4288_v44, %v4295_v21  ;;  %v19784_v22 = vpop.f32.mrb[76].mxu1 }
 0x28c   : > { %25103 = vst [vmem:[#allocation101_spill] sm:$0xff] %v19777_v37  ;;  %25104 = vst [vmem:[#allocation102_spill] sm:$0xff] %v19780_v11  ;;  %v19787_v4 = vrot.slane %v6216_v24, %v18959_v0  ;;  %v19790_v45 = vrot.slane %v16856_v41, %v18959_v0  ;;  %v4316_v29 = vcombine.high %v1605_v15, %v25052_v18  ;;  %v19795_v9 = vpop.f32.mrb[77].mxu1 }
 0x28d   : > { %v19798_v23 = vrot.slane %v6250_v31, %v18959_v0  ;;  %v19801_v12 = vrot.slane %v16857_v47, %v18959_v0  ;;  %v6266_v61 = vcombine.low %v4304_v28, %v4311_v34  ;;  %v16858_v58 = vcombine.high %v4304_v28, %v4311_v34  ;;  %v19803_v44 = vpop.f32.mrb[78].mxu1 }
 0x28e   : > { %25105 = vst [vmem:[#allocation103_spill] sm:$0xff] %v19787_v4  ;;  %25106 = vst [vmem:[#allocation104_spill] sm:$0xff] %v19790_v45  ;;  %v4323_v21 = vrot.slane %v1605_v15, %v18959_v0  ;;  %v4330_v36 = vrot.slane %v4316_v29, %v18959_v0  ;;  %v4331_v24 = vcombine.high %v1607_v50, %v25052_v18  ;;  %v19809_v14 = vpop.f32.mrb[79].mxu1 }
 0x28f   : > { %25107 = vst [vmem:[#allocation105_spill] sm:$0xff] %v19798_v23  ;;  %25108 = vst [vmem:[#allocation106_spill] sm:$0xff] %v19801_v12  ;;  %v4338_v41 = vrot.slane %v1607_v50, %v18959_v0  ;;  %v19812_v31 = vrot.slane %v6266_v61, %v18959_v0  ;;  %v19815_v47 = vrot.slane %v16858_v58, %v18959_v0 }
 0x290   : > { %v1609_v15 = vadd.f32 %v19494_v46, %v18988_v25  ;;  %v4345_v34 = vrot.slane %v4331_v24, %v18959_v0  ;;  %v1611_v50 = vadd.f32 %v19498_v6, %v18996_v35  ;;  %v1615_v58 = vadd.f32 %v19524_v27, %v18988_v25 }
 0x291   : > { %25109 = vst [vmem:[#allocation107_spill] sm:$0xff] %v19812_v31  ;;  %25110 = vst [vmem:[#allocation108_spill] sm:$0xff] %v19815_v47  ;;  %v4346_v29 = vcombine.low %v4323_v21, %v4338_v41  ;;  %v4347_v4 = vcombine.high %v4323_v21, %v4338_v41  ;;  %v1617_v28 = vadd.f32 %v19530_v20, %v18996_v35 }
 0x292   : > { %v4382_v45 = vcombine.high %v1609_v15, %v25052_v18  ;;  %v4389_v61 = vrot.slane %v1609_v15, %v18959_v0  ;;  %v4362_v24 = vcombine.low %v4330_v36, %v4345_v34  ;;  %v4363_v47 = vcombine.high %v4330_v36, %v4345_v34 }
 0x293   : > { %v4354_v31 = vrot.slane %v4346_v29, %v18966_v10  ;;  %v4361_v46 = vrot.slane %v4347_v4, %v18966_v10  ;;  %v4397_v6 = vcombine.high %v1611_v50, %v25052_v18  ;;  %v4404_v41 = vrot.slane %v1611_v50, %v18959_v0  ;;  %v19836_v12 = vpop.f32.mrb[80].mxu1 }
 0x294   : > { %v4396_v21 = vrot.slane %v4382_v45, %v18959_v0  ;;  %v4448_v15 = vcombine.high %v1615_v58, %v25052_v18  ;;  %v4370_v27 = vrot.slane %v4362_v24, %v18966_v10  ;;  %v4377_v20 = vrot.slane %v4363_v47, %v18966_v10  ;;  %v19840_v11 = vpop.f32.mrb[81].mxu1 }
 0x295   : > { %v6300_v23 = vcombine.low %v4354_v31, %v4361_v46  ;;  %v16859_v29 = vcombine.high %v4354_v31, %v4361_v46  ;;  %v4411_v4 = vrot.slane %v4397_v6, %v18959_v0  ;;  %v4412_v36 = vcombine.low %v4389_v61, %v4404_v41  ;;  %v19844_v37 = vpop.f32.mrb[82].mxu1 }
 0x296   : > { %v4413_v45 = vcombine.high %v4389_v61, %v4404_v41  ;;  %v4455_v34 = vrot.slane %v1615_v58, %v18959_v0  ;;  %v6316_v24 = vcombine.low %v4370_v27, %v4377_v20  ;;  %v16860_v47 = vcombine.high %v4370_v27, %v4377_v20  ;;  %v19852_v60 = vpop.f32.mrb[83].mxu1 }
 0x297   : > { %v19847_v50 = vrot.slane %v6300_v23, %v18959_v0  ;;  %v19850_v26 = vrot.slane %v16859_v29, %v18959_v0  ;;  %25113 = vst [vmem:[#allocation111_spill] sm:$0xff] %v19852_v60  ;;  %v4420_v31 = vrot.slane %v4412_v36, %v18966_v10  ;;  %v4428_v6 = vcombine.low %v4396_v21, %v4411_v4 }
 0x298   : > { %v4427_v46 = vrot.slane %v4413_v45, %v18966_v10  ;;  %v4429_v61 = vcombine.high %v4396_v21, %v4411_v4  ;;  %v19857_v58 = vrot.slane %v6316_v24, %v18959_v0  ;;  %v19860_v41 = vrot.slane %v16860_v47, %v18959_v0 }
 0x299   : > { %25111 = vst [vmem:[#allocation109_spill] sm:$0xff] %v19847_v50  ;;  %25112 = vst [vmem:[#allocation110_spill] sm:$0xff] %v19850_v26  ;;  %v4462_v29 = vrot.slane %v4448_v15, %v18959_v0  ;;  %v4436_v27 = vrot.slane %v4428_v6, %v18966_v10  ;;  %v4463_v45 = vcombine.high %v1617_v28, %v25052_v18 }
 0x29a   : > { %25114 = vst [vmem:[#allocation112_spill] sm:$0xff] %v19857_v58  ;;  %25115 = vst [vmem:[#allocation113_spill] sm:$0xff] %v19860_v41  ;;  %v4443_v20 = vrot.slane %v4429_v61, %v18966_v10  ;;  %v6350_v36 = vcombine.low %v4420_v31, %v4427_v46  ;;  %v16861_v60 = vcombine.high %v4420_v31, %v4427_v46 }
 0x29b   : > { %v4470_v21 = vrot.slane %v1617_v28, %v18959_v0  ;;  %v1619_v4 = vadd.f32 %v19538_v3, %v18988_v25  ;;  %v1621_v24 = vadd.f32 %v19540_v33, %v18996_v35  ;;  %v19879_v23 = vpop.f32.mrb[84].mxu1  ;;  %v4477_v31 = vrot.slane %v4463_v45, %v18959_v0 }
 0x29c   : > { %v19874_v47 = vrot.slane %v6350_v36, %v18959_v0  ;;  %v19877_v15 = vrot.slane %v16861_v60, %v18959_v0  ;;  %v6366_v6 = vcombine.low %v4436_v27, %v4443_v20  ;;  %v16862_v61 = vcombine.high %v4436_v27, %v4443_v20  ;;  %v19883_v3 = vpop.f32.mrb[85].mxu1 }
 0x29d   : > { %v4478_v46 = vcombine.low %v4455_v34, %v4470_v21  ;;  %v4479_v28 = vcombine.high %v4455_v34, %v4470_v21  ;;  %v4514_v58 = vcombine.high %v1619_v4, %v25052_v18  ;;  %v4521_v27 = vrot.slane %v1619_v4, %v18959_v0  ;;  %v19894_v20 = vpop.f32.mrb[86].mxu1 }
 0x29e   : > { %25116 = vst [vmem:[#allocation114_spill] sm:$0xff] %v19874_v47  ;;  %25117 = vst [vmem:[#allocation115_spill] sm:$0xff] %v19877_v15  ;;  %v19886_v33 = vrot.slane %v6366_v6, %v18959_v0  ;;  %v19889_v36 = vrot.slane %v16862_v61, %v18959_v0  ;;  %v4494_v21 = vcombine.low %v4462_v29, %v4477_v31  ;;  %v19898_v26 = vpop.f32.mrb[87].mxu1 }
 0x29f   : > { %v4486_v45 = vrot.slane %v4478_v46, %v18966_v10  ;;  %v4493_v34 = vrot.slane %v4479_v28, %v18966_v10  ;;  %v4495_v41 = vcombine.high %v4462_v29, %v4477_v31  ;;  %25120 = vst [vmem:[#allocation118_spill] sm:$0xff] %v19898_v26  ;;  %v4528_v6 = vrot.slane %v4514_v58, %v18959_v0 }
 0x2a0   : > { %25118 = vst [vmem:[#allocation116_spill] sm:$0xff] %v19886_v33  ;;  %25119 = vst [vmem:[#allocation117_spill] sm:$0xff] %v19889_v36  ;;  %v4529_v61 = vcombine.high %v1621_v24, %v25052_v18  ;;  %v4536_v33 = vrot.slane %v1621_v24, %v18959_v0  ;;  %v1625_v60 = vadd.f32 %v19565_v51, %v18988_v25 }
 0x2a1   : > { %v4502_v4 = vrot.slane %v4494_v21, %v18966_v10  ;;  %v4509_v36 = vrot.slane %v4495_v41, %v18966_v10  ;;  %v6400_v46 = vcombine.low %v4486_v45, %v4493_v34  ;;  %v16863_v15 = vcombine.high %v4486_v45, %v4493_v34 }
 0x2a2   : > { %v4543_v28 = vrot.slane %v4529_v61, %v18959_v0  ;;  %v4544_v29 = vcombine.low %v4521_v27, %v4536_v33  ;;  %v4545_v31 = vcombine.high %v4521_v27, %v4536_v33  ;;  %v4580_v47 = vcombine.high %v1625_v60, %v25052_v18 }
 0x2a3   : > { %v19910_v58 = vrot.slane %v6400_v46, %v18959_v0  ;;  %v19913_v24 = vrot.slane %v16863_v15, %v18959_v0  ;;  %v6416_v50 = vcombine.low %v4502_v4, %v4509_v36  ;;  %v16864_v51 = vcombine.high %v4502_v4, %v4509_v36  ;;  %v19917_v34 = vpop.f32.mrb[88].mxu1 }
 0x2a4   : > { %v4552_v21 = vrot.slane %v4544_v29, %v18966_v10  ;;  %v4559_v41 = vrot.slane %v4545_v31, %v18966_v10  ;;  %v4560_v26 = vcombine.low %v4528_v6, %v4543_v28  ;;  %v4561_v45 = vcombine.high %v4528_v6, %v4543_v28  ;;  %v19928_v36 = vpop.f32.mrb[89].mxu1 }
 0x2a5   : > { %25121 = vst [vmem:[#allocation119_spill] sm:$0xff] %v19910_v58  ;;  %25122 = vst [vmem:[#allocation120_spill] sm:$0xff] %v19913_v24  ;;  %v19920_v33 = vrot.slane %v6416_v50, %v18959_v0  ;;  %v19923_v27 = vrot.slane %v16864_v51, %v18959_v0  ;;  %v4587_v61 = vrot.slane %v1625_v60, %v18959_v0  ;;  %v19932_v29 = vpop.f32.mrb[90].mxu1 }
 0x2a6   : > { %v4568_v4 = vrot.slane %v4560_v26, %v18966_v10  ;;  %v4575_v46 = vrot.slane %v4561_v45, %v18966_v10  ;;  %v6450_v6 = vcombine.low %v4552_v21, %v4559_v41  ;;  %v16865_v28 = vcombine.high %v4552_v21, %v4559_v41  ;;  %25125 = vst [vmem:[#allocation123_spill] sm:$0xff] %v19932_v29 }
 0x2a7   : > { %25123 = vst [vmem:[#allocation121_spill] sm:$0xff] %v19920_v33  ;;  %25124 = vst [vmem:[#allocation122_spill] sm:$0xff] %v19923_v27  ;;  %v4594_v50 = vrot.slane %v4580_v47, %v18959_v0  ;;  %v1627_v31 = vadd.f32 %v19579_v1, %v18996_v35  ;;  %v1629_v51 = vadd.f32 %v19583_v62, %v18988_v25 }
 0x2a8   : > { %v1631_v60 = vadd.f32 %v19591_v53, %v18996_v35  ;;  %v19942_v15 = vrot.slane %v6450_v6, %v18959_v0  ;;  %v19945_v26 = vrot.slane %v16865_v28, %v18959_v0  ;;  %v6466_v21 = vcombine.low %v4568_v4, %v4575_v46 }
 0x2a9   : > { %v16866_v41 = vcombine.high %v4568_v4, %v4575_v46  ;;  %v4595_v45 = vcombine.high %v1627_v31, %v25052_v18  ;;  %v4602_v47 = vrot.slane %v1627_v31, %v18959_v0  ;;  %v4646_v1 = vcombine.high %v1629_v51, %v25052_v18  ;;  %v19960_v4 = vpop.f32.mrb[91].mxu1 }
 0x2aa   : > { %25126 = vst [vmem:[#allocation124_spill] sm:$0xff] %v19942_v15  ;;  %25127 = vst [vmem:[#allocation125_spill] sm:$0xff] %v19945_v26  ;;  %v4653_v33 = vrot.slane %v1629_v51, %v18959_v0  ;;  %v19952_v62 = vrot.slane %v6466_v21, %v18959_v0  ;;  %v4661_v28 = vcombine.high %v1631_v60, %v25052_v18 }
 0x2ab   : > { %v19955_v53 = vrot.slane %v16866_v41, %v18959_v0  ;;  %25130 = vst [vmem:[#allocation128_spill] sm:$0xff] %v19960_v4  ;;  %v4609_v46 = vrot.slane %v4595_v45, %v18959_v0  ;;  %v4610_v31 = vcombine.low %v4587_v61, %v4602_v47  ;;  %v4611_v27 = vcombine.high %v4587_v61, %v4602_v47  ;;  %v19978_v29 = vpop.f32.mrb[92].mxu1 }
 0x2ac   : > { %25128 = vst [vmem:[#allocation126_spill] sm:$0xff] %v19952_v62  ;;  %v4660_v24 = vrot.slane %v4646_v1, %v18959_v0  ;;  %v4668_v51 = vrot.slane %v1631_v60, %v18959_v0  ;;  %v4675_v21 = vrot.slane %v4661_v28, %v18959_v0  ;;  %v1635_v41 = vadd.f32 %v19618_v54, %v18988_v25 }
 0x2ad   : > { %25129 = vst [vmem:[#allocation127_spill] sm:$0xff] %v19955_v53  ;;  %v1637_v6 = vadd.f32 %v19622_v8, %v18996_v35  ;;  %v4618_v62 = vrot.slane %v4610_v31, %v18966_v10  ;;  %v4625_v53 = vrot.slane %v4611_v27, %v18966_v10  ;;  %v4626_v26 = vcombine.low %v4594_v50, %v4609_v46 }
 0x2ae   : > { %v4627_v45 = vcombine.high %v4594_v50, %v4609_v46  ;;  %v4676_v15 = vcombine.low %v4653_v33, %v4668_v51  ;;  %v4677_v61 = vcombine.high %v4653_v33, %v4668_v51  ;;  %v4692_v47 = vcombine.low %v4660_v24, %v4675_v21  ;;  %v19986_v46 = vpop.f32.mrb[93].mxu1 }
 0x2af   : > { %v4693_v1 = vcombine.high %v4660_v24, %v4675_v21  ;;  %v4634_v60 = vrot.slane %v4626_v26, %v18966_v10  ;;  %v6500_v58 = vcombine.low %v4618_v62, %v4625_v53  ;;  %v16867_v4 = vcombine.high %v4618_v62, %v4625_v53  ;;  %25133 = vst [vmem:[#allocation131_spill] sm:$0xff] %v19986_v46 }
 0x2b0   : > { %v4641_v28 = vrot.slane %v4627_v45, %v18966_v10  ;;  %v4684_v54 = vrot.slane %v4676_v15, %v18966_v10  ;;  %v4691_v8 = vrot.slane %v4677_v61, %v18966_v10  ;;  %v4700_v31 = vrot.slane %v4692_v47, %v18966_v10 }
 0x2b1   : > { %v4707_v27 = vrot.slane %v4693_v1, %v18966_v10  ;;  %v19981_v33 = vrot.slane %v6500_v58, %v18959_v0  ;;  %v19984_v24 = vrot.slane %v16867_v4, %v18959_v0  ;;  %v4712_v4 = vcombine.high %v1635_v41, %v25052_v18  ;;  %v20028_v58 = vpop.f32.mrb[94].mxu1 }
 0x2b2   : > { %v6516_v50 = vcombine.low %v4634_v60, %v4641_v28  ;;  %v16868_v26 = vcombine.high %v4634_v60, %v4641_v28  ;;  %v6550_v62 = vcombine.low %v4684_v54, %v4691_v8  ;;  %v16869_v15 = vcombine.high %v4684_v54, %v4691_v8  ;;  %25140 = vst [vmem:[#allocation138_spill] sm:$0xff] %v20028_v58 }
 0x2b3   : > { %25131 = vst [vmem:[#allocation129_spill] sm:$0xff] %v19981_v33  ;;  %25132 = vst [vmem:[#allocation130_spill] sm:$0xff] %v19984_v24  ;;  %v6566_v53 = vcombine.low %v4700_v31, %v4707_v27  ;;  %v16870_v51 = vcombine.high %v4700_v31, %v4707_v27  ;;  %v4719_v28 = vrot.slane %v1635_v41, %v18959_v0 }
 0x2b4   : > { %v19989_v21 = vrot.slane %v6516_v50, %v18959_v0  ;;  %v19992_v45 = vrot.slane %v16868_v26, %v18959_v0  ;;  %v19998_v61 = vrot.slane %v6550_v62, %v18959_v0  ;;  %v20001_v47 = vrot.slane %v16869_v15, %v18959_v0 }
 0x2b5   : > { %v20004_v1 = vrot.slane %v6566_v53, %v18959_v0  ;;  %v20007_v60 = vrot.slane %v16870_v51, %v18959_v0  ;;  %v4726_v54 = vrot.slane %v4712_v4, %v18959_v0  ;;  %v4727_v8 = vcombine.high %v1637_v6, %v25052_v18 }
 0x2b6   : > { %25134 = vst [vmem:[#allocation132_spill] sm:$0xff] %v19989_v21  ;;  %25135 = vst [vmem:[#allocation133_spill] sm:$0xff] %v19992_v45  ;;  %v4734_v31 = vrot.slane %v1637_v6, %v18959_v0  ;;  %v1639_v50 = vadd.f32 %v19629_v55, %v18988_v25  ;;  %v1641_v26 = vadd.f32 %v19633_v52, %v18996_v35  ;;  %v20036_v21 = vpop.f32.mrb[95].mxu1 }
 0x2b7   : > { %25136 = vst [vmem:[#allocation134_spill] sm:$0xff] %v19998_v61  ;;  %25137 = vst [vmem:[#allocation135_spill] sm:$0xff] %v20001_v47  ;;  %v1645_v62 = vadd.f32 %v19656_v39, %v18988_v25  ;;  %v4741_v41 = vrot.slane %v4727_v8, %v18959_v0  ;;  %v1647_v51 = vadd.f32 %v19665_v30, %v18996_v35 }
 0x2b8   : > { %25138 = vst [vmem:[#allocation136_spill] sm:$0xff] %v20004_v1  ;;  %25139 = vst [vmem:[#allocation137_spill] sm:$0xff] %v20007_v60  ;;  %v4742_v15 = vcombine.low %v4719_v28, %v4734_v31  ;;  %v4743_v53 = vcombine.high %v4719_v28, %v4734_v31  ;;  %v4778_v6 = vcombine.high %v1639_v50, %v25052_v18 }
 0x2b9   : > { %v4785_v4 = vrot.slane %v1639_v50, %v18959_v0  ;;  %v4793_v27 = vcombine.high %v1641_v26, %v25052_v18  ;;  %v4800_v55 = vrot.slane %v1641_v26, %v18959_v0  ;;  %v4758_v8 = vcombine.low %v4726_v54, %v4741_v41  ;;  %25141 = vst [vmem:[#allocation139_spill] sm:$0xff] %v20036_v21 }
 0x2ba   : > { %v4750_v52 = vrot.slane %v4742_v15, %v18966_v10  ;;  %v4757_v39 = vrot.slane %v4743_v53, %v18966_v10  ;;  %v4759_v1 = vcombine.high %v4726_v54, %v4741_v41  ;;  %v4792_v28 = vrot.slane %v4778_v6, %v18959_v0 }
 0x2bb   : > { %v4807_v30 = vrot.slane %v4793_v27, %v18959_v0  ;;  %v4808_v31 = vcombine.low %v4785_v4, %v4800_v55  ;;  %v4809_v60 = vcombine.high %v4785_v4, %v4800_v55  ;;  %v4766_v50 = vrot.slane %v4758_v8, %v18966_v10 }
 0x2bc   : > { %v4773_v47 = vrot.slane %v4759_v1, %v18966_v10  ;;  %v6600_v61 = vcombine.low %v4750_v52, %v4757_v39  ;;  %v16871_v26 = vcombine.high %v4750_v52, %v4757_v39 }
 0x2bd   : > { %v4816_v15 = vrot.slane %v4808_v31, %v18966_v10  ;;  %v4823_v53 = vrot.slane %v4809_v60, %v18966_v10  ;;  %v4824_v45 = vcombine.low %v4792_v28, %v4807_v30  ;;  %v4825_v54 = vcombine.high %v4792_v28, %v4807_v30 }
 0x2be   : > { %v20041_v41 = vrot.slane %v6600_v61, %v18959_v0  ;;  %v20044_v27 = vrot.slane %v16871_v26, %v18959_v0  ;;  %v6616_v6 = vcombine.low %v4766_v50, %v4773_v47  ;;  %v16872_v4 = vcombine.high %v4766_v50, %v4773_v47 }
 0x2bf   : > { %v4832_v1 = vrot.slane %v4824_v45, %v18966_v10  ;;  %v4839_v55 = vrot.slane %v4825_v54, %v18966_v10  ;;  %v6650_v52 = vcombine.low %v4816_v15, %v4823_v53  ;;  %v16873_v39 = vcombine.high %v4816_v15, %v4823_v53 }
 0x2c0   : > { %25142 = vst [vmem:[#allocation140_spill] sm:$0xff] %v20041_v41  ;;  %25143 = vst [vmem:[#allocation141_spill] sm:$0xff] %v20044_v27  ;;  %v20049_v8 = vrot.slane %v6616_v6, %v18959_v0  ;;  %v20052_v60 = vrot.slane %v16872_v4, %v18959_v0  ;;  %v4844_v28 = vcombine.high %v1645_v62, %v25052_v18 }
 0x2c1   : > { %v20058_v30 = vrot.slane %v6650_v52, %v18959_v0  ;;  %v20061_v45 = vrot.slane %v16873_v39, %v18959_v0  ;;  %v6666_v47 = vcombine.low %v4832_v1, %v4839_v55  ;;  %v16874_v31 = vcombine.high %v4832_v1, %v4839_v55 }
 0x2c2   : > { %25144 = vst [vmem:[#allocation142_spill] sm:$0xff] %v20049_v8  ;;  %25145 = vst [vmem:[#allocation143_spill] sm:$0xff] %v20052_v60  ;;  %v4851_v50 = vrot.slane %v1645_v62, %v18959_v0  ;;  %v4858_v26 = vrot.slane %v4844_v28, %v18959_v0  ;;  %v4859_v15 = vcombine.high %v1647_v51, %v25052_v18 }
 0x2c3   : > { %25146 = vst [vmem:[#allocation144_spill] sm:$0xff] %v20058_v30  ;;  %25147 = vst [vmem:[#allocation145_spill] sm:$0xff] %v20061_v45  ;;  %v4866_v53 = vrot.slane %v1647_v51, %v18959_v0  ;;  %v20068_v54 = vrot.slane %v6666_v47, %v18959_v0  ;;  %v20071_v6 = vrot.slane %v16874_v31, %v18959_v0 }
 0x2c4   : > { %v1649_v1 = vadd.f32 %v19673_v43, %v18988_v25  ;;  %v4873_v62 = vrot.slane %v4859_v15, %v18959_v0  ;;  %v1651_v39 = vadd.f32 %v19679_v48, %v18996_v35  ;;  %v1655_v47 = vadd.f32 %v19700_v13, %v18988_v25 }
 0x2c5   : > { %25148 = vst [vmem:[#allocation146_spill] sm:$0xff] %v20068_v54  ;;  %25149 = vst [vmem:[#allocation147_spill] sm:$0xff] %v20071_v6  ;;  %v4874_v55 = vcombine.low %v4851_v50, %v4866_v53  ;;  %v4875_v52 = vcombine.high %v4851_v50, %v4866_v53  ;;  %v1657_v31 = vadd.f32 %v19704_v16, %v18996_v35 }
 0x2c6   : > { %v4910_v51 = vcombine.high %v1649_v1, %v25052_v18  ;;  %v4917_v28 = vrot.slane %v1649_v1, %v18959_v0  ;;  %v4890_v15 = vcombine.low %v4858_v26, %v4873_v62  ;;  %v4891_v61 = vcombine.high %v4858_v26, %v4873_v62 }
 0x2c7   : > { %v4882_v4 = vrot.slane %v4874_v55, %v18966_v10  ;;  %v4889_v43 = vrot.slane %v4875_v52, %v18966_v10  ;;  %v4925_v48 = vcombine.high %v1651_v39, %v25052_v18  ;;  %v4932_v53 = vrot.slane %v1651_v39, %v18959_v0 }
 0x2c8   : > { %v4924_v50 = vrot.slane %v4910_v51, %v18959_v0  ;;  %v4976_v1 = vcombine.high %v1655_v47, %v25052_v18  ;;  %v20093_v54 = vrot.slane %v4890_v15, %v18966_v10  ;;  %v20096_v13 = vrot.slane %v4891_v61, %v18966_v10 }
 0x2c9   : > { %v6700_v16 = vcombine.low %v4882_v4, %v4889_v43  ;;  %v16875_v55 = vcombine.high %v4882_v4, %v4889_v43  ;;  %v4939_v52 = vrot.slane %v4925_v48, %v18959_v0  ;;  %v4940_v6 = vcombine.low %v4917_v28, %v4932_v53 }
 0x2ca   : > { %v4941_v26 = vcombine.high %v4917_v28, %v4932_v53  ;;  %v4983_v62 = vrot.slane %v1655_v47, %v18959_v0  ;;  %v4990_v47 = vrot.slane %v4976_v1, %v18959_v0  ;;  %v4991_v53 = vcombine.high %v1657_v31, %v25052_v18 }
 0x2cb   : > { %v20101_v51 = vrot.slane %v6700_v16, %v18959_v0  ;;  %v20104_v39 = vrot.slane %v16875_v55, %v18959_v0  ;;  %v4948_v4 = vrot.slane %v4940_v6, %v18966_v10  ;;  %v4956_v48 = vcombine.low %v4924_v50, %v4939_v52 }
 0x2cc   : > { %v4955_v43 = vrot.slane %v4941_v26, %v18966_v10  ;;  %v4957_v28 = vcombine.high %v4924_v50, %v4939_v52  ;;  %v4998_v16 = vrot.slane %v1657_v31, %v18959_v0  ;;  %v1659_v55 = vadd.f32 %v19710_v17, %v18988_v25 }
 0x2cd   : > { %v20118_v15 = vrot.slane %v4956_v48, %v18966_v10  ;;  %v5005_v26 = vrot.slane %v4991_v53, %v18959_v0 }
 0x2ce   : > { %v20121_v61 = vrot.slane %v4957_v28, %v18966_v10  ;;  %v6750_v6 = vcombine.low %v4948_v4, %v4955_v43  ;;  %v16877_v45 = vcombine.high %v4948_v4, %v4955_v43  ;;  %v5006_v50 = vcombine.low %v4983_v62, %v4998_v16 }
 0x2cf   : > { %v5007_v52 = vcombine.high %v4983_v62, %v4998_v16  ;;  %v5042_v1 = vcombine.high %v1659_v55, %v25052_v18  ;;  %v5022_v28 = vcombine.low %v4990_v47, %v5005_v26  ;;  %v5023_v62 = vcombine.high %v4990_v47, %v5005_v26 }
 0x2d0   : > { %v20126_v30 = vrot.slane %v6750_v6, %v18959_v0  ;;  %v20129_v31 = vrot.slane %v16877_v45, %v18959_v0  ;;  %v5014_v4 = vrot.slane %v5006_v50, %v18966_v10  ;;  %v5049_v53 = vrot.slane %v1659_v55, %v18959_v0 }
 0x2d1   : > { %v5021_v43 = vrot.slane %v5007_v52, %v18966_v10  ;;  %v5056_v16 = vrot.slane %v5042_v1, %v18959_v0  ;;  %v1661_v45 = vadd.f32 %v19718_v2, %v18996_v35  ;;  %v1665_v6 = vadd.f32 %v19753_v38, %v18988_v25 }
 0x2d2   : > { %v20144_v17 = vrot.slane %v5022_v28, %v18966_v10  ;;  %v20147_v48 = vrot.slane %v5023_v62, %v18966_v10  ;;  %v1675_v28 = vadd.f32 %v19784_v22, %v18988_v25 }
 0x2d3   : > { %v6800_v50 = vcombine.low %v5014_v4, %v5021_v43  ;;  %v16879_v52 = vcombine.high %v5014_v4, %v5021_v43  ;;  %v5057_v47 = vcombine.high %v1661_v45, %v25052_v18  ;;  %v5064_v55 = vrot.slane %v1661_v45, %v18959_v0 }
 0x2d4   : > { %v5108_v26 = vcombine.high %v1665_v6, %v25052_v18  ;;  %v5115_v1 = vrot.slane %v1665_v6, %v18959_v0  ;;  %v1667_v6 = vadd.f32 %v19758_v19, %v18996_v35 }
 0x2d5   : > { %v20154_v2 = vrot.slane %v6800_v50, %v18959_v0  ;;  %v20157_v38 = vrot.slane %v16879_v52, %v18959_v0  ;;  %v5071_v43 = vrot.slane %v5057_v47, %v18959_v0  ;;  %v5072_v62 = vcombine.low %v5049_v53, %v5064_v55 }
 0x2d6   : > { %v5073_v45 = vcombine.high %v5049_v53, %v5064_v55  ;;  %v5122_v8 = vrot.slane %v5108_v26, %v18959_v0  ;;  %v1669_v50 = vadd.f32 %v19764_v32, %v18988_v25  ;;  %v1671_v52 = vadd.f32 %v19768_v7, %v18996_v35 }
 0x2d7   : > { %v5080_v4 = vrot.slane %v5072_v62, %v18966_v10  ;;  %v5088_v60 = vcombine.low %v5056_v16, %v5071_v43  ;;  %v5089_v53 = vcombine.high %v5056_v16, %v5071_v43  ;;  %v5123_v55 = vcombine.high %v1667_v6, %v25052_v18 }
 0x2d8   : > { %v5087_v47 = vrot.slane %v5073_v45, %v18966_v10  ;;  %v5130_v26 = vrot.slane %v1667_v6, %v18959_v0  ;;  %v5174_v19 = vcombine.high %v1669_v50, %v25052_v18  ;;  %v5181_v32 = vrot.slane %v1669_v50, %v18959_v0 }
 0x2d9   : > { %v20180_v27 = vrot.slane %v5088_v60, %v18966_v10  ;;  %v20183_v7 = vrot.slane %v5089_v53, %v18966_v10  ;;  %v5137_v45 = vrot.slane %v5123_v55, %v18959_v0  ;;  %v5189_v55 = vcombine.high %v1671_v52, %v25052_v18 }
 0x2da   : > { %v6850_v22 = vcombine.low %v5080_v4, %v5087_v47  ;;  %v16881_v62 = vcombine.high %v5080_v4, %v5087_v47  ;;  %v5138_v41 = vcombine.low %v5115_v1, %v5130_v26  ;;  %v5139_v16 = vcombine.high %v5115_v1, %v5130_v26 }
 0x2db   : > { %v5188_v43 = vrot.slane %v5174_v19, %v18959_v0  ;;  %v5154_v53 = vcombine.low %v5122_v8, %v5137_v45  ;;  %v5155_v1 = vcombine.high %v5122_v8, %v5137_v45  ;;  %v5196_v26 = vrot.slane %v1671_v52, %v18959_v0 }
 0x2dc   : > { %v20188_v6 = vrot.slane %v6850_v22, %v18959_v0  ;;  %v20191_v24 = vrot.slane %v16881_v62, %v18959_v0  ;;  %v5146_v4 = vrot.slane %v5138_v41, %v18966_v10  ;;  %v5153_v47 = vrot.slane %v5139_v16, %v18966_v10 }
 0x2dd   : > { %v5240_v19 = vcombine.high %v1675_v28, %v25052_v18  ;;  %v5247_v22 = vrot.slane %v1675_v28, %v18959_v0  ;;  %v20204_v62 = vrot.slane %v5154_v53, %v18966_v10  ;;  %v20207_v60 = vrot.slane %v5155_v1, %v18966_v10 }
 0x2de   : > { %v6900_v50 = vcombine.low %v5146_v4, %v5153_v47  ;;  %v16883_v41 = vcombine.high %v5146_v4, %v5153_v47  ;;  %v5203_v16 = vrot.slane %v5189_v55, %v18959_v0  ;;  %v5204_v33 = vcombine.low %v5181_v32, %v5196_v26 }
 0x2df   : > { %v5205_v8 = vcombine.high %v5181_v32, %v5196_v26  ;;  %v5254_v45 = vrot.slane %v5240_v19, %v18959_v0  ;;  %v1677_v55 = vadd.f32 %v19795_v9, %v18996_v35  ;;  %v25150_v26 = vcombine.low %v20093_v54, %v20096_v13 }
 0x2e0   : > { %v20212_v52 = vrot.slane %v6900_v50, %v18959_v0  ;;  %v20215_v21 = vrot.slane %v16883_v41, %v18959_v0  ;;  %v5212_v4 = vrot.slane %v5204_v33, %v18966_v10  ;;  %v5220_v1 = vcombine.low %v5188_v43, %v5203_v16 }
 0x2e1   : > { %v5219_v47 = vrot.slane %v5205_v8, %v18966_v10  ;;  %v5221_v32 = vcombine.high %v5188_v43, %v5203_v16  ;;  %v1679_v50 = vadd.f32 %v19803_v44, %v18988_v25  ;;  %v6723_v19 = vrot.slane %v25150_v26, %v18959_v0 }
 0x2e2   : > { %v25151_v41 = vcombine.high %v20093_v54, %v20096_v13  ;;  %v20236_v8 = vrot.slane %v5220_v1, %v18966_v10  ;;  %v5255_v44 = vcombine.high %v1677_v55, %v25052_v18  ;;  %v5262_v53 = vrot.slane %v1677_v55, %v18959_v0 }
 0x2e3   : > { %v20239_v43 = vrot.slane %v5221_v32, %v18966_v10  ;;  %v6950_v9 = vcombine.low %v5212_v4, %v5219_v47  ;;  %v16885_v16 = vcombine.high %v5212_v4, %v5219_v47  ;;  %v5306_v28 = vcombine.high %v1679_v50, %v25052_v18 }
 0x2e4   : > { %v6731_v33 = vrot.slane %v25151_v41, %v18959_v0  ;;  %v5313_v26 = vrot.slane %v1679_v50, %v18959_v0  ;;  %v5269_v47 = vrot.slane %v5255_v44, %v18959_v0  ;;  %v5270_v1 = vcombine.low %v5247_v22, %v5262_v53 }
 0x2e5   : > { %v20246_v58 = vrot.slane %v6950_v9, %v18959_v0  ;;  %v20249_v54 = vrot.slane %v16885_v16, %v18959_v0  ;;  %v5271_v32 = vcombine.high %v5247_v22, %v5262_v53  ;;  %v5320_v55 = vrot.slane %v5306_v28, %v18959_v0 }
 0x2e6   : > { %v6732_v50 = vcombine.low %v20101_v51, %v20104_v39  ;;  %v6740_v41 = vcombine.low %v6723_v19, %v6731_v33  ;;  %v25152_v9 = vcombine.low %v20118_v15, %v20121_v61  ;;  %v25153_v13 = vcombine.high %v20118_v15, %v20121_v61 }
 0x2e7   : > { %v5278_v44 = vrot.slane %v5270_v1, %v18966_v10  ;;  %v5285_v22 = vrot.slane %v5271_v32, %v18966_v10  ;;  %v5286_v53 = vcombine.low %v5254_v45, %v5269_v47  ;;  %v5287_v28 = vcombine.high %v5254_v45, %v5269_v47 }
 0x2e8   : > { %v6773_v16 = vrot.slane %v25152_v9, %v18959_v0  ;;  %v6781_v4 = vrot.slane %v25153_v13, %v18959_v0  ;;  %v6739_v46 = vrot.slane %v6732_v50, %v18966_v10  ;;  %v6747_v51 = vrot.slane %v6740_v41, %v18966_v10 }
 0x2e9   : > { %v6782_v39 = vcombine.low %v20126_v30, %v20129_v31  ;;  %v20274_v33 = vrot.slane %v5286_v53, %v18966_v10  ;;  %v20277_v15 = vrot.slane %v5287_v28, %v18966_v10  ;;  %v7000_v61 = vcombine.low %v5278_v44, %v5285_v22 }
 0x2ea   : > { %v6790_v19 = vcombine.low %v6773_v16, %v6781_v4  ;;  %v16887_v13 = vcombine.high %v5278_v44, %v5285_v22  ;;  %v6748_v1 = vcombine.low %v6739_v46, %v6747_v51  ;;  %v6749_v47 = vcombine.high %v6739_v46, %v6747_v51 }
 0x2eb   : > { %v6789_v32 = vrot.slane %v6782_v39, %v18966_v10  ;;  %v20282_v50 = vrot.slane %v7000_v61, %v18959_v0  ;;  %v7016_v31 = vcombine.low %v20274_v33, %v20277_v15  ;;  %v16888_v4 = vcombine.high %v20274_v33, %v20277_v15 }
 0x2ec   : > { %v6797_v45 = vrot.slane %v6790_v19, %v18966_v10  ;;  %v20285_v30 = vrot.slane %v16887_v13, %v18959_v0  ;;  %v1681_v16 = vadd.f32 %v19809_v14, %v18996_v35  ;;  %v25154_v46 = vcombine.low %v19568_v59, %v19571_v49 }
 0x2ed   : > { %v5940_v22 = vcombine.low %v19574_v56, %v19577_v57  ;;  %v25155_v53 = vcombine.low %v19602_v63, %v19605_v42  ;;  %v5990_v51 = vcombine.low %v19610_v5, %v19613_v40  ;;  %v1685_v39 = vadd.f32 %v19836_v12, %v18988_v25 }
 0x2ee   : > { %v6798_v41 = vcombine.low %v6789_v32, %v6797_v45  ;;  %v6799_v9 = vcombine.high %v6789_v32, %v6797_v45  ;;  %v5939_v44 = vrot.slane %v25154_v46, %v18966_v10  ;;  %v5321_v61 = vcombine.high %v1681_v16, %v25052_v18 }
 0x2ef   : > { %v5989_v28 = vrot.slane %v25155_v53, %v18966_v10  ;;  %v5328_v59 = vrot.slane %v1681_v16, %v18959_v0  ;;  %v5947_v49 = vrot.slane %v5940_v22, %v18966_v10  ;;  %v5997_v56 = vrot.slane %v5990_v51, %v18966_v10 }
 0x2f0   : > { %v7508_v14 = vpack.c.bf16 %v6798_v41, %v6748_v1  ;;  %v7524_v19 = vpack.c.bf16 %v6799_v9, %v6749_v47  ;;  %v5372_v57 = vcombine.high %v1685_v39, %v25052_v18  ;;  %v5379_v42 = vrot.slane %v1685_v39, %v18959_v0 }
 0x2f1   : > { %v5335_v5 = vrot.slane %v5321_v61, %v18959_v0  ;;  %v5336_v63 = vcombine.low %v5313_v26, %v5328_v59  ;;  %v5337_v40 = vcombine.high %v5313_v26, %v5328_v59  ;;  %v5948_v12 = vcombine.low %v5939_v44, %v5947_v49 }
 0x2f2   : > { %17173 = vmatprep.subr.bf16.mxu1 %v7508_v14  ;;  %17205 = vmatprep.subr.bf16.mxu0 %v7524_v19  ;;  %v5998_v13 = vcombine.low %v5989_v28, %v5997_v56  ;;  %v5949_v1 = vcombine.high %v5939_v44, %v5947_v49  ;;  %v5999_v32 = vcombine.high %v5989_v28, %v5997_v56 }
 0x2f3   : > { %v5344_v45 = vrot.slane %v5336_v63, %v18966_v10  ;;  %v5351_v47 = vrot.slane %v5337_v40, %v18966_v10  ;;  %v5352_v41 = vcombine.low %v5320_v55, %v5335_v5  ;;  %v5353_v9 = vcombine.high %v5320_v55, %v5335_v5 }
 0x2f4   : > { %v7500_v16 = vpack.c.bf16 %v5998_v13, %v5948_v12  ;;  %v7516_v46 = vpack.c.bf16 %v5999_v32, %v5949_v1  ;;  %v5386_v22 = vrot.slane %v5372_v57, %v18959_v0  ;;  %v1687_v53 = vadd.f32 %v19840_v11, %v18996_v35 }
 0x2f5   : > { %v20320_v51 = vrot.slane %v5352_v41, %v18966_v10  ;;  %v20323_v26 = vrot.slane %v5353_v9, %v18966_v10  ;;  %v7050_v44 = vcombine.low %v5344_v45, %v5351_v47  ;;  %v16889_v28 = vcombine.high %v5344_v45, %v5351_v47 }
 0x2f6   : > { %17174 = vmatpush3.bf16.xpose.msra.mxu1 %v7500_v16  ;;  %17206 = vmatpush3.bf16.xpose.msra.mxu0 %v7516_v46  ;;  %v5387_v39 = vcombine.high %v1687_v53, %v25052_v18  ;;  %v5394_v55 = vrot.slane %v1687_v53, %v18959_v0  ;;  %v1689_v14 = vadd.f32 %v19844_v37, %v18988_v25 }
 0x2f7   : > { %v20330_v19 = vrot.slane %v7050_v44, %v18959_v0  ;;  %v20333_v11 = vrot.slane %v16889_v28, %v18959_v0  ;;  %v7066_v61 = vcombine.low %v20320_v51, %v20323_v26  ;;  %v16890_v59 = vcombine.high %v20320_v51, %v20323_v26  ;;  %v25187_v51 = vld [vmem:[#allocation128_spill] sm:$0xff] }
 0x2f8   : > { %v5401_v49 = vrot.slane %v5387_v39, %v18959_v0  ;;  %v5402_v56 = vcombine.low %v5379_v42, %v5394_v55  ;;  %v5403_v57 = vcombine.high %v5379_v42, %v5394_v55  ;;  %v5438_v5 = vcombine.high %v1689_v14, %v25052_v18  ;;  %v25160_v55 = vld [vmem:[#allocation111_spill] sm:$0xff] }
 0x2f9   : > { %v5445_v37 = vrot.slane %v1689_v14, %v18959_v0  ;;  %v25156_v63 = vcombine.low %v20144_v17, %v20147_v48  ;;  %v25157_v12 = vcombine.high %v20144_v17, %v20147_v48  ;;  %v6832_v1 = vcombine.low %v20154_v2, %v20157_v38 }
 0x2fa   : > { %v5410_v32 = vrot.slane %v5402_v56, %v18966_v10  ;;  %v5417_v42 = vrot.slane %v5403_v57, %v18966_v10  ;;  %v5418_v45 = vcombine.low %v5386_v22, %v5401_v49  ;;  %v5419_v47 = vcombine.high %v5386_v22, %v5401_v49 }
 0x2fb   : > { %v6823_v40 = vrot.slane %v25156_v63, %v18959_v0  ;;  %v6831_v13 = vrot.slane %v25157_v12, %v18959_v0  ;;  %v5452_v41 = vrot.slane %v5438_v5, %v18959_v0  ;;  %v6839_v9 = vrot.slane %v6832_v1, %v18966_v10  ;;  %v25161_v12 = vld [vmem:[#allocation85_spill] sm:$0xff] }
 0x2fc   : > { %v25158_v46 = vcombine.low %v20180_v27, %v20183_v7  ;;  %v20361_v48 = vrot.slane %v5418_v45, %v18966_v10  ;;  %v20364_v2 = vrot.slane %v5419_v47, %v18966_v10  ;;  %v7100_v38 = vcombine.low %v5410_v32, %v5417_v42  ;;  %v25165_v45 = vld [vmem:[#allocation87_spill] sm:$0xff] }
 0x2fd   : > { %v6840_v16 = vcombine.low %v6823_v40, %v6831_v13  ;;  %v16891_v53 = vcombine.high %v5410_v32, %v5417_v42  ;;  %v25159_v44 = vcombine.high %v20180_v27, %v20183_v7  ;;  %v6882_v39 = vcombine.low %v20188_v6, %v20191_v24  ;;  %v25162_v13 = vld [vmem:[#allocation86_spill] sm:$0xff]  ;;  %v25164_v42 = vld [vmem:[#allocation88_spill] sm:$0xff] }
 0x2fe   : > { %v6873_v17 = vrot.slane %v25158_v46, %v18959_v0  ;;  %v1691_v14 = vadd.f32 %v25160_v55, %v18996_v35  ;;  %v20376_v49 = vrot.slane %v7100_v38, %v18959_v0  ;;  %v7116_v57 = vcombine.low %v20361_v48, %v20364_v2  ;;  %v25166_v46 = vld [vmem:[#allocation89_spill] sm:$0xff]  ;;  %v25167_v38 = vld [vmem:[#allocation90_spill] sm:$0xff] }
 0x2ff   : > { %v6847_v22 = vrot.slane %v6840_v16, %v18966_v10  ;;  %v6881_v28 = vrot.slane %v25159_v44, %v18959_v0  ;;  %v20379_v56 = vrot.slane %v16891_v53, %v18959_v0  ;;  %v6889_v7 = vrot.slane %v6882_v39, %v18966_v10 }
 0x300   : > { %v5453_v6 = vcombine.high %v1691_v14, %v25052_v18  ;;  %v5460_v40 = vrot.slane %v1691_v14, %v18959_v0  ;;  %v25163_v1 = vcombine.low %v25161_v12, %v25162_v13  ;;  %v6040_v47 = vcombine.low %v25165_v45, %v25164_v42 }
 0x301   : > { %v6848_v27 = vcombine.low %v6839_v9, %v6847_v22  ;;  %v6890_v63 = vcombine.low %v6873_v17, %v6881_v28  ;;  %v6849_v24 = vcombine.high %v6839_v9, %v6847_v22  ;;  %v25168_v53 = vcombine.low %v25166_v46, %v25167_v38  ;;  %v25169_v9 = vld [vmem:[#allocation92_spill] sm:$0xff]  ;;  %v25170_v22 = vld [vmem:[#allocation91_spill] sm:$0xff] }
 0x302   : > { %v6039_v32 = vrot.slane %v25163_v1, %v18966_v10  ;;  %v6090_v44 = vcombine.low %v25170_v22, %v25169_v9  ;;  %v1695_v28 = vadd.f32 %v19879_v23, %v18988_v25  ;;  %v5467_v39 = vrot.slane %v5453_v6, %v18959_v0 }
 0x303   : > { %v6897_v16 = vrot.slane %v6890_v63, %v18966_v10  ;;  %v6089_v17 = vrot.slane %v25168_v53, %v18966_v10  ;;  %v5468_v55 = vcombine.low %v5445_v37, %v5460_v40  ;;  %v5469_v14 = vcombine.high %v5445_v37, %v5460_v40 }
 0x304   : > { %v6047_v12 = vrot.slane %v6040_v47, %v18966_v10  ;;  %v6097_v63 = vrot.slane %v6090_v44, %v18966_v10  ;;  %v5504_v42 = vcombine.high %v1695_v28, %v25052_v18  ;;  %v5484_v38 = vcombine.low %v5452_v41, %v5467_v39 }
 0x305   : > { %v6898_v13 = vcombine.low %v6889_v7, %v6897_v16  ;;  %v6899_v1 = vcombine.high %v6889_v7, %v6897_v16  ;;  %v5476_v45 = vrot.slane %v5468_v55, %v18966_v10  ;;  %v5483_v46 = vrot.slane %v5469_v14, %v18966_v10 }
 0x306   : > { %v5485_v53 = vcombine.high %v5452_v41, %v5467_v39  ;;  %v6048_v22 = vcombine.low %v6039_v32, %v6047_v12  ;;  %v6098_v6 = vcombine.low %v6089_v17, %v6097_v63  ;;  %v20410_v37 = vrot.slane %v5484_v38, %v18966_v10 }
 0x307   : > { %v7509_v9 = vpack.c.bf16 %v6898_v13, %v6848_v27  ;;  %v7525_v23 = vpack.c.bf16 %v6899_v1, %v6849_v24  ;;  %v7150_v7 = vcombine.low %v5476_v45, %v5483_v46  ;;  %v16893_v47 = vcombine.high %v5476_v45, %v5483_v46  ;;  %v25197_v24 = vld [vmem:[#allocation107_spill] sm:$0xff] }
 0x308   : > { %v20413_v40 = vrot.slane %v5485_v53, %v18966_v10  ;;  %v7501_v16 = vpack.c.bf16 %v6098_v6, %v6048_v22  ;;  %v6049_v44 = vcombine.high %v6039_v32, %v6047_v12  ;;  %v6099_v55 = vcombine.high %v6089_v17, %v6097_v63 }
 0x309   : > { %17175 = vmatprep.subr.bf16.mxu1 %v7509_v9  ;;  %17207 = vmatprep.subr.bf16.mxu0 %v7525_v23  ;;  %v20416_v14 = vrot.slane %v7150_v7, %v18959_v0  ;;  %v20419_v41 = vrot.slane %v16893_v47, %v18959_v0  ;;  %v5511_v13 = vrot.slane %v1695_v28, %v18959_v0 }
 0x30a   : > { %17176 = vmatpush3.bf16.xpose.msra.mxu1 %v7501_v16  ;;  %v7517_v39 = vpack.c.bf16 %v6099_v55, %v6049_v44  ;;  %v5518_v1 = vrot.slane %v5504_v42, %v18959_v0  ;;  %v1697_v32 = vadd.f32 %v19883_v3, %v18996_v35  ;;  %v1699_v17 = vadd.f32 %v19894_v20, %v18988_v25 }
 0x30b   : > { %v25171_v12 = vcombine.low %v20204_v62, %v20207_v60  ;;  %v25172_v45 = vcombine.high %v20204_v62, %v20207_v60  ;;  %v6932_v28 = vcombine.low %v20212_v52, %v20215_v21  ;;  %v25173_v20 = vcombine.low %v20236_v8, %v20239_v43 }
 0x30c   : > { %17208 = vmatpush3.bf16.xpose.msra.mxu0 %v7517_v39  ;;  %v5519_v42 = vcombine.high %v1697_v32, %v25052_v18  ;;  %v5526_v3 = vrot.slane %v1697_v32, %v18959_v0  ;;  %v25174_v53 = vcombine.high %v20236_v8, %v20239_v43  ;;  %v5570_v60 = vcombine.high %v1699_v17, %v25052_v18  ;;  %v25175_v43 = vld [vmem:[#allocation118_spill] sm:$0xff] }
 0x30d   : > { %v6923_v63 = vrot.slane %v25171_v12, %v18959_v0  ;;  %v6931_v46 = vrot.slane %v25172_v45, %v18959_v0  ;;  %v6973_v38 = vrot.slane %v25173_v20, %v18959_v0  ;;  %v5577_v62 = vrot.slane %v1699_v17, %v18959_v0 }
 0x30e   : > { %v6981_v9 = vrot.slane %v25174_v53, %v18959_v0  ;;  %v6939_v21 = vrot.slane %v6932_v28, %v18966_v10  ;;  %v5533_v23 = vrot.slane %v5519_v42, %v18959_v0  ;;  %v5534_v22 = vcombine.low %v5511_v13, %v5526_v3 }
 0x30f   : > { %v6940_v52 = vcombine.low %v6923_v63, %v6931_v46  ;;  %v5535_v6 = vcombine.high %v5511_v13, %v5526_v3  ;;  %v6982_v7 = vcombine.low %v20246_v58, %v20249_v54  ;;  %v5584_v47 = vrot.slane %v5570_v60, %v18959_v0 }
 0x310   : > { %v6990_v8 = vcombine.low %v6973_v38, %v6981_v9  ;;  %v1701_v44 = vadd.f32 %v25175_v43, %v18996_v35  ;;  %v5542_v55 = vrot.slane %v5534_v22, %v18966_v10  ;;  %v5550_v32 = vcombine.low %v5518_v1, %v5533_v23  ;;  %v25196_v9 = vld [vmem:[#allocation108_spill] sm:$0xff] }
 0x311   : > { %v6947_v16 = vrot.slane %v6940_v52, %v18966_v10  ;;  %v5549_v39 = vrot.slane %v5535_v6, %v18966_v10  ;;  %v5551_v17 = vcombine.high %v5518_v1, %v5533_v23  ;;  %v6989_v13 = vrot.slane %v6982_v7, %v18966_v10  ;;  %v25176_v7 = vld [vmem:[#allocation93_spill] sm:$0xff] }
 0x312   : > { %v6997_v63 = vrot.slane %v6990_v8, %v18966_v10  ;;  %v20466_v54 = vrot.slane %v5550_v32, %v18966_v10  ;;  %v5585_v20 = vcombine.high %v1701_v44, %v25052_v18  ;;  %v5592_v1 = vrot.slane %v1701_v44, %v18959_v0  ;;  %v25179_v44 = vld [vmem:[#allocation96_spill] sm:$0xff]  ;;  %v25181_v32 = vld [vmem:[#allocation97_spill] sm:$0xff] }
 0x313   : > { %v6948_v12 = vcombine.low %v6939_v21, %v6947_v16  ;;  %v6949_v58 = vcombine.high %v6939_v21, %v6947_v16  ;;  %v20469_v45 = vrot.slane %v5551_v17, %v18966_v10  ;;  %v7200_v46 = vcombine.low %v5542_v55, %v5549_v39  ;;  %v25177_v16 = vld [vmem:[#allocation94_spill] sm:$0xff] }
 0x314   : > { %v16895_v28 = vcombine.high %v5542_v55, %v5549_v39  ;;  %v6998_v42 = vcombine.low %v6989_v13, %v6997_v63  ;;  %v6999_v3 = vcombine.high %v6989_v13, %v6997_v63  ;;  %v5599_v23 = vrot.slane %v5585_v20, %v18959_v0  ;;  %v25180_v55 = vld [vmem:[#allocation95_spill] sm:$0xff]  ;;  %v25182_v17 = vld [vmem:[#allocation98_spill] sm:$0xff] }
 0x315   : > { %v20474_v38 = vrot.slane %v7200_v46, %v18959_v0  ;;  %v5600_v22 = vcombine.low %v5577_v62, %v5592_v1  ;;  %v5601_v6 = vcombine.high %v5577_v62, %v5592_v1  ;;  %v25178_v8 = vcombine.low %v25176_v7, %v25177_v16 }
 0x316   : > { %v20477_v53 = vrot.slane %v16895_v28, %v18959_v0  ;;  %v7510_v21 = vpack.c.bf16 %v6998_v42, %v6948_v12  ;;  %v7526_v52 = vpack.c.bf16 %v6999_v3, %v6949_v58  ;;  %v6140_v39 = vcombine.low %v25180_v55, %v25179_v44  ;;  %v25184_v42 = vld [vmem:[#allocation100_spill] sm:$0xff]  ;;  %v25185_v3 = vld [vmem:[#allocation99_spill] sm:$0xff] }
 0x317   : > { %v6139_v43 = vrot.slane %v25178_v8, %v18966_v10  ;;  %v25183_v13 = vcombine.low %v25181_v32, %v25182_v17  ;;  %v5608_v12 = vrot.slane %v5600_v22, %v18966_v10  ;;  %v5616_v58 = vcombine.low %v5584_v47, %v5599_v23 }
 0x318   : > { %17177 = vmatprep.subr.bf16.mxu1 %v7510_v21  ;;  %17209 = vmatprep.subr.bf16.mxu0 %v7526_v52  ;;  %v5617_v46 = vcombine.high %v5584_v47, %v5599_v23  ;;  %v5615_v62 = vrot.slane %v5601_v6, %v18966_v10  ;;  %v6147_v28 = vrot.slane %v6140_v39, %v18966_v10  ;;  %v25186_v47 = vld [vmem:[#allocation123_spill] sm:$0xff] }
 0x319   : > { %v6189_v63 = vrot.slane %v25183_v13, %v18966_v10  ;;  %v6190_v20 = vcombine.low %v25185_v3, %v25184_v42  ;;  %v1705_v1 = vadd.f32 %v19917_v34, %v18988_v25  ;;  %v20502_v7 = vrot.slane %v5616_v58, %v18966_v10  ;;  %v20527_v42 = vpop.f32.mrb[0].mxu0 }
 0x31a   : > { %v20505_v21 = vrot.slane %v5617_v46, %v18966_v10  ;;  %v1707_v52 = vadd.f32 %v19928_v36, %v18996_v35  ;;  %v1709_v23 = vadd.f32 %v25186_v47, %v18988_v25  ;;  %v7250_v22 = vcombine.low %v5608_v12, %v5615_v62  ;;  %v20533_v47 = vpop.f32.mrb[1].mxu0 }
 0x31b   : > { %v16897_v6 = vcombine.high %v5608_v12, %v5615_v62  ;;  %v6148_v16 = vcombine.low %v6139_v43, %v6147_v28  ;;  %v6197_v8 = vrot.slane %v6190_v20, %v18966_v10  ;;  %v6149_v55 = vcombine.high %v6139_v43, %v6147_v28 }
 0x31c   : > { %v5636_v39 = vcombine.high %v1705_v1, %v25052_v18  ;;  %v20518_v32 = vrot.slane %v7250_v22, %v18959_v0  ;;  %v5643_v12 = vrot.slane %v1705_v1, %v18959_v0  ;;  %v5651_v46 = vcombine.high %v1707_v52, %v25052_v18 }
 0x31d   : > { %v20521_v36 = vrot.slane %v16897_v6, %v18959_v0  ;;  %v6198_v17 = vcombine.low %v6189_v63, %v6197_v8  ;;  %v6199_v13 = vcombine.high %v6189_v63, %v6197_v8  ;;  %v5658_v62 = vrot.slane %v1707_v52, %v18959_v0  ;;  %v20540_v6 = vpop.f32.mrb[2].mxu0 }
 0x31e   : > { %v5650_v58 = vrot.slane %v5636_v39, %v18959_v0  ;;  %v5702_v3 = vcombine.high %v1709_v23, %v25052_v18  ;;  %v20531_v20 = vrot.slane %v1709_v23, %v18959_v0  ;;  %v5665_v63 = vrot.slane %v5651_v46, %v18959_v0 }
 0x31f   : > { %v7502_v43 = vpack.c.bf16 %v6198_v17, %v6148_v16  ;;  %v7518_v28 = vpack.c.bf16 %v6199_v13, %v6149_v55  ;;  %v5666_v1 = vcombine.low %v5643_v12, %v5658_v62  ;;  %v5667_v22 = vcombine.high %v5643_v12, %v5658_v62  ;;  %v20551_v55 = vpop.f32.mrb[3].mxu0 }
 0x320   : > { %v7023_v52 = vrot.slane %v7016_v31, %v18959_v0  ;;  %v20543_v16 = vrot.slane %v5702_v3, %v18959_v0  ;;  %v7031_v23 = vrot.slane %v16888_v4, %v18959_v0  ;;  %v7032_v8 = vcombine.low %v20282_v50, %v20285_v30  ;;  %v20555_v12 = vpop.f32.mrb[4].mxu0 }
 0x321   : > { %17178 = vmatpush3.bf16.xpose.msra.mxu1 %v7502_v43  ;;  %17210 = vmatpush3.bf16.xpose.msra.mxu0 %v7518_v28  ;;  %v5674_v39 = vrot.slane %v5666_v1, %v18966_v10  ;;  %v5681_v31 = vrot.slane %v5667_v22, %v18966_v10  ;;  %v5682_v17 = vcombine.low %v5650_v58, %v5665_v63  ;;  %v20566_v50 = vpop.f32.mrb[5].mxu0 }
 0x322   : > { %v5683_v13 = vcombine.high %v5650_v58, %v5665_v63  ;;  %v7039_v46 = vrot.slane %v7032_v8, %v18966_v10  ;;  %v7040_v62 = vcombine.low %v7023_v52, %v7031_v23  ;;  %v7073_v33 = vrot.slane %v7066_v61, %v18959_v0  ;;  %v20574_v28 = vpop.f32.mrb[6].mxu0  ;;  %v25192_v23 = vld [vmem:[#allocation103_spill] sm:$0xff] }
 0x323   : > { %v7081_v15 = vrot.slane %v16890_v59, %v18959_v0  ;;  %v20569_v30 = vrot.slane %v5682_v17, %v18966_v10  ;;  %v7300_v58 = vcombine.low %v5674_v39, %v5681_v31  ;;  %v16899_v43 = vcombine.high %v5674_v39, %v5681_v31  ;;  %v20581_v59 = vpop.f32.mrb[7].mxu0 }
 0x324   : > { %v20572_v4 = vrot.slane %v5683_v13, %v18966_v10  ;;  %v7047_v3 = vrot.slane %v7040_v62, %v18966_v10  ;;  %v7082_v61 = vcombine.low %v20330_v19, %v20333_v11  ;;  %v1711_v26 = vadd.f32 %v25187_v51, %v18996_v35  ;;  %v20593_v8 = vpop.f32.mrb[8].mxu0  ;;  %v25191_v51 = vld [vmem:[#allocation104_spill] sm:$0xff] }
 0x325   : > { %v7090_v63 = vcombine.low %v7073_v33, %v7081_v15  ;;  %v20584_v1 = vrot.slane %v7300_v58, %v18959_v0  ;;  %v20587_v22 = vrot.slane %v16899_v43, %v18959_v0  ;;  %v20597_v17 = vpop.f32.mrb[9].mxu0  ;;  %v25188_v33 = vld [vmem:[#allocation101_spill] sm:$0xff]  ;;  %v25189_v15 = vld [vmem:[#allocation102_spill] sm:$0xff]  ;;  %v6240_v52 = vcombine.low %v25192_v23, %v25191_v51 }
 0x326   : > { %v7048_v19 = vcombine.low %v7039_v46, %v7047_v3  ;;  %v7089_v11 = vrot.slane %v7082_v61, %v18966_v10  ;;  %v7049_v31 = vcombine.high %v7039_v46, %v7047_v3  ;;  %v5717_v13 = vcombine.high %v1711_v26, %v25052_v18  ;;  %v20607_v44 = vpop.f32.mrb[10].mxu0  ;;  %v25193_v46 = vld [vmem:[#allocation105_spill] sm:$0xff]  ;;  %v25194_v3 = vld [vmem:[#allocation106_spill] sm:$0xff] }
 0x327   : > { %v7097_v39 = vrot.slane %v7090_v63, %v18966_v10  ;;  %v5724_v62 = vrot.slane %v1711_v26, %v18959_v0  ;;  %v25190_v58 = vcombine.low %v25188_v33, %v25189_v15  ;;  %v25195_v63 = vcombine.low %v25193_v46, %v25194_v3  ;;  %v20615_v27 = vpop.f32.mrb[11].mxu0 }
 0x328   : > { %v6290_v26 = vcombine.low %v25197_v24, %v25196_v9  ;;  %v5731_v33 = vrot.slane %v5717_v13, %v18959_v0  ;;  %v20621_v51 = vpop.f32.mrb[12].mxu0  ;;  %v1715_v3 = vadd.f32 %v19978_v29, %v18988_v25 }
 0x329   : > { %v6239_v43 = vrot.slane %v25190_v58, %v18966_v10  ;;  %v7098_v61 = vcombine.low %v7089_v11, %v7097_v39  ;;  %v7099_v34 = vcombine.high %v7089_v11, %v7097_v39  ;;  %v6289_v60 = vrot.slane %v25195_v63, %v18966_v10  ;;  %v20626_v24 = vpop.f32.mrb[13].mxu0 }
 0x32a   : > { %v5732_v15 = vcombine.low %v20531_v20, %v5724_v62  ;;  %v5733_v23 = vcombine.high %v20531_v20, %v5724_v62  ;;  %v6247_v58 = vrot.slane %v6240_v52, %v18966_v10  ;;  %v6297_v46 = vrot.slane %v6290_v26, %v18966_v10 }
 0x32b   : > { %v7511_v11 = vpack.c.bf16 %v7098_v61, %v7048_v19  ;;  %v7527_v39 = vpack.c.bf16 %v7099_v34, %v7049_v31  ;;  %v5748_v63 = vcombine.low %v20543_v16, %v5731_v33  ;;  %v5749_v20 = vcombine.high %v20543_v16, %v5731_v33 }
 0x32c   : > { %v5740_v9 = vrot.slane %v5732_v15, %v18966_v10  ;;  %v5747_v13 = vrot.slane %v5733_v23, %v18966_v10  ;;  %v6248_v52 = vcombine.low %v6239_v43, %v6247_v58  ;;  %v6298_v19 = vcombine.low %v6289_v60, %v6297_v46 }
 0x32d   : > { %17179 = vmatprep.subr.bf16.mxu1 %v7511_v11  ;;  %17211 = vmatprep.subr.bf16.mxu0 %v7527_v39  ;;  %v6249_v34 = vcombine.high %v6239_v43, %v6247_v58  ;;  %v20633_v31 = vrot.slane %v5748_v63, %v18966_v10  ;;  %v20636_v29 = vrot.slane %v5749_v20, %v18966_v10  ;;  %v20650_v11 = vpop.f32.mrb[14].mxu0  ;;  %v25210_v43 = vld [vmem:[#allocation112_spill] sm:$0xff] }
 0x32e   : > { %v7350_v62 = vcombine.low %v5740_v9, %v5747_v13  ;;  %v16901_v61 = vcombine.high %v5740_v9, %v5747_v13  ;;  %v7503_v26 = vpack.c.bf16 %v6298_v19, %v6248_v52  ;;  %v6299_v15 = vcombine.high %v6289_v60, %v6297_v46  ;;  %v25198_v46 = vld [vmem:[#allocation131_spill] sm:$0xff]  ;;  %v25199_v9 = vld [vmem:[#allocation138_spill] sm:$0xff]  ;;  %v20657_v63 = vpop.f32.mrb[15].mxu0 }
 0x32f   : > { %v5768_v23 = vcombine.high %v1715_v3, %v25052_v18  ;;  %v5775_v5 = vrot.slane %v1715_v3, %v18959_v0  ;;  %v1717_v3 = vadd.f32 %v25198_v46, %v18996_v35  ;;  %v1719_v13 = vadd.f32 %v25199_v9, %v18988_v25 }
 0x330   : > { %v20641_v16 = vrot.slane %v7350_v62, %v18959_v0  ;;  %v20644_v33 = vrot.slane %v16901_v61, %v18959_v0  ;;  %17180 = vmatpush3.bf16.xpose.msra.mxu1 %v7503_v26  ;;  %v7519_v60 = vpack.c.bf16 %v6299_v15, %v6249_v34  ;;  %v7123_v20 = vrot.slane %v7116_v57, %v18959_v0  ;;  %v20673_v61 = vpop.f32.mrb[16].mxu0 }
 0x331   : > { %v5782_v39 = vrot.slane %v5768_v23, %v18959_v0  ;;  %v25200_v52 = vcombine.high %v20361_v48, %v20364_v2  ;;  %v7132_v34 = vcombine.low %v20376_v49, %v20379_v56  ;;  %v25201_v62 = vcombine.low %v20410_v37, %v20413_v40  ;;  %v20679_v2 = vpop.f32.mrb[17].mxu0 }
 0x332   : > { %17212 = vmatpush3.bf16.xpose.msra.mxu0 %v7519_v60  ;;  %v5783_v26 = vcombine.high %v1717_v3, %v25052_v18  ;;  %v5790_v57 = vrot.slane %v1717_v3, %v18959_v0  ;;  %v5834_v15 = vcombine.high %v1719_v13, %v25052_v18  ;;  %v5841_v48 = vrot.slane %v1719_v13, %v18959_v0 }
 0x333   : > { %v7131_v19 = vrot.slane %v25200_v52, %v18959_v0  ;;  %v7173_v25 = vrot.slane %v25201_v62, %v18959_v0  ;;  %25202 = vst [vmem:[#allocation111_spill] sm:$0xff] %v20679_v2  ;;  %v7139_v49 = vrot.slane %v7132_v34, %v18966_v10  ;;  %v25203_v23 = vcombine.high %v20410_v37, %v20413_v40 }
 0x334   : > { %v7182_v60 = vcombine.low %v20416_v14, %v20419_v41  ;;  %v5797_v9 = vrot.slane %v5783_v26, %v18959_v0  ;;  %v5798_v3 = vcombine.low %v5775_v5, %v5790_v57  ;;  %v5799_v52 = vcombine.high %v5775_v5, %v5790_v57 }
 0x335   : > { %v7140_v56 = vcombine.low %v7123_v20, %v7131_v19  ;;  %v7181_v46 = vrot.slane %v25203_v23, %v18959_v0  ;;  %v5848_v62 = vrot.slane %v5834_v15, %v18959_v0  ;;  %v25204_v20 = vld [vmem:[#allocation139_spill] sm:$0xff] }
 0x336   : > { %v7189_v58 = vrot.slane %v7182_v60, %v18966_v10  ;;  %v1721_v19 = vadd.f32 %v25204_v20, %v18996_v35  ;;  %v5806_v37 = vrot.slane %v5798_v3, %v18966_v10  ;;  %v5813_v40 = vrot.slane %v5799_v52, %v18966_v10 }
 0x337   : > { %v7147_v13 = vrot.slane %v7140_v56, %v18966_v10  ;;  %v7190_v34 = vcombine.low %v7173_v25, %v7181_v46  ;;  %v5814_v23 = vcombine.low %v5782_v39, %v5797_v9  ;;  %v5815_v14 = vcombine.high %v5782_v39, %v5797_v9 }
 0x338   : > { %v5849_v57 = vcombine.high %v1721_v19, %v25052_v18  ;;  %v7400_v56 = vcombine.low %v5806_v37, %v5813_v40  ;;  %v16903_v35 = vcombine.high %v5806_v37, %v5813_v40  ;;  %v5856_v3 = vrot.slane %v1721_v19, %v18959_v0  ;;  %v20716_v40 = vpop.f32.mrb[18].mxu0 }
 0x339   : > { %v7148_v41 = vcombine.low %v7139_v49, %v7147_v13  ;;  %v7197_v26 = vrot.slane %v7190_v34, %v18966_v10  ;;  %v7149_v5 = vcombine.high %v7139_v49, %v7147_v13  ;;  %v20699_v15 = vrot.slane %v5814_v23, %v18966_v10  ;;  %25205 = vst [vmem:[#allocation85_spill] sm:$0xff] %v20716_v40  ;;  %v20724_v52 = vpop.f32.mrb[19].mxu0  ;;  %v25227_v13 = vld [vmem:[#allocation121_spill] sm:$0xff] }
 0x33a   : > { %v20702_v25 = vrot.slane %v5815_v14, %v18966_v10  ;;  %v5863_v39 = vrot.slane %v5849_v57, %v18959_v0  ;;  %v20707_v9 = vrot.slane %v7400_v56, %v18959_v0  ;;  %v20710_v49 = vrot.slane %v16903_v35, %v18959_v0  ;;  %v25206_v14 = vld [vmem:[#allocation109_spill] sm:$0xff]  ;;  %25211 = vst [vmem:[#allocation86_spill] sm:$0xff] %v20724_v52  ;;  %v25232_v52 = vld [vmem:[#allocation126_spill] sm:$0xff] }
 0x33b   : > { %v7198_v46 = vcombine.low %v7189_v58, %v7197_v26  ;;  %v7199_v60 = vcombine.high %v7189_v58, %v7197_v26  ;;  %v5864_v37 = vcombine.low %v5841_v48, %v5856_v3  ;;  %v5865_v58 = vcombine.high %v5841_v48, %v5856_v3  ;;  %v25207_v26 = vld [vmem:[#allocation110_spill] sm:$0xff]  ;;  %v25209_v35 = vld [vmem:[#allocation113_spill] sm:$0xff] }
 0x33c   : > { %v5880_v19 = vcombine.low %v5848_v62, %v5863_v39  ;;  %v5881_v23 = vcombine.high %v5848_v62, %v5863_v39  ;;  %v25208_v57 = vcombine.low %v25206_v14, %v25207_v26  ;;  %v6340_v2 = vcombine.low %v25210_v43, %v25209_v35  ;;  %v25215_v14 = vld [vmem:[#allocation117_spill] sm:$0xff]  ;;  %v20741_v26 = vpop.f32.mrb[20].mxu0 }
 0x33d   : > { %v7512_v34 = vpack.c.bf16 %v7198_v46, %v7148_v41  ;;  %v7528_v20 = vpack.c.bf16 %v7199_v60, %v7149_v5  ;;  %v5872_v41 = vrot.slane %v5864_v37, %v18966_v10  ;;  %v5879_v48 = vrot.slane %v5865_v58, %v18966_v10  ;;  %v25212_v5 = vld [vmem:[#allocation114_spill] sm:$0xff]  ;;  %v25213_v46 = vld [vmem:[#allocation115_spill] sm:$0xff]  ;;  %25217 = vst [vmem:[#allocation88_spill] sm:$0xff] %v20741_v26 }
 0x33e   : > { %v6339_v56 = vrot.slane %v25208_v57, %v18966_v10  ;;  %v25214_v62 = vcombine.low %v25212_v5, %v25213_v46  ;;  %v20733_v3 = vrot.slane %v5880_v19, %v18966_v10  ;;  %v20736_v39 = vrot.slane %v5881_v23, %v18966_v10  ;;  %v20751_v5 = vpop.f32.mrb[21].mxu0 }
 0x33f   : > { %17181 = vmatprep.subr.bf16.mxu1 %v7512_v34  ;;  %17213 = vmatprep.subr.bf16.mxu0 %v7528_v20  ;;  %v6347_v43 = vrot.slane %v6340_v2, %v18966_v10  ;;  %v25216_v34 = vld [vmem:[#allocation116_spill] sm:$0xff]  ;;  %v7450_v37 = vcombine.low %v5872_v41, %v5879_v48  ;;  %v16905_v58 = vcombine.high %v5872_v41, %v5879_v48 }
 0x340   : > { %v6389_v60 = vrot.slane %v25214_v62, %v18966_v10  ;;  %v6390_v20 = vcombine.low %v25216_v34, %v25215_v14  ;;  %v25218_v57 = vcombine.low %v20466_v54, %v20469_v45  ;;  %v25219_v19 = vcombine.high %v20466_v54, %v20469_v45  ;;  %25220 = vst [vmem:[#allocation87_spill] sm:$0xff] %v20751_v5 }
 0x341   : > { %v6348_v62 = vcombine.low %v6339_v56, %v6347_v43  ;;  %v20759_v48 = vrot.slane %v7450_v37, %v18959_v0  ;;  %v20762_v14 = vrot.slane %v16905_v58, %v18959_v0  ;;  %v6349_v34 = vcombine.high %v6339_v56, %v6347_v43 }
 0x342   : > { %v7223_v35 = vrot.slane %v25218_v57, %v18959_v0  ;;  %v7231_v23 = vrot.slane %v25219_v19, %v18959_v0  ;;  %v6397_v41 = vrot.slane %v6390_v20, %v18966_v10  ;;  %v7232_v54 = vcombine.low %v20474_v38, %v20477_v53  ;;  %v25223_v38 = vld [vmem:[#allocation119_spill] sm:$0xff]  ;;  %v25224_v53 = vld [vmem:[#allocation120_spill] sm:$0xff] }
 0x343   : > { %v25221_v46 = vcombine.low %v20502_v7, %v20505_v21  ;;  %v25222_v37 = vcombine.high %v20502_v7, %v20505_v21  ;;  %v7282_v56 = vcombine.low %v20518_v32, %v20521_v36  ;;  %v25228_v7 = vld [vmem:[#allocation124_spill] sm:$0xff]  ;;  %v25229_v21 = vld [vmem:[#allocation125_spill] sm:$0xff]  ;;  %v25231_v36 = vld [vmem:[#allocation127_spill] sm:$0xff] }
 0x344   : > { %v6398_v45 = vcombine.low %v6389_v60, %v6397_v41  ;;  %v6399_v57 = vcombine.high %v6389_v60, %v6397_v41  ;;  %v7240_v19 = vcombine.low %v7223_v35, %v7231_v23  ;;  %v7239_v20 = vrot.slane %v7232_v54, %v18966_v10 }
 0x345   : > { %v7273_v2 = vrot.slane %v25221_v46, %v18959_v0  ;;  %v7281_v58 = vrot.slane %v25222_v37, %v18959_v0  ;;  %v25225_v60 = vcombine.low %v25223_v38, %v25224_v53  ;;  %v25226_v46 = vld [vmem:[#allocation122_spill] sm:$0xff]  ;;  %v7289_v5 = vrot.slane %v7282_v56, %v18966_v10  ;;  %v20802_v56 = vpop.f32.mrb[22].mxu0 }
 0x346   : > { %v7504_v35 = vpack.c.bf16 %v6398_v45, %v6348_v62  ;;  %v7520_v23 = vpack.c.bf16 %v6399_v57, %v6349_v34  ;;  %v7247_v41 = vrot.slane %v7240_v19, %v18966_v10  ;;  %v6440_v54 = vcombine.low %v25227_v13, %v25226_v46 }
 0x347   : > { %v6439_v43 = vrot.slane %v25225_v60, %v18966_v10  ;;  %v7290_v26 = vcombine.low %v7273_v2, %v7281_v58  ;;  %v25230_v37 = vcombine.low %v25228_v7, %v25229_v21  ;;  %v6490_v40 = vcombine.low %v25232_v52, %v25231_v36  ;;  %v20810_v60 = vpop.f32.mrb[23].mxu0 }
 0x348   : > { %17182 = vmatpush3.bf16.xpose.msra.mxu1 %v7504_v35  ;;  %17214 = vmatpush3.bf16.xpose.msra.mxu0 %v7520_v23  ;;  %v7248_v62 = vcombine.low %v7239_v20, %v7247_v41  ;;  %v7249_v34 = vcombine.high %v7239_v20, %v7247_v41  ;;  %v6447_v45 = vrot.slane %v6440_v54, %v18966_v10 }
 0x349   : > { %v6489_v32 = vrot.slane %v25230_v37, %v18966_v10  ;;  %v7297_v57 = vrot.slane %v7290_v26, %v18966_v10  ;;  %v6497_v13 = vrot.slane %v6490_v40, %v18966_v10  ;;  %v25233_v2 = vcombine.low %v20569_v30, %v20572_v4 }
 0x34a   : > { %v25234_v58 = vcombine.high %v20569_v30, %v20572_v4  ;;  %v6448_v38 = vcombine.low %v6439_v43, %v6447_v45  ;;  %v6449_v20 = vcombine.high %v6439_v43, %v6447_v45  ;;  %v7332_v53 = vcombine.low %v20584_v1, %v20587_v22  ;;  %v20819_v22 = vpop.f32.mrb[24].mxu0 }
 0x34b   : > { %v7323_v19 = vrot.slane %v25233_v2, %v18959_v0  ;;  %v25235_v40 = vcombine.low %v20633_v31, %v20636_v29  ;;  %v7298_v35 = vcombine.low %v7289_v5, %v7297_v57  ;;  %v7299_v23 = vcombine.high %v7289_v5, %v7297_v57  ;;  %v20821_v5 = vpop.f32.mrb[25].mxu0 }
 0x34c   : > { %v7331_v52 = vrot.slane %v25234_v58, %v18959_v0  ;;  %v6498_v41 = vcombine.low %v6489_v32, %v6497_v13  ;;  %v6499_v46 = vcombine.high %v6489_v32, %v6497_v13  ;;  %v7339_v30 = vrot.slane %v7332_v53, %v18966_v10  ;;  %v25237_v13 = vld [vmem:[#allocation129_spill] sm:$0xff] }
 0x34d   : > { %v7373_v26 = vrot.slane %v25235_v40, %v18959_v0  ;;  %v25236_v43 = vcombine.high %v20633_v31, %v20636_v29  ;;  %v7382_v1 = vcombine.low %v20641_v16, %v20644_v33  ;;  %v7513_v7 = vpack.c.bf16 %v7298_v35, %v7248_v62  ;;  %v25238_v31 = vld [vmem:[#allocation130_spill] sm:$0xff]  ;;  %v25240_v16 = vld [vmem:[#allocation133_spill] sm:$0xff]  ;;  %v25241_v33 = vld [vmem:[#allocation132_spill] sm:$0xff] }
 0x34e   : > { %v7340_v4 = vcombine.low %v7323_v19, %v7331_v52  ;;  %v7529_v21 = vpack.c.bf16 %v7299_v23, %v7249_v34  ;;  %v7505_v37 = vpack.c.bf16 %v6498_v41, %v6448_v38  ;;  %v7521_v36 = vpack.c.bf16 %v6499_v46, %v6449_v20  ;;  %v25242_v34 = vld [vmem:[#allocation134_spill] sm:$0xff]  ;;  %v25243_v19 = vld [vmem:[#allocation135_spill] sm:$0xff]  ;;  %v25245_v38 = vld [vmem:[#allocation137_spill] sm:$0xff] }
 0x34f   : > { %v7381_v54 = vrot.slane %v25236_v43, %v18959_v0  ;;  %v7389_v45 = vrot.slane %v7382_v1, %v18966_v10  ;;  %v25239_v29 = vcombine.low %v25237_v13, %v25238_v31  ;;  %17183 = vmatprep.subr.bf16.mxu1 %v7513_v7  ;;  %v6540_v62 = vcombine.low %v25241_v33, %v25240_v16  ;;  %v25246_v20 = vld [vmem:[#allocation136_spill] sm:$0xff] }
 0x350   : > { %v7347_v32 = vrot.slane %v7340_v4, %v18966_v10  ;;  %17215 = vmatprep.subr.bf16.mxu0 %v7529_v21  ;;  %v25244_v58 = vcombine.low %v25242_v34, %v25243_v19  ;;  %v6590_v53 = vcombine.low %v25246_v20, %v25245_v38  ;;  %17184 = vmatpush3.bf16.xpose.msra.mxu1 %v7505_v37  ;;  %v25251_v34 = vld [vmem:[#allocation140_spill] sm:$0xff]  ;;  %v25252_v19 = vld [vmem:[#allocation141_spill] sm:$0xff]  ;;  %v25254_v38 = vld [vmem:[#allocation143_spill] sm:$0xff] }
 0x351   : > { %v7390_v57 = vcombine.low %v7373_v26, %v7381_v54  ;;  %v6539_v2 = vrot.slane %v25239_v29, %v18966_v10  ;;  %17216 = vmatpush3.bf16.xpose.msra.mxu0 %v7521_v36  ;;  %v6547_v23 = vrot.slane %v6540_v62, %v18966_v10  ;;  %v25247_v46 = vcombine.low %v20699_v15, %v20702_v25  ;;  %v20861_v62 = vpop.f32.mrb[26].mxu0  ;;  %v25255_v20 = vld [vmem:[#allocation142_spill] sm:$0xff] }
 0x352   : > { %v6589_v52 = vrot.slane %v25244_v58, %v18966_v10  ;;  %v7348_v40 = vcombine.low %v7339_v30, %v7347_v32  ;;  %v7349_v35 = vcombine.high %v7339_v30, %v7347_v32  ;;  %v6597_v41 = vrot.slane %v6590_v53, %v18966_v10 }
 0x353   : > { %v7397_v26 = vrot.slane %v7390_v57, %v18966_v10  ;;  %v7423_v4 = vrot.slane %v25247_v46, %v18959_v0  ;;  %v25248_v43 = vcombine.high %v20699_v15, %v20702_v25  ;;  %v7432_v21 = vcombine.low %v20707_v9, %v20710_v49 }
 0x354   : > { %v25249_v30 = vcombine.low %v20733_v3, %v20736_v39  ;;  %v6548_v36 = vcombine.low %v6539_v2, %v6547_v23  ;;  %v6598_v32 = vcombine.low %v6589_v52, %v6597_v41  ;;  %v6549_v57 = vcombine.high %v6539_v2, %v6547_v23  ;;  %v25259_v23 = vld [vmem:[#allocation147_spill] sm:$0xff] }
 0x355   : > { %v7431_v54 = vrot.slane %v25248_v43, %v18959_v0  ;;  %v7398_v1 = vcombine.low %v7389_v45, %v7397_v26  ;;  %v7399_v7 = vcombine.high %v7389_v45, %v7397_v26  ;;  %v6599_v13 = vcombine.high %v6589_v52, %v6597_v41  ;;  %v25260_v41 = vld [vmem:[#allocation146_spill] sm:$0xff] }
 0x356   : > { %v7473_v37 = vrot.slane %v25249_v30, %v18959_v0  ;;  %v7439_v16 = vrot.slane %v7432_v21, %v18966_v10  ;;  %v7506_v25 = vpack.c.bf16 %v6598_v32, %v6548_v36  ;;  %v25250_v9 = vcombine.high %v20733_v3, %v20736_v39  ;;  %v25261_v30 = vld [vmem:[#allocation27_spill] sm:$0xff] }
 0x357   : > { %v7514_v31 = vpack.c.bf16 %v7398_v1, %v7348_v40  ;;  %v7530_v29 = vpack.c.bf16 %v7399_v7, %v7349_v35  ;;  %v7440_v15 = vcombine.low %v7423_v4, %v7431_v54  ;;  %v7522_v33 = vpack.c.bf16 %v6599_v13, %v6549_v57  ;;  %v20870_v40 = vpop.f32.mrb[27].mxu0 }
 0x358   : > { %v7481_v49 = vrot.slane %v25250_v9, %v18959_v0  ;;  %v7482_v45 = vcombine.low %v20759_v48, %v20762_v14  ;;  %v25253_v58 = vcombine.low %v25251_v34, %v25252_v19  ;;  %v6640_v53 = vcombine.low %v25255_v20, %v25254_v38  ;;  %v25256_v48 = vld [vmem:[#allocation144_spill] sm:$0xff]  ;;  %v25257_v14 = vld [vmem:[#allocation145_spill] sm:$0xff]  ;;  %v20880_v1 = vpop.f32.mrb[28].mxu0  ;;  %v25267_v9 = vld [vmem:[#allocation31_spill] sm:$0xff] }
 0x359   : > { %17185 = vmatprep.subr.bf16.mxu1 %v7514_v31  ;;  %17217 = vmatprep.subr.bf16.mxu0 %v7530_v29  ;;  %v7447_v2 = vrot.slane %v7440_v15, %v18966_v10  ;;  %v25258_v26 = vcombine.low %v25256_v48, %v25257_v14  ;;  %v6690_v46 = vcombine.low %v25260_v41, %v25259_v23  ;;  %v20892_v31 = vpop.f32.mrb[29].mxu0  ;;  %v25265_v15 = vld [vmem:[#allocation30_spill] sm:$0xff]  ;;  %v25272_v14 = vld [vmem:[#allocation33_spill] sm:$0xff] }
 0x35a   : > { %v6639_v52 = vrot.slane %v25253_v58, %v18966_v10  ;;  %v7489_v3 = vrot.slane %v7482_v45, %v18966_v10  ;;  %v7490_v39 = vcombine.low %v7473_v37, %v7481_v49  ;;  %17186 = vmatpush3.bf16.xpose.msra.mxu1 %v7506_v25  ;;  %17218 = vmatpush3.bf16.xpose.msra.mxu0 %v7522_v33  ;;  %v25262_v37 = vld [vmem:[#allocation28_spill] sm:$0xff]  ;;  %v25266_v25 = vld [vmem:[#allocation29_spill] sm:$0xff]  ;;  %v25271_v48 = vld [vmem:[#allocation34_spill] sm:$0xff] }
 0x35b   : > { %v6689_v35 = vrot.slane %v25258_v26, %v18966_v10  ;;  %v7448_v4 = vcombine.low %v7439_v16, %v7447_v2  ;;  %v7449_v43 = vcombine.high %v7439_v16, %v7447_v2  ;;  %v6647_v54 = vrot.slane %v6640_v53, %v18966_v10  ;;  %v25268_v49 = vld [vmem:[#allocation32_spill] sm:$0xff] }
 0x35c   : > { %v7497_v7 = vrot.slane %v7490_v39, %v18966_v10  ;;  %v6697_v21 = vrot.slane %v6690_v46, %v18966_v10  ;;  %v25263_v36 = vcombine.low %v25261_v30, %v25262_v37  ;;  %v25264_v57 = vcombine.high %v25261_v30, %v25262_v37 }
 0x35d   : > { %v6648_v29 = vcombine.low %v6639_v52, %v6647_v54  ;;  %v6649_v16 = vcombine.high %v6639_v52, %v6647_v54  ;;  %v3104_v33 = vcombine.low %v25266_v25, %v25265_v15  ;;  %v25269_v45 = vcombine.low %v25267_v9, %v25268_v49 }
 0x35e   : > { %v3095_v32 = vrot.slane %v25263_v36, %v18959_v0  ;;  %v3103_v13 = vrot.slane %v25264_v57, %v18959_v0  ;;  %v7498_v34 = vcombine.low %v7489_v3, %v7497_v7  ;;  %v7499_v19 = vcombine.high %v7489_v3, %v7497_v7  ;;  %v25273_v7 = vld [vmem:[#allocation35_spill] sm:$0xff]  ;;  %v25278_v57 = vld [vmem:[#allocation37_spill] sm:$0xff] }
 0x35f   : > { %v3145_v2 = vrot.slane %v25269_v45, %v18959_v0  ;;  %v6698_v58 = vcombine.low %v6689_v35, %v6697_v21  ;;  %v6699_v38 = vcombine.high %v6689_v35, %v6697_v21  ;;  %v3111_v20 = vrot.slane %v3104_v33, %v18966_v10  ;;  %v25274_v21 = vld [vmem:[#allocation36_spill] sm:$0xff] }
 0x360   : > { %v3112_v53 = vcombine.low %v3095_v32, %v3103_v13  ;;  %v25270_v39 = vcombine.high %v25267_v9, %v25268_v49  ;;  %v3154_v26 = vcombine.low %v25272_v14, %v25271_v48  ;;  %v7515_v23 = vpack.c.bf16 %v7498_v34, %v7448_v4  ;;  %v25285_v48 = vld [vmem:[#allocation43_spill] sm:$0xff]  ;;  %v25286_v14 = vld [vmem:[#allocation44_spill] sm:$0xff] }
 0x361   : > { %v7531_v41 = vpack.c.bf16 %v7499_v19, %v7449_v43  ;;  %v7507_v46 = vpack.c.bf16 %v6698_v58, %v6648_v29  ;;  %v7523_v54 = vpack.c.bf16 %v6699_v38, %v6649_v16  ;;  %v25275_v37 = vcombine.low %v25273_v7, %v25274_v21  ;;  %v25277_v43 = vld [vmem:[#allocation38_spill] sm:$0xff]  ;;  %v25279_v29 = vld [vmem:[#allocation39_spill] sm:$0xff]  ;;  %v25280_v16 = vld [vmem:[#allocation40_spill] sm:$0xff] }
 0x362   : > { %v3153_v52 = vrot.slane %v25270_v39, %v18959_v0  ;;  %v3119_v30 = vrot.slane %v3112_v53, %v18966_v10  ;;  %v3161_v3 = vrot.slane %v3154_v26, %v18966_v10  ;;  %17187 = vmatprep.subr.bf16.mxu1 %v7515_v23  ;;  %v25276_v32 = vcombine.high %v25273_v7, %v25274_v21  ;;  %v25283_v58 = vld [vmem:[#allocation42_spill] sm:$0xff]  ;;  %v25284_v38 = vld [vmem:[#allocation41_spill] sm:$0xff]  ;;  %v25290_v7 = vld [vmem:[#allocation47_spill] sm:$0xff] }
 0x363   : > { %v3195_v36 = vrot.slane %v25275_v37, %v18959_v0  ;;  %17219 = vmatprep.subr.bf16.mxu0 %v7531_v41  ;;  %v3204_v13 = vcombine.low %v25278_v57, %v25277_v43  ;;  %v25281_v15 = vcombine.low %v25279_v29, %v25280_v16  ;;  %17188 = vmatpush3.bf16.xpose.msra.mxu1 %v7507_v46  ;;  %v20943_v37 = vpop.f32.mrb[30].mxu0  ;;  %v25292_v43 = vld [vmem:[#allocation46_spill] sm:$0xff] }
 0x364   : > { %v3162_v35 = vcombine.low %v3145_v2, %v3153_v52  ;;  %v3203_v4 = vrot.slane %v25276_v32, %v18959_v0  ;;  %17220 = vmatpush3.bf16.xpose.msra.mxu0 %v7523_v54  ;;  %v3120_v33 = vcombine.low %v3111_v20, %v3119_v30  ;;  %v3121_v49 = vcombine.high %v3111_v20, %v3119_v30 }
 0x365   : > { %v3245_v25 = vrot.slane %v25281_v15, %v18959_v0  ;;  %v3211_v45 = vrot.slane %v3204_v13, %v18966_v10  ;;  %v25282_v34 = vcombine.high %v25279_v29, %v25280_v16  ;;  %v3254_v53 = vcombine.low %v25284_v38, %v25283_v58  ;;  %v20949_v29 = vpop.f32.mrb[31].mxu0  ;;  %v25296_v58 = vld [vmem:[#allocation49_spill] sm:$0xff] }
 0x366   : > { %v3169_v9 = vrot.slane %v3162_v35, %v18966_v10  ;;  %v3212_v2 = vcombine.low %v3195_v36, %v3203_v4  ;;  %v25287_v26 = vcombine.low %v25285_v48, %v25286_v14  ;;  %v25288_v20 = vcombine.high %v25285_v48, %v25286_v14  ;;  %v25289_v35 = vld [vmem:[#allocation48_spill] sm:$0xff]  ;;  %v25291_v4 = vld [vmem:[#allocation45_spill] sm:$0xff]  ;;  %v25300_v14 = vld [vmem:[#allocation51_spill] sm:$0xff] }
 0x367   : > { %v3253_v19 = vrot.slane %v25282_v34, %v18959_v0  ;;  %v3261_v54 = vrot.slane %v3254_v53, %v18966_v10  ;;  %v3304_v21 = vcombine.low %v25290_v7, %v25289_v35  ;;  %v25293_v57 = vcombine.low %v25291_v4, %v25292_v43  ;;  %v25297_v53 = vld [vmem:[#allocation53_spill] sm:$0xff] }
 0x368   : > { %v3170_v39 = vcombine.low %v3161_v3, %v3169_v9  ;;  %v3171_v52 = vcombine.high %v3161_v3, %v3169_v9  ;;  %v3295_v23 = vrot.slane %v25287_v26, %v18959_v0  ;;  %v3303_v41 = vrot.slane %v25288_v20, %v18959_v0  ;;  %v25301_v26 = vld [vmem:[#allocation52_spill] sm:$0xff] }
 0x369   : > { %v3219_v46 = vrot.slane %v3212_v2, %v18966_v10  ;;  %v3262_v30 = vcombine.low %v3245_v25, %v3253_v19  ;;  %v3345_v13 = vrot.slane %v25293_v57, %v18959_v0  ;;  %v3311_v25 = vrot.slane %v3304_v21, %v18966_v10  ;;  %v20953_v2 = vpop.f32.mrb[32].mxu0  ;;  %v25295_v19 = vld [vmem:[#allocation50_spill] sm:$0xff]  ;;  %v25304_v57 = vld [vmem:[#allocation55_spill] sm:$0xff] }
 0x36a   : > { %v3773_v3 = vpack.c.bf16 %v3170_v39, %v3120_v33  ;;  %v3781_v36 = vpack.c.bf16 %v3171_v52, %v3121_v49  ;;  %v3312_v32 = vcombine.low %v3295_v23, %v3303_v41  ;;  %v25294_v33 = vcombine.high %v25291_v4, %v25292_v43  ;;  %v25298_v39 = vld [vmem:[#allocation54_spill] sm:$0xff]  ;;  %17190 = vmatmul.mubr.bf16.vlgmr.msra.gmra.mrb[96].mxu1 %v25300_v14  ;;  %v25303_v43 = vld [vmem:[#allocation56_spill] sm:$0xff] }
 0x36b   : > { %v3220_v16 = vcombine.low %v3211_v45, %v3219_v46  ;;  %v3269_v15 = vrot.slane %v3262_v30, %v18966_v10  ;;  %v3221_v9 = vcombine.high %v3211_v45, %v3219_v46  ;;  %v3354_v38 = vcombine.low %v25296_v58, %v25295_v19  ;;  %v20966_v45 = vpop.f32.mrb[33].mxu0  ;;  %17222 = vmatmul.mubr.bf16.vlgmr.msra.gmra.mrb[64].mxu0 %v25301_v26  ;;  %v25306_v58 = vld [vmem:[#allocation58_spill] sm:$0xff] }
 0x36c   : > { %v3319_v34 = vrot.slane %v3312_v32, %v18966_v10  ;;  %v3353_v49 = vrot.slane %v25294_v33, %v18959_v0  ;;  %v25299_v52 = vcombine.low %v25297_v53, %v25298_v39  ;;  %v25302_v41 = vcombine.high %v25297_v53, %v25298_v39  ;;  %17191 = vmatprep.mubr.bf16.mxu1 %v3773_v3 }
 0x36d   : > { %v3270_v23 = vcombine.low %v3261_v54, %v3269_v15  ;;  %v3271_v20 = vcombine.high %v3261_v54, %v3269_v15  ;;  %17223 = vmatprep.mubr.bf16.mxu0 %v3781_v36  ;;  %v3361_v35 = vrot.slane %v3354_v38, %v18966_v10  ;;  %v3404_v33 = vcombine.low %v25304_v57, %v25303_v43  ;;  %v25305_v15 = vld [vmem:[#allocation57_spill] sm:$0xff]  ;;  %v25315_v57 = vld [vmem:[#allocation64_spill] sm:$0xff] }
 0x36e   : > { %v3395_v48 = vrot.slane %v25299_v52, %v18959_v0  ;;  %v3403_v46 = vrot.slane %v25302_v41, %v18959_v0  ;;  %v3320_v30 = vcombine.low %v3311_v25, %v3319_v34  ;;  %v3362_v7 = vcombine.low %v3345_v13, %v3353_v49  ;;  %v25312_v49 = vld [vmem:[#allocation62_spill] sm:$0xff] }
 0x36f   : > { %v3774_v21 = vpack.c.bf16 %v3270_v23, %v3220_v16  ;;  %v3782_v32 = vpack.c.bf16 %v3271_v20, %v3221_v9  ;;  %v3321_v4 = vcombine.high %v3311_v25, %v3319_v34  ;;  %v25307_v53 = vcombine.low %v25305_v15, %v25306_v58  ;;  %v25309_v16 = vld [vmem:[#allocation60_spill] sm:$0xff]  ;;  %v25310_v9 = vld [vmem:[#allocation59_spill] sm:$0xff]  ;;  %v25311_v34 = vld [vmem:[#allocation61_spill] sm:$0xff] }
 0x370   : > { %v3369_v19 = vrot.slane %v3362_v7, %v18966_v10  ;;  %v3412_v54 = vcombine.low %v3395_v48, %v3403_v46  ;;  %v25308_v52 = vcombine.high %v25305_v15, %v25306_v58  ;;  %v3411_v13 = vrot.slane %v3404_v33, %v18966_v10  ;;  %v25316_v33 = vld [vmem:[#allocation63_spill] sm:$0xff] }
 0x371   : > { %v3445_v39 = vrot.slane %v25307_v53, %v18959_v0  ;;  %v3454_v25 = vcombine.low %v25310_v9, %v25309_v16  ;;  %v25313_v14 = vcombine.low %v25311_v34, %v25312_v49  ;;  %v25314_v26 = vcombine.high %v25311_v34, %v25312_v49  ;;  %v25317_v53 = vld [vmem:[#allocation65_spill] sm:$0xff] }
 0x372   : > { %v3453_v38 = vrot.slane %v25308_v52, %v18959_v0  ;;  %v3370_v20 = vcombine.low %v3361_v35, %v3369_v19  ;;  %v3371_v41 = vcombine.high %v3361_v35, %v3369_v19  ;;  %v3419_v46 = vrot.slane %v3412_v54, %v18966_v10  ;;  %v25318_v52 = vld [vmem:[#allocation66_spill] sm:$0xff]  ;;  %17192 = vmatmul.mubr.bf16.gmra.mrb[100].mxu1 %v3773_v3  ;;  %v25323_v3 = vld [vmem:[#allocation67_spill] sm:$0xff] }
 0x373   : > { %v3495_v48 = vrot.slane %v25313_v14, %v18959_v0  ;;  %v3503_v23 = vrot.slane %v25314_v26, %v18959_v0  ;;  %v3461_v43 = vrot.slane %v3454_v25, %v18966_v10  ;;  %v3504_v15 = vcombine.low %v25316_v33, %v25315_v57  ;;  %v21005_v14 = vpop.f32.mrb[34].mxu0  ;;  %17224 = vmatmul.mubr.bf16.gmra.mrb[68].mxu0 %v3781_v36 }
 0x374   : > { %v3462_v7 = vcombine.low %v3445_v39, %v3453_v38  ;;  %v25319_v16 = vcombine.low %v25317_v53, %v25318_v52  ;;  %v21007_v34 = vpack.c.bf16 %v3370_v20, %v3320_v30  ;;  %v21009_v49 = vpack.c.bf16 %v3371_v41, %v3321_v4  ;;  %v21012_v54 = vpop.f32.mrb[35].mxu0  ;;  %17193 = vmatprep.mubr.bf16.mxu1 %v3774_v21  ;;  %v25322_v41 = vld [vmem:[#allocation68_spill] sm:$0xff] }
 0x375   : > { %v3512_v58 = vcombine.low %v3495_v48, %v3503_v23  ;;  %v3420_v35 = vcombine.low %v3411_v13, %v3419_v46  ;;  %v3421_v39 = vcombine.high %v3411_v13, %v3419_v46  ;;  %v3511_v38 = vrot.slane %v3504_v15, %v18966_v10  ;;  %17225 = vmatprep.mubr.bf16.mxu0 %v3782_v32  ;;  %v21020_v23 = vpop.f32.mrb[36].mxu0  ;;  %v25324_v46 = vld [vmem:[#allocation69_spill] sm:$0xff] }
 0x376   : > { %v3545_v9 = vrot.slane %v25319_v16, %v18959_v0  ;;  %v3469_v19 = vrot.slane %v3462_v7, %v18966_v10  ;;  %v25320_v30 = vcombine.high %v25317_v53, %v25318_v52  ;;  %25321 = vst [vmem:[#allocation89_spill] sm:$0xff] %v21020_v23  ;;  %v3554_v36 = vcombine.low %v25323_v3, %v25322_v41  ;;  %v25325_v7 = vld [vmem:[#allocation70_spill] sm:$0xff]  ;;  %v21028_v15 = vpop.f32.mrb[37].mxu0  ;;  %v25331_v41 = vld [vmem:[#allocation73_spill] sm:$0xff] }
 0x377   : > { %v3519_v25 = vrot.slane %v3512_v58, %v18966_v10  ;;  %v25326_v57 = vcombine.low %v25324_v46, %v25325_v7  ;;  %25327 = vst [vmem:[#allocation90_spill] sm:$0xff] %v21028_v15  ;;  %v25328_v52 = vcombine.high %v25324_v46, %v25325_v7  ;;  %v25332_v3 = vld [vmem:[#allocation74_spill] sm:$0xff] }
 0x378   : > { %v3470_v48 = vcombine.low %v3461_v43, %v3469_v19  ;;  %v3471_v26 = vcombine.high %v3461_v43, %v3469_v19  ;;  %v3553_v4 = vrot.slane %v25320_v30, %v18959_v0  ;;  %v3561_v19 = vrot.slane %v3554_v36, %v18966_v10  ;;  %v25337_v36 = vld [vmem:[#allocation77_spill] sm:$0xff]  ;;  %v25338_v7 = vld [vmem:[#allocation78_spill] sm:$0xff] }
 0x379   : > { %v3520_v20 = vcombine.low %v3511_v38, %v3519_v25  ;;  %v3521_v13 = vcombine.high %v3511_v38, %v3519_v25  ;;  %v3595_v33 = vrot.slane %v25326_v57, %v18959_v0  ;;  %v3603_v16 = vrot.slane %v25328_v52, %v18959_v0  ;;  %v25329_v38 = vld [vmem:[#allocation72_spill] sm:$0xff]  ;;  %v25330_v25 = vld [vmem:[#allocation71_spill] sm:$0xff] }
 0x37a   : > { %v21030_v43 = vpack.c.bf16 %v3470_v48, %v3420_v35  ;;  %v21032_v58 = vpack.c.bf16 %v3471_v26, %v3421_v39  ;;  %v3562_v53 = vcombine.low %v3545_v9, %v3553_v4  ;;  %v3604_v30 = vcombine.low %v25330_v25, %v25329_v38  ;;  %v25335_v26 = vld [vmem:[#allocation76_spill] sm:$0xff]  ;;  %v25336_v4 = vld [vmem:[#allocation75_spill] sm:$0xff]  ;;  %17194 = vmatmul.mubr.bf16.gmra.mrb[104].mxu1 %v3774_v21 }
 0x37b   : > { %v25333_v57 = vcombine.low %v25331_v41, %v25332_v3  ;;  %v25334_v35 = vcombine.high %v25331_v41, %v25332_v3  ;;  %v3612_v48 = vcombine.low %v3595_v33, %v3603_v16  ;;  %v3654_v46 = vcombine.low %v25336_v4, %v25335_v26  ;;  %v25341_v3 = vld [vmem:[#allocation80_spill] sm:$0xff]  ;;  %17226 = vmatmul.mubr.bf16.gmra.mrb[72].mxu0 %v3782_v32 }
 0x37c   : > { %v3569_v39 = vrot.slane %v3562_v53, %v18966_v10  ;;  %v25339_v52 = vcombine.low %v25337_v36, %v25338_v7  ;;  %v3611_v25 = vrot.slane %v3604_v30, %v18966_v10  ;;  %17195 = vmatprep.mubr.bf16.mxu1 %v21007_v34  ;;  %17227 = vmatprep.mubr.bf16.mxu0 %v21009_v49 }
 0x37d   : > { %v3645_v15 = vrot.slane %v25333_v57, %v18959_v0  ;;  %v3653_v9 = vrot.slane %v25334_v35, %v18959_v0  ;;  %v25340_v57 = vcombine.high %v25337_v36, %v25338_v7  ;;  %v25342_v35 = vld [vmem:[#allocation79_spill] sm:$0xff]  ;;  %v3619_v26 = vrot.slane %v3612_v48, %v18966_v10  ;;  %v25344_v7 = vld [vmem:[#allocation81_spill] sm:$0xff] }
 0x37e   : > { %v3695_v38 = vrot.slane %v25339_v52, %v18959_v0  ;;  %v3704_v53 = vcombine.low %v25342_v35, %v25341_v3  ;;  %v3570_v33 = vcombine.low %v3561_v19, %v3569_v39  ;;  %v3571_v16 = vcombine.high %v3561_v19, %v3569_v39  ;;  %v25349_v35 = vld [vmem:[#allocation83_spill] sm:$0xff] }
 0x37f   : > { %v3662_v23 = vcombine.low %v3645_v15, %v3653_v9  ;;  %v3703_v41 = vrot.slane %v25340_v57, %v18959_v0  ;;  %v3661_v4 = vrot.slane %v3654_v46, %v18966_v10  ;;  %v21067_v9 = vpop.f32.mrb[38].mxu0  ;;  %v3620_v39 = vcombine.low %v3611_v25, %v3619_v26 }
 0x380   : > { %v3711_v15 = vrot.slane %v3704_v53, %v18966_v10  ;;  %v21071_v36 = vpack.c.bf16 %v3570_v33, %v3520_v20  ;;  %v21073_v19 = vpack.c.bf16 %v3571_v16, %v3521_v13  ;;  %v21075_v48 = vpop.f32.mrb[39].mxu0  ;;  %v3621_v32 = vcombine.high %v3611_v25, %v3619_v26  ;;  %v25348_v13 = vld [vmem:[#allocation84_spill] sm:$0xff]  ;;  %v25350_v33 = vld [vmem:[#allocation25_spill] sm:$0xff] }
 0x381   : > { %v3669_v52 = vrot.slane %v3662_v23, %v18966_v10  ;;  %v3712_v30 = vcombine.low %v3695_v38, %v3703_v41  ;;  %25343 = vst [vmem:[#allocation92_spill] sm:$0xff] %v21075_v48  ;;  %v25345_v38 = vld [vmem:[#allocation82_spill] sm:$0xff]  ;;  %v3754_v53 = vcombine.low %v25349_v35, %v25348_v13  ;;  %v1758_v16 = vadd.f32 %v20527_v42, %v25350_v33  ;;  %v21090_v25 = vpop.f32.mrb[40].mxu0 }
 0x382   : > { %v25346_v57 = vcombine.low %v25344_v7, %v25345_v38  ;;  %v25347_v20 = vcombine.high %v25344_v7, %v25345_v38  ;;  %v25352_v13 = vld [vmem:[#allocation26_spill] sm:$0xff]  ;;  %17196 = vmatmul.mubr.bf16.gmra.mrb[108].mxu1 %v21007_v34 }
 0x383   : > { %v3670_v21 = vcombine.low %v3661_v4, %v3669_v52  ;;  %v3671_v46 = vcombine.high %v3661_v4, %v3669_v52  ;;  %v3719_v23 = vrot.slane %v3712_v30, %v18966_v10  ;;  %v3761_v48 = vrot.slane %v3754_v53, %v18966_v10  ;;  %17228 = vmatmul.mubr.bf16.gmra.mrb[76].mxu0 %v21009_v49 }
 0x384   : > { %v3745_v41 = vrot.slane %v25346_v57, %v18959_v0  ;;  %v3753_v3 = vrot.slane %v25347_v20, %v18959_v0  ;;  %v21096_v57 = vpop.f32.mrb[41].mxu0  ;;  %v7532_v38 = vcombine.high %v1758_v16, %v25052_v18  ;;  %v7539_v20 = vrot.slane %v1758_v16, %v18959_v0  ;;  %17197 = vmatprep.mubr.bf16.mxu1 %v21030_v43 }
 0x385   : > { %v21092_v26 = vpack.c.bf16 %v3670_v21, %v3620_v39  ;;  %v21094_v4 = vpack.c.bf16 %v3671_v46, %v3621_v32  ;;  %v3720_v52 = vcombine.low %v3711_v15, %v3719_v23  ;;  %v3721_v30 = vcombine.high %v3711_v15, %v3719_v23  ;;  %25351 = vst [vmem:[#allocation91_spill] sm:$0xff] %v21096_v57  ;;  %v21137_v57 = vpop.f32.mrb[42].mxu0 }
 0x386   : > { %v3762_v7 = vcombine.low %v3745_v41, %v3753_v3  ;;  %v1760_v42 = vadd.f32 %v20533_v47, %v25352_v13  ;;  %v1762_v39 = vadd.f32 %v20540_v6, %v25350_v33  ;;  %v1764_v21 = vadd.f32 %v20551_v55, %v25352_v13  ;;  %17229 = vmatprep.mubr.bf16.mxu0 %v21032_v58 }
 0x387   : > { %v1768_v15 = vadd.f32 %v20555_v12, %v25350_v33  ;;  %v7546_v46 = vrot.slane %v7532_v38, %v18959_v0  ;;  %v21113_v23 = vadd.f32 %v20566_v50, %v25352_v13  ;;  %v21117_v47 = vadd.f32 %v20574_v28, %v25350_v33  ;;  %25353 = vst [vmem:[#allocation118_spill] sm:$0xff] %v21137_v57 }
 0x388   : > { %v3769_v32 = vrot.slane %v3762_v7, %v18966_v10  ;;  %v7547_v6 = vcombine.high %v1760_v42, %v25052_v18  ;;  %v7554_v55 = vrot.slane %v1760_v42, %v18959_v0  ;;  %v7598_v12 = vcombine.high %v1762_v39, %v25052_v18 }
 0x389   : > { %v7605_v3 = vrot.slane %v1762_v39, %v18959_v0  ;;  %v7613_v7 = vcombine.high %v1764_v21, %v25052_v18  ;;  %v7620_v38 = vrot.slane %v1764_v21, %v18959_v0 }
 0x38a   : > { %v3770_v50 = vcombine.low %v3761_v48, %v3769_v32  ;;  %v3771_v41 = vcombine.high %v3761_v48, %v3769_v32  ;;  %v7561_v28 = vrot.slane %v7547_v6, %v18959_v0  ;;  %v7562_v35 = vcombine.low %v7539_v20, %v7554_v55  ;;  %17198 = vmatmul.mubr.bf16.gmra.mrb[112].mxu1 %v21030_v43 }
 0x38b   : > { %v7563_v34 = vcombine.high %v7539_v20, %v7554_v55  ;;  %v7612_v49 = vrot.slane %v7598_v12, %v18959_v0  ;;  %v7627_v20 = vrot.slane %v7613_v7, %v18959_v0  ;;  %v7628_v6 = vcombine.low %v7605_v3, %v7620_v38  ;;  %17230 = vmatmul.mubr.bf16.gmra.mrb[80].mxu0 %v21032_v58 }
 0x38c   : > { %v21129_v53 = vpack.c.bf16 %v3770_v50, %v3720_v52  ;;  %v21131_v16 = vpack.c.bf16 %v3771_v41, %v3721_v30  ;;  %v7570_v42 = vrot.slane %v7562_v35, %v18966_v10  ;;  %v7578_v32 = vcombine.low %v7546_v46, %v7561_v28  ;;  %v21141_v30 = vpop.f32.mrb[43].mxu0  ;;  %17199 = vmatprep.mubr.bf16.mxu1 %v21071_v36 }
 0x38d   : > { %v7577_v48 = vrot.slane %v7563_v34, %v18966_v10  ;;  %v7579_v39 = vcombine.high %v7546_v46, %v7561_v28  ;;  %v7629_v55 = vcombine.high %v7605_v3, %v7620_v38  ;;  %v7664_v52 = vcombine.high %v1768_v15, %v25052_v18  ;;  %v21147_v57 = vpop.f32.mrb[44].mxu0  ;;  %17231 = vmatprep.mubr.bf16.mxu0 %v21073_v19 }
 0x38e   : > { %v7586_v12 = vrot.slane %v7578_v32, %v18966_v10  ;;  %v7636_v35 = vrot.slane %v7628_v6, %v18966_v10  ;;  %v7644_v28 = vcombine.low %v7612_v49, %v7627_v20  ;;  %v7645_v34 = vcombine.high %v7612_v49, %v7627_v20 }
 0x38f   : > { %v7593_v21 = vrot.slane %v7579_v39, %v18966_v10  ;;  %v9644_v50 = vcombine.low %v7570_v42, %v7577_v48  ;;  %v16907_v41 = vcombine.high %v7570_v42, %v7577_v48  ;;  %v7643_v46 = vrot.slane %v7629_v55, %v18966_v10  ;;  %v21157_v42 = vpop.f32.mrb[45].mxu0 }
 0x390   : > { %v7652_v48 = vrot.slane %v7644_v28, %v18966_v10  ;;  %v7659_v43 = vrot.slane %v7645_v34, %v18966_v10  ;;  %v7678_v28 = vrot.slane %v7664_v52, %v18959_v0  ;;  %v7679_v34 = vcombine.high %v21113_v23, %v25052_v18 }
 0x391   : > { %v21152_v3 = vrot.slane %v9644_v50, %v18959_v0  ;;  %v21155_v7 = vrot.slane %v16907_v41, %v18959_v0  ;;  %v9660_v38 = vcombine.low %v7586_v12, %v7593_v21  ;;  %v16908_v49 = vcombine.high %v7586_v12, %v7593_v21 }
 0x392   : > { %v9694_v39 = vcombine.low %v7636_v35, %v7643_v46  ;;  %v16909_v20 = vcombine.high %v7636_v35, %v7643_v46  ;;  %v9710_v55 = vcombine.low %v7652_v48, %v7659_v43  ;;  %v16910_v50 = vcombine.high %v7652_v48, %v7659_v43  ;;  %17200 = vmatmul.mubr.bf16.gmra.mrb[116].mxu1 %v21071_v36 }
 0x393   : > { %v21164_v58 = vrot.slane %v9660_v38, %v18959_v0  ;;  %v21169_v6 = vrot.slane %v16908_v49, %v18959_v0  ;;  %v7671_v41 = vrot.slane %v1768_v15, %v18959_v0  ;;  %v7686_v15 = vrot.slane %v21113_v23, %v18959_v0  ;;  %17232 = vmatmul.mubr.bf16.gmra.mrb[84].mxu0 %v21073_v19 }
 0x394   : > { %v21173_v12 = vrot.slane %v9694_v39, %v18959_v0  ;;  %v21176_v21 = vrot.slane %v16909_v20, %v18959_v0  ;;  %v21182_v35 = vrot.slane %v9710_v55, %v18959_v0  ;;  %v21185_v46 = vrot.slane %v16910_v50, %v18959_v0  ;;  %v21198_v39 = vpop.f32.mrb[46].mxu0  ;;  %17201 = vmatprep.mubr.bf16.mxu1 %v21092_v26 }
 0x395   : > { %v7730_v38 = vcombine.high %v21117_v47, %v25052_v18  ;;  %v7693_v52 = vrot.slane %v7679_v34, %v18959_v0  ;;  %v7737_v48 = vrot.slane %v21117_v47, %v18959_v0  ;;  %v1774_v43 = vadd.f32 %v20581_v59, %v25352_v13  ;;  %17233 = vmatprep.mubr.bf16.mxu0 %v21094_v4 }
 0x396   : > { %25354 = vst [vmem:[#allocation93_spill] sm:$0xff] %v21173_v12  ;;  %25355 = vst [vmem:[#allocation94_spill] sm:$0xff] %v21176_v21  ;;  %v7694_v20 = vcombine.low %v7671_v41, %v7686_v15  ;;  %v7695_v55 = vcombine.high %v7671_v41, %v7686_v15  ;;  %v1778_v50 = vadd.f32 %v20593_v8, %v25350_v33 }
 0x397   : > { %25356 = vst [vmem:[#allocation96_spill] sm:$0xff] %v21182_v35  ;;  %25357 = vst [vmem:[#allocation95_spill] sm:$0xff] %v21185_v46  ;;  %v7744_v23 = vrot.slane %v7730_v38, %v18959_v0  ;;  %v7710_v34 = vcombine.low %v7678_v28, %v7693_v52  ;;  %v7711_v49 = vcombine.high %v7678_v28, %v7693_v52 }
 0x398   : > { %v7745_v47 = vcombine.high %v1774_v43, %v25052_v18  ;;  %v7702_v59 = vrot.slane %v7694_v20, %v18966_v10  ;;  %v7709_v41 = vrot.slane %v7695_v55, %v18966_v10  ;;  %v7752_v15 = vrot.slane %v1774_v43, %v18959_v0 }
 0x399   : > { %v7718_v8 = vrot.slane %v7710_v34, %v18966_v10  ;;  %v7725_v36 = vrot.slane %v7711_v49, %v18966_v10  ;;  %v7796_v28 = vcombine.high %v1778_v50, %v25052_v18 }
 0x39a   : > { %v7759_v19 = vrot.slane %v7745_v47, %v18959_v0  ;;  %v9744_v38 = vcombine.low %v7702_v59, %v7709_v41  ;;  %v16911_v52 = vcombine.high %v7702_v59, %v7709_v41  ;;  %v7760_v32 = vcombine.low %v7737_v48, %v7752_v15  ;;  %v21223_v47 = vpop.f32.mrb[47].mxu0  ;;  %17202 = vmatmul.mubr.bf16.gmra.mrb[120].mxu1 %v21092_v26 }
 0x39b   : > { %v7761_v35 = vcombine.high %v7737_v48, %v7752_v15  ;;  %v9760_v46 = vcombine.low %v7718_v8, %v7725_v36  ;;  %v16912_v21 = vcombine.high %v7718_v8, %v7725_v36  ;;  %17234 = vmatmul.mubr.bf16.gmra.mrb[88].mxu0 %v21094_v4  ;;  %17203 = vmatprep.mubr.bf16.mxu1 %v21129_v53 }
 0x39c   : > { %v7776_v12 = vcombine.low %v7744_v23, %v7759_v19  ;;  %v7777_v20 = vcombine.high %v7744_v23, %v7759_v19  ;;  %v21216_v55 = vrot.slane %v9744_v38, %v18959_v0  ;;  %v21219_v43 = vrot.slane %v16911_v52, %v18959_v0  ;;  %17235 = vmatprep.mubr.bf16.mxu0 %v21131_v16 }
 0x39d   : > { %v7768_v49 = vrot.slane %v7760_v32, %v18966_v10  ;;  %v7775_v34 = vrot.slane %v7761_v35, %v18966_v10  ;;  %v21226_v59 = vrot.slane %v9760_v46, %v18959_v0  ;;  %v21229_v48 = vrot.slane %v16912_v21, %v18959_v0 }
 0x39e   : > { %v7784_v23 = vrot.slane %v7776_v12, %v18966_v10  ;;  %v7791_v41 = vrot.slane %v7777_v20, %v18966_v10  ;;  %v7803_v32 = vrot.slane %v1778_v50, %v18959_v0  ;;  %v7810_v21 = vrot.slane %v7796_v28, %v18959_v0 }
 0x39f   : > { %v9794_v8 = vcombine.low %v7768_v49, %v7775_v34  ;;  %v16913_v36 = vcombine.high %v7768_v49, %v7775_v34  ;;  %v1780_v50 = vadd.f32 %v20597_v17, %v25352_v13  ;;  %v1782_v28 = vadd.f32 %v20607_v44, %v25350_v33  ;;  %v21265_v34 = vpop.f32.mrb[48].mxu0 }
 0x3a0   : > { %v9810_v35 = vcombine.low %v7784_v23, %v7791_v41  ;;  %v16914_v46 = vcombine.high %v7784_v23, %v7791_v41  ;;  %v1784_v38 = vadd.f32 %v20615_v27, %v25352_v13  ;;  %v1788_v17 = vadd.f32 %v20621_v51, %v25350_v33 }
 0x3a1   : > { %v21242_v12 = vrot.slane %v9794_v8, %v18959_v0  ;;  %v21245_v19 = vrot.slane %v16913_v36, %v18959_v0  ;;  %v7811_v20 = vcombine.high %v1780_v50, %v25052_v18  ;;  %v7818_v49 = vrot.slane %v1780_v50, %v18959_v0  ;;  %v21271_v8 = vpop.f32.mrb[49].mxu0 }
 0x3a2   : > { %v21250_v26 = vrot.slane %v9810_v35, %v18959_v0  ;;  %v21253_v4 = vrot.slane %v16914_v46, %v18959_v0  ;;  %v7862_v23 = vcombine.high %v1782_v28, %v25052_v18  ;;  %v7869_v41 = vrot.slane %v1782_v28, %v18959_v0  ;;  %17204 = vmatmul.mubr.bf16.gmra.mrb[124].mxu1 %v21129_v53 }
 0x3a3   : > { %25358 = vst [vmem:[#allocation97_spill] sm:$0xff] %v21242_v12  ;;  %25359 = vst [vmem:[#allocation98_spill] sm:$0xff] %v21245_v19  ;;  %v7877_v44 = vcombine.high %v1784_v38, %v25052_v18  ;;  %v7884_v27 = vrot.slane %v1784_v38, %v18959_v0  ;;  %v7825_v36 = vrot.slane %v7811_v20, %v18959_v0  ;;  %17236 = vmatmul.mubr.bf16.gmra.mrb[92].mxu0 %v21131_v16 }
 0x3a4   : > { %25360 = vst [vmem:[#allocation100_spill] sm:$0xff] %v21250_v26  ;;  %25361 = vst [vmem:[#allocation99_spill] sm:$0xff] %v21253_v4  ;;  %v7826_v35 = vcombine.low %v7803_v32, %v7818_v49  ;;  %v7827_v46 = vcombine.high %v7803_v32, %v7818_v49  ;;  %v7928_v50 = vcombine.high %v1788_v17, %v25052_v18 }
 0x3a5   : > { %v7876_v51 = vrot.slane %v7862_v23, %v18959_v0  ;;  %v7891_v52 = vrot.slane %v7877_v44, %v18959_v0  ;;  %v7892_v15 = vcombine.low %v7869_v41, %v7884_v27  ;;  %v7893_v26 = vcombine.high %v7869_v41, %v7884_v27 }
 0x3a6   : > { %v7834_v28 = vrot.slane %v7826_v35, %v18966_v10  ;;  %v7841_v4 = vrot.slane %v7827_v46, %v18966_v10  ;;  %v7842_v19 = vcombine.low %v7810_v21, %v7825_v36  ;;  %v7843_v38 = vcombine.high %v7810_v21, %v7825_v36  ;;  %v21292_v36 = vpop.f32.mrb[50].mxu0 }
 0x3a7   : > { %v7900_v32 = vrot.slane %v7892_v15, %v18966_v10  ;;  %v7907_v20 = vrot.slane %v7893_v26, %v18966_v10  ;;  %v7908_v49 = vcombine.low %v7876_v51, %v7891_v52  ;;  %v7909_v35 = vcombine.high %v7876_v51, %v7891_v52 }
 0x3a8   : > { %v7850_v23 = vrot.slane %v7842_v19, %v18966_v10  ;;  %v7857_v44 = vrot.slane %v7843_v38, %v18966_v10  ;;  %v9844_v41 = vcombine.low %v7834_v28, %v7841_v4  ;;  %v16915_v27 = vcombine.high %v7834_v28, %v7841_v4 }
 0x3a9   : > { %v7916_v46 = vrot.slane %v7908_v49, %v18966_v10  ;;  %v9894_v12 = vcombine.low %v7900_v32, %v7907_v20  ;;  %v16917_v21 = vcombine.high %v7900_v32, %v7907_v20  ;;  %v7923_v19 = vrot.slane %v7909_v35, %v18966_v10 }
 0x3aa   : > { %v21287_v53 = vrot.slane %v9844_v41, %v18959_v0  ;;  %v21290_v16 = vrot.slane %v16915_v27, %v18959_v0  ;;  %v9860_v15 = vcombine.low %v7850_v23, %v7857_v44  ;;  %v16916_v26 = vcombine.high %v7850_v23, %v7857_v44 }
 0x3ab   : > { %v21296_v38 = vrot.slane %v9894_v12, %v18959_v0  ;;  %v21299_v4 = vrot.slane %v16917_v21, %v18959_v0  ;;  %v7935_v52 = vrot.slane %v1788_v17, %v18959_v0  ;;  %v7942_v20 = vrot.slane %v7928_v50, %v18959_v0  ;;  %v21315_v17 = vpop.f32.mrb[51].mxu0  ;;  %v25368_v50 = vld [vmem:[#allocation111_spill] sm:$0xff] }
 0x3ac   : > { %25362 = vst [vmem:[#allocation123_spill] sm:$0xff] %v21287_v53  ;;  %25363 = vst [vmem:[#allocation128_spill] sm:$0xff] %v21290_v16  ;;  %v21303_v51 = vrot.slane %v9860_v15, %v18959_v0  ;;  %v21306_v28 = vrot.slane %v16916_v26, %v18959_v0  ;;  %v9910_v49 = vcombine.low %v7916_v46, %v7923_v19  ;;  %v21349_v53 = vpop.f32.mrb[52].mxu0 }
 0x3ad   : > { %25364 = vst [vmem:[#allocation101_spill] sm:$0xff] %v21296_v38  ;;  %25365 = vst [vmem:[#allocation102_spill] sm:$0xff] %v21299_v4  ;;  %v16918_v23 = vcombine.high %v7916_v46, %v7923_v19  ;;  %v1790_v44 = vadd.f32 %v20626_v24, %v25352_v13  ;;  %v1792_v41 = vadd.f32 %v20650_v11, %v25350_v33 }
 0x3ae   : > { %25366 = vst [vmem:[#allocation104_spill] sm:$0xff] %v21303_v51  ;;  %25367 = vst [vmem:[#allocation103_spill] sm:$0xff] %v21306_v28  ;;  %v1794_v27 = vadd.f32 %v20657_v63, %v25352_v13  ;;  %v1798_v35 = vadd.f32 %v20673_v61, %v25350_v33  ;;  %v1800_v46 = vadd.f32 %v25368_v50, %v25352_v13 }
 0x3af   : > { %v21326_v21 = vrot.slane %v9910_v49, %v18959_v0  ;;  %v21329_v15 = vrot.slane %v16918_v23, %v18959_v0  ;;  %v7943_v24 = vcombine.high %v1790_v44, %v25052_v18  ;;  %v7950_v26 = vrot.slane %v1790_v44, %v18959_v0 }
 0x3b0   : > { %v7994_v11 = vcombine.high %v1792_v41, %v25052_v18  ;;  %v8001_v63 = vrot.slane %v1792_v41, %v18959_v0  ;;  %v8009_v19 = vcombine.high %v1794_v27, %v25052_v18  ;;  %v8016_v61 = vrot.slane %v1794_v27, %v18959_v0 }
 0x3b1   : > { %25369 = vst [vmem:[#allocation105_spill] sm:$0xff] %v21326_v21  ;;  %25370 = vst [vmem:[#allocation106_spill] sm:$0xff] %v21329_v15  ;;  %v7957_v50 = vrot.slane %v7943_v24, %v18959_v0  ;;  %v7958_v12 = vcombine.low %v7935_v52, %v7950_v26  ;;  %v7959_v49 = vcombine.high %v7935_v52, %v7950_v26 }
 0x3b2   : > { %v8060_v32 = vcombine.high %v1798_v35, %v25052_v18  ;;  %v8008_v23 = vrot.slane %v7994_v11, %v18959_v0  ;;  %v8023_v21 = vrot.slane %v8009_v19, %v18959_v0  ;;  %v8024_v15 = vcombine.low %v8001_v63, %v8016_v61 }
 0x3b3   : > { %v8025_v44 = vcombine.high %v8001_v63, %v8016_v61  ;;  %v7966_v4 = vrot.slane %v7958_v12, %v18966_v10  ;;  %v7973_v41 = vrot.slane %v7959_v49, %v18966_v10  ;;  %v7974_v38 = vcombine.low %v7942_v20, %v7957_v50 }
 0x3b4   : > { %v7975_v51 = vcombine.high %v7942_v20, %v7957_v50  ;;  %v8032_v27 = vrot.slane %v8024_v15, %v18966_v10  ;;  %v8040_v28 = vcombine.low %v8008_v23, %v8023_v21  ;;  %v8041_v52 = vcombine.high %v8008_v23, %v8023_v21  ;;  %v21357_v50 = vpop.f32.mrb[53].mxu0 }
 0x3b5   : > { %v8039_v24 = vrot.slane %v8025_v44, %v18966_v10  ;;  %v7982_v26 = vrot.slane %v7974_v38, %v18966_v10  ;;  %v9944_v16 = vcombine.low %v7966_v4, %v7973_v41  ;;  %v16919_v19 = vcombine.high %v7966_v4, %v7973_v41  ;;  %25373 = vst [vmem:[#allocation131_spill] sm:$0xff] %v21357_v50 }
 0x3b6   : > { %v7989_v11 = vrot.slane %v7975_v51, %v18966_v10  ;;  %v8048_v63 = vrot.slane %v8040_v28, %v18966_v10  ;;  %v8055_v12 = vrot.slane %v8041_v52, %v18966_v10 }
 0x3b7   : > { %v9994_v61 = vcombine.low %v8032_v27, %v8039_v24  ;;  %v16921_v49 = vcombine.high %v8032_v27, %v8039_v24  ;;  %v21352_v20 = vrot.slane %v9944_v16, %v18959_v0  ;;  %v21355_v15 = vrot.slane %v16919_v19, %v18959_v0 }
 0x3b8   : > { %v9960_v21 = vcombine.low %v7982_v26, %v7989_v11  ;;  %v16920_v38 = vcombine.high %v7982_v26, %v7989_v11  ;;  %v10010_v28 = vcombine.low %v8048_v63, %v8055_v12  ;;  %v16922_v23 = vcombine.high %v8048_v63, %v8055_v12  ;;  %v25380_v12 = vld [vmem:[#allocation85_spill] sm:$0xff] }
 0x3b9   : > { %25371 = vst [vmem:[#allocation108_spill] sm:$0xff] %v21352_v20  ;;  %25372 = vst [vmem:[#allocation107_spill] sm:$0xff] %v21355_v15  ;;  %v21360_v4 = vrot.slane %v9994_v61, %v18959_v0  ;;  %v21363_v51 = vrot.slane %v16921_v49, %v18959_v0  ;;  %v8067_v27 = vrot.slane %v1798_v35, %v18959_v0  ;;  %v25381_v35 = vld [vmem:[#allocation86_spill] sm:$0xff] }
 0x3ba   : > { %v21366_v44 = vrot.slane %v9960_v21, %v18959_v0  ;;  %v21369_v16 = vrot.slane %v16920_v38, %v18959_v0  ;;  %v21375_v24 = vrot.slane %v10010_v28, %v18959_v0  ;;  %v21378_v52 = vrot.slane %v16922_v23, %v18959_v0  ;;  %v21389_v21 = vpop.f32.mrb[54].mxu0  ;;  %v25383_v38 = vld [vmem:[#allocation88_spill] sm:$0xff]  ;;  %v25384_v23 = vld [vmem:[#allocation87_spill] sm:$0xff] }
 0x3bb   : > { %25374 = vst [vmem:[#allocation138_spill] sm:$0xff] %v21360_v4  ;;  %25375 = vst [vmem:[#allocation139_spill] sm:$0xff] %v21363_v51  ;;  %v8074_v11 = vrot.slane %v8060_v32, %v18959_v0  ;;  %v8075_v19 = vcombine.high %v1800_v46, %v25052_v18  ;;  %v8082_v63 = vrot.slane %v1800_v46, %v18959_v0 }
 0x3bc   : > { %25376 = vst [vmem:[#allocation109_spill] sm:$0xff] %v21366_v44  ;;  %25377 = vst [vmem:[#allocation110_spill] sm:$0xff] %v21369_v16  ;;  %v1802_v61 = vadd.f32 %v25380_v12, %v25350_v33  ;;  %v1804_v49 = vadd.f32 %v25381_v35, %v25352_v13  ;;  %v1808_v28 = vadd.f32 %v25383_v38, %v25350_v33 }
 0x3bd   : > { %25378 = vst [vmem:[#allocation113_spill] sm:$0xff] %v21375_v24  ;;  %25379 = vst [vmem:[#allocation112_spill] sm:$0xff] %v21378_v52  ;;  %v1810_v26 = vadd.f32 %v25384_v23, %v25352_v13  ;;  %v1812_v32 = vadd.f32 %v20802_v56, %v25350_v33  ;;  %v1814_v46 = vadd.f32 %v20810_v60, %v25352_v13 }
 0x3be   : > { %25382 = vst [vmem:[#allocation114_spill] sm:$0xff] %v21389_v21  ;;  %v8089_v41 = vrot.slane %v8075_v19, %v18959_v0  ;;  %v8090_v12 = vcombine.low %v8067_v27, %v8082_v63  ;;  %v8091_v24 = vcombine.high %v8067_v27, %v8082_v63  ;;  %v8126_v35 = vcombine.high %v1802_v61, %v25052_v18 }
 0x3bf   : > { %v8133_v52 = vrot.slane %v1802_v61, %v18959_v0  ;;  %v8141_v51 = vcombine.high %v1804_v49, %v25052_v18  ;;  %v8148_v38 = vrot.slane %v1804_v49, %v18959_v0  ;;  %v8192_v23 = vcombine.high %v1808_v28, %v25052_v18 }
 0x3c0   : > { %v8098_v4 = vrot.slane %v8090_v12, %v18966_v10  ;;  %v8105_v56 = vrot.slane %v8091_v24, %v18966_v10  ;;  %v8106_v44 = vcombine.low %v8074_v11, %v8089_v41  ;;  %v8107_v60 = vcombine.high %v8074_v11, %v8089_v41 }
 0x3c1   : > { %v8140_v19 = vrot.slane %v8126_v35, %v18959_v0  ;;  %v8155_v27 = vrot.slane %v8141_v51, %v18959_v0  ;;  %v8156_v63 = vcombine.low %v8133_v52, %v8148_v38  ;;  %v8157_v16 = vcombine.high %v8133_v52, %v8148_v38  ;;  %v21419_v35 = vpop.f32.mrb[55].mxu0 }
 0x3c2   : > { %v8114_v61 = vrot.slane %v8106_v44, %v18966_v10  ;;  %v8121_v15 = vrot.slane %v8107_v60, %v18966_v10  ;;  %v10044_v20 = vcombine.low %v8098_v4, %v8105_v56  ;;  %v16923_v49 = vcombine.high %v8098_v4, %v8105_v56 }
 0x3c3   : > { %v8164_v21 = vrot.slane %v8156_v63, %v18966_v10  ;;  %v8171_v12 = vrot.slane %v8157_v16, %v18966_v10  ;;  %v8172_v50 = vcombine.low %v8140_v19, %v8155_v27  ;;  %v8173_v24 = vcombine.high %v8140_v19, %v8155_v27 }
 0x3c4   : > { %v21414_v41 = vrot.slane %v10044_v20, %v18959_v0  ;;  %v21417_v11 = vrot.slane %v16923_v49, %v18959_v0  ;;  %v10060_v51 = vcombine.low %v8114_v61, %v8121_v15  ;;  %v16924_v52 = vcombine.high %v8114_v61, %v8121_v15 }
 0x3c5   : > { %v8180_v44 = vrot.slane %v8172_v50, %v18966_v10  ;;  %v8187_v4 = vrot.slane %v8173_v24, %v18966_v10  ;;  %v10094_v38 = vcombine.low %v8164_v21, %v8171_v12  ;;  %v16925_v56 = vcombine.high %v8164_v21, %v8171_v12  ;;  %v21442_v24 = vpop.f32.mrb[56].mxu0 }
 0x3c6   : > { %25385 = vst [vmem:[#allocation115_spill] sm:$0xff] %v21414_v41  ;;  %25386 = vst [vmem:[#allocation117_spill] sm:$0xff] %v21417_v11  ;;  %v21424_v16 = vrot.slane %v10060_v51, %v18959_v0  ;;  %v21427_v60 = vrot.slane %v16924_v52, %v18959_v0  ;;  %v8199_v19 = vrot.slane %v1808_v28, %v18959_v0 }
 0x3c7   : > { %v21433_v15 = vrot.slane %v10094_v38, %v18959_v0  ;;  %v21436_v50 = vrot.slane %v16925_v56, %v18959_v0  ;;  %v10110_v27 = vcombine.low %v8180_v44, %v8187_v4  ;;  %v16926_v63 = vcombine.high %v8180_v44, %v8187_v4 }
 0x3c8   : > { %25387 = vst [vmem:[#allocation116_spill] sm:$0xff] %v21424_v16  ;;  %25388 = vst [vmem:[#allocation119_spill] sm:$0xff] %v21427_v60  ;;  %v8206_v21 = vrot.slane %v8192_v23, %v18959_v0  ;;  %v8207_v61 = vcombine.high %v1810_v26, %v25052_v18  ;;  %v8214_v49 = vrot.slane %v1810_v26, %v18959_v0  ;;  %v21453_v23 = vpop.f32.mrb[57].mxu0 }
 0x3c9   : > { %25389 = vst [vmem:[#allocation120_spill] sm:$0xff] %v21433_v15  ;;  %25390 = vst [vmem:[#allocation122_spill] sm:$0xff] %v21436_v50  ;;  %v8258_v12 = vcombine.high %v1812_v32, %v25052_v18  ;;  %v21445_v28 = vrot.slane %v10110_v27, %v18959_v0  ;;  %v21448_v51 = vrot.slane %v16926_v63, %v18959_v0 }
 0x3ca   : > { %v8265_v44 = vrot.slane %v1812_v32, %v18959_v0  ;;  %v8221_v4 = vrot.slane %v8207_v61, %v18959_v0  ;;  %v8222_v26 = vcombine.low %v8199_v19, %v8214_v49  ;;  %v8223_v38 = vcombine.high %v8199_v19, %v8214_v49 }
 0x3cb   : > { %25391 = vst [vmem:[#allocation121_spill] sm:$0xff] %v21445_v28  ;;  %25392 = vst [vmem:[#allocation124_spill] sm:$0xff] %v21448_v51  ;;  %v8272_v56 = vrot.slane %v8258_v12, %v18959_v0  ;;  %v8273_v20 = vcombine.high %v1814_v46, %v25052_v18  ;;  %v8280_v27 = vrot.slane %v1814_v46, %v18959_v0 }
 0x3cc   : > { %v1818_v63 = vadd.f32 %v20819_v22, %v25350_v33  ;;  %v1820_v52 = vadd.f32 %v20821_v5, %v25352_v13  ;;  %v8230_v32 = vrot.slane %v8222_v26, %v18966_v10  ;;  %v8237_v28 = vrot.slane %v8223_v38, %v18966_v10 }
 0x3cd   : > { %v8238_v51 = vcombine.low %v8206_v21, %v8221_v4  ;;  %v8239_v61 = vcombine.high %v8206_v21, %v8221_v4  ;;  %v8287_v19 = vrot.slane %v8273_v20, %v18959_v0  ;;  %v8288_v49 = vcombine.low %v8265_v44, %v8280_v27 }
 0x3ce   : > { %v8289_v12 = vcombine.high %v8265_v44, %v8280_v27  ;;  %v8324_v50 = vcombine.high %v1818_v63, %v25052_v18  ;;  %v10144_v22 = vcombine.low %v8230_v32, %v8237_v28  ;;  %v16927_v16 = vcombine.high %v8230_v32, %v8237_v28  ;;  %v21479_v32 = vpop.f32.mrb[58].mxu0 }
 0x3cf   : > { %v8246_v46 = vrot.slane %v8238_v51, %v18966_v10  ;;  %v8253_v15 = vrot.slane %v8239_v61, %v18966_v10  ;;  %v8296_v5 = vrot.slane %v8288_v49, %v18966_v10  ;;  %v8304_v60 = vcombine.low %v8272_v56, %v8287_v19  ;;  %25395 = vst [vmem:[#allocation126_spill] sm:$0xff] %v21479_v32 }
 0x3d0   : > { %v8303_v26 = vrot.slane %v8289_v12, %v18966_v10  ;;  %v8305_v38 = vcombine.high %v8272_v56, %v8287_v19  ;;  %v21472_v21 = vrot.slane %v10144_v22, %v18959_v0  ;;  %v21475_v20 = vrot.slane %v16927_v16, %v18959_v0 }
 0x3d1   : > { %v10160_v44 = vcombine.low %v8246_v46, %v8253_v15  ;;  %v16928_v4 = vcombine.high %v8246_v46, %v8253_v15  ;;  %v8312_v51 = vrot.slane %v8304_v60, %v18966_v10  ;;  %v8331_v19 = vrot.slane %v1818_v63, %v18959_v0 }
 0x3d2   : > { %25393 = vst [vmem:[#allocation125_spill] sm:$0xff] %v21472_v21  ;;  %25394 = vst [vmem:[#allocation127_spill] sm:$0xff] %v21475_v20  ;;  %v8319_v27 = vrot.slane %v8305_v38, %v18966_v10  ;;  %v10194_v61 = vcombine.low %v8296_v5, %v8303_v26  ;;  %v16929_v28 = vcombine.high %v8296_v5, %v8303_v26 }
 0x3d3   : > { %v21482_v49 = vrot.slane %v10160_v44, %v18959_v0  ;;  %v21485_v56 = vrot.slane %v16928_v4, %v18959_v0  ;;  %v8338_v22 = vrot.slane %v8324_v50, %v18959_v0  ;;  %v8339_v5 = vcombine.high %v1820_v52, %v25052_v18  ;;  %v21501_v44 = vpop.f32.mrb[59].mxu0 }
 0x3d4   : > { %v21491_v15 = vrot.slane %v10194_v61, %v18959_v0  ;;  %v21494_v60 = vrot.slane %v16929_v28, %v18959_v0  ;;  %v10210_v12 = vcombine.low %v8312_v51, %v8319_v27  ;;  %v16930_v46 = vcombine.high %v8312_v51, %v8319_v27  ;;  %25400 = vst [vmem:[#allocation134_spill] sm:$0xff] %v21501_v44 }
 0x3d5   : > { %25396 = vst [vmem:[#allocation129_spill] sm:$0xff] %v21482_v49  ;;  %25397 = vst [vmem:[#allocation130_spill] sm:$0xff] %v21485_v56  ;;  %v8346_v26 = vrot.slane %v1820_v52, %v18959_v0  ;;  %v1822_v38 = vadd.f32 %v20861_v62, %v25350_v33  ;;  %v1824_v50 = vadd.f32 %v20870_v40, %v25352_v13 }
 0x3d6   : > { %25398 = vst [vmem:[#allocation133_spill] sm:$0xff] %v21491_v15  ;;  %25399 = vst [vmem:[#allocation132_spill] sm:$0xff] %v21494_v60  ;;  %v21504_v63 = vrot.slane %v10210_v12, %v18959_v0  ;;  %v21507_v4 = vrot.slane %v16930_v46, %v18959_v0  ;;  %v8353_v27 = vrot.slane %v8339_v5, %v18959_v0 }
 0x3d7   : > { %v8354_v52 = vcombine.low %v8331_v19, %v8346_v26  ;;  %v8355_v61 = vcombine.high %v8331_v19, %v8346_v26  ;;  %v8390_v62 = vcombine.high %v1822_v38, %v25052_v18  ;;  %v8397_v28 = vrot.slane %v1822_v38, %v18959_v0 }
 0x3d8   : > { %25401 = vst [vmem:[#allocation135_spill] sm:$0xff] %v21504_v63  ;;  %25402 = vst [vmem:[#allocation137_spill] sm:$0xff] %v21507_v4  ;;  %v8405_v12 = vcombine.high %v1824_v50, %v25052_v18  ;;  %v8412_v16 = vrot.slane %v1824_v50, %v18959_v0  ;;  %v1828_v46 = vadd.f32 %v20880_v1, %v25350_v33 }
 0x3d9   : > { %v8362_v51 = vrot.slane %v8354_v52, %v18966_v10  ;;  %v8369_v63 = vrot.slane %v8355_v61, %v18966_v10  ;;  %v8370_v40 = vcombine.low %v8338_v22, %v8353_v27  ;;  %v8371_v4 = vcombine.high %v8338_v22, %v8353_v27 }
 0x3da   : > { %v8404_v5 = vrot.slane %v8390_v62, %v18959_v0  ;;  %v8419_v19 = vrot.slane %v8405_v12, %v18959_v0  ;;  %v8420_v26 = vcombine.low %v8397_v28, %v8412_v16  ;;  %v8421_v60 = vcombine.high %v8397_v28, %v8412_v16 }
 0x3db   : > { %v8378_v38 = vrot.slane %v8370_v40, %v18966_v10  ;;  %v8385_v15 = vrot.slane %v8371_v4, %v18966_v10  ;;  %v10244_v50 = vcombine.low %v8362_v51, %v8369_v63  ;;  %v16931_v49 = vcombine.high %v8362_v51, %v8369_v63  ;;  %v21536_v51 = vpop.f32.mrb[60].mxu0 }
 0x3dc   : > { %v8428_v1 = vrot.slane %v8420_v26, %v18966_v10  ;;  %v8435_v52 = vrot.slane %v8421_v60, %v18966_v10  ;;  %v8436_v56 = vcombine.low %v8404_v5, %v8419_v19  ;;  %v8437_v61 = vcombine.high %v8404_v5, %v8419_v19  ;;  %25405 = vst [vmem:[#allocation141_spill] sm:$0xff] %v21536_v51 }
 0x3dd   : > { %v21529_v22 = vrot.slane %v10244_v50, %v18959_v0  ;;  %v21532_v27 = vrot.slane %v16931_v49, %v18959_v0  ;;  %v10260_v62 = vcombine.low %v8378_v38, %v8385_v15  ;;  %v16932_v16 = vcombine.high %v8378_v38, %v8385_v15  ;;  %v21547_v15 = vpop.f32.mrb[61].mxu0 }
 0x3de   : > { %v8444_v28 = vrot.slane %v8436_v56, %v18966_v10  ;;  %v8451_v4 = vrot.slane %v8437_v61, %v18966_v10  ;;  %v10294_v12 = vcombine.low %v8428_v1, %v8435_v52  ;;  %v16933_v63 = vcombine.high %v8428_v1, %v8435_v52  ;;  %25408 = vst [vmem:[#allocation144_spill] sm:$0xff] %v21547_v15 }
 0x3df   : > { %25403 = vst [vmem:[#allocation136_spill] sm:$0xff] %v21529_v22  ;;  %25404 = vst [vmem:[#allocation140_spill] sm:$0xff] %v21532_v27  ;;  %v21539_v60 = vrot.slane %v10260_v62, %v18959_v0  ;;  %v21542_v40 = vrot.slane %v16932_v16, %v18959_v0  ;;  %v8456_v5 = vcombine.high %v1828_v46, %v25052_v18 }
 0x3e0   : > { %v21550_v56 = vrot.slane %v10294_v12, %v18959_v0  ;;  %v21553_v19 = vrot.slane %v16933_v63, %v18959_v0  ;;  %v10310_v26 = vcombine.low %v8444_v28, %v8451_v4  ;;  %v16934_v38 = vcombine.high %v8444_v28, %v8451_v4  ;;  %v21575_v63 = vpop.f32.mrb[62].mxu0 }
 0x3e1   : > { %25406 = vst [vmem:[#allocation143_spill] sm:$0xff] %v21539_v60  ;;  %25407 = vst [vmem:[#allocation142_spill] sm:$0xff] %v21542_v40  ;;  %v8463_v50 = vrot.slane %v1828_v46, %v18959_v0  ;;  %v8470_v1 = vrot.slane %v8456_v5, %v18959_v0  ;;  %v1830_v52 = vadd.f32 %v20892_v31, %v25352_v13 }
 0x3e2   : > { %25409 = vst [vmem:[#allocation145_spill] sm:$0xff] %v21550_v56  ;;  %25410 = vst [vmem:[#allocation147_spill] sm:$0xff] %v21553_v19  ;;  %v1832_v61 = vadd.f32 %v20943_v37, %v25350_v33  ;;  %v21562_v62 = vrot.slane %v10310_v26, %v18959_v0  ;;  %v21565_v16 = vrot.slane %v16934_v38, %v18959_v0 }
 0x3e3   : > { %v1834_v46 = vadd.f32 %v20949_v29, %v25352_v13  ;;  %v8471_v28 = vcombine.high %v1830_v52, %v25052_v18  ;;  %v8478_v4 = vrot.slane %v1830_v52, %v18959_v0  ;;  %25413 = vst [vmem:[#allocation28_spill] sm:$0xff] %v21575_v63  ;;  %v1838_v38 = vadd.f32 %v20953_v2, %v25350_v33 }
 0x3e4   : > { %25411 = vst [vmem:[#allocation146_spill] sm:$0xff] %v21562_v62  ;;  %25412 = vst [vmem:[#allocation27_spill] sm:$0xff] %v21565_v16  ;;  %v8522_v31 = vcombine.high %v1832_v61, %v25052_v18  ;;  %v8529_v37 = vrot.slane %v1832_v61, %v18959_v0  ;;  %v1840_v29 = vadd.f32 %v20966_v45, %v25352_v13 }
 0x3e5   : > { %v8537_v5 = vcombine.high %v1834_v46, %v25052_v18  ;;  %v8544_v26 = vrot.slane %v1834_v46, %v18959_v0  ;;  %v8485_v12 = vrot.slane %v8471_v28, %v18959_v0  ;;  %v8486_v49 = vcombine.low %v8463_v50, %v8478_v4 }
 0x3e6   : > { %v8487_v52 = vcombine.high %v8463_v50, %v8478_v4  ;;  %v8536_v62 = vrot.slane %v8522_v31, %v18959_v0  ;;  %v8588_v56 = vcombine.high %v1838_v38, %v25052_v18 }
 0x3e7   : > { %v8551_v61 = vrot.slane %v8537_v5, %v18959_v0  ;;  %v8552_v16 = vcombine.low %v8529_v37, %v8544_v26  ;;  %v8553_v19 = vcombine.high %v8529_v37, %v8544_v26  ;;  %v8494_v46 = vrot.slane %v8486_v49, %v18966_v10 }
 0x3e8   : > { %v8501_v60 = vrot.slane %v8487_v52, %v18966_v10  ;;  %v8502_v2 = vcombine.low %v8470_v1, %v8485_v12  ;;  %v8503_v40 = vcombine.high %v8470_v1, %v8485_v12  ;;  %v21601_v12 = vpop.f32.mrb[63].mxu0 }
 0x3e9   : > { %v8560_v45 = vrot.slane %v8552_v16, %v18966_v10  ;;  %v8567_v28 = vrot.slane %v8553_v19, %v18966_v10  ;;  %v8568_v27 = vcombine.low %v8536_v62, %v8551_v61  ;;  %v8569_v50 = vcombine.high %v8536_v62, %v8551_v61  ;;  %25416 = vst [vmem:[#allocation31_spill] sm:$0xff] %v21601_v12 }
 0x3ea   : > { %v8510_v4 = vrot.slane %v8502_v2, %v18966_v10  ;;  %v8517_v31 = vrot.slane %v8503_v40, %v18966_v10  ;;  %v10344_v5 = vcombine.low %v8494_v46, %v8501_v60  ;;  %v16935_v37 = vcombine.high %v8494_v46, %v8501_v60 }
 0x3eb   : > { %v8576_v26 = vrot.slane %v8568_v27, %v18966_v10  ;;  %v8583_v49 = vrot.slane %v8569_v50, %v18966_v10  ;;  %v10394_v22 = vcombine.low %v8560_v45, %v8567_v28  ;;  %v16937_v52 = vcombine.high %v8560_v45, %v8567_v28 }
 0x3ec   : > { %v21596_v1 = vrot.slane %v10344_v5, %v18959_v0  ;;  %v21599_v16 = vrot.slane %v16935_v37, %v18959_v0  ;;  %v10360_v19 = vcombine.low %v8510_v4, %v8517_v31  ;;  %v16936_v62 = vcombine.high %v8510_v4, %v8517_v31 }
 0x3ed   : > { %v21604_v40 = vrot.slane %v10394_v22, %v18959_v0  ;;  %v21607_v60 = vrot.slane %v16937_v52, %v18959_v0  ;;  %v10410_v27 = vcombine.low %v8576_v26, %v8583_v49  ;;  %v16938_v61 = vcombine.high %v8576_v26, %v8583_v49  ;;  %v25423_v49 = vld [vmem:[#allocation89_spill] sm:$0xff] }
 0x3ee   : > { %25414 = vst [vmem:[#allocation30_spill] sm:$0xff] %v21596_v1  ;;  %25415 = vst [vmem:[#allocation29_spill] sm:$0xff] %v21599_v16  ;;  %v21610_v46 = vrot.slane %v10360_v19, %v18959_v0  ;;  %v21613_v2 = vrot.slane %v16936_v62, %v18959_v0  ;;  %v8595_v28 = vrot.slane %v1838_v38, %v18959_v0  ;;  %v25424_v19 = vld [vmem:[#allocation90_spill] sm:$0xff] }
 0x3ef   : > { %25417 = vst [vmem:[#allocation32_spill] sm:$0xff] %v21604_v40  ;;  %25418 = vst [vmem:[#allocation34_spill] sm:$0xff] %v21607_v60  ;;  %v21619_v50 = vrot.slane %v10410_v27, %v18959_v0  ;;  %v21622_v22 = vrot.slane %v16938_v61, %v18959_v0  ;;  %v8602_v31 = vrot.slane %v8588_v56, %v18959_v0  ;;  %v25425_v56 = vld [vmem:[#allocation92_spill] sm:$0xff] }
 0x3f0   : > { %25419 = vst [vmem:[#allocation33_spill] sm:$0xff] %v21610_v46  ;;  %25420 = vst [vmem:[#allocation35_spill] sm:$0xff] %v21613_v2  ;;  %v8603_v5 = vcombine.high %v1840_v29, %v25052_v18  ;;  %v8610_v37 = vrot.slane %v1840_v29, %v18959_v0  ;;  %v1842_v26 = vadd.f32 %v21005_v14, %v25350_v33 }
 0x3f1   : > { %25421 = vst [vmem:[#allocation36_spill] sm:$0xff] %v21619_v50  ;;  %25422 = vst [vmem:[#allocation38_spill] sm:$0xff] %v21622_v22  ;;  %v1844_v38 = vadd.f32 %v21012_v54, %v25352_v13  ;;  %v1848_v52 = vadd.f32 %v25423_v49, %v25350_v33  ;;  %v1850_v62 = vadd.f32 %v25424_v19, %v25352_v13 }
 0x3f2   : > { %v1852_v27 = vadd.f32 %v21067_v9, %v25350_v33  ;;  %v1854_v61 = vadd.f32 %v25425_v56, %v25352_v13  ;;  %v8617_v29 = vrot.slane %v8603_v5, %v18959_v0  ;;  %v8618_v4 = vcombine.low %v8595_v28, %v8610_v37 }
 0x3f3   : > { %v8619_v45 = vcombine.high %v8595_v28, %v8610_v37  ;;  %v8654_v14 = vcombine.high %v1842_v26, %v25052_v18  ;;  %v8661_v54 = vrot.slane %v1842_v26, %v18959_v0  ;;  %v8669_v50 = vcombine.high %v1844_v38, %v25052_v18 }
 0x3f4   : > { %v8676_v49 = vrot.slane %v1844_v38, %v18959_v0  ;;  %v8720_v19 = vcombine.high %v1848_v52, %v25052_v18  ;;  %v8626_v22 = vrot.slane %v8618_v4, %v18966_v10  ;;  %v8634_v60 = vcombine.low %v8602_v31, %v8617_v29 }
 0x3f5   : > { %v8633_v9 = vrot.slane %v8619_v45, %v18966_v10  ;;  %v8635_v56 = vcombine.high %v8602_v31, %v8617_v29  ;;  %v8668_v5 = vrot.slane %v8654_v14, %v18959_v0  ;;  %v8683_v28 = vrot.slane %v8669_v50, %v18959_v0 }
 0x3f6   : > { %v8684_v37 = vcombine.low %v8661_v54, %v8676_v49  ;;  %v8685_v40 = vcombine.high %v8661_v54, %v8676_v49  ;;  %v21652_v26 = vrot.slane %v8634_v60, %v18966_v10 }
 0x3f7   : > { %v21655_v46 = vrot.slane %v8635_v56, %v18966_v10  ;;  %v10444_v38 = vcombine.low %v8626_v22, %v8633_v9  ;;  %v16939_v2 = vcombine.high %v8626_v22, %v8633_v9  ;;  %v8700_v16 = vcombine.low %v8668_v5, %v8683_v28 }
 0x3f8   : > { %v8692_v4 = vrot.slane %v8684_v37, %v18966_v10  ;;  %v8699_v45 = vrot.slane %v8685_v40, %v18966_v10  ;;  %v8701_v31 = vcombine.high %v8668_v5, %v8683_v28  ;;  %v8727_v9 = vrot.slane %v1848_v52, %v18959_v0 }
 0x3f9   : > { %v21660_v29 = vrot.slane %v10444_v38, %v18959_v0  ;;  %v21663_v50 = vrot.slane %v16939_v2, %v18959_v0  ;;  %v21670_v22 = vrot.slane %v8700_v16, %v18966_v10  ;;  %v8734_v56 = vrot.slane %v8720_v19, %v18959_v0 }
 0x3fa   : > { %v21673_v54 = vrot.slane %v8701_v31, %v18966_v10  ;;  %v10494_v40 = vcombine.low %v8692_v4, %v8699_v45  ;;  %v16941_v49 = vcombine.high %v8692_v4, %v8699_v45  ;;  %v8735_v2 = vcombine.high %v1850_v62, %v25052_v18 }
 0x3fb   : > { %v8742_v5 = vrot.slane %v1850_v62, %v18959_v0  ;;  %v8786_v45 = vcombine.high %v1852_v27, %v25052_v18  ;;  %v8793_v62 = vrot.slane %v1852_v27, %v18959_v0  ;;  %v8801_v31 = vcombine.high %v1854_v61, %v25052_v18 }
 0x3fc   : > { %v21680_v28 = vrot.slane %v10494_v40, %v18959_v0  ;;  %v21683_v37 = vrot.slane %v16941_v49, %v18959_v0  ;;  %v8749_v52 = vrot.slane %v8735_v2, %v18959_v0  ;;  %v8808_v40 = vrot.slane %v1854_v61, %v18959_v0 }
 0x3fd   : > { %v8750_v4 = vcombine.low %v8727_v9, %v8742_v5  ;;  %v8751_v19 = vcombine.high %v8727_v9, %v8742_v5  ;;  %v1858_v49 = vadd.f32 %v21090_v25, %v25350_v33  ;;  %v8800_v2 = vrot.slane %v8786_v45, %v18959_v0 }
 0x3fe   : > { %v8766_v38 = vcombine.low %v8734_v56, %v8749_v52  ;;  %v8767_v60 = vcombine.high %v8734_v56, %v8749_v52  ;;  %v8815_v9 = vrot.slane %v8801_v31, %v18959_v0  ;;  %v8816_v5 = vcombine.low %v8793_v62, %v8808_v40 }
 0x3ff   : > { %v8758_v16 = vrot.slane %v8750_v4, %v18966_v10  ;;  %v8765_v14 = vrot.slane %v8751_v19, %v18966_v10  ;;  %v8817_v1 = vcombine.high %v8793_v62, %v8808_v40  ;;  %v8859_v31 = vrot.slane %v1858_v49, %v18959_v0  ;;  %v25426_v40 = vld [vmem:[#allocation91_spill] sm:$0xff] }
 0x400   : > { %v21701_v27 = vrot.slane %v8766_v38, %v18966_v10  ;;  %v21704_v61 = vrot.slane %v8767_v60, %v18966_v10  ;;  %v8824_v4 = vrot.slane %v8816_v5, %v18966_v10  ;;  %v8832_v21 = vcombine.low %v8800_v2, %v8815_v9 }
 0x401   : > { %v10544_v20 = vcombine.low %v8758_v16, %v8765_v14  ;;  %v16943_v25 = vcombine.high %v8758_v16, %v8765_v14  ;;  %v8831_v19 = vrot.slane %v8817_v1, %v18966_v10  ;;  %v8833_v56 = vcombine.high %v8800_v2, %v8815_v9  ;;  %v25427_v9 = vld [vmem:[#allocation118_spill] sm:$0xff] }
 0x402   : > { %v21719_v14 = vrot.slane %v8832_v21, %v18966_v10  ;;  %v1860_v2 = vadd.f32 %v25426_v40, %v25352_v13  ;;  %v1862_v5 = vadd.f32 %v25427_v9, %v25350_v33  ;;  %v1868_v60 = vadd.f32 %v21147_v57, %v25350_v33 }
 0x403   : > { %v21709_v52 = vrot.slane %v10544_v20, %v18959_v0  ;;  %v21712_v45 = vrot.slane %v16943_v25, %v18959_v0  ;;  %v21722_v16 = vrot.slane %v8833_v56, %v18966_v10  ;;  %v10594_v1 = vcombine.low %v8824_v4, %v8831_v19 }
 0x404   : > { %v16945_v62 = vcombine.high %v8824_v4, %v8831_v19  ;;  %v8852_v20 = vcombine.high %v1858_v49, %v25052_v18  ;;  %v8867_v19 = vcombine.high %v1860_v2, %v25052_v18  ;;  %v8874_v40 = vrot.slane %v1860_v2, %v18959_v0 }
 0x405   : > { %v21731_v25 = vrot.slane %v10594_v1, %v18959_v0  ;;  %v8918_v9 = vcombine.high %v1862_v5, %v25052_v18  ;;  %v8925_v1 = vrot.slane %v1862_v5, %v18959_v0  ;;  %v1870_v56 = vadd.f32 %v21157_v42, %v25352_v13 }
 0x406   : > { %v21734_v21 = vrot.slane %v16945_v62, %v18959_v0  ;;  %v8866_v49 = vrot.slane %v8852_v20, %v18959_v0  ;;  %v1864_v62 = vadd.f32 %v21141_v30, %v25352_v13  ;;  %v8881_v4 = vrot.slane %v8867_v19, %v18959_v0 }
 0x407   : > { %v8882_v20 = vcombine.low %v8859_v31, %v8874_v40  ;;  %v8883_v38 = vcombine.high %v8859_v31, %v8874_v40  ;;  %v8932_v11 = vrot.slane %v8918_v9, %v18959_v0  ;;  %v8984_v5 = vcombine.high %v1868_v60, %v25052_v18 }
 0x408   : > { %v8933_v2 = vcombine.high %v1864_v62, %v25052_v18  ;;  %v8940_v41 = vrot.slane %v1864_v62, %v18959_v0  ;;  %v8991_v30 = vrot.slane %v1868_v60, %v18959_v0  ;;  %v8898_v63 = vcombine.low %v8866_v49, %v8881_v4 }
 0x409   : > { %v8890_v12 = vrot.slane %v8882_v20, %v18966_v10  ;;  %v8897_v57 = vrot.slane %v8883_v38, %v18966_v10  ;;  %v8899_v42 = vcombine.high %v8866_v49, %v8881_v4  ;;  %v8998_v40 = vrot.slane %v8984_v5, %v18959_v0 }
 0x40a   : > { %v8947_v19 = vrot.slane %v8933_v2, %v18959_v0  ;;  %v8948_v15 = vcombine.low %v8925_v1, %v8940_v41  ;;  %v8949_v31 = vcombine.high %v8925_v1, %v8940_v41  ;;  %v21762_v9 = vrot.slane %v8898_v63, %v18966_v10 }
 0x40b   : > { %v21765_v62 = vrot.slane %v8899_v42, %v18966_v10  ;;  %v10644_v51 = vcombine.low %v8890_v12, %v8897_v57  ;;  %v16947_v60 = vcombine.high %v8890_v12, %v8897_v57  ;;  %v9006_v5 = vrot.slane %v1870_v56, %v18959_v0 }
 0x40c   : > { %v8956_v20 = vrot.slane %v8948_v15, %v18966_v10  ;;  %v8963_v38 = vrot.slane %v8949_v31, %v18966_v10  ;;  %v8964_v44 = vcombine.low %v8932_v11, %v8947_v19  ;;  %v8965_v4 = vcombine.high %v8932_v11, %v8947_v19 }
 0x40d   : > { %v21770_v49 = vrot.slane %v10644_v51, %v18959_v0  ;;  %v21773_v41 = vrot.slane %v16947_v60, %v18959_v0  ;;  %v8999_v51 = vcombine.high %v1870_v56, %v25052_v18  ;;  %v1872_v57 = vadd.f32 %v21198_v39, %v25350_v33 }
 0x40e   : > { %v21780_v12 = vrot.slane %v8964_v44, %v18966_v10  ;;  %v21783_v15 = vrot.slane %v8965_v4, %v18966_v10  ;;  %v10694_v2 = vcombine.low %v8956_v20, %v8963_v38  ;;  %v16949_v11 = vcombine.high %v8956_v20, %v8963_v38 }
 0x40f   : > { %v25428_v42 = vcombine.low %v21652_v26, %v21655_v46  ;;  %v9013_v20 = vrot.slane %v8999_v51, %v18959_v0  ;;  %v9014_v39 = vcombine.low %v8991_v30, %v9006_v5  ;;  %v9015_v38 = vcombine.high %v8991_v30, %v9006_v5 }
 0x410   : > { %v21794_v44 = vrot.slane %v10694_v2, %v18959_v0  ;;  %v21797_v31 = vrot.slane %v16949_v11, %v18959_v0  ;;  %v9050_v4 = vcombine.high %v1872_v57, %v25052_v18  ;;  %v25429_v2 = vcombine.high %v21652_v26, %v21655_v46 }
 0x411   : > { %v10467_v19 = vrot.slane %v25428_v42, %v18959_v0  ;;  %v9057_v42 = vrot.slane %v1872_v57, %v18959_v0  ;;  %v10476_v1 = vcombine.low %v21660_v29, %v21663_v50  ;;  %v25430_v56 = vcombine.low %v21670_v22, %v21673_v54 }
 0x412   : > { %v10475_v11 = vrot.slane %v25429_v2, %v18959_v0  ;;  %v9022_v51 = vrot.slane %v9014_v39, %v18966_v10  ;;  %v9029_v30 = vrot.slane %v9015_v38, %v18966_v10  ;;  %v9030_v5 = vcombine.low %v8998_v40, %v9013_v20 }
 0x413   : > { %v10517_v60 = vrot.slane %v25430_v56, %v18959_v0  ;;  %v9031_v63 = vcombine.high %v8998_v40, %v9013_v20  ;;  %v9064_v57 = vrot.slane %v9050_v4, %v18959_v0  ;;  %v10483_v32 = vrot.slane %v10476_v1, %v18966_v10 }
 0x414   : > { %v10484_v46 = vcombine.low %v10467_v19, %v10475_v11  ;;  %v25431_v26 = vcombine.high %v21670_v22, %v21673_v54  ;;  %v21825_v50 = vrot.slane %v9030_v5, %v18966_v10  ;;  %v10744_v39 = vcombine.low %v9022_v51, %v9029_v30 }
 0x415   : > { %v21828_v56 = vrot.slane %v9031_v63, %v18966_v10  ;;  %v16951_v38 = vcombine.high %v9022_v51, %v9029_v30  ;;  %v10526_v20 = vcombine.low %v21680_v28, %v21683_v37  ;;  %v1874_v19 = vadd.f32 %v21223_v47, %v25352_v13 }
 0x416   : > { %v10525_v29 = vrot.slane %v25431_v26, %v18959_v0  ;;  %v10491_v40 = vrot.slane %v10484_v46, %v18966_v10  ;;  %v21836_v22 = vrot.slane %v10744_v39, %v18959_v0  ;;  %v25432_v51 = vcombine.low %v21152_v3, %v21155_v7  ;;  %v25434_v39 = vld [vmem:[#allocation94_spill] sm:$0xff] }
 0x417   : > { %v21839_v54 = vrot.slane %v16951_v38, %v18959_v0  ;;  %v10533_v11 = vrot.slane %v10526_v20, %v18966_v10  ;;  %v9065_v47 = vcombine.high %v1874_v19, %v25052_v18  ;;  %v9684_v5 = vcombine.low %v21164_v58, %v21169_v6 }
 0x418   : > { %v10534_v1 = vcombine.low %v10517_v60, %v10525_v29  ;;  %v10492_v2 = vcombine.low %v10483_v32, %v10491_v40  ;;  %v10493_v37 = vcombine.high %v10483_v32, %v10491_v40  ;;  %v9072_v60 = vrot.slane %v1874_v19, %v18959_v0  ;;  %v25433_v29 = vld [vmem:[#allocation93_spill] sm:$0xff]  ;;  %v25436_v32 = vld [vmem:[#allocation95_spill] sm:$0xff]  ;;  %v25437_v40 = vld [vmem:[#allocation96_spill] sm:$0xff] }
 0x419   : > { %v9683_v30 = vrot.slane %v25432_v51, %v18966_v10  ;;  %v25435_v38 = vcombine.low %v25433_v29, %v25434_v39  ;;  %v9079_v19 = vrot.slane %v9065_v47, %v18959_v0  ;;  %v9691_v3 = vrot.slane %v9684_v5, %v18966_v10 }
 0x41a   : > { %v10541_v28 = vrot.slane %v10534_v1, %v18966_v10  ;;  %v9734_v1 = vcombine.low %v25437_v40, %v25436_v32  ;;  %v9080_v4 = vcombine.low %v9057_v42, %v9072_v60  ;;  %v9081_v63 = vcombine.high %v9057_v42, %v9072_v60 }
 0x41b   : > { %v9733_v20 = vrot.slane %v25435_v38, %v18966_v10  ;;  %v1878_v6 = vadd.f32 %v21265_v34, %v25350_v33  ;;  %v9096_v29 = vcombine.low %v9064_v57, %v9079_v19  ;;  %v9097_v39 = vcombine.high %v9064_v57, %v9079_v19 }
 0x41c   : > { %v10542_v46 = vcombine.low %v10533_v11, %v10541_v28  ;;  %v10543_v26 = vcombine.high %v10533_v11, %v10541_v28  ;;  %v9741_v58 = vrot.slane %v9734_v1, %v18966_v10  ;;  %v9088_v11 = vrot.slane %v9080_v4, %v18966_v10 }
 0x41d   : > { %v9095_v28 = vrot.slane %v9081_v63, %v18966_v10  ;;  %v9692_v47 = vcombine.low %v9683_v30, %v9691_v3  ;;  %v9693_v42 = vcombine.high %v9683_v30, %v9691_v3  ;;  %v21869_v60 = vrot.slane %v9096_v29, %v18966_v10 }
 0x41e   : > { %v11252_v7 = vpack.c.bf16 %v10542_v46, %v10492_v2  ;;  %v11268_v51 = vpack.c.bf16 %v10543_v26, %v10493_v37  ;;  %v9742_v38 = vcombine.low %v9733_v20, %v9741_v58  ;;  %v21872_v2 = vrot.slane %v9097_v39, %v18966_v10 }
 0x41f   : > { %v10794_v37 = vcombine.low %v9088_v11, %v9095_v28  ;;  %v16953_v5 = vcombine.high %v9088_v11, %v9095_v28  ;;  %v9743_v46 = vcombine.high %v9733_v20, %v9741_v58  ;;  %v9116_v4 = vcombine.high %v1878_v6, %v25052_v18 }
 0x420   : > { %17237 = vmatprep.subr.bf16.mxu1 %v11252_v7  ;;  %17301 = vmatprep.subr.bf16.mxu0 %v11268_v51  ;;  %v11244_v34 = vpack.c.bf16 %v9742_v38, %v9692_v47  ;;  %v9123_v63 = vrot.slane %v1878_v6, %v18959_v0  ;;  %v10810_v30 = vcombine.low %v21869_v60, %v21872_v2 }
 0x421   : > { %v21877_v57 = vrot.slane %v10794_v37, %v18959_v0  ;;  %v21880_v26 = vrot.slane %v16953_v5, %v18959_v0  ;;  %v16954_v32 = vcombine.high %v21869_v60, %v21872_v2  ;;  %v11260_v40 = vpack.c.bf16 %v9743_v46, %v9693_v42  ;;  %v25471_v60 = vld [vmem:[#allocation134_spill] sm:$0xff] }
 0x422   : > { %17238 = vmatpush3.bf16.msra.mxu1 %v11244_v34  ;;  %v9130_v20 = vrot.slane %v9116_v4, %v18959_v0  ;;  %v1880_v1 = vadd.f32 %v21271_v8, %v25352_v13  ;;  %v1882_v19 = vadd.f32 %v21292_v36, %v25350_v33  ;;  %v25438_v3 = vcombine.low %v21701_v27, %v21704_v61 }
 0x423   : > { %v25439_v51 = vcombine.high %v21701_v27, %v21704_v61  ;;  %v10576_v6 = vcombine.low %v21709_v52, %v21712_v45  ;;  %v25440_v8 = vcombine.low %v21719_v14, %v21722_v16  ;;  %17302 = vmatpush3.bf16.msra.mxu0 %v11260_v40  ;;  %v25441_v52 = vcombine.high %v21719_v14, %v21722_v16 }
 0x424   : > { %v10567_v7 = vrot.slane %v25438_v3, %v18959_v0  ;;  %v9131_v36 = vcombine.high %v1880_v1, %v25052_v18  ;;  %v9138_v28 = vrot.slane %v1880_v1, %v18959_v0  ;;  %v9182_v29 = vcombine.high %v1882_v19, %v25052_v18 }
 0x425   : > { %v10575_v58 = vrot.slane %v25439_v51, %v18959_v0  ;;  %v10617_v11 = vrot.slane %v25440_v8, %v18959_v0  ;;  %v9189_v39 = vrot.slane %v1882_v19, %v18959_v0  ;;  %v10583_v27 = vrot.slane %v10576_v6, %v18966_v10 }
 0x426   : > { %v10625_v45 = vrot.slane %v25441_v52, %v18959_v0  ;;  %v10626_v47 = vcombine.low %v21731_v25, %v21734_v21  ;;  %v9145_v38 = vrot.slane %v9131_v36, %v18959_v0  ;;  %v9146_v42 = vcombine.low %v9123_v63, %v9138_v28 }
 0x427   : > { %v10584_v61 = vcombine.low %v10567_v7, %v10575_v58  ;;  %v9147_v37 = vcombine.high %v9123_v63, %v9138_v28  ;;  %v9196_v5 = vrot.slane %v9182_v29, %v18959_v0  ;;  %v1884_v40 = vadd.f32 %v21315_v17, %v25352_v13 }
 0x428   : > { %v10633_v46 = vrot.slane %v10626_v47, %v18966_v10  ;;  %v10634_v4 = vcombine.low %v10617_v11, %v10625_v45  ;;  %v9154_v14 = vrot.slane %v9146_v42, %v18966_v10  ;;  %v9162_v1 = vcombine.low %v9130_v20, %v9145_v38 }
 0x429   : > { %v10591_v34 = vrot.slane %v10584_v61, %v18966_v10  ;;  %v9161_v16 = vrot.slane %v9147_v37, %v18966_v10  ;;  %v9163_v25 = vcombine.high %v9130_v20, %v9145_v38  ;;  %v9197_v3 = vcombine.high %v1884_v40, %v25052_v18 }
 0x42a   : > { %v10641_v19 = vrot.slane %v10634_v4, %v18966_v10  ;;  %v21927_v7 = vrot.slane %v9162_v1, %v18966_v10  ;;  %v9204_v11 = vrot.slane %v1884_v40, %v18959_v0  ;;  %v25442_v37 = vcombine.low %v21216_v55, %v21219_v43 }
 0x42b   : > { %v10592_v21 = vcombine.low %v10583_v27, %v10591_v34  ;;  %v10593_v63 = vcombine.high %v10583_v27, %v10591_v34  ;;  %v21930_v51 = vrot.slane %v9163_v25, %v18966_v10  ;;  %v10844_v58 = vcombine.low %v9154_v14, %v9161_v16  ;;  %v25478_v27 = vld [vmem:[#allocation110_spill] sm:$0xff] }
 0x42c   : > { %v16955_v17 = vcombine.high %v9154_v14, %v9161_v16  ;;  %v10642_v6 = vcombine.low %v10633_v46, %v10641_v19  ;;  %v10643_v8 = vcombine.high %v10633_v46, %v10641_v19  ;;  %v9211_v20 = vrot.slane %v9197_v3, %v18959_v0  ;;  %v25443_v14 = vld [vmem:[#allocation97_spill] sm:$0xff]  ;;  %v25444_v16 = vld [vmem:[#allocation98_spill] sm:$0xff]  ;;  %v25448_v3 = vld [vmem:[#allocation131_spill] sm:$0xff] }
 0x42d   : > { %v21935_v36 = vrot.slane %v10844_v58, %v18959_v0  ;;  %v9212_v45 = vcombine.low %v9189_v39, %v9204_v11  ;;  %v9213_v47 = vcombine.high %v9189_v39, %v9204_v11  ;;  %v9783_v34 = vrot.slane %v25442_v37, %v18966_v10 }
 0x42e   : > { %v21938_v28 = vrot.slane %v16955_v17, %v18959_v0  ;;  %v11253_v61 = vpack.c.bf16 %v10642_v6, %v10592_v21  ;;  %v11269_v52 = vpack.c.bf16 %v10643_v8, %v10593_v63  ;;  %v9228_v38 = vcombine.low %v9196_v5, %v9211_v20  ;;  %v25476_v6 = vld [vmem:[#allocation107_spill] sm:$0xff] }
 0x42f   : > { %v9229_v42 = vcombine.high %v9196_v5, %v9211_v20  ;;  %v9784_v46 = vcombine.low %v21226_v59, %v21229_v48  ;;  %v9220_v4 = vrot.slane %v9212_v45, %v18966_v10  ;;  %v9227_v40 = vrot.slane %v9213_v47, %v18966_v10  ;;  %v25446_v59 = vld [vmem:[#allocation99_spill] sm:$0xff]  ;;  %v25447_v48 = vld [vmem:[#allocation100_spill] sm:$0xff] }
 0x430   : > { %17239 = vmatprep.subr.bf16.mxu1 %v11253_v61  ;;  %17303 = vmatprep.subr.bf16.mxu0 %v11269_v52  ;;  %v25445_v39 = vcombine.low %v25443_v14, %v25444_v16  ;;  %v21957_v5 = vrot.slane %v9228_v38, %v18966_v10  ;;  %v9834_v25 = vcombine.low %v25447_v48, %v25446_v59 }
 0x431   : > { %v21960_v55 = vrot.slane %v9229_v42, %v18966_v10  ;;  %v9791_v43 = vrot.slane %v9784_v46, %v18966_v10  ;;  %v10894_v21 = vcombine.low %v9220_v4, %v9227_v40  ;;  %v16957_v19 = vcombine.high %v9220_v4, %v9227_v40  ;;  %v25449_v4 = vld [vmem:[#allocation114_spill] sm:$0xff] }
 0x432   : > { %v9833_v1 = vrot.slane %v25445_v39, %v18966_v10  ;;  %v1888_v63 = vadd.f32 %v21349_v53, %v25350_v33  ;;  %v1890_v58 = vadd.f32 %v25448_v3, %v25352_v13  ;;  %v9841_v11 = vrot.slane %v9834_v25, %v18966_v10 }
 0x433   : > { %v9792_v8 = vcombine.low %v9783_v34, %v9791_v43  ;;  %v21975_v20 = vrot.slane %v10894_v21, %v18959_v0  ;;  %v21978_v61 = vrot.slane %v16957_v19, %v18959_v0  ;;  %v9793_v52 = vcombine.high %v9783_v34, %v9791_v43 }
 0x434   : > { %v9248_v53 = vcombine.high %v1888_v63, %v25052_v18  ;;  %v9842_v45 = vcombine.low %v9833_v1, %v9841_v11  ;;  %v9843_v47 = vcombine.high %v9833_v1, %v9841_v11  ;;  %v9255_v38 = vrot.slane %v1888_v63, %v18959_v0 }
 0x435   : > { %v9263_v42 = vcombine.high %v1890_v58, %v25052_v18  ;;  %v9270_v46 = vrot.slane %v1890_v58, %v18959_v0  ;;  %v1892_v40 = vadd.f32 %v25449_v4, %v25350_v33  ;;  %v25450_v14 = vcombine.low %v21762_v9, %v21765_v62 }
 0x436   : > { %v9262_v37 = vrot.slane %v9248_v53, %v18959_v0  ;;  %v11245_v16 = vpack.c.bf16 %v9842_v45, %v9792_v8  ;;  %v11261_v39 = vpack.c.bf16 %v9843_v47, %v9793_v52  ;;  %v25451_v43 = vcombine.high %v21762_v9, %v21765_v62 }
 0x437   : > { %v10667_v34 = vrot.slane %v25450_v14, %v18959_v0  ;;  %v9277_v1 = vrot.slane %v9263_v42, %v18959_v0  ;;  %v9278_v48 = vcombine.low %v9255_v38, %v9270_v46  ;;  %v9279_v25 = vcombine.high %v9255_v38, %v9270_v46 }
 0x438   : > { %v10675_v59 = vrot.slane %v25451_v43, %v18959_v0  ;;  %v9314_v21 = vcombine.high %v1892_v40, %v25052_v18  ;;  %v9321_v19 = vrot.slane %v1892_v40, %v18959_v0  ;;  %17240 = vmatpush3.bf16.msra.mxu1 %v11245_v16  ;;  %17304 = vmatpush3.bf16.msra.mxu0 %v11261_v39 }
 0x439   : > { %v9294_v63 = vcombine.low %v9262_v37, %v9277_v1  ;;  %v9295_v3 = vcombine.high %v9262_v37, %v9277_v1  ;;  %v10676_v58 = vcombine.low %v21770_v49, %v21773_v41  ;;  %v9286_v8 = vrot.slane %v9278_v48, %v18966_v10 }
 0x43a   : > { %v9293_v11 = vrot.slane %v9279_v25, %v18966_v10  ;;  %v9328_v9 = vrot.slane %v9314_v21, %v18959_v0  ;;  %v10684_v62 = vcombine.low %v10667_v34, %v10675_v59  ;;  %v25452_v47 = vcombine.low %v21780_v12, %v21783_v15 }
 0x43b   : > { %v22004_v52 = vrot.slane %v9294_v63, %v18966_v10  ;;  %v22007_v53 = vrot.slane %v9295_v3, %v18966_v10  ;;  %v10683_v45 = vrot.slane %v10676_v58, %v18966_v10  ;;  %v25453_v37 = vcombine.high %v21780_v12, %v21783_v15  ;;  %v25457_v63 = vld [vmem:[#allocation103_spill] sm:$0xff]  ;;  %v25458_v3 = vld [vmem:[#allocation104_spill] sm:$0xff] }
 0x43c   : > { %v10717_v49 = vrot.slane %v25452_v47, %v18959_v0  ;;  %v10944_v41 = vcombine.low %v9286_v8, %v9293_v11  ;;  %v16959_v38 = vcombine.high %v9286_v8, %v9293_v11  ;;  %v10691_v42 = vrot.slane %v10684_v62, %v18966_v10  ;;  %v25459_v8 = vld [vmem:[#allocation101_spill] sm:$0xff]  ;;  %v25460_v11 = vld [vmem:[#allocation102_spill] sm:$0xff] }
 0x43d   : > { %v10725_v46 = vrot.slane %v25453_v37, %v18959_v0  ;;  %v10726_v14 = vcombine.low %v21794_v44, %v21797_v31  ;;  %v1894_v34 = vadd.f32 %v21419_v35, %v25352_v13  ;;  %v25454_v31 = vld [vmem:[#allocation123_spill] sm:$0xff]  ;;  %v25455_v35 = vld [vmem:[#allocation128_spill] sm:$0xff]  ;;  %v9884_v58 = vcombine.low %v25458_v3, %v25457_v63 }
 0x43e   : > { %v22028_v16 = vrot.slane %v10944_v41, %v18959_v0  ;;  %v22031_v39 = vrot.slane %v16959_v38, %v18959_v0  ;;  %v10692_v12 = vcombine.low %v10683_v45, %v10691_v42  ;;  %v10693_v43 = vcombine.high %v10683_v45, %v10691_v42  ;;  %v25462_v38 = vld [vmem:[#allocation106_spill] sm:$0xff]  ;;  %v25463_v42 = vld [vmem:[#allocation105_spill] sm:$0xff] }
 0x43f   : > { %v10734_v15 = vcombine.low %v10717_v49, %v10725_v46  ;;  %v10733_v1 = vrot.slane %v10726_v14, %v18966_v10  ;;  %v9329_v59 = vcombine.high %v1894_v34, %v25052_v18  ;;  %v9336_v48 = vrot.slane %v1894_v34, %v18959_v0 }
 0x440   : > { %v25456_v25 = vcombine.low %v25454_v31, %v25455_v35  ;;  %v25461_v62 = vcombine.low %v25459_v8, %v25460_v11  ;;  %v9934_v37 = vcombine.low %v25463_v42, %v25462_v38  ;;  %v9891_v34 = vrot.slane %v9884_v58, %v18966_v10  ;;  %v22064_v11 = vpop.f32.mrb[64].mxu0 }
 0x441   : > { %v10741_v44 = vrot.slane %v10734_v15, %v18966_v10  ;;  %v9343_v45 = vrot.slane %v9329_v59, %v18959_v0  ;;  %v9344_v49 = vcombine.low %v9321_v19, %v9336_v48  ;;  %v9345_v41 = vcombine.high %v9321_v19, %v9336_v48 }
 0x442   : > { %v9883_v21 = vrot.slane %v25456_v25, %v18966_v10  ;;  %v9933_v47 = vrot.slane %v25461_v62, %v18966_v10  ;;  %v1898_v15 = vadd.f32 %v21442_v24, %v25350_v33  ;;  %v9941_v19 = vrot.slane %v9934_v37, %v18966_v10  ;;  %v22062_v24 = vpop.f32.mrb[96].mxu1 }
 0x443   : > { %v10742_v46 = vcombine.low %v10733_v1, %v10741_v44  ;;  %v10743_v14 = vcombine.high %v10733_v1, %v10741_v44  ;;  %v9352_v31 = vrot.slane %v9344_v49, %v18966_v10  ;;  %v9359_v35 = vrot.slane %v9345_v41, %v18966_v10  ;;  %v22066_v62 = vpop.f32.mrb[97].mxu1 }
 0x444   : > { %v9360_v25 = vcombine.low %v9328_v9, %v9343_v45  ;;  %v9361_v63 = vcombine.high %v9328_v9, %v9343_v45  ;;  %v9892_v8 = vcombine.low %v9883_v21, %v9891_v34  ;;  %v9942_v9 = vcombine.low %v9933_v47, %v9941_v19  ;;  %25464 = vst [vmem:[#allocation37_spill] sm:$0xff] %v22066_v62  ;;  %v22068_v45 = vpop.f32.mrb[65].mxu0  ;;  %v22080_v37 = vpop.f32.mrb[98].mxu1 }
 0x445   : > { %v11254_v3 = vpack.c.bf16 %v10742_v46, %v10692_v12  ;;  %v11270_v59 = vpack.c.bf16 %v10743_v14, %v10693_v43  ;;  %v10994_v44 = vcombine.low %v9352_v31, %v9359_v35  ;;  %v16961_v58 = vcombine.high %v9352_v31, %v9359_v35  ;;  %v22086_v31 = vpop.f32.mrb[99].mxu1 }
 0x446   : > { %v22057_v48 = vrot.slane %v9360_v25, %v18966_v10  ;;  %v22060_v1 = vrot.slane %v9361_v63, %v18966_v10  ;;  %v9893_v12 = vcombine.high %v9883_v21, %v9891_v34  ;;  %v9943_v43 = vcombine.high %v9933_v47, %v9941_v19  ;;  %v22082_v21 = vpop.f32.mrb[66].mxu0  ;;  %25465 = vst [vmem:[#allocation39_spill] sm:$0xff] %v22086_v31  ;;  %v25467_v63 = vld [vmem:[#allocation126_spill] sm:$0xff] }
 0x447   : > { %17241 = vmatprep.subr.bf16.mxu1 %v11254_v3  ;;  %17305 = vmatprep.subr.bf16.mxu0 %v11270_v59  ;;  %v22071_v49 = vrot.slane %v10994_v44, %v18959_v0  ;;  %v22074_v41 = vrot.slane %v16961_v58, %v18959_v0  ;;  %v11246_v47 = vpack.c.bf16 %v9942_v9, %v9892_v8  ;;  %v22088_v35 = vpop.f32.mrb[67].mxu0 }
 0x448   : > { %v11262_v46 = vpack.c.bf16 %v9943_v43, %v9893_v12  ;;  %v9380_v14 = vcombine.high %v1898_v15, %v25052_v18  ;;  %v9387_v34 = vrot.slane %v1898_v15, %v18959_v0  ;;  %25466 = vst [vmem:[#allocation40_spill] sm:$0xff] %v22088_v35  ;;  %v1900_v25 = vadd.f32 %v21453_v23, %v25352_v13 }
 0x449   : > { %v1902_v3 = vadd.f32 %v25467_v63, %v25350_v33  ;;  %v25468_v59 = vcombine.low %v21825_v50, %v21828_v56  ;;  %v25469_v19 = vcombine.high %v21825_v50, %v21828_v56  ;;  %17242 = vmatpush3.bf16.msra.mxu1 %v11246_v47  ;;  %v10776_v23 = vcombine.low %v21836_v22, %v21839_v54  ;;  %v22122_v63 = vpop.f32.mrb[68].mxu0 }
 0x44a   : > { %17306 = vmatpush3.bf16.msra.mxu0 %v11262_v46  ;;  %v9394_v44 = vrot.slane %v9380_v14, %v18959_v0  ;;  %v10817_v58 = vrot.slane %v10810_v30, %v18959_v0  ;;  %v9395_v9 = vcombine.high %v1900_v25, %v25052_v18  ;;  %v9402_v12 = vrot.slane %v1900_v25, %v18959_v0 }
 0x44b   : > { %v10767_v8 = vrot.slane %v25468_v59, %v18959_v0  ;;  %v10775_v15 = vrot.slane %v25469_v19, %v18959_v0  ;;  %v9446_v43 = vcombine.high %v1902_v3, %v25052_v18  ;;  %v9453_v50 = vrot.slane %v1902_v3, %v18959_v0  ;;  %25470 = vst [vmem:[#allocation42_spill] sm:$0xff] %v22122_v63  ;;  %v22124_v3 = vpop.f32.mrb[100].mxu1 }
 0x44c   : > { %v10783_v56 = vrot.slane %v10776_v23, %v18966_v10  ;;  %v10825_v22 = vrot.slane %v16954_v32, %v18959_v0  ;;  %v10826_v54 = vcombine.low %v21877_v57, %v21880_v26  ;;  %v9409_v30 = vrot.slane %v9395_v9, %v18959_v0  ;;  %v22130_v32 = vpop.f32.mrb[101].mxu1  ;;  %v22132_v57 = vpop.f32.mrb[69].mxu0 }
 0x44d   : > { %v10784_v47 = vcombine.low %v10767_v8, %v10775_v15  ;;  %v9410_v46 = vcombine.low %v9387_v34, %v9402_v12  ;;  %v9411_v14 = vcombine.high %v9387_v34, %v9402_v12  ;;  %v9460_v25 = vrot.slane %v9446_v43, %v18959_v0  ;;  %25472 = vst [vmem:[#allocation41_spill] sm:$0xff] %v22132_v57  ;;  %v22136_v9 = vpop.f32.mrb[102].mxu1  ;;  %v22138_v12 = vpop.f32.mrb[70].mxu0 }
 0x44e   : > { %v10833_v8 = vrot.slane %v10826_v54, %v18966_v10  ;;  %v10834_v19 = vcombine.low %v10817_v58, %v10825_v22  ;;  %v1904_v2 = vadd.f32 %v25471_v60, %v25352_v13  ;;  %v9426_v15 = vcombine.low %v9394_v44, %v9409_v30  ;;  %25473 = vst [vmem:[#allocation43_spill] sm:$0xff] %v22138_v12  ;;  %v22142_v54 = vpop.f32.mrb[103].mxu1  ;;  %v22144_v60 = vpop.f32.mrb[71].mxu0 }
 0x44f   : > { %v10791_v59 = vrot.slane %v10784_v47, %v18966_v10  ;;  %v9418_v26 = vrot.slane %v9410_v46, %v18966_v10  ;;  %v9425_v34 = vrot.slane %v9411_v14, %v18966_v10  ;;  %v9427_v23 = vcombine.high %v9394_v44, %v9409_v30  ;;  %25474 = vst [vmem:[#allocation44_spill] sm:$0xff] %v22144_v60  ;;  %v22170_v12 = vpop.f32.mrb[72].mxu0 }
 0x450   : > { %v10841_v58 = vrot.slane %v10834_v19, %v18966_v10  ;;  %v9461_v22 = vcombine.high %v1904_v2, %v25052_v18  ;;  %v22147_v46 = vrot.slane %v9426_v15, %v18966_v10  ;;  %v9468_v40 = vrot.slane %v1904_v2, %v18959_v0  ;;  %25480 = vst [vmem:[#allocation48_spill] sm:$0xff] %v22170_v12  ;;  %v22172_v15 = vpop.f32.mrb[104].mxu1 }
 0x451   : > { %v10792_v43 = vcombine.low %v10783_v56, %v10791_v59  ;;  %v10793_v47 = vcombine.high %v10783_v56, %v10791_v59  ;;  %v22150_v14 = vrot.slane %v9427_v23, %v18966_v10  ;;  %v11044_v44 = vcombine.low %v9418_v26, %v9425_v34  ;;  %25481 = vst [vmem:[#allocation47_spill] sm:$0xff] %v22172_v15 }
 0x452   : > { %v16963_v30 = vcombine.high %v9418_v26, %v9425_v34  ;;  %v10842_v42 = vcombine.low %v10833_v8, %v10841_v58  ;;  %v10843_v38 = vcombine.high %v10833_v8, %v10841_v58  ;;  %v9475_v56 = vrot.slane %v9461_v22, %v18959_v0  ;;  %v25475_v22 = vld [vmem:[#allocation108_spill] sm:$0xff] }
 0x453   : > { %v22155_v59 = vrot.slane %v11044_v44, %v18959_v0  ;;  %v9476_v34 = vcombine.low %v9453_v50, %v9468_v40  ;;  %v9477_v8 = vcombine.high %v9453_v50, %v9468_v40  ;;  %v25477_v44 = vcombine.low %v25475_v22, %v25476_v6  ;;  %v25483_v50 = vld [vmem:[#allocation139_spill] sm:$0xff]  ;;  %v22180_v6 = vpop.f32.mrb[105].mxu1 }
 0x454   : > { %v22158_v19 = vrot.slane %v16963_v30, %v18959_v0  ;;  %v11255_v4 = vpack.c.bf16 %v10842_v42, %v10792_v43  ;;  %v11271_v26 = vpack.c.bf16 %v10843_v38, %v10793_v47  ;;  %v9492_v58 = vcombine.low %v9460_v25, %v9475_v56  ;;  %v25479_v30 = vld [vmem:[#allocation109_spill] sm:$0xff]  ;;  %v25482_v42 = vld [vmem:[#allocation138_spill] sm:$0xff]  ;;  %25485 = vst [vmem:[#allocation45_spill] sm:$0xff] %v22180_v6  ;;  %v22182_v47 = vpop.f32.mrb[73].mxu0 }
 0x455   : > { %v9493_v2 = vcombine.high %v9460_v25, %v9475_v56  ;;  %v9983_v17 = vrot.slane %v25477_v44, %v18966_v10  ;;  %v9984_v29 = vcombine.low %v25479_v30, %v25478_v27  ;;  %v9484_v38 = vrot.slane %v9476_v34, %v18966_v10  ;;  %25486 = vst [vmem:[#allocation46_spill] sm:$0xff] %v22182_v47  ;;  %v25488_v34 = vld [vmem:[#allocation113_spill] sm:$0xff]  ;;  %v22193_v22 = vpop.f32.mrb[74].mxu0  ;;  %v22195_v44 = vpop.f32.mrb[106].mxu1 }
 0x456   : > { %17243 = vmatprep.subr.bf16.mxu1 %v11255_v4  ;;  %17307 = vmatprep.subr.bf16.mxu0 %v11271_v26  ;;  %v9491_v40 = vrot.slane %v9477_v8, %v18966_v10  ;;  %v25484_v25 = vcombine.low %v25482_v42, %v25483_v50  ;;  %v22185_v27 = vrot.slane %v9492_v58, %v18966_v10  ;;  %v25487_v26 = vld [vmem:[#allocation112_spill] sm:$0xff]  ;;  %v25491_v50 = vld [vmem:[#allocation141_spill] sm:$0xff]  ;;  %v22201_v12 = vpop.f32.mrb[107].mxu1 }
 0x457   : > { %v22188_v56 = vrot.slane %v9493_v2, %v18966_v10  ;;  %v9991_v4 = vrot.slane %v9984_v29, %v18966_v10  ;;  %v10034_v8 = vcombine.low %v25488_v34, %v25487_v26  ;;  %25489 = vst [vmem:[#allocation50_spill] sm:$0xff] %v22193_v22  ;;  %25490 = vst [vmem:[#allocation49_spill] sm:$0xff] %v22195_v44  ;;  %v25492_v58 = vld [vmem:[#allocation144_spill] sm:$0xff]  ;;  %v22203_v2 = vpop.f32.mrb[75].mxu0 }
 0x458   : > { %v10033_v43 = vrot.slane %v25484_v25, %v18966_v10  ;;  %v11094_v30 = vcombine.low %v9484_v38, %v9491_v40  ;;  %v16965_v42 = vcombine.high %v9484_v38, %v9491_v40  ;;  %v1908_v25 = vadd.f32 %v25491_v50, %v25350_v33  ;;  %25493 = vst [vmem:[#allocation53_spill] sm:$0xff] %v22201_v12 }
 0x459   : > { %v1910_v23 = vadd.f32 %v25492_v58, %v25352_v13  ;;  %25494 = vst [vmem:[#allocation54_spill] sm:$0xff] %v22203_v2  ;;  %v9992_v34 = vcombine.low %v9983_v17, %v9991_v4  ;;  %v10041_v22 = vrot.slane %v10034_v8, %v18966_v10  ;;  %v9993_v50 = vcombine.high %v9983_v17, %v9991_v4  ;;  %v25495_v8 = vld [vmem:[#allocation28_spill] sm:$0xff] }
 0x45a   : > { %v22211_v38 = vrot.slane %v11094_v30, %v18959_v0  ;;  %v22214_v40 = vrot.slane %v16965_v42, %v18959_v0  ;;  %v9512_v58 = vcombine.high %v1908_v25, %v25052_v18  ;;  %v9519_v44 = vrot.slane %v1908_v25, %v18959_v0 }
 0x45b   : > { %v10042_v47 = vcombine.low %v10033_v43, %v10041_v22  ;;  %v10043_v2 = vcombine.high %v10033_v43, %v10041_v22  ;;  %v9527_v29 = vcombine.high %v1910_v23, %v25052_v18  ;;  %v9534_v12 = vrot.slane %v1910_v23, %v18959_v0  ;;  %v22234_v23 = vpop.f32.mrb[108].mxu1 }
 0x45c   : > { %v9526_v26 = vrot.slane %v9512_v58, %v18959_v0  ;;  %v1912_v30 = vadd.f32 %v25495_v8, %v25350_v33  ;;  %v25496_v42 = vcombine.low %v21927_v7, %v21930_v51  ;;  %v25497_v22 = vcombine.high %v21927_v7, %v21930_v51  ;;  %v22232_v58 = vpop.f32.mrb[76].mxu0  ;;  %25499 = vst [vmem:[#allocation52_spill] sm:$0xff] %v22234_v23 }
 0x45d   : > { %v11247_v4 = vpack.c.bf16 %v10042_v47, %v9992_v34  ;;  %v11263_v15 = vpack.c.bf16 %v10043_v2, %v9993_v50  ;;  %v9541_v43 = vrot.slane %v9527_v29, %v18959_v0  ;;  %25498 = vst [vmem:[#allocation51_spill] sm:$0xff] %v22232_v58  ;;  %v9542_v6 = vcombine.low %v9519_v44, %v9534_v12  ;;  %v22240_v47 = vpop.f32.mrb[77].mxu0  ;;  %v25514_v58 = vld [vmem:[#allocation119_spill] sm:$0xff] }
 0x45e   : > { %v10867_v17 = vrot.slane %v25496_v42, %v18959_v0  ;;  %v10875_v25 = vrot.slane %v25497_v22, %v18959_v0  ;;  %v9543_v33 = vcombine.high %v9519_v44, %v9534_v12  ;;  %v9578_v8 = vcombine.high %v1912_v30, %v25052_v18  ;;  %v22238_v42 = vpop.f32.mrb[109].mxu1  ;;  %25501 = vst [vmem:[#allocation55_spill] sm:$0xff] %v22240_v47  ;;  %v22244_v51 = vpop.f32.mrb[78].mxu0 }
 0x45f   : > { %v9585_v60 = vrot.slane %v1912_v30, %v18959_v0  ;;  %25500 = vst [vmem:[#allocation56_spill] sm:$0xff] %v22238_v42  ;;  %17244 = vmatpush3.bf16.msra.mxu1 %v11247_v4  ;;  %17308 = vmatpush3.bf16.msra.mxu0 %v11263_v15  ;;  %v9558_v2 = vcombine.low %v9526_v26, %v9541_v43  ;;  %25502 = vst [vmem:[#allocation57_spill] sm:$0xff] %v22244_v51  ;;  %v22246_v34 = vpop.f32.mrb[110].mxu1  ;;  %v22253_v4 = vpop.f32.mrb[79].mxu0 }
 0x460   : > { %v9559_v29 = vcombine.high %v9526_v26, %v9541_v43  ;;  %v10876_v7 = vcombine.low %v21935_v36, %v21938_v28  ;;  %25503 = vst [vmem:[#allocation58_spill] sm:$0xff] %v22246_v34  ;;  %v9550_v12 = vrot.slane %v9542_v6, %v18966_v10  ;;  %v9557_v44 = vrot.slane %v9543_v33, %v18966_v10  ;;  %v22251_v22 = vpop.f32.mrb[111].mxu1  ;;  %v25521_v34 = vld [vmem:[#allocation124_spill] sm:$0xff] }
 0x461   : > { %v9592_v50 = vrot.slane %v9578_v8, %v18959_v0  ;;  %v10884_v30 = vcombine.low %v10867_v17, %v10875_v25  ;;  %25504 = vst [vmem:[#allocation60_spill] sm:$0xff] %v22251_v22  ;;  %25505 = vst [vmem:[#allocation59_spill] sm:$0xff] %v22253_v4  ;;  %v22256_v15 = vrot.slane %v9558_v2, %v18966_v10  ;;  %v22288_v4 = vpop.f32.mrb[80].mxu0  ;;  %v25522_v22 = vld [vmem:[#allocation121_spill] sm:$0xff] }
 0x462   : > { %v22259_v36 = vrot.slane %v9559_v29, %v18966_v10  ;;  %v10883_v28 = vrot.slane %v10876_v7, %v18966_v10  ;;  %v25506_v6 = vcombine.low %v21957_v5, %v21960_v55  ;;  %v11144_v43 = vcombine.low %v9550_v12, %v9557_v44  ;;  %25509 = vst [vmem:[#allocation61_spill] sm:$0xff] %v22288_v4  ;;  %v22305_v4 = vpop.f32.mrb[81].mxu0 }
 0x463   : > { %v16967_v33 = vcombine.high %v9550_v12, %v9557_v44  ;;  %v10891_v17 = vrot.slane %v10884_v30, %v18966_v10  ;;  %v25507_v25 = vcombine.high %v21957_v5, %v21960_v55  ;;  %v10926_v7 = vcombine.low %v21975_v20, %v21978_v61  ;;  %v22290_v20 = vpop.f32.mrb[112].mxu1  ;;  %v25511_v61 = vld [vmem:[#allocation115_spill] sm:$0xff]  ;;  %25520 = vst [vmem:[#allocation63_spill] sm:$0xff] %v22305_v4 }
 0x464   : > { %v10917_v26 = vrot.slane %v25506_v6, %v18959_v0  ;;  %v25508_v6 = vld [vmem:[#allocation31_spill] sm:$0xff]  ;;  %v22280_v12 = vrot.slane %v11144_v43, %v18959_v0  ;;  %25510 = vst [vmem:[#allocation62_spill] sm:$0xff] %v22290_v20  ;;  %v25512_v43 = vld [vmem:[#allocation117_spill] sm:$0xff] }
 0x465   : > { %v10925_v8 = vrot.slane %v25507_v25, %v18959_v0  ;;  %v1914_v51 = vadd.f32 %v25508_v6, %v25352_v13  ;;  %v22283_v44 = vrot.slane %v16967_v33, %v18959_v0  ;;  %v10892_v5 = vcombine.low %v10883_v28, %v10891_v17 }
 0x466   : > { %v10933_v30 = vrot.slane %v10926_v7, %v18966_v10  ;;  %v10893_v25 = vcombine.high %v10883_v28, %v10891_v17  ;;  %v25513_v33 = vcombine.low %v25511_v61, %v25512_v43  ;;  %v25516_v28 = vld [vmem:[#allocation120_spill] sm:$0xff]  ;;  %v25517_v17 = vld [vmem:[#allocation122_spill] sm:$0xff]  ;;  %v10134_v61 = vcombine.low %v25522_v22, %v25521_v34  ;;  %v22310_v43 = vpop.f32.mrb[82].mxu0 }
 0x467   : > { %v10934_v55 = vcombine.low %v10917_v26, %v10925_v8  ;;  %v9593_v2 = vcombine.high %v1914_v51, %v25052_v18  ;;  %v9600_v29 = vrot.slane %v1914_v51, %v18959_v0  ;;  %v25515_v26 = vld [vmem:[#allocation116_spill] sm:$0xff]  ;;  %v25518_v7 = vcombine.low %v25516_v28, %v25517_v17  ;;  %v22303_v51 = vpop.f32.mrb[113].mxu1  ;;  %25523 = vst [vmem:[#allocation65_spill] sm:$0xff] %v22310_v43 }
 0x468   : > { %v10083_v6 = vrot.slane %v25513_v33, %v18966_v10  ;;  %v10084_v8 = vcombine.low %v25515_v26, %v25514_v58  ;;  %25519 = vst [vmem:[#allocation64_spill] sm:$0xff] %v22303_v51  ;;  %v22312_v33 = vpop.f32.mrb[114].mxu1  ;;  %v25525_v17 = vcombine.low %v22004_v52, %v22007_v53 }
 0x469   : > { %v10941_v13 = vrot.slane %v10934_v55, %v18966_v10  ;;  %v10133_v18 = vrot.slane %v25518_v7, %v18966_v10  ;;  %v9607_v20 = vrot.slane %v9593_v2, %v18959_v0  ;;  %v9608_v55 = vcombine.low %v9585_v60, %v9600_v29  ;;  %25524 = vst [vmem:[#allocation66_spill] sm:$0xff] %v22312_v33  ;;  %v22319_v4 = vpop.f32.mrb[115].mxu1  ;;  %v22321_v2 = vpop.f32.mrb[83].mxu0 }
 0x46a   : > { %v9609_v47 = vcombine.high %v9585_v60, %v9600_v29  ;;  %v10091_v28 = vrot.slane %v10084_v8, %v18966_v10  ;;  %v10967_v7 = vrot.slane %v25525_v17, %v18959_v0  ;;  %25526 = vst [vmem:[#allocation68_spill] sm:$0xff] %v22319_v4  ;;  %25527 = vst [vmem:[#allocation67_spill] sm:$0xff] %v22321_v2 }
 0x46b   : > { %v10942_v58 = vcombine.low %v10933_v30, %v10941_v13  ;;  %v10943_v26 = vcombine.high %v10933_v30, %v10941_v13  ;;  %v9616_v60 = vrot.slane %v9608_v55, %v18966_v10  ;;  %v9624_v22 = vcombine.low %v9592_v50, %v9607_v20 }
 0x46c   : > { %v9623_v34 = vrot.slane %v9609_v47, %v18966_v10  ;;  %v9625_v29 = vcombine.high %v9592_v50, %v9607_v20  ;;  %v10092_v30 = vcombine.low %v10083_v6, %v10091_v28  ;;  %v10141_v13 = vrot.slane %v10134_v61, %v18966_v10  ;;  %v22342_v61 = vpop.f32.mrb[84].mxu0 }
 0x46d   : > { %v11256_v43 = vpack.c.bf16 %v10942_v58, %v10892_v5  ;;  %v11272_v33 = vpack.c.bf16 %v10943_v26, %v10893_v25  ;;  %v22327_v8 = vrot.slane %v9624_v22, %v18966_v10  ;;  %v10093_v2 = vcombine.high %v10083_v6, %v10091_v28  ;;  %v22344_v58 = vpop.f32.mrb[116].mxu1  ;;  %v22354_v26 = vpop.f32.mrb[85].mxu0 }
 0x46e   : > { %v22330_v17 = vrot.slane %v9625_v29, %v18966_v10  ;;  %v11194_v4 = vcombine.low %v9616_v60, %v9623_v34  ;;  %v16969_v51 = vcombine.high %v9616_v60, %v9623_v34  ;;  %v10142_v55 = vcombine.low %v10133_v18, %v10141_v13  ;;  %v22370_v29 = vpop.f32.mrb[86].mxu0 }
 0x46f   : > { %17245 = vmatprep.subr.bf16.mxu1 %v11256_v43  ;;  %17309 = vmatprep.subr.bf16.mxu0 %v11272_v33  ;;  %v10143_v47 = vcombine.high %v10133_v18, %v10141_v13  ;;  %v25528_v18 = vcombine.high %v22004_v52, %v22007_v53  ;;  %v10976_v6 = vcombine.low %v22028_v16, %v22031_v39  ;;  %v25531_v53 = vld [vmem:[#allocation125_spill] sm:$0xff]  ;;  %v25532_v16 = vld [vmem:[#allocation127_spill] sm:$0xff] }
 0x470   : > { %v22333_v50 = vrot.slane %v11194_v4, %v18959_v0  ;;  %v22336_v5 = vrot.slane %v16969_v51, %v18959_v0  ;;  %v11248_v43 = vpack.c.bf16 %v10142_v55, %v10092_v30  ;;  %v22352_v51 = vpop.f32.mrb[117].mxu1  ;;  %v25529_v28 = vcombine.low %v22057_v48, %v22060_v1 }
 0x471   : > { %v11264_v33 = vpack.c.bf16 %v10143_v47, %v10093_v2  ;;  %v10975_v4 = vrot.slane %v25528_v18, %v18959_v0  ;;  %v25530_v2 = vcombine.high %v22057_v48, %v22060_v1  ;;  %v11026_v52 = vcombine.low %v22071_v49, %v22074_v41  ;;  %v22372_v30 = vpop.f32.mrb[118].mxu1  ;;  %v25534_v47 = vld [vmem:[#allocation130_spill] sm:$0xff]  ;;  %v25535_v48 = vld [vmem:[#allocation129_spill] sm:$0xff]  ;;  %v22379_v49 = vpop.f32.mrb[87].mxu0 }
 0x472   : > { %v11017_v60 = vrot.slane %v25529_v28, %v18959_v0  ;;  %v25533_v39 = vcombine.low %v25531_v53, %v25532_v16  ;;  %17246 = vmatpush3.bf16.msra.mxu1 %v11248_v43  ;;  %v10983_v13 = vrot.slane %v10976_v6, %v18966_v10  ;;  %v10184_v1 = vcombine.low %v25535_v48, %v25534_v47  ;;  %v22377_v18 = vpop.f32.mrb[119].mxu1  ;;  %v25539_v53 = vld [vmem:[#allocation132_spill] sm:$0xff]  ;;  %v25541_v43 = vld [vmem:[#allocation137_spill] sm:$0xff] }
 0x473   : > { %v11025_v34 = vrot.slane %v25530_v2, %v18959_v0  ;;  %17310 = vmatpush3.bf16.msra.mxu0 %v11264_v33  ;;  %v10984_v55 = vcombine.low %v10967_v7, %v10975_v4  ;;  %25536 = vst [vmem:[#allocation69_spill] sm:$0xff] %v22377_v18  ;;  %25537 = vst [vmem:[#allocation70_spill] sm:$0xff] %v22379_v49  ;;  %v11033_v41 = vrot.slane %v11026_v52, %v18966_v10  ;;  %v25538_v2 = vld [vmem:[#allocation133_spill] sm:$0xff]  ;;  %v25542_v33 = vld [vmem:[#allocation135_spill] sm:$0xff] }
 0x474   : > { %v10183_v22 = vrot.slane %v25533_v39, %v18966_v10  ;;  %v25540_v16 = vcombine.low %v25538_v2, %v25539_v53  ;;  %v10234_v20 = vcombine.low %v25542_v33, %v25541_v43  ;;  %v10191_v4 = vrot.slane %v10184_v1, %v18966_v10 }
 0x475   : > { %v11034_v28 = vcombine.low %v11017_v60, %v11025_v34  ;;  %v10991_v7 = vrot.slane %v10984_v55, %v18966_v10  ;;  %v11550_v6 = vmax.f32 %v22064_v11, %v22068_v45  ;;  %v11502_v47 = vmax.f32 %v22062_v24, %v22066_v62  ;;  %v22400_v62 = vpop.f32.mrb[88].mxu0 }
 0x476   : > { %v10233_v39 = vrot.slane %v25540_v16, %v18966_v10  ;;  %v10241_v34 = vrot.slane %v10234_v20, %v18966_v10  ;;  %v11553_v52 = vmax.f32 %v22082_v21, %v22088_v35  ;;  %v11505_v48 = vmax.f32 %v22080_v37, %v22086_v31 }
 0x477   : > { %v11041_v60 = vrot.slane %v11034_v28, %v18966_v10  ;;  %v10992_v2 = vcombine.low %v10983_v13, %v10991_v7  ;;  %v10993_v55 = vcombine.high %v10983_v13, %v10991_v7  ;;  %v10192_v53 = vcombine.low %v10183_v22, %v10191_v4  ;;  %11551 = vmax.xlane.f32.xlu1 %v11550_v6  ;;  %v22402_v28 = vpop.f32.mrb[120].mxu1  ;;  %v22420_v6 = vpop.f32.mrb[89].mxu0 }
 0x478   : > { %v10193_v1 = vcombine.high %v10183_v22, %v10191_v4  ;;  %v10242_v33 = vcombine.low %v10233_v39, %v10241_v34  ;;  %v10243_v25 = vcombine.high %v10233_v39, %v10241_v34  ;;  %11503 = vmax.xlane.f32.xlu0 %v11502_v47  ;;  %v25543_v20 = vcombine.low %v22147_v46, %v22150_v14  ;;  %v22418_v4 = vpop.f32.mrb[121].mxu1  ;;  %v22422_v31 = vpop.f32.mrb[90].mxu0 }
 0x479   : > { %v11042_v16 = vcombine.low %v11033_v41, %v11041_v60  ;;  %v11043_v43 = vcombine.high %v11033_v41, %v11041_v60  ;;  %v25544_v13 = vcombine.high %v22147_v46, %v22150_v14  ;;  %v11076_v41 = vcombine.low %v22155_v59, %v22158_v19  ;;  %25546 = vst [vmem:[#allocation72_spill] sm:$0xff] %v22418_v4  ;;  %v22424_v46 = vpop.f32.mrb[122].mxu1 }
 0x47a   : > { %v11067_v35 = vrot.slane %v25543_v20, %v18959_v0  ;;  %v25545_v39 = vcombine.low %v22185_v27, %v22188_v56  ;;  %v11249_v34 = vpack.c.bf16 %v10242_v33, %v10192_v53  ;;  %v11265_v20 = vpack.c.bf16 %v10243_v25, %v10193_v1  ;;  %v25548_v25 = vld [vmem:[#allocation136_spill] sm:$0xff] }
 0x47b   : > { %v11075_v22 = vrot.slane %v25544_v13, %v18959_v0  ;;  %v11257_v47 = vpack.c.bf16 %v11042_v16, %v10992_v2  ;;  %v11273_v60 = vpack.c.bf16 %v11043_v43, %v10993_v55  ;;  %11554 = vmax.xlane.f32.xlu1 %v11553_v52  ;;  %v11083_v14 = vrot.slane %v11076_v41, %v18966_v10  ;;  %v22433_v2 = vpop.f32.mrb[123].mxu1  ;;  %v22435_v55 = vpop.f32.mrb[91].mxu0  ;;  %v25549_v52 = vld [vmem:[#allocation140_spill] sm:$0xff]  ;;  %v25552_v16 = vld [vmem:[#allocation143_spill] sm:$0xff] }
 0x47c   : > { %v11117_v7 = vrot.slane %v25545_v39, %v18959_v0  ;;  %v25547_v19 = vcombine.high %v22185_v27, %v22188_v56  ;;  %v11126_v39 = vcombine.low %v22211_v38, %v22214_v40  ;;  %v25550_v53 = vcombine.low %v25548_v25, %v25549_v52  ;;  %v25553_v27 = vld [vmem:[#allocation145_spill] sm:$0xff]  ;;  %v25554_v56 = vld [vmem:[#allocation147_spill] sm:$0xff]  ;;  %11506 = vmax.xlane.f32.xlu0 %v11505_v48 }
 0x47d   : > { %v11084_v59 = vcombine.low %v11067_v35, %v11075_v22  ;;  %17247 = vmatprep.subr.bf16.mxu1 %v11257_v47  ;;  %17311 = vmatprep.subr.bf16.mxu0 %v11273_v60  ;;  %v25551_v35 = vld [vmem:[#allocation142_spill] sm:$0xff]  ;;  %v25555_v33 = vcombine.low %v25553_v27, %v25554_v56  ;;  %v25556_v60 = vld [vmem:[#allocation27_spill] sm:$0xff]  ;;  %v11508_v52 = vmax.f32 %v22124_v3, %v22130_v32  ;;  %v22466_v27 = vpop.f32.mrb[124].mxu1 }
 0x47e   : > { %v11125_v13 = vrot.slane %v25547_v19, %v18959_v0  ;;  %v10283_v1 = vrot.slane %v25550_v53, %v18966_v10  ;;  %v10284_v43 = vcombine.low %v25552_v16, %v25551_v35  ;;  %17248 = vmatpush3.bf16.msra.mxu1 %v11249_v34  ;;  %17312 = vmatpush3.bf16.msra.mxu0 %v11265_v20  ;;  %v25557_v19 = vld [vmem:[#allocation146_spill] sm:$0xff] }
 0x47f   : > { %v10333_v22 = vrot.slane %v25555_v33, %v18966_v10  ;;  %v11091_v38 = vrot.slane %v11084_v59, %v18966_v10  ;;  %v11133_v40 = vrot.slane %v11126_v39, %v18966_v10  ;;  %v10334_v25 = vcombine.low %v25557_v19, %v25556_v60 }
 0x480   : > { %v11134_v41 = vcombine.low %v11117_v7, %v11125_v13  ;;  %v10291_v47 = vrot.slane %v10284_v43, %v18966_v10  ;;  %v11511_v53 = vmax.f32 %v22136_v9, %v22142_v54  ;;  %v11556_v59 = vmax.f32 %v22122_v63, %v22132_v57  ;;  %v22464_v43 = vpop.f32.mrb[92].mxu0  ;;  %11509 = vmax.xlane.f32.xlu0 %v11508_v52 }
 0x481   : > { %v11092_v35 = vcombine.low %v11083_v14, %v11091_v38  ;;  %v11093_v20 = vcombine.high %v11083_v14, %v11091_v38  ;;  %v10341_v48 = vrot.slane %v10334_v25, %v18966_v10  ;;  %v25558_v39 = vcombine.low %v22256_v15, %v22259_v36 }
 0x482   : > { %v11141_v34 = vrot.slane %v11134_v41, %v18966_v10  ;;  %v10292_v7 = vcombine.low %v10283_v1, %v10291_v47  ;;  %v10293_v13 = vcombine.high %v10283_v1, %v10291_v47  ;;  %11512 = vmax.xlane.f32.xlu1 %v11511_v53  ;;  %v25559_v14 = vcombine.high %v22256_v15, %v22259_v36  ;;  %v22474_v41 = vpop.f32.mrb[125].mxu1  ;;  %v22476_v47 = vpop.f32.mrb[93].mxu0 }
 0x483   : > { %v11167_v16 = vrot.slane %v25558_v39, %v18959_v0  ;;  %v11176_v1 = vcombine.low %v22280_v12, %v22283_v44  ;;  %v10342_v60 = vcombine.low %v10333_v22, %v10341_v48  ;;  %v10343_v19 = vcombine.high %v10333_v22, %v10341_v48  ;;  %v22486_v53 = vpop.f32.mrb[94].mxu0  ;;  %v22488_v12 = vpop.f32.mrb[126].mxu1 }
 0x484   : > { %v11142_v56 = vcombine.low %v11133_v40, %v11141_v34  ;;  %v11143_v33 = vcombine.high %v11133_v40, %v11141_v34  ;;  %v11175_v38 = vrot.slane %v25559_v14, %v18959_v0  ;;  %v25560_v25 = vcombine.low %v22327_v8, %v22330_v17  ;;  %v22491_v52 = vpop.f32.mrb[127].mxu1  ;;  %v22493_v48 = vpop.f32.mrb[95].mxu0  ;;  %11557 = vmax.xlane.f32.xlu0 %v11556_v59  ;;  %v25576_v59 = vld [vmem:[#allocation53_spill] sm:$0xff] }
 0x485   : > { %v25561_v15 = vcombine.high %v22327_v8, %v22330_v17  ;;  %v11183_v39 = vrot.slane %v11176_v1, %v18966_v10  ;;  %v11250_v14 = vpack.c.bf16 %v10342_v60, %v10292_v7  ;;  %v11226_v57 = vcombine.low %v22333_v50, %v22336_v5  ;;  %v25567_v50 = vld [vmem:[#allocation32_spill] sm:$0xff]  ;;  %v25568_v5 = vld [vmem:[#allocation34_spill] sm:$0xff] }
 0x486   : > { %v11217_v40 = vrot.slane %v25560_v25, %v18959_v0  ;;  %v11258_v44 = vpack.c.bf16 %v11142_v56, %v11092_v35  ;;  %v11274_v34 = vpack.c.bf16 %v11143_v33, %v11093_v20  ;;  %v11184_v22 = vcombine.low %v11167_v16, %v11175_v38  ;;  %v25562_v35 = vld [vmem:[#allocation30_spill] sm:$0xff]  ;;  %v25563_v20 = vld [vmem:[#allocation29_spill] sm:$0xff]  ;;  %v25565_v16 = vld [vmem:[#allocation35_spill] sm:$0xff] }
 0x487   : > { %v11225_v36 = vrot.slane %v25561_v15, %v18959_v0  ;;  %v11266_v25 = vpack.c.bf16 %v10343_v19, %v10293_v13  ;;  %v25564_v56 = vcombine.low %v25562_v35, %v25563_v20  ;;  %v25566_v38 = vld [vmem:[#allocation33_spill] sm:$0xff]  ;;  %v11233_v7 = vrot.slane %v11226_v57, %v18966_v10  ;;  %v25573_v20 = vld [vmem:[#allocation43_spill] sm:$0xff]  ;;  %v25578_v0 = vld [vmem:[#allocation46_spill] sm:$0xff] }
 0x488   : > { %17249 = vmatprep.subr.bf16.mxu1 %v11258_v44  ;;  %17313 = vmatprep.subr.bf16.mxu0 %v11274_v34  ;;  %v11191_v17 = vrot.slane %v11184_v22, %v18966_v10  ;;  %v10384_v1 = vcombine.low %v25566_v38, %v25565_v16  ;;  %v25569_v60 = vcombine.low %v25567_v50, %v25568_v5  ;;  %v25570_v44 = vld [vmem:[#allocation38_spill] sm:$0xff]  ;;  %v25571_v34 = vld [vmem:[#allocation36_spill] sm:$0xff] }
 0x489   : > { %v11234_v8 = vcombine.low %v11217_v40, %v11225_v36  ;;  %v10383_v33 = vrot.slane %v25564_v56, %v18966_v10  ;;  %17250 = vmatpush3.bf16.msra.mxu1 %v11250_v14  ;;  %17314 = vmatpush3.bf16.msra.mxu0 %v11266_v25  ;;  %v10434_v22 = vcombine.low %v25571_v34, %v25570_v44  ;;  %v25572_v25 = vld [vmem:[#allocation44_spill] sm:$0xff]  ;;  %v25574_v56 = vld [vmem:[#allocation45_spill] sm:$0xff] }
 0x48a   : > { %v10433_v19 = vrot.slane %v25569_v60, %v18966_v10  ;;  %v11192_v40 = vcombine.low %v11183_v39, %v11191_v17  ;;  %v11193_v15 = vcombine.high %v11183_v39, %v11191_v17  ;;  %v10391_v36 = vrot.slane %v10384_v1, %v18966_v10  ;;  %v25577_v60 = vld [vmem:[#allocation49_spill] sm:$0xff]  ;;  %v25579_v44 = vld [vmem:[#allocation48_spill] sm:$0xff] }
 0x48b   : > { %v11241_v13 = vrot.slane %v11234_v8, %v18966_v10  ;;  %v11559_v57 = vmax.f32 %v25573_v20, %v25572_v25  ;;  %v25575_v8 = vld [vmem:[#allocation47_spill] sm:$0xff]  ;;  %v10441_v50 = vrot.slane %v10434_v22, %v18966_v10  ;;  %v11517_v39 = vmax.f32 %v25577_v60, %v25576_v59  ;;  %v25582_v22 = vld [vmem:[#allocation60_spill] sm:$0xff] }
 0x48c   : > { %v11514_v16 = vmax.f32 %v25575_v8, %v25574_v56  ;;  %v10392_v38 = vcombine.low %v10383_v33, %v10391_v36  ;;  %v10393_v5 = vcombine.high %v10383_v33, %v10391_v36  ;;  %v11562_v34 = vmax.f32 %v25579_v44, %v25578_v0  ;;  %v25583_v33 = vld [vmem:[#allocation58_spill] sm:$0xff]  ;;  %v25588_v0 = vld [vmem:[#allocation64_spill] sm:$0xff] }
 0x48d   : > { %v11242_v35 = vcombine.low %v11233_v7, %v11241_v13  ;;  %v11243_v14 = vcombine.high %v11233_v7, %v11241_v13  ;;  %11560 = vmax.xlane.f32.xlu1 %v11559_v57  ;;  %v25580_v7 = vld [vmem:[#allocation54_spill] sm:$0xff]  ;;  %v10442_v25 = vcombine.low %v10433_v19, %v10441_v50  ;;  %v10443_v20 = vcombine.high %v10433_v19, %v10441_v50  ;;  %v25587_v57 = vld [vmem:[#allocation57_spill] sm:$0xff] }
 0x48e   : > { %v25581_v13 = vld [vmem:[#allocation50_spill] sm:$0xff]  ;;  %11515 = vmax.xlane.f32.xlu0 %v11514_v16  ;;  %v11520_v56 = vmax.f32 %v22234_v23, %v22238_v42  ;;  %v11523_v36 = vmax.f32 %v25583_v33, %v25582_v22  ;;  %v25590_v16 = vld [vmem:[#allocation68_spill] sm:$0xff]  ;;  %v25592_v42 = vld [vmem:[#allocation63_spill] sm:$0xff] }
 0x48f   : > { %v11259_v17 = vpack.c.bf16 %v11242_v35, %v11192_v40  ;;  %v11275_v1 = vpack.c.bf16 %v11243_v14, %v11193_v15  ;;  %v11565_v63 = vmax.f32 %v25581_v13, %v25580_v7  ;;  %v25584_v40 = vld [vmem:[#allocation55_spill] sm:$0xff]  ;;  %v25589_v44 = vld [vmem:[#allocation62_spill] sm:$0xff]  ;;  %v11251_v13 = vpack.c.bf16 %v10442_v25, %v10392_v38  ;;  %v25593_v23 = vld [vmem:[#allocation61_spill] sm:$0xff] }
 0x490   : > { %v25585_v15 = vld [vmem:[#allocation51_spill] sm:$0xff]  ;;  %v11526_v7 = vmax.f32 %v25589_v44, %v25588_v0  ;;  %v11267_v19 = vpack.c.bf16 %v10443_v20, %v10393_v5  ;;  %v25591_v50 = vld [vmem:[#allocation66_spill] sm:$0xff]  ;;  %v11574_v60 = vmax.f32 %v25593_v23, %v25592_v42  ;;  %v11580_v25 = vmax.f32 %v22342_v61, %v22354_v26 }
 0x491   : > { %17251 = vmatprep.subr.bf16.mxu1 %v11259_v17  ;;  %17315 = vmatprep.subr.bf16.mxu0 %v11275_v1  ;;  %v11568_v35 = vmax.f32 %v25585_v15, %v25584_v40  ;;  %v25586_v14 = vld [vmem:[#allocation59_spill] sm:$0xff]  ;;  %v11529_v59 = vmax.f32 %v25591_v50, %v25590_v16  ;;  %v25595_v1 = vld [vmem:[#allocation65_spill] sm:$0xff]  ;;  %v11532_v40 = vmax.f32 %v22344_v58, %v22352_v51 }
 0x492   : > { %v11571_v10 = vmax.f32 %v25587_v57, %v25586_v14  ;;  %11518 = vmax.xlane.f32.xlu1 %v11517_v39  ;;  %v25594_v17 = vld [vmem:[#allocation67_spill] sm:$0xff]  ;;  %v11535_v14 = vmax.f32 %v22372_v30, %v22377_v18  ;;  %17252 = vmatpush3.bf16.msra.mxu1 %v11251_v13  ;;  %v11583_v20 = vmax.f32 %v22370_v29, %v22379_v49 }
 0x493   : > { %v11577_v22 = vmax.f32 %v25595_v1, %v25594_v17  ;;  %17316 = vmatpush3.bf16.msra.mxu0 %v11267_v19  ;;  %v11538_v38 = vmax.f32 %v22402_v28, %v22418_v4  ;;  %v11541_v5 = vmax.f32 %v22424_v46, %v22433_v2  ;;  %11563 = vmax.xlane.f32.xlu0 %v11562_v34  ;;  %v25596_v34 = vld [vmem:[#allocation37_spill] sm:$0xff] }
 0x494   : > { %v11586_v39 = vmax.f32 %v22400_v62, %v22420_v6  ;;  %v11589_v18 = vmax.f32 %v22422_v31, %v22435_v55  ;;  %v11544_v13 = vmax.f32 %v22466_v27, %v22474_v41  ;;  %v11547_v19 = vmax.f32 %v22488_v12, %v22491_v52 }
 0x495   : > { %v11592_v49 = vmax.f32 %v22464_v43, %v22476_v47  ;;  %v11595_v4 = vmax.f32 %v22486_v53, %v22493_v48 }
 0x496   : > { %11566 = vmax.xlane.f32.xlu1 %v11565_v63 }
 0x497   : > { %11521 = vmax.xlane.f32.xlu0 %v11520_v56 }
 0x49a   : > { %11524 = vmax.xlane.f32.xlu1 %v11523_v36 }
 0x49b   : > { %11569 = vmax.xlane.f32.xlu0 %v11568_v35 }
 0x49e   : > { %11572 = vmax.xlane.f32.xlu1 %v11571_v10 }
 0x49f   : > { %11527 = vmax.xlane.f32.xlu0 %v11526_v7 }
 0x4a2   : > { %11530 = vmax.xlane.f32.xlu1 %v11529_v59 }
 0x4a3   : > { %11575 = vmax.xlane.f32.xlu0 %v11574_v60 }
 0x4a6   : > { %11578 = vmax.xlane.f32.xlu1 %v11577_v22 }
 0x4a7   : > { %11533 = vmax.xlane.f32.xlu0 %v11532_v40 }
 0x4aa   : > { %11536 = vmax.xlane.f32.xlu1 %v11535_v14 }
 0x4ab   : > { %11581 = vmax.xlane.f32.xlu0 %v11580_v25 }
 0x4ae   : > { %11584 = vmax.xlane.f32.xlu1 %v11583_v20  ;;  %v25598_v20 = vld [vmem:[#allocation39_spill] sm:$0xff] }
 0x4af   : > { %11539 = vmax.xlane.f32.xlu0 %v11538_v38 }
 0x4b2   : > { %11542 = vmax.xlane.f32.xlu1 %v11541_v5 }
 0x4b3   : > { %11587 = vmax.xlane.f32.xlu0 %v11586_v39 }
 0x4b6   : > { %11590 = vmax.xlane.f32.xlu1 %v11589_v18 }
 0x4b7   : > { %11545 = vmax.xlane.f32.xlu0 %v11544_v13 }
 0x4ba   : > { %11548 = vmax.xlane.f32.xlu1 %v11547_v19 }
 0x4bb   : > { %11593 = vmax.xlane.f32.xlu0 %v11592_v49  ;;  %v25597_v49 = vld [vmem:[#allocation40_spill] sm:$0xff] }
 0x4be   : > { %11596 = vmax.xlane.f32.xlu1 %v11595_v4 }
 0x504   : > { %v11552_v63 = vpop.xlane.xlu1 %11551 }
 0x505   : > { %v11630_v56 = vsub.f32 %v22064_v11, %v11552_v63  ;;  %v11631_v10 = vsub.f32 %v22068_v45, %v11552_v63  ;;  %v11504_v59 = vpop.xlane.xlu0 %11503 }
 0x506   : > { %v11598_v60 = vsub.f32 %v22062_v24, %v11504_v59  ;;  %v11599_v7 = vsub.f32 %v25596_v34, %v11504_v59 }
 0x507   : > { %v11726_v22 = vmul.f32 1.442695, %v11630_v56  ;;  %v11728_v14 = vmul.f32 1.442695, %v11631_v10 }
 0x508   : > { %v11662_v36 = vmul.f32 1.442695, %v11598_v60  ;;  %v11664_v40 = vmul.f32 1.442695, %v11599_v7  ;;  %v11555_v35 = vpop.xlane.xlu1 %11554 }
 0x509   : > { %v11632_v18 = vsub.f32 %v22082_v21, %v11555_v35  ;;  %17929 = vpow2.f32 %v11726_v22  ;;  %v11633_v4 = vsub.f32 %v25597_v49, %v11555_v35  ;;  %v11507_v11 = vpop.xlane.xlu0 %11506 }
 0x50a   : > { %17931 = vpow2.f32 %v11662_v36  ;;  %v11600_v45 = vsub.f32 %v22080_v37, %v11507_v11  ;;  %v11601_v24 = vsub.f32 %v25598_v20, %v11507_v11 }
 0x50b   : > { %v11730_v25 = vmul.f32 1.442695, %v11632_v18  ;;  %17933 = vpow2.f32 %v11664_v40  ;;  %v11732_v5 = vmul.f32 1.442695, %v11633_v4  ;;  %v25600_v40 = vld [vmem:[#allocation41_spill] sm:$0xff] }
 0x50c   : > { %17935 = vpow2.f32 %v11728_v14  ;;  %v11666_v39 = vmul.f32 1.442695, %v11600_v45  ;;  %v11668_v13 = vmul.f32 1.442695, %v11601_v24  ;;  %v25602_v45 = vld [vmem:[#allocation44_spill] sm:$0xff] }
 0x50d   : > { %17937 = vpow2.f32 %v11730_v25  ;;  %v11510_v21 = vpop.xlane.xlu0 %11509  ;;  %v25601_v25 = vld [vmem:[#allocation43_spill] sm:$0xff] }
 0x50e   : > { %17939 = vpow2.f32 %v11666_v39  ;;  %v11602_v56 = vsub.f32 %v22124_v3, %v11510_v21  ;;  %v11603_v10 = vsub.f32 %v22130_v32, %v11510_v21  ;;  %v25603_v39 = vld [vmem:[#allocation45_spill] sm:$0xff] }
 0x50f   : > { %v11513_v38 = vpop.xlane.xlu1 %11512  ;;  %17941 = vpow2.f32 %v11668_v13 }
 0x510   : > { %v11604_v19 = vsub.f32 %v22136_v9, %v11513_v38  ;;  %v11605_v63 = vsub.f32 %v22142_v54, %v11513_v38  ;;  %17943 = vpow2.f32 %v11732_v5  ;;  %v11670_v37 = vmul.f32 1.442695, %v11602_v56  ;;  %v25599_v54 = vld [vmem:[#allocation42_spill] sm:$0xff] }
 0x511   : > { %v11672_v60 = vmul.f32 1.442695, %v11603_v10  ;;  %v11558_v9 = vpop.xlane.xlu0 %11557 }
 0x512   : > { %v11674_v59 = vmul.f32 1.442695, %v11604_v19  ;;  %v11676_v34 = vmul.f32 1.442695, %v11605_v63  ;;  %v11634_v36 = vsub.f32 %v25599_v54, %v11558_v9  ;;  %v11635_v3 = vsub.f32 %v25600_v40, %v11558_v9  ;;  %v25605_v54 = vld [vmem:[#allocation53_spill] sm:$0xff] }
 0x513   : > { %v22576_v7 = vpop.eup %17929 }
 0x514   : > { %17945 = vpow2.f32 %v11674_v59  ;;  %v22578_v22 = vpop.eup %17931  ;;  %v11734_v14 = vmul.f32 1.442695, %v11634_v36  ;;  %v11736_v18 = vmul.f32 1.442695, %v11635_v3 }
 0x515   : > { %17947 = vpow2.f32 %v11670_v37  ;;  %v22582_v35 = vpop.eup %17933 }
 0x516   : > { %17949 = vpow2.f32 %v11672_v60  ;;  %v22584_v32 = vpop.eup %17935  ;;  %v11790_v4 = vadd.f32 %v22582_v35, %v22578_v22 }
 0x517   : > { %17951 = vpow2.f32 %v11676_v34  ;;  %v22590_v38 = vpop.eup %17937  ;;  %v11838_v60 = vadd.f32 %v22584_v32, %v22576_v7 }
 0x518   : > { %17953 = vpow2.f32 %v11734_v14  ;;  %11791 = vadd.xlane.f32.xlu0 %v11790_v4  ;;  %v22594_v19 = vpop.eup %17939 }
 0x519   : > { %17955 = vpow2.f32 %v11736_v18  ;;  %v22596_v56 = vpop.eup %17941 }
 0x51a   : > { %v11561_v49 = vpop.xlane.xlu1 %11560  ;;  %v22600_v34 = vpop.eup %17943  ;;  %v11793_v40 = vadd.f32 %v22596_v56, %v22594_v19 }
 0x51b   : > { %v11636_v11 = vsub.f32 %v25601_v25, %v11561_v49  ;;  %v11637_v20 = vsub.f32 %v25602_v45, %v11561_v49  ;;  %v11516_v24 = vpop.xlane.xlu0 %11515  ;;  %v25606_v25 = vld [vmem:[#allocation48_spill] sm:$0xff] }
 0x51c   : > { %v11606_v5 = vsub.f32 %v25575_v8, %v11516_v24  ;;  %v11607_v13 = vsub.f32 %v25603_v39, %v11516_v24  ;;  %v25604_v8 = vld [vmem:[#allocation49_spill] sm:$0xff]  ;;  %11839 = vadd.xlane.f32.xlu0 %v11838_v60  ;;  %11794 = vadd.xlane.f32.xlu1 %v11793_v40  ;;  %v11841_v39 = vadd.f32 %v22600_v34, %v22590_v38  ;;  %v25610_v40 = vld [vmem:[#allocation52_spill] sm:$0xff] }
 0x51d   : > { %v11738_v21 = vmul.f32 1.442695, %v11636_v11  ;;  %v11740_v63 = vmul.f32 1.442695, %v11637_v20  ;;  %v25607_v20 = vld [vmem:[#allocation46_spill] sm:$0xff] }
 0x51e   : > { %v11678_v10 = vmul.f32 1.442695, %v11606_v5  ;;  %v11680_v59 = vmul.f32 1.442695, %v11607_v13  ;;  %v22606_v3 = vpop.eup %17945 }
 0x51f   : > { %v11519_v37 = vpop.xlane.xlu1 %11518  ;;  %17957 = vpow2.f32 %v11738_v21  ;;  %v22608_v18 = vpop.eup %17947 }
 0x520   : > { %v11608_v9 = vsub.f32 %v25604_v8, %v11519_v37  ;;  %v11609_v36 = vsub.f32 %v25605_v54, %v11519_v37  ;;  %17959 = vpow2.f32 %v11740_v63  ;;  %v11564_v14 = vpop.xlane.xlu0 %11563  ;;  %v22611_v45 = vpop.eup %17949  ;;  %v25608_v63 = vld [vmem:[#allocation50_spill] sm:$0xff]  ;;  %11842 = vadd.xlane.f32.xlu1 %v11841_v39 }
 0x521   : > { %17961 = vpow2.f32 %v11678_v10  ;;  %v11638_v11 = vsub.f32 %v25606_v25, %v11564_v14  ;;  %v11639_v24 = vsub.f32 %v25607_v20, %v11564_v14  ;;  %v22616_v13 = vpop.eup %17951  ;;  %v25609_v37 = vld [vmem:[#allocation54_spill] sm:$0xff] }
 0x522   : > { %v11682_v49 = vmul.f32 1.442695, %v11608_v9  ;;  %v11684_v4 = vmul.f32 1.442695, %v11609_v36  ;;  %17963 = vpow2.f32 %v11680_v59  ;;  %v11796_v59 = vadd.f32 %v22611_v45, %v22608_v18  ;;  %v22623_v25 = vpop.eup %17953 }
 0x523   : > { %v11567_v5 = vpop.xlane.xlu1 %11566  ;;  %v11742_v21 = vmul.f32 1.442695, %v11638_v11  ;;  %v11744_v8 = vmul.f32 1.442695, %v11639_v24  ;;  %v22628_v24 = vpop.eup %17955 }
 0x524   : > { %17965 = vpow2.f32 %v11682_v49  ;;  %v11640_v10 = vsub.f32 %v25608_v63, %v11567_v5  ;;  %v11641_v60 = vsub.f32 %v25609_v37, %v11567_v5  ;;  %v11522_v9 = vpop.xlane.xlu0 %11521  ;;  %v25611_v49 = vld [vmem:[#allocation56_spill] sm:$0xff]  ;;  %11797 = vadd.xlane.f32.xlu0 %v11796_v59 }
 0x525   : > { %17967 = vpow2.f32 %v11684_v4  ;;  %v11610_v14 = vsub.f32 %v25610_v40, %v11522_v9  ;;  %v11611_v11 = vsub.f32 %v25611_v49, %v11522_v9  ;;  %v11799_v4 = vadd.f32 %v22616_v13, %v22606_v3  ;;  %v25612_v63 = vld [vmem:[#allocation60_spill] sm:$0xff] }
 0x526   : > { %17969 = vpow2.f32 %v11742_v21  ;;  %v11746_v54 = vmul.f32 1.442695, %v11640_v10  ;;  %v11748_v36 = vmul.f32 1.442695, %v11641_v60  ;;  %v11844_v60 = vadd.f32 %v22628_v24, %v22623_v25 }
 0x527   : > { %17971 = vpow2.f32 %v11744_v8  ;;  %v11525_v20 = vpop.xlane.xlu1 %11524  ;;  %v11686_v5 = vmul.f32 1.442695, %v11610_v14  ;;  %v11688_v39 = vmul.f32 1.442695, %v11611_v11  ;;  %11800 = vadd.xlane.f32.xlu1 %v11799_v4 }
 0x528   : > { %17973 = vpow2.f32 %v11746_v54  ;;  %v11612_v21 = vsub.f32 %v25583_v33, %v11525_v20  ;;  %v11613_v10 = vsub.f32 %v25612_v63, %v11525_v20  ;;  %v11570_v37 = vpop.xlane.xlu0 %11569  ;;  %v25613_v33 = vld [vmem:[#allocation55_spill] sm:$0xff]  ;;  %11845 = vadd.xlane.f32.xlu0 %v11844_v60 }
 0x529   : > { %17975 = vpow2.f32 %v11748_v36  ;;  %v22634_v8 = vpop.eup %17957  ;;  %v11642_v40 = vsub.f32 %v25585_v15, %v11570_v37  ;;  %v11643_v14 = vsub.f32 %v25613_v33, %v11570_v37  ;;  %v25614_v63 = vld [vmem:[#allocation59_spill] sm:$0xff] }
 0x52a   : > { %17977 = vpow2.f32 %v11686_v5  ;;  %v11690_v9 = vmul.f32 1.442695, %v11612_v21  ;;  %v11692_v59 = vmul.f32 1.442695, %v11613_v10  ;;  %v22637_v54 = vpop.eup %17959 }
 0x52b   : > { %17979 = vpow2.f32 %v11688_v39  ;;  %v11573_v49 = vpop.xlane.xlu1 %11572  ;;  %v22640_v36 = vpop.eup %17961  ;;  %v11750_v11 = vmul.f32 1.442695, %v11642_v40  ;;  %v11752_v15 = vmul.f32 1.442695, %v11643_v14  ;;  %v11847_v10 = vadd.f32 %v22637_v54, %v22634_v8 }
 0x52c   : > { %17981 = vpow2.f32 %v11690_v9  ;;  %v11644_v20 = vsub.f32 %v25587_v57, %v11573_v49  ;;  %v11645_v5 = vsub.f32 %v25614_v63, %v11573_v49  ;;  %v22644_v21 = vpop.eup %17963  ;;  %v11528_v4 = vpop.xlane.xlu0 %11527 }
 0x52d   : > { %17983 = vpow2.f32 %v11692_v59  ;;  %v11614_v9 = vsub.f32 %v25589_v44, %v11528_v4  ;;  %v11615_v57 = vsub.f32 %v25588_v0, %v11528_v4  ;;  %v11802_v59 = vadd.f32 %v22644_v21, %v22640_v36  ;;  %11848 = vadd.xlane.f32.xlu1 %v11847_v10 }
 0x52e   : > { %v22648_v39 = vpop.eup %17965  ;;  %17985 = vpow2.f32 %v11750_v11  ;;  %v11754_v37 = vmul.f32 1.442695, %v11644_v20  ;;  %v11756_v60 = vmul.f32 1.442695, %v11645_v5 }
 0x52f   : > { %v22651_v40 = vpop.eup %17967  ;;  %17987 = vpow2.f32 %v11752_v15  ;;  %v11531_v33 = vpop.xlane.xlu1 %11530  ;;  %v11694_v49 = vmul.f32 1.442695, %v11614_v9  ;;  %v11696_v44 = vmul.f32 1.442695, %v11615_v57  ;;  %11803 = vadd.xlane.f32.xlu0 %v11802_v59 }
 0x530   : > { %v22656_v14 = vpop.eup %17969  ;;  %17989 = vpow2.f32 %v11754_v37  ;;  %v11616_v11 = vsub.f32 %v25591_v50, %v11531_v33  ;;  %v11617_v20 = vsub.f32 %v25590_v16, %v11531_v33  ;;  %v11576_v5 = vpop.xlane.xlu0 %11575  ;;  %v11805_v0 = vadd.f32 %v22651_v40, %v22648_v39 }
 0x531   : > { %v22660_v63 = vpop.eup %17971  ;;  %17991 = vpow2.f32 %v11756_v60  ;;  %v11646_v37 = vsub.f32 %v25593_v23, %v11576_v5  ;;  %v11647_v16 = vsub.f32 %v25592_v42, %v11576_v5 }
 0x532   : > { %v22664_v15 = vpop.eup %17973  ;;  %17993 = vpow2.f32 %v11694_v49  ;;  %v11698_v4 = vmul.f32 1.442695, %v11616_v11  ;;  %v11700_v10 = vmul.f32 1.442695, %v11617_v20  ;;  %v11850_v60 = vadd.f32 %v22660_v63, %v22656_v14  ;;  %11806 = vadd.xlane.f32.xlu1 %v11805_v0 }
 0x533   : > { %v22667_v9 = vpop.eup %17975  ;;  %17995 = vpow2.f32 %v11696_v44  ;;  %v11579_v50 = vpop.xlane.xlu1 %11578  ;;  %v11758_v33 = vmul.f32 1.442695, %v11646_v37  ;;  %v11760_v23 = vmul.f32 1.442695, %v11647_v16 }
 0x534   : > { %v22672_v57 = vpop.eup %17977  ;;  %17997 = vpow2.f32 %v11698_v4  ;;  %v11648_v59 = vsub.f32 %v25595_v1, %v11579_v50  ;;  %v11649_v49 = vsub.f32 %v25594_v17, %v11579_v50  ;;  %11851 = vadd.xlane.f32.xlu0 %v11850_v60  ;;  %v11534_v20 = vpop.xlane.xlu0 %11533  ;;  %v11853_v42 = vadd.f32 %v22667_v9, %v22664_v15 }
 0x535   : > { %25615 = vst [vmem:[#allocation71_spill] sm:$0xff] %v22672_v57  ;;  %v22676_v11 = vpop.eup %17979  ;;  %17999 = vpow2.f32 %v11700_v10  ;;  %v11618_v4 = vsub.f32 %v22344_v58, %v11534_v20  ;;  %v11619_v17 = vsub.f32 %v22352_v51, %v11534_v20 }
 0x536   : > { %v22680_v44 = vpop.eup %17981  ;;  %18001 = vpow2.f32 %v11758_v33  ;;  %v11762_v5 = vmul.f32 1.442695, %v11648_v59  ;;  %v11764_v0 = vmul.f32 1.442695, %v11649_v49  ;;  %v11808_v10 = vadd.f32 %v22676_v11, %v22672_v57  ;;  %11854 = vadd.xlane.f32.xlu1 %v11853_v42  ;;  %v25617_v33 = vld [vmem:[#allocation69_spill] sm:$0xff] }
 0x537   : > { %v22683_v37 = vpop.eup %17983  ;;  %18003 = vpow2.f32 %v11760_v23  ;;  %v11537_v1 = vpop.xlane.xlu1 %11536  ;;  %v11702_v50 = vmul.f32 1.442695, %v11618_v4  ;;  %v11704_v58 = vmul.f32 1.442695, %v11619_v17 }
 0x538   : > { %v22688_v16 = vpop.eup %17985  ;;  %18005 = vpow2.f32 %v11762_v5  ;;  %v11620_v60 = vsub.f32 %v22372_v30, %v11537_v1  ;;  %v11621_v59 = vsub.f32 %v25617_v33, %v11537_v1  ;;  %11809 = vadd.xlane.f32.xlu0 %v11808_v10  ;;  %v11582_v23 = vpop.xlane.xlu0 %11581  ;;  %v11811_v51 = vadd.f32 %v22683_v37, %v22680_v44 }
 0x539   : > { %25616 = vst [vmem:[#allocation73_spill] sm:$0xff] %v22688_v16  ;;  %v22692_v49 = vpop.eup %17987  ;;  %18007 = vpow2.f32 %v11764_v0  ;;  %v11650_v5 = vsub.f32 %v22342_v61, %v11582_v23  ;;  %v11651_v30 = vsub.f32 %v22354_v26, %v11582_v23 }
 0x53a   : > { %v22696_v20 = vpop.eup %17989  ;;  %18009 = vpow2.f32 %v11702_v50  ;;  %v11706_v42 = vmul.f32 1.442695, %v11620_v60  ;;  %v11708_v57 = vmul.f32 1.442695, %v11621_v59  ;;  %v11856_v0 = vadd.f32 %v22692_v49, %v22688_v16  ;;  %11812 = vadd.xlane.f32.xlu1 %v11811_v51  ;;  %v25619_v60 = vld [vmem:[#allocation70_spill] sm:$0xff] }
 0x53b   : > { %v22699_v4 = vpop.eup %17991  ;;  %18011 = vpow2.f32 %v11704_v58  ;;  %v11585_v1 = vpop.xlane.xlu1 %11584  ;;  %v11766_v10 = vmul.f32 1.442695, %v11650_v5  ;;  %v11768_v61 = vmul.f32 1.442695, %v11651_v30 }
 0x53c   : > { %v22704_v17 = vpop.eup %17993  ;;  %18013 = vpow2.f32 %v11706_v42  ;;  %v11652_v50 = vsub.f32 %v22370_v29, %v11585_v1  ;;  %v11653_v33 = vsub.f32 %v25619_v60, %v11585_v1  ;;  %11857 = vadd.xlane.f32.xlu0 %v11856_v0  ;;  %v11540_v58 = vpop.xlane.xlu0 %11539  ;;  %v11859_v26 = vadd.f32 %v22699_v4, %v22696_v20  ;;  %v25620_v29 = vld [vmem:[#allocation72_spill] sm:$0xff] }
 0x53d   : > { %25618 = vst [vmem:[#allocation74_spill] sm:$0xff] %v22704_v17  ;;  %v22708_v59 = vpop.eup %17995  ;;  %18015 = vpow2.f32 %v11708_v57  ;;  %v11622_v42 = vsub.f32 %v22402_v28, %v11540_v58  ;;  %v11623_v1 = vsub.f32 %v25620_v29, %v11540_v58 }
 0x53e   : > { %v22712_v23 = vpop.eup %17997  ;;  %18017 = vpow2.f32 %v11766_v10  ;;  %v11770_v51 = vmul.f32 1.442695, %v11652_v50  ;;  %v11772_v16 = vmul.f32 1.442695, %v11653_v33  ;;  %v11814_v57 = vadd.f32 %v22708_v59, %v22704_v17  ;;  %11860 = vadd.xlane.f32.xlu1 %v11859_v26 }
 0x53f   : > { %v22715_v5 = vpop.eup %17999  ;;  %18019 = vpow2.f32 %v11768_v61  ;;  %v11543_v60 = vpop.xlane.xlu1 %11542  ;;  %v11710_v0 = vmul.f32 1.442695, %v11622_v42  ;;  %v11712_v28 = vmul.f32 1.442695, %v11623_v1 }
 0x540   : > { %v22720_v30 = vpop.eup %18001  ;;  %18021 = vpow2.f32 %v11770_v51  ;;  %v11624_v10 = vsub.f32 %v22424_v46, %v11543_v60  ;;  %v11625_v50 = vsub.f32 %v22433_v2, %v11543_v60  ;;  %11815 = vadd.xlane.f32.xlu0 %v11814_v57  ;;  %v11588_v61 = vpop.xlane.xlu0 %11587  ;;  %v11817_v58 = vadd.f32 %v22715_v5, %v22712_v23 }
 0x541   : > { %v22724_v33 = vpop.eup %18003  ;;  %18023 = vpow2.f32 %v11772_v16  ;;  %v11654_v51 = vsub.f32 %v22400_v62, %v11588_v61  ;;  %v11655_v46 = vsub.f32 %v22420_v6, %v11588_v61 }
 0x542   : > { %v22728_v29 = vpop.eup %18005  ;;  %18025 = vpow2.f32 %v11710_v0  ;;  %v11714_v26 = vmul.f32 1.442695, %v11624_v10  ;;  %v11716_v17 = vmul.f32 1.442695, %v11625_v50  ;;  %v11862_v16 = vadd.f32 %v22724_v33, %v22720_v30  ;;  %11818 = vadd.xlane.f32.xlu1 %v11817_v58 }
 0x543   : > { %v22731_v42 = vpop.eup %18007  ;;  %18027 = vpow2.f32 %v11712_v28  ;;  %v11591_v2 = vpop.xlane.xlu1 %11590  ;;  %v11774_v60 = vmul.f32 1.442695, %v11654_v51  ;;  %v11776_v62 = vmul.f32 1.442695, %v11655_v46 }
 0x544   : > { %v22736_v1 = vpop.eup %18009  ;;  %18029 = vpow2.f32 %v11714_v26  ;;  %v11656_v57 = vsub.f32 %v22422_v31, %v11591_v2  ;;  %v11657_v0 = vsub.f32 %v22435_v55, %v11591_v2  ;;  %11863 = vadd.xlane.f32.xlu0 %v11862_v16  ;;  %v11546_v50 = vpop.xlane.xlu0 %11545  ;;  %v11865_v6 = vadd.f32 %v22731_v42, %v22728_v29 }
 0x545   : > { %v22740_v10 = vpop.eup %18011  ;;  %18031 = vpow2.f32 %v11716_v17  ;;  %v11626_v26 = vsub.f32 %v22466_v27, %v11546_v50  ;;  %v11627_v31 = vsub.f32 %v22474_v41, %v11546_v50 }
 0x546   : > { %v22744_v28 = vpop.eup %18013  ;;  %18033 = vpow2.f32 %v11774_v60  ;;  %v11778_v61 = vmul.f32 1.442695, %v11656_v57  ;;  %v11780_v58 = vmul.f32 1.442695, %v11657_v0  ;;  %v11820_v55 = vadd.f32 %v22740_v10, %v22736_v1  ;;  %11866 = vadd.xlane.f32.xlu1 %v11865_v6 }
 0x547   : > { %v22747_v51 = vpop.eup %18015  ;;  %18035 = vpow2.f32 %v11776_v62  ;;  %v11549_v17 = vpop.xlane.xlu1 %11548  ;;  %v11718_v2 = vmul.f32 1.442695, %v11626_v26  ;;  %v11720_v27 = vmul.f32 1.442695, %v11627_v31 }
 0x548   : > { %v22752_v46 = vpop.eup %18017  ;;  %18037 = vpow2.f32 %v11778_v61  ;;  %v11628_v16 = vsub.f32 %v22488_v12, %v11549_v17  ;;  %v11629_v60 = vsub.f32 %v22491_v52, %v11549_v17  ;;  %11821 = vadd.xlane.f32.xlu0 %v11820_v55  ;;  %v11594_v0 = vpop.xlane.xlu0 %11593  ;;  %v11823_v41 = vadd.f32 %v22747_v51, %v22744_v28 }
 0x549   : > { %v22756_v57 = vpop.eup %18019  ;;  %18039 = vpow2.f32 %v11780_v58  ;;  %v11658_v61 = vsub.f32 %v22464_v43, %v11594_v0  ;;  %v11659_v12 = vsub.f32 %v22476_v47, %v11594_v0 }
 0x54a   : > { %v22760_v62 = vpop.eup %18021  ;;  %18041 = vpow2.f32 %v11718_v2  ;;  %v11722_v50 = vmul.f32 1.442695, %v11628_v16  ;;  %v11724_v6 = vmul.f32 1.442695, %v11629_v60  ;;  %v11868_v52 = vadd.f32 %v22756_v57, %v22752_v46  ;;  %11824 = vadd.xlane.f32.xlu1 %v11823_v41 }
 0x54b   : > { %v22763_v26 = vpop.eup %18023  ;;  %18043 = vpow2.f32 %v11720_v27  ;;  %v11597_v58 = vpop.xlane.xlu1 %11596  ;;  %v11782_v55 = vmul.f32 1.442695, %v11658_v61  ;;  %v11784_v43 = vmul.f32 1.442695, %v11659_v12 }
 0x54c   : > { %v22768_v31 = vpop.eup %18025  ;;  %18045 = vpow2.f32 %v11722_v50  ;;  %v11660_v17 = vsub.f32 %v22486_v53, %v11597_v58  ;;  %v11661_v2 = vsub.f32 %v22493_v48, %v11597_v58  ;;  %11869 = vadd.xlane.f32.xlu0 %v11868_v52  ;;  %v11871_v47 = vadd.f32 %v22763_v26, %v22760_v62 }
 0x54d   : > { %25621 = vst [vmem:[#allocation76_spill] sm:$0xff] %v22768_v31  ;;  %v22772_v16 = vpop.eup %18027  ;;  %18047 = vpow2.f32 %v11724_v6 }
 0x54e   : > { %v22776_v60 = vpop.eup %18029  ;;  %18049 = vpow2.f32 %v11782_v55  ;;  %v11786_v27 = vmul.f32 1.442695, %v11660_v17  ;;  %v11788_v0 = vmul.f32 1.442695, %v11661_v2  ;;  %v11826_v41 = vadd.f32 %v22772_v16, %v22768_v31  ;;  %11872 = vadd.xlane.f32.xlu1 %v11871_v47 }
 0x54f   : > { %25622 = vst [vmem:[#allocation75_spill] sm:$0xff] %v22776_v60  ;;  %v22780_v50 = vpop.eup %18031  ;;  %18051 = vpow2.f32 %v11784_v43 }
 0x550   : > { %v22782_v53 = vpop.eup %18033  ;;  %18053 = vpow2.f32 %v11786_v27  ;;  %11827 = vadd.xlane.f32.xlu0 %v11826_v41  ;;  %v11829_v6 = vadd.f32 %v22780_v50, %v22776_v60  ;;  %v17694_v60 = vld [vmem:[#allocation10 + $0x14] ss:$8 sps:$4 sm:$0xff]  }
 0x551   : > { %25623 = vst [vmem:[#allocation77_spill] sm:$0xff] %v22782_v53  ;;  %v22784_v48 = vpop.eup %18035  ;;  %18055 = vpow2.f32 %v11788_v0 }
 0x552   : > { %25624 = vst [vmem:[#allocation78_spill] sm:$0xff] %v22784_v48  ;;  %v22788_v61 = vpop.eup %18037  ;;  %v11874_v12 = vadd.f32 %v22784_v48, %v22782_v53  ;;  %11830 = vadd.xlane.f32.xlu1 %v11829_v6 }
 0x553   : > { %25625 = vst [vmem:[#allocation80_spill] sm:$0xff] %v22788_v61  ;;  %v22792_v52 = vpop.eup %18039 }
 0x554   : > { %25626 = vst [vmem:[#allocation79_spill] sm:$0xff] %v22792_v52  ;;  %v22794_v58 = vpop.eup %18041  ;;  %11875 = vadd.xlane.f32.xlu0 %v11874_v12  ;;  %v11877_v17 = vadd.f32 %v22792_v52, %v22788_v61 }
 0x555   : > { %25627 = vst [vmem:[#allocation81_spill] sm:$0xff] %v22794_v58  ;;  %v22796_v55 = vpop.eup %18043 }
 0x556   : > { %25628 = vst [vmem:[#allocation82_spill] sm:$0xff] %v22796_v55  ;;  %v22800_v2 = vpop.eup %18045  ;;  %v11832_v43 = vadd.f32 %v22796_v55, %v22794_v58  ;;  %11878 = vadd.xlane.f32.xlu1 %v11877_v17  ;;  %v17691_v58 = vld [vmem:[#allocation10 + $0x4] ss:$8 sps:$4 sm:$0xff]  }
 0x557   : > { %25629 = vst [vmem:[#allocation84_spill] sm:$0xff] %v22800_v2  ;;  %v22804_v47 = vpop.eup %18047  ;;  %14284 = vmatprep.subr.bf16.mxu1 %v17691_v58 }
 0x558   : > { %25630 = vst [vmem:[#allocation83_spill] sm:$0xff] %v22804_v47  ;;  %v22806_v27 = vpop.eup %18049  ;;  %11833 = vadd.xlane.f32.xlu0 %v11832_v43  ;;  %v11835_v41 = vadd.f32 %v22804_v47, %v22800_v2 }
 0x559   : > { %25631 = vst [vmem:[#allocation25_spill] sm:$0xff] %v22806_v27  ;;  %v22808_v0 = vpop.eup %18051 }
 0x55a   : > { %25632 = vst [vmem:[#allocation26_spill] sm:$0xff] %v22808_v0  ;;  %v22812_v6 = vpop.eup %18053  ;;  %v11880_v12 = vadd.f32 %v22808_v0, %v22806_v27  ;;  %11836 = vadd.xlane.f32.xlu1 %v11835_v41 }
 0x55b   : > { %25633 = vst [vmem:[#allocation111_spill] sm:$0xff] %v22812_v6  ;;  %v22816_v61 = vpop.eup %18055 }
 0x55c   : > { %25634 = vst [vmem:[#allocation85_spill] sm:$0xff] %v22816_v61  ;;  %11881 = vadd.xlane.f32.xlu0 %v11880_v12  ;;  %v11883_v17 = vadd.f32 %v22816_v61, %v22812_v6 }
 0x55e   : > { %11884 = vadd.xlane.f32.xlu1 %v11883_v17 }
 0x5a5   : > { %v11792_v55 = vpop.xlane.xlu0 %11791 }
 0x5a6   : > { %18057 = vrcp.f32 %v11792_v55 }
 0x5a9   : > { %v11840_v43 = vpop.xlane.xlu0 %11839  ;;  %v11795_v53 = vpop.xlane.xlu1 %11794 }
 0x5aa   : > { %18059 = vrcp.f32 %v11795_v53 }
 0x5ab   : > { %18061 = vrcp.f32 %v11840_v43 }
 0x5ad   : > { %v11843_v2 = vpop.xlane.xlu1 %11842 }
 0x5ae   : > { %18063 = vrcp.f32 %v11843_v2 }
 0x5b0   : > { %v18058_v27 = vpop.eup %18057 }
 0x5b1   : > { %v11798_v47 = vpop.xlane.xlu0 %11797  ;;  %v11918_v6 = vmul.f32 %v18058_v27, %v22578_v22  ;;  %v11919_v55 = vmul.f32 %v18058_v27, %v22582_v35 }
 0x5b2   : > { %18065 = vrcp.f32 %v11798_v47  ;;  %v17689_v47 = vld [vmem:[#allocation10] ss:$8 sps:$4 sm:$0xff]  }
 0x5b4   : > { %v11801_v0 = vpop.xlane.xlu1 %11800  ;;  %v18060_v12 = vpop.eup %18059 }
 0x5b5   : > { %v11846_v41 = vpop.xlane.xlu0 %11845  ;;  %18067 = vrcp.f32 %v11801_v0  ;;  %v18062_v17 = vpop.eup %18061  ;;  %v11920_v58 = vmul.f32 %v18060_v12, %v22594_v19  ;;  %v11921_v53 = vmul.f32 %v18060_v12, %v22596_v56 }
 0x5b6   : > { %18069 = vrcp.f32 %v11846_v41  ;;  %v11950_v48 = vmul.f32 %v18062_v17, %v22576_v7  ;;  %v11951_v19 = vmul.f32 %v18062_v17, %v22584_v32  ;;  %v17692_v41 = vld [vmem:[#allocation10 + $0x10] ss:$8 sps:$4 sm:$0xff]  }
 0x5b7   : > { %v11983_v61 = vpack.c.bf16 %v11921_v53, %v11919_v55  ;;  %v11982_v2 = vpack.c.bf16 %v11920_v58, %v11918_v6  ;;  %v17697_v55 = vld [vmem:[#allocation10 + $0x24] ss:$8 sps:$4 sm:$0xff]   ;;  %v17695_v53 = vld [vmem:[#allocation10 + $0x20] ss:$8 sps:$4 sm:$0xff]  }
 0x5b8   : > { %v18064_v52 = vpop.eup %18063 }
 0x5b9   : > { %v11952_v22 = vmul.f32 %v18064_v52, %v22590_v38  ;;  %12046 = vmatprep.mubr.bf16.mxu1 %v11983_v61  ;;  %v11953_v35 = vmul.f32 %v18064_v52, %v22600_v34 }
 0x5ba   : > { %v11849_v43 = vpop.xlane.xlu1 %11848  ;;  %12047 = vmatmul.mubr.bf16.vlgmr.msra.gmra.mrb[128].mxu1 %v11982_v2 }
 0x5bb   : > { %18071 = vrcp.f32 %v11849_v43  ;;  %v11999_v27 = vpack.c.bf16 %v11953_v35, %v11951_v19  ;;  %v11998_v6 = vpack.c.bf16 %v11952_v22, %v11950_v48  ;;  %14285 = vmatpush1.bf16.msra.mxu1 %v17689_v47 }
 0x5bc   : > { %v11804_v0 = vpop.xlane.xlu0 %11803  ;;  %v18066_v31 = vpop.eup %18065  ;;  %14286 = vmatprep.subr.bf16.mxu1 %v17694_v60 }
 0x5bd   : > { %18073 = vrcp.f32 %v11804_v0  ;;  %v11923_v58 = vmul.f32 %v18066_v31, %v22611_v45  ;;  %12143 = vmatprep.mubr.bf16.mxu0 %v11999_v27  ;;  %v11922_v32 = vmul.f32 %v18066_v31, %v22608_v18  ;;  %v17700_v45 = vld [vmem:[#allocation10 + $0x34] ss:$8 sps:$4 sm:$0xff]   ;;  %v17698_v0 = vld [vmem:[#allocation10 + $0x30] ss:$8 sps:$4 sm:$0xff]  }
 0x5be   : > { %12144 = vmatmul.mubr.bf16.vlgmr.msra.gmra.mrb[96].mxu0 %v11998_v6 }
 0x5bf   : > { %v11807_v56 = vpop.xlane.xlu1 %11806  ;;  %v18068_v12 = vpop.eup %18067  ;;  %14287 = vmatpush1.bf16.msra.mxu1 %v17692_v41 }
 0x5c0   : > { %18075 = vrcp.f32 %v11807_v56  ;;  %v11925_v38 = vmul.f32 %v18068_v12, %v22616_v13  ;;  %v11924_v34 = vmul.f32 %v18068_v12, %v22606_v3  ;;  %v18070_v52 = vpop.eup %18069  ;;  %14288 = vmatprep.subr.bf16.mxu1 %v17697_v55  ;;  %v17703_v56 = vld [vmem:[#allocation10 + $0x44] ss:$8 sps:$4 sm:$0xff]   ;;  %v17701_v55 = vld [vmem:[#allocation10 + $0x40] ss:$8 sps:$4 sm:$0xff]  }
 0x5c1   : > { %v11852_v7 = vpop.xlane.xlu0 %11851  ;;  %v11955_v18 = vmul.f32 %v18070_v52, %v22628_v24  ;;  %v11954_v13 = vmul.f32 %v18070_v52, %v22623_v25 }
 0x5c2   : > { %18077 = vrcp.f32 %v11852_v7  ;;  %v11985_v48 = vpack.c.bf16 %v11925_v38, %v11923_v58  ;;  %v11984_v17 = vpack.c.bf16 %v11924_v34, %v11922_v32  ;;  %v17706_v32 = vld [vmem:[#allocation10 + $0x54] ss:$8 sps:$4 sm:$0xff]  }
 0x5c3   : > { %v11855_v61 = vpop.xlane.xlu1 %11854  ;;  %14289 = vmatpush1.bf16.msra.mxu1 %v17695_v53  ;;  %v17704_v53 = vld [vmem:[#allocation10 + $0x50] ss:$8 sps:$4 sm:$0xff]  }
 0x5c4   : > { %18079 = vrcp.f32 %v11855_v61  ;;  %12054 = vmatprep.mubr.bf16.mxu1 %v11985_v48  ;;  %14290 = vmatprep.subr.bf16.mxu1 %v17700_v45  ;;  %v17709_v45 = vld [vmem:[#allocation10 + $0x64] ss:$8 sps:$4 sm:$0xff]  }
 0x5c5   : > { %v11810_v43 = vpop.xlane.xlu0 %11809  ;;  %v18072_v60 = vpop.eup %18071  ;;  %12055 = vmatmul.mubr.bf16.gmra.mrb[132].mxu1 %v11984_v17 }
 0x5c6   : > { %18081 = vrcp.f32 %v11810_v43  ;;  %v11957_v3 = vmul.f32 %v18072_v60, %v22637_v54  ;;  %v11956_v31 = vmul.f32 %v18072_v60, %v22634_v8  ;;  %v25635_v60 = vld [vmem:[#allocation71_spill] sm:$0xff] }
 0x5c7   : > { %v11813_v2 = vpop.xlane.xlu1 %11812  ;;  %v18074_v47 = vpop.eup %18073  ;;  %14291 = vmatpush1.bf16.msra.mxu1 %v17698_v0 }
 0x5c8   : > { %18083 = vrcp.f32 %v11813_v2  ;;  %v12001_v19 = vpack.c.bf16 %v11957_v3, %v11955_v18  ;;  %v12000_v35 = vpack.c.bf16 %v11956_v31, %v11954_v13  ;;  %v11927_v24 = vmul.f32 %v18074_v47, %v22644_v21  ;;  %14292 = vmatprep.subr.bf16.mxu1 %v17703_v56 }
 0x5c9   : > { %v11858_v22 = vpop.xlane.xlu0 %11857  ;;  %v11926_v25 = vmul.f32 %v18074_v47, %v22640_v36  ;;  %v17707_v47 = vld [vmem:[#allocation10 + $0x60] ss:$8 sps:$4 sm:$0xff]  }
 0x5ca   : > { %v18076_v27 = vpop.eup %18075  ;;  %18085 = vrcp.f32 %v11858_v22  ;;  %12151 = vmatprep.mubr.bf16.mxu0 %v12001_v19  ;;  %v17712_v22 = vld [vmem:[#allocation10 + $0x74] ss:$8 sps:$4 sm:$0xff]  }
 0x5cb   : > { %v11861_v6 = vpop.xlane.xlu1 %11860  ;;  %v11929_v54 = vmul.f32 %v18076_v27, %v22651_v40  ;;  %v11928_v8 = vmul.f32 %v18076_v27, %v22648_v39  ;;  %12152 = vmatmul.mubr.bf16.gmra.mrb[100].mxu0 %v12000_v35  ;;  %14293 = vmatpush1.bf16.msra.mxu1 %v17701_v55  ;;  %v25636_v35 = vld [vmem:[#allocation73_spill] sm:$0xff] }
 0x5cc   : > { %v18078_v41 = vpop.eup %18077  ;;  %18087 = vrcp.f32 %v11861_v6  ;;  %14294 = vmatprep.subr.bf16.mxu1 %v17706_v32 }
 0x5cd   : > { %v11816_v12 = vpop.xlane.xlu0 %11815  ;;  %v11987_v7 = vpack.c.bf16 %v11929_v54, %v11927_v24  ;;  %v11986_v58 = vpack.c.bf16 %v11928_v8, %v11926_v25  ;;  %v11959_v40 = vmul.f32 %v18078_v41, %v22660_v63  ;;  %v11958_v39 = vmul.f32 %v18078_v41, %v22656_v14  ;;  %v17710_v25 = vld [vmem:[#allocation10 + $0x70] ss:$8 sps:$4 sm:$0xff]   ;;  %v17715_v41 = vld [vmem:[#allocation10 + $0x84] ss:$8 sps:$4 sm:$0xff]  }
 0x5ce   : > { %v18080_v38 = vpop.eup %18079  ;;  %18089 = vrcp.f32 %v11816_v12 }
 0x5cf   : > { %12062 = vmatprep.mubr.bf16.mxu1 %v11987_v7  ;;  %v11819_v21 = vpop.xlane.xlu1 %11818  ;;  %v11961_v36 = vmul.f32 %v18080_v38, %v22667_v9  ;;  %v11960_v34 = vmul.f32 %v18080_v38, %v22664_v15  ;;  %14295 = vmatpush1.bf16.msra.mxu1 %v17704_v53  ;;  %v25637_v7 = vld [vmem:[#allocation74_spill] sm:$0xff] }
 0x5d0   : > { %v18082_v61 = vpop.eup %18081  ;;  %18091 = vrcp.f32 %v11819_v21  ;;  %12063 = vmatmul.mubr.bf16.gmra.mrb[136].mxu1 %v11986_v58  ;;  %14296 = vmatprep.subr.bf16.mxu1 %v17709_v45 }
 0x5d1   : > { %v11864_v52 = vpop.xlane.xlu0 %11863  ;;  %v12003_v48 = vpack.c.bf16 %v11961_v36, %v11959_v40  ;;  %v12002_v17 = vpack.c.bf16 %v11960_v34, %v11958_v39  ;;  %v11931_v9 = vmul.f32 %v18082_v61, %v22676_v11  ;;  %v11930_v15 = vmul.f32 %v18082_v61, %v25635_v60  ;;  %v17713_v40 = vld [vmem:[#allocation10 + $0x80] ss:$8 sps:$4 sm:$0xff]  }
 0x5d2   : > { %v18084_v43 = vpop.eup %18083  ;;  %18093 = vrcp.f32 %v11864_v52 }
 0x5d3   : > { %12159 = vmatprep.mubr.bf16.mxu0 %v12003_v48  ;;  %v11867_v63 = vpop.xlane.xlu1 %11866  ;;  %v11933_v14 = vmul.f32 %v18084_v43, %v22683_v37  ;;  %v11932_v2 = vmul.f32 %v18084_v43, %v22680_v44  ;;  %14297 = vmatpush1.bf16.msra.mxu1 %v17707_v47 }
 0x5d4   : > { %v18086_v18 = vpop.eup %18085  ;;  %18095 = vrcp.f32 %v11867_v63  ;;  %12160 = vmatmul.mubr.bf16.gmra.mrb[104].mxu0 %v12002_v17  ;;  %14298 = vmatprep.subr.bf16.mxu1 %v17712_v22  ;;  %v25638_v22 = vld [vmem:[#allocation76_spill] sm:$0xff] }
 0x5d5   : > { %v11822_v3 = vpop.xlane.xlu0 %11821  ;;  %v11989_v13 = vpack.c.bf16 %v11933_v14, %v11931_v9  ;;  %v11988_v31 = vpack.c.bf16 %v11932_v2, %v11930_v15  ;;  %v11963_v37 = vmul.f32 %v18086_v18, %v22692_v49  ;;  %v11962_v44 = vmul.f32 %v18086_v18, %v25636_v35 }
 0x5d6   : > { %v18088_v0 = vpop.eup %18087  ;;  %18097 = vrcp.f32 %v11822_v3 }
 0x5d7   : > { %12070 = vmatprep.mubr.bf16.mxu1 %v11989_v13  ;;  %v11825_v11 = vpop.xlane.xlu1 %11824  ;;  %v11965_v19 = vmul.f32 %v18088_v0, %v22699_v4  ;;  %v11964_v56 = vmul.f32 %v18088_v0, %v22696_v20  ;;  %14299 = vmatpush1.bf16.msra.mxu1 %v17710_v25 }
 0x5d8   : > { %v18090_v27 = vpop.eup %18089  ;;  %18099 = vrcp.f32 %v11825_v11  ;;  %12071 = vmatmul.mubr.bf16.gmra.mrb[140].mxu1 %v11988_v31  ;;  %14300 = vmatprep.subr.bf16.mxu1 %v17715_v41  ;;  %v25639_v11 = vld [vmem:[#allocation75_spill] sm:$0xff] }
 0x5d9   : > { %v11870_v6 = vpop.xlane.xlu0 %11869  ;;  %v12005_v24 = vpack.c.bf16 %v11965_v19, %v11963_v37  ;;  %v12004_v54 = vpack.c.bf16 %v11964_v56, %v11962_v44  ;;  %v11935_v4 = vmul.f32 %v18090_v27, %v22708_v59  ;;  %v11934_v20 = vmul.f32 %v18090_v27, %v25637_v7  ;;  %v25640_v44 = vld [vmem:[#allocation78_spill] sm:$0xff]  ;;  %v25641_v27 = vld [vmem:[#allocation79_spill] sm:$0xff] }
 0x5da   : > { %v18092_v8 = vpop.eup %18091  ;;  %18101 = vrcp.f32 %v11870_v6  ;;  %v25645_v7 = vld [vmem:[#allocation83_spill] sm:$0xff] }
 0x5db   : > { %12167 = vmatprep.mubr.bf16.mxu0 %v12005_v24  ;;  %v11873_v49 = vpop.xlane.xlu1 %11872  ;;  %v11937_v12 = vmul.f32 %v18092_v8, %v22715_v5  ;;  %v11936_v58 = vmul.f32 %v18092_v8, %v22712_v23  ;;  %14301 = vmatpush1.bf16.msra.mxu1 %v17713_v40  ;;  %v25642_v24 = vld [vmem:[#allocation77_spill] sm:$0xff] }
 0x5dc   : > { %v18094_v55 = vpop.eup %18093  ;;  %18103 = vrcp.f32 %v11873_v49  ;;  %12168 = vmatmul.mubr.bf16.gmra.mrb[108].mxu0 %v12004_v54 }
 0x5dd   : > { %v11828_v38 = vpop.xlane.xlu0 %11827  ;;  %v11991_v32 = vpack.c.bf16 %v11937_v12, %v11935_v4  ;;  %v11990_v21 = vpack.c.bf16 %v11936_v58, %v11934_v20  ;;  %v11967_v59 = vmul.f32 %v18094_v55, %v22724_v33  ;;  %v11966_v34 = vmul.f32 %v18094_v55, %v22720_v30  ;;  %v25644_v4 = vld [vmem:[#allocation82_spill] sm:$0xff]  ;;  %v25646_v58 = vld [vmem:[#allocation81_spill] sm:$0xff] }
 0x5de   : > { %v18096_v36 = vpop.eup %18095  ;;  %18105 = vrcp.f32 %v11828_v38  ;;  %v25647_v38 = vld [vmem:[#allocation84_spill] sm:$0xff] }
 0x5df   : > { %12078 = vmatprep.mubr.bf16.mxu1 %v11991_v32  ;;  %v11831_v39 = vpop.xlane.xlu1 %11830  ;;  %v11969_v5 = vmul.f32 %v18096_v36, %v22731_v42  ;;  %v11968_v23 = vmul.f32 %v18096_v36, %v22728_v29 }
 0x5e0   : > { %v18098_v61 = vpop.eup %18097  ;;  %18107 = vrcp.f32 %v11831_v39  ;;  %12079 = vmatmul.mubr.bf16.gmra.mrb[144].mxu1 %v11990_v21 }
 0x5e1   : > { %v11876_v52 = vpop.xlane.xlu0 %11875  ;;  %v12007_v48 = vpack.c.bf16 %v11969_v5, %v11967_v59  ;;  %v12006_v17 = vpack.c.bf16 %v11968_v23, %v11966_v34  ;;  %v11939_v45 = vmul.f32 %v18098_v61, %v22740_v10  ;;  %v11938_v42 = vmul.f32 %v18098_v61, %v22736_v1  ;;  %v25648_v59 = vld [vmem:[#allocation26_spill] sm:$0xff]  ;;  %v25649_v34 = vld [vmem:[#allocation85_spill] sm:$0xff] }
 0x5e2   : > { %v18100_v53 = vpop.eup %18099  ;;  %18109 = vrcp.f32 %v11876_v52  ;;  %v25650_v61 = vld [vmem:[#allocation25_spill] sm:$0xff] }
 0x5e3   : > { %12175 = vmatprep.mubr.bf16.mxu0 %v12007_v48  ;;  %v11879_v43 = vpop.xlane.xlu1 %11878  ;;  %v11941_v33 = vmul.f32 %v18100_v53, %v22747_v51  ;;  %v11940_v30 = vmul.f32 %v18100_v53, %v22744_v28  ;;  %v25651_v48 = vld [vmem:[#allocation111_spill] sm:$0xff] }
 0x5e4   : > { %v18102_v29 = vpop.eup %18101  ;;  %18111 = vrcp.f32 %v11879_v43  ;;  %12176 = vmatmul.mubr.bf16.gmra.mrb[112].mxu0 %v12006_v17 }
 0x5e5   : > { %v11834_v63 = vpop.xlane.xlu0 %11833  ;;  %v11993_v9 = vpack.c.bf16 %v11941_v33, %v11939_v45  ;;  %v11992_v14 = vpack.c.bf16 %v11940_v30, %v11938_v42  ;;  %v11971_v2 = vmul.f32 %v18102_v29, %v22756_v57  ;;  %v11970_v51 = vmul.f32 %v18102_v29, %v22752_v46  ;;  %v17716_v45 = vld [vmem:[#allocation10 + $0x90] ss:$8 sps:$4 sm:$0xff]   ;;  %v17718_v33 = vld [vmem:[#allocation10 + $0x94] ss:$8 sps:$4 sm:$0xff]   ;;  %v17719_v42 = vld [vmem:[#allocation10 + $0xa0] ss:$8 sps:$4 sm:$0xff]  }
 0x5e6   : > { %v18104_v60 = vpop.eup %18103  ;;  %18113 = vrcp.f32 %v11834_v63  ;;  %14302 = vmatprep.subr.bf16.mxu1 %v17718_v33  ;;  %v17721_v30 = vld [vmem:[#allocation10 + $0xa4] ss:$8 sps:$4 sm:$0xff]   ;;  %v17722_v29 = vld [vmem:[#allocation10 + $0xb0] ss:$8 sps:$4 sm:$0xff]   ;;  %v17724_v63 = vld [vmem:[#allocation10 + $0xb4] ss:$8 sps:$4 sm:$0xff]  }
 0x5e7   : > { %12086 = vmatprep.mubr.bf16.mxu1 %v11993_v9  ;;  %v11837_v15 = vpop.xlane.xlu1 %11836  ;;  %v11973_v10 = vmul.f32 %v18104_v60, %v22763_v26  ;;  %v11972_v1 = vmul.f32 %v18104_v60, %v22760_v62  ;;  %14303 = vmatpush1.bf16.msra.mxu1 %v17716_v45  ;;  %v17725_v9 = vld [vmem:[#allocation10 + $0xc0] ss:$8 sps:$4 sm:$0xff]   ;;  %v17730_v60 = vld [vmem:[#allocation10 + $0xd4] ss:$8 sps:$4 sm:$0xff]  }
 0x5e8   : > { %v18106_v18 = vpop.eup %18105  ;;  %18115 = vrcp.f32 %v11837_v15  ;;  %12087 = vmatmul.mubr.bf16.gmra.mrb[148].mxu1 %v11992_v14  ;;  %14304 = vmatprep.subr.bf16.mxu1 %v17721_v30  ;;  %v17727_v14 = vld [vmem:[#allocation10 + $0xc4] ss:$8 sps:$4 sm:$0xff]   ;;  %v17728_v15 = vld [vmem:[#allocation10 + $0xd0] ss:$8 sps:$4 sm:$0xff]  }
 0x5e9   : > { %v11882_v28 = vpop.xlane.xlu0 %11881  ;;  %v12009_v3 = vpack.c.bf16 %v11973_v10, %v11971_v2  ;;  %v12008_v13 = vpack.c.bf16 %v11972_v1, %v11970_v51  ;;  %v11943_v0 = vmul.f32 %v18106_v18, %v22772_v16  ;;  %v11942_v26 = vmul.f32 %v18106_v18, %v25638_v22  ;;  %v25643_v16 = vld [vmem:[#allocation80_spill] sm:$0xff]  ;;  %v17734_v51 = vld [vmem:[#allocation10 + $0xf0] ss:$8 sps:$4 sm:$0xff]   ;;  %v17736_v1 = vld [vmem:[#allocation10 + $0xf4] ss:$8 sps:$4 sm:$0xff]  }
 0x5ea   : > { %v18108_v31 = vpop.eup %18107  ;;  %18117 = vrcp.f32 %v11882_v28  ;;  %v17731_v2 = vld [vmem:[#allocation10 + $0xe0] ss:$8 sps:$4 sm:$0xff]   ;;  %v17733_v10 = vld [vmem:[#allocation10 + $0xe4] ss:$8 sps:$4 sm:$0xff]  }
 0x5eb   : > { %12183 = vmatprep.mubr.bf16.mxu0 %v12009_v3  ;;  %v11885_v47 = vpop.xlane.xlu1 %11884  ;;  %v11945_v57 = vmul.f32 %v18108_v31, %v22780_v50  ;;  %v11944_v46 = vmul.f32 %v18108_v31, %v25639_v11  ;;  %14305 = vmatpush1.bf16.msra.mxu1 %v17719_v42 }
 0x5ec   : > { %v18110_v37 = vpop.eup %18109  ;;  %18119 = vrcp.f32 %v11885_v47  ;;  %12184 = vmatmul.mubr.bf16.gmra.mrb[116].mxu0 %v12008_v13  ;;  %14306 = vmatprep.subr.bf16.mxu1 %v17724_v63 }
 0x5ed   : > { %v11995_v62 = vpack.c.bf16 %v11945_v57, %v11943_v0  ;;  %v11994_v19 = vpack.c.bf16 %v11944_v46, %v11942_v26  ;;  %v11975_v56 = vmul.f32 %v18110_v37, %v25640_v44  ;;  %v11974_v54 = vmul.f32 %v18110_v37, %v25642_v24 }
 0x5ee   : > { %v18112_v35 = vpop.eup %18111  ;;  %v25652_v57 = vmov 0.0  }
 0x5ef   : > { %12094 = vmatprep.mubr.bf16.mxu1 %v11995_v62  ;;  %v11977_v6 = vmul.f32 %v18112_v35, %v25641_v27  ;;  %v11976_v25 = vmul.f32 %v18112_v35, %v25643_v16  ;;  %14307 = vmatpush1.bf16.msra.mxu1 %v17722_v29 }
 0x5f0   : > { %v18114_v50 = vpop.eup %18113  ;;  %12095 = vmatmul.mubr.bf16.gmra.mrb[152].mxu1 %v11994_v19  ;;  %14308 = vmatprep.subr.bf16.mxu1 %v17727_v14  ;;  %v25653_v19 = vld [vmem:[#allocation23_spill] sm:$0xff] }
 0x5f1   : > { %v12011_v8 = vpack.c.bf16 %v11977_v6, %v11975_v56  ;;  %v12010_v41 = vpack.c.bf16 %v11976_v25, %v11974_v54  ;;  %v11947_v12 = vmul.f32 %v18114_v50, %v25644_v4  ;;  %v11946_v55 = vmul.f32 %v18114_v50, %v25646_v58  ;;  %v25654_v58 = vld [vmem:[#allocation24_spill] sm:$0xff] }
 0x5f2   : > { %v18116_v49 = vpop.eup %18115 }
 0x5f3   : > { %12191 = vmatprep.mubr.bf16.mxu0 %v12011_v8  ;;  %v11949_v20 = vmul.f32 %v18116_v49, %v25645_v7  ;;  %v11948_v32 = vmul.f32 %v18116_v49, %v25647_v38  ;;  %14309 = vmatpush1.bf16.msra.mxu1 %v17725_v9 }
 0x5f4   : > { %v18118_v21 = vpop.eup %18117  ;;  %12192 = vmatmul.mubr.bf16.gmra.mrb[120].mxu0 %v12010_v41  ;;  %14310 = vmatprep.subr.bf16.mxu1 %v17730_v60 }
 0x5f5   : > { %v11997_v40 = vpack.c.bf16 %v11949_v20, %v11947_v12  ;;  %v11996_v36 = vpack.c.bf16 %v11948_v32, %v11946_v55  ;;  %v11979_v5 = vmul.f32 %v18118_v21, %v25648_v59  ;;  %v11978_v52 = vmul.f32 %v18118_v21, %v25650_v61 }
 0x5f6   : > { %v18120_v39 = vpop.eup %18119 }
 0x5f7   : > { %12102 = vmatprep.mubr.bf16.mxu1 %v11997_v40  ;;  %v11981_v23 = vmul.f32 %v18120_v39, %v25649_v34  ;;  %v11980_v17 = vmul.f32 %v18120_v39, %v25651_v48  ;;  %14311 = vmatpush1.bf16.msra.mxu1 %v17728_v15 }
 0x5f8   : > { %12103 = vmatmul.mubr.bf16.gmra.mrb[156].mxu1 %v11996_v36  ;;  %14312 = vmatprep.subr.bf16.mxu1 %v17733_v10 }
 0x5f9   : > { %v12013_v53 = vpack.c.bf16 %v11981_v23, %v11979_v5  ;;  %v12012_v43 = vpack.c.bf16 %v11980_v17, %v11978_v52 }
 0x5fb   : > { %12199 = vmatprep.mubr.bf16.mxu0 %v12013_v53  ;;  %14313 = vmatpush1.bf16.msra.mxu1 %v17731_v2 }
 0x5fc   : > { %12200 = vmatmul.mubr.bf16.gmra.mrb[124].mxu0 %v12012_v43  ;;  %14314 = vmatprep.subr.bf16.mxu1 %v17736_v1 }
 0x5ff   : > { %14315 = vmatpush1.bf16.msra.mxu1 %v17734_v51 }
 0x68d   : > { %v17253_v18 = vpop.f32.mrb[128].mxu1 }
 0x68e   : > { %v17254_v28 = vpop.f32.mrb[129].mxu1 }
 0x68f   : > { %v17255_v3 = vadd.f32 %v17254_v28, %v17253_v18  ;;  %v17256_v13 = vpop.f32.mrb[130].mxu1 }
 0x690   : > { %v17257_v31 = vpop.f32.mrb[131].mxu1 }
 0x691   : > { %v17258_v47 = vadd.f32 %v17257_v31, %v17256_v13  ;;  %v17317_v0 = vpop.f32.mrb[96].mxu0  ;;  %v12208_v22 = vcombine.high %v17255_v3, %v25652_v57  ;;  %v12215_v35 = vrot.slane %v17255_v3, %v25653_v19 }
 0x692   : > { %v17318_v26 = vpop.f32.mrb[97].mxu0 }
 0x693   : > { %v17319_v11 = vadd.f32 %v17318_v26, %v17317_v0  ;;  %v17320_v46 = vpop.f32.mrb[98].mxu0  ;;  %v12274_v37 = vcombine.high %v17258_v47, %v25652_v57  ;;  %v12222_v24 = vrot.slane %v12208_v22, %v25653_v19  ;;  %v12281_v49 = vrot.slane %v17258_v47, %v25653_v19 }
 0x694   : > { %v17321_v62 = vpop.f32.mrb[99].mxu0 }
 0x695   : > { %v12223_v44 = vcombine.high %v17319_v11, %v25652_v57  ;;  %v12230_v56 = vrot.slane %v17319_v11, %v25653_v19  ;;  %v17322_v27 = vadd.f32 %v17321_v62, %v17320_v46  ;;  %v12288_v4 = vrot.slane %v12274_v37, %v25653_v19 }
 0x697   : > { %v12237_v16 = vrot.slane %v12223_v44, %v25653_v19  ;;  %v12238_v25 = vcombine.low %v12215_v35, %v12230_v56  ;;  %v12239_v50 = vcombine.high %v12215_v35, %v12230_v56  ;;  %v12289_v8 = vcombine.high %v17322_v27, %v25652_v57 }
 0x698   : > { %v17259_v6 = vpop.f32.mrb[132].mxu1  ;;  %v12296_v12 = vrot.slane %v17322_v27, %v25653_v19 }
 0x699   : > { %v17260_v54 = vpop.f32.mrb[133].mxu1  ;;  %v12246_v55 = vrot.slane %v12238_v25, %v25654_v58  ;;  %v12253_v38 = vrot.slane %v12239_v50, %v25654_v58  ;;  %v12254_v32 = vcombine.low %v12222_v24, %v12237_v16  ;;  %v12255_v21 = vcombine.high %v12222_v24, %v12237_v16 }
 0x69a   : > { %v17262_v41 = vpop.f32.mrb[134].mxu1  ;;  %v17261_v7 = vadd.f32 %v17260_v54, %v17259_v6  ;;  %v12303_v40 = vrot.slane %v12289_v8, %v25653_v19  ;;  %v12304_v36 = vcombine.low %v12281_v49, %v12296_v12  ;;  %v12305_v39 = vcombine.high %v12281_v49, %v12296_v12 }
 0x69b   : > { %v17263_v20 = vpop.f32.mrb[135].mxu1  ;;  %v22900_v34 = vrot.slane %v12254_v32, %v25654_v58  ;;  %v22903_v23 = vrot.slane %v12255_v21, %v25654_v58  ;;  %v13264_v61 = vcombine.low %v12246_v55, %v12253_v38  ;;  %v16971_v52 = vcombine.high %v12246_v55, %v12253_v38 }
 0x69c   : > { %v12340_v59 = vcombine.high %v17261_v7, %v25652_v57  ;;  %v12312_v17 = vrot.slane %v12304_v36, %v25654_v58  ;;  %v12319_v53 = vrot.slane %v12305_v39, %v25654_v58  ;;  %v12320_v43 = vcombine.low %v12288_v4, %v12303_v40 }
 0x69d   : > { %v12321_v45 = vcombine.high %v12288_v4, %v12303_v40  ;;  %v22908_v42 = vrot.slane %v13264_v61, %v25653_v19  ;;  %v22911_v30 = vrot.slane %v16971_v52, %v25653_v19  ;;  %v13280_v29 = vcombine.low %v22900_v34, %v22903_v23 }
 0x69e   : > { %v17323_v5 = vpop.f32.mrb[100].mxu0  ;;  %v16972_v63 = vcombine.high %v22900_v34, %v22903_v23  ;;  %v22918_v14 = vrot.slane %v12320_v43, %v25654_v58  ;;  %v13314_v15 = vcombine.low %v12312_v17, %v12319_v53  ;;  %v16973_v2 = vcombine.high %v12312_v17, %v12319_v53 }
 0x69f   : > { %v17324_v48 = vpop.f32.mrb[101].mxu0  ;;  %v22921_v60 = vrot.slane %v12321_v45, %v25654_v58  ;;  %v12347_v51 = vrot.slane %v17261_v7, %v25653_v19  ;;  %v12354_v1 = vrot.slane %v12340_v59, %v25653_v19  ;;  %v17264_v18 = vadd.f32 %v17263_v20, %v17262_v41 }
 0x6a0   : > { %v17326_v33 = vpop.f32.mrb[102].mxu0  ;;  %v17325_v28 = vadd.f32 %v17324_v48, %v17323_v5  ;;  %v22926_v13 = vrot.slane %v13314_v15, %v25653_v19  ;;  %v22929_v31 = vrot.slane %v16973_v2, %v25653_v19  ;;  %v22940_v6 = vrot.slane %v13280_v29, %v25653_v19 }
 0x6a1   : > { %v17327_v9 = vpop.f32.mrb[103].mxu0  ;;  %v13330_v47 = vcombine.low %v22918_v14, %v22921_v60  ;;  %v16974_v0 = vcombine.high %v22918_v14, %v22921_v60  ;;  %v12406_v26 = vcombine.high %v17264_v18, %v25652_v57  ;;  %v12413_v11 = vrot.slane %v17264_v18, %v25653_v19 }
 0x6a2   : > { %v12355_v46 = vcombine.high %v17325_v28, %v25652_v57  ;;  %v12362_v37 = vrot.slane %v17325_v28, %v25653_v19  ;;  %v17328_v35 = vadd.f32 %v17327_v9, %v17326_v33  ;;  %v13346_v23 = vcombine.low %v22926_v13, %v22929_v31 }
 0x6a3   : > { %v17265_v10 = vpop.f32.mrb[136].mxu1  ;;  %v12420_v24 = vrot.slane %v12406_v26, %v25653_v19  ;;  %v13345_v34 = vrot.slane %v16974_v0, %v25653_v19 }
 0x6a4   : > { %v17266_v3 = vpop.f32.mrb[137].mxu1  ;;  %v12369_v54 = vrot.slane %v12355_v46, %v25653_v19  ;;  %v12370_v16 = vcombine.low %v12347_v51, %v12362_v37  ;;  %v12371_v25 = vcombine.high %v12347_v51, %v12362_v37  ;;  %v12421_v8 = vcombine.high %v17328_v35, %v25652_v57 }
 0x6a5   : > { %v17268_v22 = vpop.f32.mrb[138].mxu1  ;;  %v17267_v44 = vadd.f32 %v17266_v3, %v17265_v10  ;;  %v12428_v41 = vrot.slane %v17328_v35, %v25653_v19 }
 0x6a6   : > { %v17269_v62 = vpop.f32.mrb[139].mxu1  ;;  %v12378_v7 = vrot.slane %v12370_v16, %v25654_v58  ;;  %v12385_v20 = vrot.slane %v12371_v25, %v25654_v58  ;;  %v12386_v55 = vcombine.low %v12354_v1, %v12369_v54  ;;  %v12387_v38 = vcombine.high %v12354_v1, %v12369_v54 }
 0x6a7   : > { %v17270_v56 = vadd.f32 %v17269_v62, %v17268_v22  ;;  %v17329_v27 = vpop.f32.mrb[104].mxu0  ;;  %v12472_v49 = vcombine.high %v17267_v44, %v25652_v57  ;;  %v22948_v4 = vrot.slane %v17267_v44, %v25653_v19  ;;  %v12435_v21 = vrot.slane %v12421_v8, %v25653_v19 }
 0x6a8   : > { %v17330_v50 = vpop.f32.mrb[105].mxu0  ;;  %v12436_v40 = vcombine.low %v12413_v11, %v12428_v41  ;;  %v12437_v36 = vcombine.high %v12413_v11, %v12428_v41  ;;  %v22957_v5 = vrot.slane %v12386_v55, %v25654_v58  ;;  %v22960_v61 = vrot.slane %v12387_v38, %v25654_v58 }
 0x6a9   : > { %v17332_v12 = vpop.f32.mrb[106].mxu0  ;;  %v22954_v39 = vrot.slane %v12472_v49, %v25653_v19  ;;  %v13364_v52 = vcombine.low %v12378_v7, %v12385_v20  ;;  %v16975_v48 = vcombine.high %v12378_v7, %v12385_v20  ;;  %v12452_v45 = vcombine.low %v12420_v24, %v12435_v21 }
 0x6aa   : > { %v17333_v32 = vpop.f32.mrb[107].mxu0  ;;  %v12444_v53 = vrot.slane %v12436_v40, %v25654_v58  ;;  %v12451_v43 = vrot.slane %v12437_v36, %v25654_v58  ;;  %v12453_v33 = vcombine.high %v12420_v24, %v12435_v21  ;;  %v13380_v2 = vcombine.low %v22957_v5, %v22960_v61 }
 0x6ab   : > { %v17271_v59 = vpop.f32.mrb[140].mxu1  ;;  %v22965_v9 = vrot.slane %v13364_v52, %v25653_v19  ;;  %v22968_v15 = vrot.slane %v16975_v48, %v25653_v19  ;;  %v16976_v10 = vcombine.high %v22957_v5, %v22960_v61  ;;  %v22975_v1 = vrot.slane %v12452_v45, %v25654_v58 }
 0x6ac   : > { %v17272_v17 = vpop.f32.mrb[141].mxu1  ;;  %v22978_v18 = vrot.slane %v12453_v33, %v25654_v58  ;;  %v13414_v28 = vcombine.low %v12444_v53, %v12451_v43  ;;  %v16977_v3 = vcombine.high %v12444_v53, %v12451_v43  ;;  %v12538_v26 = vcombine.high %v17270_v56, %v25652_v57 }
 0x6ad   : > { %v17274_v29 = vpop.f32.mrb[142].mxu1  ;;  %v12545_v11 = vrot.slane %v17270_v56, %v25653_v19  ;;  %v17331_v46 = vadd.f32 %v17330_v50, %v17329_v27  ;;  %v17334_v37 = vadd.f32 %v17333_v32, %v17332_v12  ;;  %v17273_v49 = vadd.f32 %v17272_v17, %v17271_v59 }
 0x6ae   : > { %v17275_v51 = vpop.f32.mrb[143].mxu1  ;;  %v22983_v35 = vrot.slane %v13414_v28, %v25653_v19  ;;  %v22986_v44 = vrot.slane %v16977_v3, %v25653_v19  ;;  %v13430_v24 = vcombine.low %v22975_v1, %v22978_v18  ;;  %v12552_v25 = vrot.slane %v12538_v26, %v25653_v19 }
 0x6af   : > { %v17335_v22 = vpop.f32.mrb[108].mxu0  ;;  %v12487_v56 = vcombine.high %v17331_v46, %v25652_v57  ;;  %v12494_v27 = vrot.slane %v17331_v46, %v25653_v19  ;;  %v12553_v50 = vcombine.high %v17334_v37, %v25652_v57  ;;  %v12560_v41 = vrot.slane %v17334_v37, %v25653_v19 }
 0x6b0   : > { %v17336_v62 = vpop.f32.mrb[109].mxu0  ;;  %v17276_v12 = vadd.f32 %v17275_v51, %v17274_v29  ;;  %v12604_v48 = vcombine.high %v17273_v49, %v25652_v57  ;;  %v12611_v59 = vrot.slane %v17273_v49, %v25653_v19 }
 0x6b1   : > { %v22992_v16 = vpop.f32.mrb[110].mxu0  ;;  %v17337_v7 = vadd.f32 %v17336_v62, %v17335_v22  ;;  %v12501_v55 = vrot.slane %v12487_v56, %v25653_v19  ;;  %v12502_v38 = vcombine.low %v22948_v4, %v12494_v27  ;;  %v12503_v32 = vcombine.high %v22948_v4, %v12494_v27 }
 0x6b2   : > { %v22998_v8 = vpop.f32.mrb[111].mxu0  ;;  %v12567_v21 = vrot.slane %v12553_v50, %v25653_v19  ;;  %v12568_v36 = vcombine.low %v12545_v11, %v12560_v41  ;;  %v12569_v52 = vcombine.high %v12545_v11, %v12560_v41 }
 0x6b3   : > { %v23001_v20 = vpop.f32.mrb[144].mxu1  ;;  %v12510_v53 = vrot.slane %v12502_v38, %v25654_v58  ;;  %v12517_v43 = vrot.slane %v12503_v32, %v25654_v58  ;;  %v12518_v45 = vcombine.low %v22954_v39, %v12501_v55  ;;  %v12519_v4 = vcombine.high %v22954_v39, %v12501_v55 }
 0x6b4   : > { %v23007_v40 = vpop.f32.mrb[145].mxu1  ;;  %v12576_v29 = vrot.slane %v12568_v36, %v25654_v58  ;;  %v12583_v51 = vrot.slane %v12569_v52, %v25654_v58  ;;  %v12584_v28 = vcombine.low %v12552_v25, %v12567_v21  ;;  %v12585_v3 = vcombine.high %v12552_v25, %v12567_v21 }
 0x6b5   : > { %v23011_v17 = vpop.f32.mrb[146].mxu1  ;;  %v23024_v26 = vrot.slane %v12518_v45, %v25654_v58  ;;  %v23027_v11 = vrot.slane %v12519_v4, %v25654_v58  ;;  %v13464_v46 = vcombine.low %v12510_v53, %v12517_v43  ;;  %v16979_v37 = vcombine.high %v12510_v53, %v12517_v43 }
 0x6b6   : > { %v23017_v33 = vpop.f32.mrb[147].mxu1  ;;  %v23032_v39 = vrot.slane %v12584_v28, %v25654_v58  ;;  %v23035_v56 = vrot.slane %v12585_v3, %v25654_v58  ;;  %v13514_v27 = vcombine.low %v12576_v29, %v12583_v51  ;;  %v16981_v25 = vcombine.high %v12576_v29, %v12583_v51 }
 0x6b7   : > { %v23021_v22 = vpop.f32.mrb[112].mxu0  ;;  %v23040_v41 = vrot.slane %v13464_v46, %v25653_v19  ;;  %v23043_v49 = vrot.slane %v16979_v37, %v25653_v19  ;;  %v12618_v45 = vrot.slane %v12604_v48, %v25653_v19  ;;  %v12670_v4 = vcombine.high %v17276_v12, %v25652_v57 }
 0x6b8   : > { %v23029_v62 = vpop.f32.mrb[113].mxu0  ;;  %v23052_v21 = vrot.slane %v13514_v27, %v25653_v19  ;;  %v23055_v36 = vrot.slane %v16981_v25, %v25653_v19  ;;  %v23066_v29 = vrot.slane %v17276_v12, %v25653_v19  ;;  %v12619_v51 = vcombine.high %v17337_v7, %v25652_v57 }
 0x6b9   : > { %v23037_v50 = vpop.f32.mrb[114].mxu0  ;;  %v12626_v3 = vrot.slane %v17337_v7, %v25653_v19  ;;  %v13295_v46 = vrot.slane %v16972_v63, %v25653_v19  ;;  %v13296_v37 = vcombine.low %v22908_v42, %v22911_v30  ;;  %v13337_v12 = vrot.slane %v13330_v47, %v25653_v19 }
 0x6ba   : > { %v23049_v32 = vpop.f32.mrb[115].mxu0  ;;  %v23085_v27 = vrot.slane %v12670_v4, %v25653_v19  ;;  %v12633_v7 = vrot.slane %v12619_v51, %v25653_v19  ;;  %v13353_v52 = vrot.slane %v13346_v23, %v25654_v58  ;;  %v17340_v0 = vadd.f32 %v22998_v8, %v22992_v16 }
 0x6bb   : > { %v23061_v43 = vpop.f32.mrb[148].mxu1  ;;  %v12634_v30 = vcombine.low %v12611_v59, %v12626_v3  ;;  %v12635_v63 = vcombine.high %v12611_v59, %v12626_v3  ;;  %v13303_v47 = vrot.slane %v13296_v37, %v25654_v58  ;;  %v13304_v25 = vcombine.low %v22940_v6, %v13295_v46 }
 0x6bc   : > { %v23069_v28 = vpop.f32.mrb[149].mxu1  ;;  %v12650_v53 = vcombine.low %v12618_v45, %v12633_v7  ;;  %v12651_v51 = vcombine.high %v12618_v45, %v12633_v7  ;;  %v13354_v38 = vcombine.low %v13337_v12, %v13345_v34  ;;  %v17279_v46 = vadd.f32 %v23007_v40, %v23001_v20 }
 0x6bd   : > { %v23082_v48 = vpop.f32.mrb[150].mxu1  ;;  %v12642_v60 = vrot.slane %v12634_v30, %v25654_v58  ;;  %v12649_v13 = vrot.slane %v12635_v63, %v25654_v58  ;;  %v13311_v31 = vrot.slane %v13304_v25, %v25654_v58  ;;  %v12692_v25 = vrot.slane %v17340_v0, %v25653_v19 }
 0x6be   : > { %v23094_v42 = vpop.f32.mrb[151].mxu1  ;;  %v23111_v6 = vrot.slane %v12650_v53, %v25654_v58  ;;  %v23114_v45 = vrot.slane %v12651_v51, %v25654_v58  ;;  %v13361_v3 = vrot.slane %v13354_v38, %v25654_v58  ;;  %v17282_v8 = vadd.f32 %v23017_v33, %v23011_v17 }
 0x6bf   : > { %v23098_v4 = vpop.f32.mrb[116].mxu0  ;;  %v13564_v12 = vcombine.low %v12642_v60, %v12649_v13  ;;  %v16983_v7 = vcombine.high %v12642_v60, %v12649_v13  ;;  %v13312_v34 = vcombine.low %v13303_v47, %v13311_v31  ;;  %v13313_v23 = vcombine.high %v13303_v47, %v13311_v31 }
 0x6c0   : > { %v23101_v14 = vpop.f32.mrb[117].mxu0  ;;  %v13362_v30 = vcombine.low %v13353_v52, %v13361_v3  ;;  %v13363_v63 = vcombine.high %v13353_v52, %v13361_v3  ;;  %v12685_v47 = vcombine.high %v17340_v0, %v25652_v57  ;;  %v12736_v31 = vcombine.high %v17279_v46, %v25652_v57 }
 0x6c1   : > { %v23108_v59 = vpop.f32.mrb[118].mxu0  ;;  %v23130_v20 = vrot.slane %v13564_v12, %v25653_v19  ;;  %v23133_v40 = vrot.slane %v16983_v7, %v25653_v19  ;;  %v12743_v52 = vrot.slane %v17279_v46, %v25653_v19  ;;  %v12700_v53 = vcombine.low %v23066_v29, %v12692_v25 }
 0x6c2   : > { %v23119_v37 = vpop.f32.mrb[119].mxu0  ;;  %v14065_v60 = vpack.c.bf16 %v13363_v63, %v13313_v23  ;;  %v14064_v13 = vpack.c.bf16 %v13362_v30, %v13312_v34  ;;  %v12699_v12 = vrot.slane %v12685_v47, %v25653_v19  ;;  %v12701_v7 = vcombine.high %v23066_v29, %v12692_v25 }
 0x6c3   : > { %v23121_v16 = vpop.f32.mrb[152].mxu1  ;;  %v12750_v34 = vrot.slane %v12736_v31, %v25653_v19  ;;  %v17343_v23 = vadd.f32 %v23029_v62, %v23021_v22  ;;  %v13387_v46 = vrot.slane %v13380_v2, %v25653_v19  ;;  %v13395_v29 = vrot.slane %v16976_v10, %v25653_v19 }
 0x6c4   : > { %v23127_v38 = vpop.f32.mrb[153].mxu1  ;;  %14316 = vmatprep.mubr.bf16.mxu1 %v14065_v60  ;;  %v12708_v17 = vrot.slane %v12700_v53, %v25654_v58  ;;  %v12715_v33 = vrot.slane %v12701_v7, %v25654_v58  ;;  %v12716_v63 = vcombine.low %v23085_v27, %v12699_v12  ;;  %v12717_v22 = vcombine.high %v23085_v27, %v12699_v12 }
 0x6c5   : > { %v23137_v51 = vpop.f32.mrb[154].mxu1  ;;  %14317 = vmatmul.mubr.bf16.vlgmr.msra.gmra.mrb[160].mxu1 %v14064_v13  ;;  %v12802_v2 = vcombine.high %v17282_v8, %v25652_v57  ;;  %v23171_v47 = vrot.slane %v17282_v8, %v25653_v19  ;;  %v12751_v5 = vcombine.high %v17343_v23, %v25652_v57  ;;  %v12758_v61 = vrot.slane %v17343_v23, %v25653_v19 }
 0x6c6   : > { %v23141_v3 = vpop.f32.mrb[155].mxu1  ;;  %v23178_v53 = vrot.slane %v12716_v63, %v25654_v58  ;;  %v23181_v25 = vrot.slane %v12717_v22, %v25654_v58  ;;  %v13614_v27 = vcombine.low %v12708_v17, %v12715_v33  ;;  %v16985_v60 = vcombine.high %v12708_v17, %v12715_v33 }
 0x6c7   : > { %v23148_v0 = vpop.f32.mrb[120].mxu0  ;;  %v23186_v31 = vrot.slane %v12802_v2, %v25653_v19  ;;  %v12765_v8 = vrot.slane %v12751_v5, %v25653_v19  ;;  %v12766_v12 = vcombine.low %v12743_v52, %v12758_v61  ;;  %v12767_v7 = vcombine.high %v12743_v52, %v12758_v61 }
 0x6c8   : > { %v23161_v30 = vpop.f32.mrb[121].mxu0  ;;  %v23192_v55 = vrot.slane %v13614_v27, %v25653_v19  ;;  %v23195_v63 = vrot.slane %v16985_v60, %v25653_v19  ;;  %v13396_v27 = vcombine.low %v22965_v9, %v22968_v15  ;;  %v13404_v60 = vcombine.low %v13387_v46, %v13395_v29 }
 0x6c9   : > { %v23167_v62 = vpop.f32.mrb[122].mxu0  ;;  %v12774_v2 = vrot.slane %v12766_v12, %v25654_v58  ;;  %v12781_v52 = vrot.slane %v12767_v7, %v25654_v58  ;;  %v12782_v5 = vcombine.low %v12750_v34, %v12765_v8  ;;  %v12783_v61 = vcombine.high %v12750_v34, %v12765_v8 }
 0x6ca   : > { %v23175_v10 = vpop.f32.mrb[123].mxu0  ;;  %v13437_v17 = vrot.slane %v13430_v24, %v25653_v19  ;;  %v25656_v33 = vcombine.high %v22975_v1, %v22978_v18  ;;  %v13403_v29 = vrot.slane %v13396_v27, %v25654_v58  ;;  %v13411_v24 = vrot.slane %v13404_v60, %v25654_v58 }
 0x6cb   : > { %v23183_v13 = vpop.f32.mrb[156].mxu1  ;;  %v23220_v34 = vrot.slane %v12782_v5, %v25654_v58  ;;  %v23223_v8 = vrot.slane %v12783_v61, %v25654_v58  ;;  %v13664_v9 = vcombine.low %v12774_v2, %v12781_v52  ;;  %v16987_v15 = vcombine.high %v12774_v2, %v12781_v52 }
 0x6cc   : > { %v23189_v23 = vpop.f32.mrb[157].mxu1  ;;  %v13445_v12 = vrot.slane %v25656_v33, %v25653_v19  ;;  %v13446_v1 = vcombine.low %v22983_v35, %v22986_v44  ;;  %v13413_v27 = vcombine.high %v13403_v29, %v13411_v24  ;;  %v13412_v60 = vcombine.low %v13403_v29, %v13411_v24 }
 0x6cd   : > { %v23201_v22 = vpop.f32.mrb[158].mxu1  ;;  %v23234_v33 = vrot.slane %v13664_v9, %v25653_v19  ;;  %v23237_v5 = vrot.slane %v16987_v15, %v25653_v19  ;;  %v17288_v9 = vadd.f32 %v23094_v42, %v23082_v48  ;;  %v17349_v15 = vadd.f32 %v23101_v14, %v23098_v4 }
 0x6ce   : > { %25655 = vst [vmem:[#allocation86_spill] sm:$0xff] %v23201_v22  ;;  %v23205_v54 = vpop.f32.mrb[159].mxu1  ;;  %v13454_v18 = vcombine.low %v13437_v17, %v13445_v12  ;;  %v13453_v35 = vrot.slane %v13446_v1, %v25654_v58  ;;  %v17346_v17 = vadd.f32 %v23049_v32, %v23037_v50  ;;  %v17285_v12 = vadd.f32 %v23069_v28, %v23061_v43 }
 0x6cf   : > { %v23217_v22 = vpop.f32.mrb[124].mxu0  ;;  %v12934_v32 = vcombine.high %v17288_v9, %v25652_v57  ;;  %v23261_v43 = vrot.slane %v17288_v9, %v25653_v19 }
 0x6d0   : > { %v23225_v46 = vpop.f32.mrb[125].mxu0  ;;  %v13461_v44 = vrot.slane %v13454_v18, %v25654_v58  ;;  %v12817_v2 = vcombine.high %v17346_v17, %v25652_v57  ;;  %v12824_v1 = vrot.slane %v17346_v17, %v25653_v19  ;;  %v12868_v18 = vcombine.high %v17285_v12, %v25652_v57 }
 0x6d1   : > { %v23231_v7 = vpop.f32.mrb[126].mxu0  ;;  %v12875_v50 = vrot.slane %v17285_v12, %v25653_v19  ;;  %v23268_v24 = vrot.slane %v12934_v32, %v25653_v19  ;;  %v25659_v12 = vcombine.high %v23024_v26, %v23027_v11 }
 0x6d2   : > { %v23243_v61 = vpop.f32.mrb[127].mxu0  ;;  %v13463_v52 = vcombine.high %v13453_v35, %v13461_v44  ;;  %v12831_v48 = vrot.slane %v12817_v2, %v25653_v19  ;;  %v12832_v42 = vcombine.low %v23171_v47, %v12824_v1  ;;  %v12833_v4 = vcombine.high %v23171_v47, %v12824_v1 }
 0x6d3   : > { %25657 = vst [vmem:[#allocation88_spill] sm:$0xff] %v23243_v61  ;;  %v13462_v61 = vcombine.low %v13453_v35, %v13461_v44  ;;  %v12882_v29 = vrot.slane %v12868_v18, %v25653_v19  ;;  %v12883_v35 = vcombine.high %v17349_v15, %v25652_v57  ;;  %v12890_v47 = vrot.slane %v17349_v15, %v25653_v19 }
 0x6d4   : > { %v14067_v28 = vpack.c.bf16 %v13463_v52, %v13413_v27  ;;  %v12840_v44 = vrot.slane %v12832_v42, %v25654_v58  ;;  %v12847_v17 = vrot.slane %v12833_v4, %v25654_v58  ;;  %v12848_v52 = vcombine.low %v23186_v31, %v12831_v48 }
 0x6d5   : > { %v14066_v14 = vpack.c.bf16 %v13462_v61, %v13412_v60  ;;  %v12849_v2 = vcombine.high %v23186_v31, %v12831_v48  ;;  %v12897_v61 = vrot.slane %v12883_v35, %v25653_v19  ;;  %v25658_v27 = vcombine.low %v23024_v26, %v23027_v11 }
 0x6d6   : > { %14326 = vmatprep.mubr.bf16.mxu1 %v14067_v28  ;;  %v13495_v9 = vrot.slane %v25659_v12, %v25653_v19  ;;  %v23286_v1 = vrot.slane %v12848_v52, %v25654_v58  ;;  %v13714_v18 = vcombine.low %v12840_v44, %v12847_v17  ;;  %v16989_v15 = vcombine.high %v12840_v44, %v12847_v17 }
 0x6d7   : > { %14327 = vmatmul.mubr.bf16.gmra.mrb[164].mxu1 %v14066_v14  ;;  %v13487_v60 = vrot.slane %v25658_v27, %v25653_v19  ;;  %v23289_v31 = vrot.slane %v12849_v2, %v25654_v58  ;;  %v12898_v32 = vcombine.low %v12875_v50, %v12890_v47  ;;  %v12899_v28 = vcombine.high %v12875_v50, %v12890_v47 }
 0x6d8   : > { %v12914_v48 = vcombine.low %v12882_v29, %v12897_v61  ;;  %v12915_v42 = vcombine.high %v12882_v29, %v12897_v61  ;;  %v23292_v4 = vrot.slane %v13714_v18, %v25653_v19  ;;  %v23295_v14 = vrot.slane %v16989_v15, %v25653_v19 }
 0x6d9   : > { %v13730_v26 = vcombine.low %v23286_v1, %v23289_v31  ;;  %v16990_v11 = vcombine.high %v23286_v1, %v23289_v31  ;;  %v12906_v35 = vrot.slane %v12898_v32, %v25654_v58  ;;  %v12913_v44 = vrot.slane %v12899_v28, %v25654_v58 }
 0x6da   : > { %v23304_v50 = vrot.slane %v12914_v48, %v25654_v58  ;;  %v23307_v29 = vrot.slane %v12915_v42, %v25654_v58  ;;  %v13496_v17 = vcombine.low %v23040_v41, %v23043_v49  ;;  %v13504_v52 = vcombine.low %v13487_v60, %v13495_v9  ;;  %v25669_v31 = vld [vmem:[#allocation88_spill] sm:$0xff] }
 0x6db   : > { %v25660_v2 = vcombine.low %v23032_v39, %v23035_v56  ;;  %v25661_v61 = vcombine.high %v23032_v39, %v23035_v56  ;;  %v13764_v12 = vcombine.low %v12906_v35, %v12913_v44  ;;  %v16991_v18 = vcombine.high %v12906_v35, %v12913_v44 }
 0x6dc   : > { %v13780_v15 = vcombine.low %v23304_v50, %v23307_v29  ;;  %v16992_v32 = vcombine.high %v23304_v50, %v23307_v29  ;;  %v13503_v41 = vrot.slane %v13496_v17, %v25654_v58  ;;  %v13511_v49 = vrot.slane %v13504_v52, %v25654_v58 }
 0x6dd   : > { %v13537_v47 = vrot.slane %v25660_v2, %v25653_v19  ;;  %v13545_v27 = vrot.slane %v25661_v61, %v25653_v19  ;;  %v13546_v60 = vcombine.low %v23052_v21, %v23055_v36  ;;  %v23328_v28 = vrot.slane %v13764_v12, %v25653_v19 }
 0x6de   : > { %v23331_v39 = vrot.slane %v16991_v18, %v25653_v19  ;;  %v17352_v56 = vadd.f32 %v23119_v37, %v23108_v59  ;;  %v17291_v48 = vadd.f32 %v23127_v38, %v23121_v16  ;;  %v13513_v42 = vcombine.high %v13503_v41, %v13511_v49 }
 0x6df   : > { %v13554_v9 = vcombine.low %v13537_v47, %v13545_v27  ;;  %v13553_v35 = vrot.slane %v13546_v60, %v25654_v58  ;;  %v13512_v17 = vcombine.low %v13503_v41, %v13511_v49  ;;  %v17294_v59 = vadd.f32 %v23141_v3, %v23137_v51 }
 0x6e0   : > { %v12949_v21 = vcombine.high %v17352_v56, %v25652_v57  ;;  %v12956_v36 = vrot.slane %v17352_v56, %v25653_v19  ;;  %v13000_v52 = vcombine.high %v17291_v48, %v25652_v57  ;;  %v13007_v2 = vrot.slane %v17291_v48, %v25653_v19 }
 0x6e1   : > { %v13561_v44 = vrot.slane %v13554_v9, %v25654_v58  ;;  %v17355_v37 = vadd.f32 %v23161_v30, %v23148_v0  ;;  %v13066_v49 = vcombine.high %v17294_v59, %v25652_v57  ;;  %v23353_v60 = vrot.slane %v17294_v59, %v25653_v19 }
 0x6e2   : > { %v12963_v16 = vrot.slane %v12949_v21, %v25653_v19  ;;  %v12964_v38 = vcombine.low %v23261_v43, %v12956_v36  ;;  %v12965_v27 = vcombine.high %v23261_v43, %v12956_v36  ;;  %v13014_v12 = vrot.slane %v13000_v52, %v25653_v19 }
 0x6e3   : > { %v13563_v47 = vcombine.high %v13553_v35, %v13561_v44  ;;  %v13562_v61 = vcombine.low %v13553_v35, %v13561_v44  ;;  %v23360_v43 = vrot.slane %v13066_v49, %v25653_v19  ;;  %v13015_v9 = vcombine.high %v17355_v37, %v25652_v57 }
 0x6e4   : > { %v12972_v51 = vrot.slane %v12964_v38, %v25654_v58  ;;  %v12979_v3 = vrot.slane %v12965_v27, %v25654_v58  ;;  %v12980_v0 = vcombine.low %v23268_v24, %v12963_v16  ;;  %v12981_v30 = vcombine.high %v23268_v24, %v12963_v16 }
 0x6e5   : > { %v14069_v18 = vpack.c.bf16 %v13563_v47, %v13513_v42  ;;  %v14068_v41 = vpack.c.bf16 %v13562_v61, %v13512_v17  ;;  %v13022_v56 = vrot.slane %v17355_v37, %v25653_v19  ;;  %v25662_v48 = vcombine.low %v23111_v6, %v23114_v45 }
 0x6e6   : > { %v23369_v35 = vrot.slane %v12980_v0, %v25654_v58  ;;  %v23372_v44 = vrot.slane %v12981_v30, %v25654_v58  ;;  %v13814_v24 = vcombine.low %v12972_v51, %v12979_v3  ;;  %v16993_v17 = vcombine.high %v12972_v51, %v12979_v3 }
 0x6e7   : > { %14336 = vmatprep.mubr.bf16.mxu1 %v14069_v18  ;;  %v13587_v42 = vrot.slane %v25662_v48, %v25653_v19  ;;  %v13029_v21 = vrot.slane %v13015_v9, %v25653_v19  ;;  %v13030_v36 = vcombine.low %v13007_v2, %v13022_v56  ;;  %v13031_v52 = vcombine.high %v13007_v2, %v13022_v56 }
 0x6e8   : > { %14337 = vmatmul.mubr.bf16.gmra.mrb[168].mxu1 %v14068_v41  ;;  %v25663_v47 = vcombine.high %v23111_v6, %v23114_v45  ;;  %v23380_v59 = vrot.slane %v13814_v24, %v25653_v19  ;;  %v23383_v37 = vrot.slane %v16993_v17, %v25653_v19  ;;  %v13830_v16 = vcombine.low %v23369_v35, %v23372_v44 }
 0x6e9   : > { %v16994_v38 = vcombine.high %v23369_v35, %v23372_v44  ;;  %v13038_v27 = vrot.slane %v13030_v36, %v25654_v58  ;;  %v13045_v2 = vrot.slane %v13031_v52, %v25654_v58  ;;  %v13046_v18 = vcombine.low %v13014_v12, %v13029_v21 }
 0x6ea   : > { %v13595_v61 = vrot.slane %v25663_v47, %v25653_v19  ;;  %v13047_v41 = vcombine.high %v13014_v12, %v13029_v21  ;;  %v13596_v6 = vcombine.low %v23130_v20, %v23133_v40  ;;  %v25664_v49 = vcombine.low %v23178_v53, %v23181_v25 }
 0x6eb   : > { %v25665_v3 = vcombine.high %v23178_v53, %v23181_v25  ;;  %v23402_v30 = vrot.slane %v13046_v18, %v25654_v58  ;;  %v13864_v12 = vcombine.low %v13038_v27, %v13045_v2  ;;  %v16995_v56 = vcombine.high %v13038_v27, %v13045_v2 }
 0x6ec   : > { %v13604_v45 = vcombine.low %v13587_v42, %v13595_v61  ;;  %v13637_v51 = vrot.slane %v25664_v49, %v25653_v19  ;;  %v23405_v9 = vrot.slane %v13047_v41, %v25654_v58  ;;  %v13603_v20 = vrot.slane %v13596_v6, %v25654_v58  ;;  %v25666_v61 = vld [vmem:[#allocation86_spill] sm:$0xff] }
 0x6ed   : > { %v13645_v0 = vrot.slane %v25665_v3, %v25653_v19  ;;  %v13646_v48 = vcombine.low %v23192_v55, %v23195_v63  ;;  %v23412_v24 = vrot.slane %v13864_v12, %v25653_v19  ;;  %v23415_v53 = vrot.slane %v16995_v56, %v25653_v19 }
 0x6ee   : > { %v13611_v40 = vrot.slane %v13604_v45, %v25654_v58  ;;  %v13880_v25 = vcombine.low %v23402_v30, %v23405_v9  ;;  %v16996_v17 = vcombine.high %v23402_v30, %v23405_v9  ;;  %v17358_v55 = vadd.f32 %v23175_v10, %v23167_v62 }
 0x6ef   : > { %v13654_v42 = vcombine.low %v13637_v51, %v13645_v0  ;;  %v13653_v36 = vrot.slane %v13646_v48, %v25654_v58  ;;  %v17297_v47 = vadd.f32 %v23189_v23, %v23183_v13  ;;  %v17300_v27 = vadd.f32 %v23205_v54, %v25666_v61 }
 0x6f0   : > { %v13613_v21 = vcombine.high %v13603_v20, %v13611_v40  ;;  %v13612_v63 = vcombine.low %v13603_v20, %v13611_v40  ;;  %v17361_v2 = vadd.f32 %v23225_v46, %v23217_v22  ;;  %v13081_v41 = vcombine.high %v17358_v55, %v25652_v57 }
 0x6f1   : > { %v13661_v52 = vrot.slane %v13654_v42, %v25654_v58  ;;  %v13088_v6 = vrot.slane %v17358_v55, %v25653_v19  ;;  %v13132_v49 = vcombine.high %v17297_v47, %v25652_v57  ;;  %v13139_v62 = vrot.slane %v17297_v47, %v25653_v19 }
 0x6f2   : > { %v13198_v10 = vcombine.high %v17300_v27, %v25652_v57  ;;  %v23437_v13 = vrot.slane %v17300_v27, %v25653_v19  ;;  %v13095_v54 = vrot.slane %v13081_v41, %v25653_v19  ;;  %v13147_v12 = vcombine.high %v17361_v2, %v25652_v57 }
 0x6f3   : > { %v13663_v18 = vcombine.high %v13653_v36, %v13661_v52  ;;  %v13662_v45 = vcombine.low %v13653_v36, %v13661_v52  ;;  %v13096_v22 = vcombine.low %v23353_v60, %v13088_v6  ;;  %v13097_v46 = vcombine.high %v23353_v60, %v13088_v6 }
 0x6f4   : > { %v13146_v3 = vrot.slane %v13132_v49, %v25653_v19  ;;  %v23444_v0 = vrot.slane %v13198_v10, %v25653_v19  ;;  %v13112_v40 = vcombine.low %v23360_v43, %v13095_v54  ;;  %v13113_v48 = vcombine.high %v23360_v43, %v13095_v54 }
 0x6f5   : > { %v14071_v23 = vpack.c.bf16 %v13663_v18, %v13613_v21  ;;  %v14070_v51 = vpack.c.bf16 %v13662_v45, %v13612_v63  ;;  %v13104_v56 = vrot.slane %v13096_v22, %v25654_v58  ;;  %v13111_v20 = vrot.slane %v13097_v46, %v25654_v58 }
 0x6f6   : > { %v13154_v60 = vrot.slane %v17361_v2, %v25653_v19  ;;  %v13161_v42 = vrot.slane %v13147_v12, %v25653_v19  ;;  %v25667_v21 = vcombine.low %v23220_v34, %v23223_v8  ;;  %v25668_v52 = vcombine.high %v23220_v34, %v23223_v8 }
 0x6f7   : > { %14346 = vmatprep.mubr.bf16.mxu1 %v14071_v23  ;;  %v23462_v63 = vrot.slane %v13112_v40, %v25654_v58  ;;  %v23465_v43 = vrot.slane %v13113_v48, %v25654_v58  ;;  %v13914_v47 = vcombine.low %v13104_v56, %v13111_v20  ;;  %v16997_v61 = vcombine.high %v13104_v56, %v13111_v20 }
 0x6f8   : > { %14347 = vmatmul.mubr.bf16.gmra.mrb[172].mxu1 %v14070_v51  ;;  %v13687_v36 = vrot.slane %v25667_v21, %v25653_v19  ;;  %v13695_v55 = vrot.slane %v25668_v52, %v25653_v19  ;;  %v13162_v27 = vcombine.low %v13139_v62, %v13154_v60  ;;  %v13163_v2 = vcombine.high %v13139_v62, %v13154_v60 }
 0x6f9   : > { %v13178_v18 = vcombine.low %v13146_v3, %v13161_v42  ;;  %v13179_v41 = vcombine.high %v13146_v3, %v13161_v42  ;;  %v23468_v6 = vrot.slane %v13914_v47, %v25653_v19  ;;  %v23471_v45 = vrot.slane %v16997_v61, %v25653_v19 }
 0x6fa   : > { %v13930_v34 = vcombine.low %v23462_v63, %v23465_v43  ;;  %v16998_v8 = vcombine.high %v23462_v63, %v23465_v43  ;;  %v13170_v49 = vrot.slane %v13162_v27, %v25654_v58  ;;  %v13177_v10 = vrot.slane %v13163_v2, %v25654_v58 }
 0x6fb   : > { %v23480_v62 = vrot.slane %v13178_v18, %v25654_v58  ;;  %v23483_v23 = vrot.slane %v13179_v41, %v25654_v58  ;;  %v13696_v54 = vcombine.low %v23234_v33, %v23237_v5  ;;  %v13704_v22 = vcombine.low %v13687_v36, %v13695_v55 }
 0x6fc   : > { %v13737_v46 = vrot.slane %v13730_v26, %v25653_v19  ;;  %v13745_v51 = vrot.slane %v16990_v11, %v25653_v19  ;;  %v13964_v3 = vcombine.low %v13170_v49, %v13177_v10  ;;  %v16999_v12 = vcombine.high %v13170_v49, %v13177_v10 }
 0x6fd   : > { %v13980_v56 = vcombine.low %v23480_v62, %v23483_v23  ;;  %v17000_v20 = vcombine.high %v23480_v62, %v23483_v23  ;;  %v13703_v33 = vrot.slane %v13696_v54, %v25654_v58  ;;  %v13711_v5 = vrot.slane %v13704_v22, %v25654_v58 }
 0x6fe   : > { %v13746_v26 = vcombine.low %v23292_v4, %v23295_v14  ;;  %v13754_v40 = vcombine.low %v13737_v46, %v13745_v51  ;;  %v23504_v48 = vrot.slane %v13964_v3, %v25653_v19  ;;  %v23507_v1 = vrot.slane %v16999_v12, %v25653_v19 }
 0x6ff   : > { %v17364_v11 = vadd.f32 %v25669_v31, %v23231_v7  ;;  %v13787_v60 = vrot.slane %v13780_v15, %v25653_v19  ;;  %v13713_v42 = vcombine.high %v13703_v33, %v13711_v5  ;;  %v13712_v14 = vcombine.low %v13703_v33, %v13711_v5 }
 0x700   : > { %v13753_v21 = vrot.slane %v13746_v26, %v25654_v58  ;;  %v13761_v4 = vrot.slane %v13754_v40, %v25654_v58  ;;  %v13795_v7 = vrot.slane %v16992_v32, %v25653_v19  ;;  %v13796_v55 = vcombine.low %v23328_v28, %v23331_v39 }
 0x701   : > { %v13213_v36 = vcombine.high %v17364_v11, %v25652_v57  ;;  %v13220_v52 = vrot.slane %v17364_v11, %v25653_v19  ;;  %v13837_v61 = vrot.slane %v13830_v16, %v25653_v19  ;;  %v13845_v57 = vrot.slane %v16994_v38, %v25653_v19 }
 0x702   : > { %v13763_v47 = vcombine.high %v13753_v21, %v13761_v4  ;;  %v13762_v15 = vcombine.low %v13753_v21, %v13761_v4  ;;  %v13803_v32 = vrot.slane %v13796_v55, %v25654_v58  ;;  %v13804_v2 = vcombine.low %v13787_v60, %v13795_v7 }
 0x703   : > { %v13227_v27 = vrot.slane %v13213_v36, %v25653_v19  ;;  %v13228_v50 = vcombine.low %v23437_v13, %v13220_v52  ;;  %v13229_v29 = vcombine.high %v23437_v13, %v13220_v52  ;;  %v13846_v18 = vcombine.low %v23380_v59, %v23383_v37 }
 0x704   : > { %v14073_v28 = vpack.c.bf16 %v13763_v47, %v13713_v42  ;;  %v14072_v39 = vpack.c.bf16 %v13762_v15, %v13712_v14  ;;  %v13811_v38 = vrot.slane %v13804_v2, %v25654_v58  ;;  %v13854_v49 = vcombine.low %v13837_v61, %v13845_v57 }
 0x705   : > { %v13236_v16 = vrot.slane %v13228_v50, %v25654_v58  ;;  %v13243_v41 = vrot.slane %v13229_v29, %v25654_v58  ;;  %v13244_v35 = vcombine.low %v23444_v0, %v13227_v27  ;;  %v13245_v44 = vcombine.high %v23444_v0, %v13227_v27 }
 0x706   : > { %14356 = vmatprep.mubr.bf16.mxu1 %v14073_v28  ;;  %v13853_v13 = vrot.slane %v13846_v18, %v25654_v58  ;;  %v13887_v10 = vrot.slane %v13880_v25, %v25653_v19  ;;  %v13813_v46 = vcombine.high %v13803_v32, %v13811_v38  ;;  %v13861_v0 = vrot.slane %v13854_v49, %v25654_v58 }
 0x707   : > { %v13252_v59 = vrot.slane %v13244_v35, %v25654_v58  ;;  %v13259_v37 = vrot.slane %v13245_v44, %v25654_v58  ;;  %v14014_v54 = vcombine.low %v13236_v16, %v13243_v41  ;;  %v17001_v22 = vcombine.high %v13236_v16, %v13243_v41  ;;  %14357 = vmatmul.mubr.bf16.gmra.mrb[176].mxu1 %v14072_v39  ;;  %v25671_v39 = vld [vmem:[#allocation22_spill] sm:$0xff] }
 0x708   : > { %v13812_v51 = vcombine.low %v13803_v32, %v13811_v38  ;;  %v13895_v3 = vrot.slane %v16996_v17, %v25653_v19  ;;  %v13863_v26 = vcombine.high %v13853_v13, %v13861_v0  ;;  %v13862_v40 = vcombine.low %v13853_v13, %v13861_v0  ;;  %v14112_v32 = vld [vmem:[%s24780_s7] sm:$0x3]  ;;  %v18188_v0 = vld [vmem:[%s18886_s19 + $0x18] sm:$0xff] }
 0x709   : > { %v14021_v12 = vrot.slane %v14014_v54, %v25653_v19  ;;  %v14029_v25 = vrot.slane %v17001_v22, %v25653_v19  ;;  %v14030_v33 = vcombine.low %v13252_v59, %v13259_v37  ;;  %v17002_v5 = vcombine.high %v13252_v59, %v13259_v37  ;;  %v18185_v38 = vld [vmem:[%s18886_s19] sm:$0xff]  ;;  %v18186_v59 = vld [vmem:[%s18886_s19 + $0x8] sm:$0xff]  ;;  %v18187_v22 = vld [vmem:[%s18886_s19 + $0x10] sm:$0xff] }
 0x70a   : > { %v13896_v31 = vcombine.low %v23412_v24, %v23415_v53  ;;  %v13904_v11 = vcombine.low %v13887_v10, %v13895_v3  ;;  %v13937_v60 = vrot.slane %v13930_v34, %v25653_v19  ;;  %v13945_v30 = vrot.slane %v16998_v8, %v25653_v19 }
 0x70b   : > { %v13946_v9 = vcombine.low %v23468_v6, %v23471_v45  ;;  %v13987_v17 = vrot.slane %v13980_v56, %v25653_v19  ;;  %v14075_v42 = vpack.c.bf16 %v13863_v26, %v13813_v46  ;;  %v14074_v21 = vpack.c.bf16 %v13862_v40, %v13812_v51 }
 0x70c   : > { %v13903_v24 = vrot.slane %v13896_v31, %v25654_v58  ;;  %v13911_v53 = vrot.slane %v13904_v11, %v25654_v58  ;;  %v13954_v4 = vcombine.low %v13937_v60, %v13945_v30  ;;  %v13995_v34 = vrot.slane %v17000_v20, %v25653_v19  ;;  %v18189_v31 = vld [vmem:[%s18886_s19 + $0x20] sm:$0xff] }
 0x70d   : > { %v13996_v63 = vcombine.low %v23504_v48, %v23507_v1  ;;  %14366 = vmatprep.mubr.bf16.mxu1 %v14075_v42  ;;  %v14037_v45 = vrot.slane %v14030_v33, %v25653_v19  ;;  %v14045_v8 = vrot.slane %v17002_v5, %v25653_v19  ;;  %v13953_v56 = vrot.slane %v13946_v9, %v25654_v58  ;;  %v18190_v9 = vld [vmem:[%s18886_s19 + $0x28] sm:$0xff] }
 0x70e   : > { %v13913_v43 = vcombine.high %v13903_v24, %v13911_v53  ;;  %v13912_v6 = vcombine.low %v13903_v24, %v13911_v53  ;;  %v13961_v14 = vrot.slane %v13954_v4, %v25654_v58  ;;  %v14004_v36 = vcombine.low %v13987_v17, %v13995_v34  ;;  %v18192_v53 = vld [vmem:[%s18886_s19 + $0x38] sm:$0xff] }
 0x70f   : > { %14367 = vmatmul.mubr.bf16.gmra.mrb[180].mxu1 %v14074_v21  ;;  %v14046_v52 = vcombine.low %v14021_v12, %v14029_v25  ;;  %v14054_v7 = vcombine.low %v14037_v45, %v14045_v8  ;;  %v14003_v20 = vrot.slane %v13996_v63, %v25654_v58  ;;  %v23594_v2 = vrot.slane %v14112_v32, %v25671_v39  ;;  %v18191_v21 = vld [vmem:[%s18886_s19 + $0x30] sm:$0xff] }
 0x710   : > { %v13963_v62 = vcombine.high %v13953_v56, %v13961_v14  ;;  %v13962_v23 = vcombine.low %v13953_v56, %v13961_v14  ;;  %v14011_v48 = vrot.slane %v14004_v36, %v25654_v58  ;;  %v18193_v14 = vld [vmem:[%s18886_s19 + $0x40] sm:$0xff] }
 0x711   : > { %v14053_v1 = vrot.slane %v14046_v52, %v25654_v58  ;;  %v14061_v55 = vrot.slane %v14054_v7, %v25654_v58  ;;  %v25670_v58 = vld [vmem:[#allocation21_spill] sm:$0xff] }
 0x712   : > { %v14077_v47 = vpack.c.bf16 %v13963_v62, %v13913_v43  ;;  %v14076_v19 = vpack.c.bf16 %v13962_v23, %v13912_v6  ;;  %v14013_v15 = vcombine.high %v14003_v20, %v14011_v48  ;;  %v14012_v61 = vcombine.low %v14003_v20, %v14011_v48  ;;  %v18194_v62 = vld [vmem:[%s18886_s19 + $0x48] sm:$0xff]  ;;  %v18195_v48 = vld [vmem:[%s18886_s19 + $0x50] sm:$0xff] }
 0x713   : > { %v14063_v57 = vcombine.high %v14053_v1, %v14061_v55  ;;  %v14062_v27 = vcombine.low %v14053_v1, %v14061_v55  ;;  %v23591_v28 = vrot.slane %v14112_v32, %v25670_v58  ;;  %v18196_v55 = vld [vmem:[%s18886_s19 + $0x58] sm:$0xff]  ;;  %v18197_v32 = vld [vmem:[%s18886_s19 + $0x60] sm:$0xff] }
 0x714   : > { %14376 = vmatprep.mubr.bf16.mxu1 %v14077_v47 }
 0x715   : > { %v14079_v50 = vpack.c.bf16 %v14063_v57, %v14013_v15  ;;  %v14078_v29 = vpack.c.bf16 %v14062_v27, %v14012_v61 }
 0x717   : > { %14377 = vmatmul.mubr.bf16.gmra.mrb[184].mxu1 %v14076_v19 }
 0x718   : > { %14386 = vmatprep.mubr.bf16.mxu1 %v14079_v50 }
 0x71f   : > { %14387 = vmatmul.mubr.bf16.gmra.mrb[188].mxu1 %v14078_v29 }
 0x798   : > { %v14318_v18 = vpop.f32.mrb[160].mxu1 }
 0x799   : > { %v14319_v16 = vadd.f32 %v14318_v18, %v23591_v28  ;;  %v14320_v41 = vpop.f32.mrb[161].mxu1 }
 0x79a   : > { %v14321_v35 = vadd.f32 %v14320_v41, %v23594_v2  ;;  %v14322_v44 = vpop.f32.mrb[162].mxu1 }
 0x79b   : > { %v23599_v13 = vadd.f32 %v18185_v38, %v14319_v16  ;;  %v14323_v49 = vadd.f32 %v14322_v44, %v23591_v28  ;;  %v14324_v10 = vpop.f32.mrb[163].mxu1 }
 0x79c   : > { %v23603_v37 = vadd.f32 %v18186_v59, %v14321_v35  ;;  %v14325_v54 = vadd.f32 %v14324_v10, %v23594_v2  ;;  %v18198_v35 = vld [vmem:[%s18886_s19 + $0x68] sm:$0xff]  ;;  %v18200_v59 = vld [vmem:[%s18886_s19 + $0x78] sm:$0xff] }
 0x79d   : > { %v23607_v46 = vadd.f32 %v18187_v22, %v14323_v49  ;;  %v18199_v49 = vld [vmem:[%s18886_s19 + $0x70] sm:$0xff] }
 0x79e   : > { %v23610_v51 = vadd.f32 %v18188_v0, %v14325_v54  ;;  %v14429_v3 = vadd.f32 %v23603_v37, %v23599_v13 }
 0x7a0   : > { %14430 = vadd.xlane.f32.xlu0 %v14429_v3  ;;  %v14432_v12 = vadd.f32 %v23610_v51, %v23607_v46 }
 0x7a2   : > { %14433 = vadd.xlane.f32.xlu1 %v14432_v12 }
 0x7aa   : > { %v14328_v25 = vpop.f32.mrb[164].mxu1 }
 0x7ab   : > { %v14329_v33 = vadd.f32 %v14328_v25, %v23591_v28  ;;  %v14330_v5 = vpop.f32.mrb[165].mxu1 }
 0x7ac   : > { %v14331_v26 = vadd.f32 %v14330_v5, %v23594_v2  ;;  %v14332_v40 = vpop.f32.mrb[166].mxu1 }
 0x7ad   : > { %v23619_v11 = vadd.f32 %v18189_v31, %v14329_v33  ;;  %v14333_v60 = vadd.f32 %v14332_v40, %v23591_v28  ;;  %v14334_v30 = vpop.f32.mrb[167].mxu1 }
 0x7ae   : > { %v23623_v17 = vadd.f32 %v18190_v9, %v14331_v26  ;;  %v14335_v42 = vadd.f32 %v14334_v30, %v23594_v2  ;;  %v18201_v26 = vld [vmem:[%s18886_s19 + $0x80] sm:$0xff]  ;;  %v18202_v30 = vld [vmem:[%s18886_s19 + $0x88] sm:$0xff] }
 0x7af   : > { %v23627_v24 = vadd.f32 %v18191_v21, %v14333_v60  ;;  %v18203_v21 = vld [vmem:[%s18886_s19 + $0x90] sm:$0xff] }
 0x7b0   : > { %v23630_v4 = vadd.f32 %v18192_v53, %v14335_v42  ;;  %v14435_v34 = vadd.f32 %v23623_v17, %v23619_v11 }
 0x7b2   : > { %14436 = vadd.xlane.f32.xlu0 %v14435_v34  ;;  %v14438_v63 = vadd.f32 %v23630_v4, %v23627_v24  ;;  %v18204_v34 = vld [vmem:[%s18886_s19 + $0x98] sm:$0xff] }
 0x7b4   : > { %14439 = vadd.xlane.f32.xlu1 %v14438_v63 }
 0x7bb   : > { %v14338_v43 = vpop.f32.mrb[168].mxu1 }
 0x7bc   : > { %v14339_v6 = vadd.f32 %v14338_v43, %v23591_v28  ;;  %v14340_v45 = vpop.f32.mrb[169].mxu1 }
 0x7bd   : > { %v14341_v8 = vadd.f32 %v14340_v45, %v23594_v2  ;;  %v14342_v56 = vpop.f32.mrb[170].mxu1 }
 0x7be   : > { %v23639_v36 = vadd.f32 %v18193_v14, %v14339_v6  ;;  %v14343_v52 = vadd.f32 %v14342_v56, %v23591_v28  ;;  %v14344_v7 = vpop.f32.mrb[171].mxu1 }
 0x7bf   : > { %v23643_v23 = vadd.f32 %v18194_v62, %v14341_v8  ;;  %v14345_v20 = vadd.f32 %v14344_v7, %v23594_v2  ;;  %v18205_v7 = vld [vmem:[%s18886_s19 + $0xa0] sm:$0xff] }
 0x7c0   : > { %v23647_v1 = vadd.f32 %v18195_v48, %v14343_v52 }
 0x7c1   : > { %v23650_v47 = vadd.f32 %v18196_v55, %v14345_v20  ;;  %v14441_v19 = vadd.f32 %v23643_v23, %v23639_v36  ;;  %v18206_v55 = vld [vmem:[%s18886_s19 + $0xa8] sm:$0xff] }
 0x7c3   : > { %14442 = vadd.xlane.f32.xlu0 %v14441_v19  ;;  %v14444_v15 = vadd.f32 %v23650_v47, %v23647_v1 }
 0x7c5   : > { %14445 = vadd.xlane.f32.xlu1 %v14444_v15 }
 0x7cb   : > { %v14348_v61 = vpop.f32.mrb[172].mxu1 }
 0x7cc   : > { %v14349_v57 = vadd.f32 %v14348_v61, %v23591_v28  ;;  %v14350_v27 = vpop.f32.mrb[173].mxu1  ;;  %v18207_v61 = vld [vmem:[%s18886_s19 + $0xb0] sm:$0xff] }
 0x7cd   : > { %v14351_v50 = vadd.f32 %v14350_v27, %v23594_v2  ;;  %v14352_v29 = vpop.f32.mrb[174].mxu1  ;;  %v18208_v27 = vld [vmem:[%s18886_s19 + $0xb8] sm:$0xff] }
 0x7ce   : > { %v23659_v18 = vadd.f32 %v18197_v32, %v14349_v57  ;;  %v14353_v16 = vadd.f32 %v14352_v29, %v23591_v28  ;;  %v14354_v41 = vpop.f32.mrb[175].mxu1 }
 0x7cf   : > { %v23663_v44 = vadd.f32 %v18198_v35, %v14351_v50  ;;  %v14355_v38 = vadd.f32 %v14354_v41, %v23594_v2 }
 0x7d0   : > { %v23667_v10 = vadd.f32 %v18199_v49, %v14353_v16 }
 0x7d1   : > { %v23670_v54 = vadd.f32 %v18200_v59, %v14355_v38  ;;  %v14447_v22 = vadd.f32 %v23663_v44, %v23659_v18  ;;  %v18209_v59 = vld [vmem:[%s18886_s19 + $0xc0] sm:$0xff] }
 0x7d3   : > { %14448 = vadd.xlane.f32.xlu0 %v14447_v22  ;;  %v14450_v0 = vadd.f32 %v23670_v54, %v23667_v10 }
 0x7d5   : > { %14451 = vadd.xlane.f32.xlu1 %v14450_v0 }
 0x7da   : > { %v14358_v3 = vpop.f32.mrb[176].mxu1 }
 0x7db   : > { %v14359_v12 = vadd.f32 %v14358_v3, %v23591_v28  ;;  %v14360_v25 = vpop.f32.mrb[177].mxu1 }
 0x7dc   : > { %v14361_v33 = vadd.f32 %v14360_v25, %v23594_v2  ;;  %v14362_v5 = vpop.f32.mrb[178].mxu1 }
 0x7dd   : > { %v23679_v40 = vadd.f32 %v18201_v26, %v14359_v12  ;;  %v14363_v31 = vadd.f32 %v14362_v5, %v23591_v28  ;;  %v14364_v60 = vpop.f32.mrb[179].mxu1  ;;  %v18210_v12 = vld [vmem:[%s18886_s19 + $0xc8] sm:$0xff]  ;;  %v18211_v5 = vld [vmem:[%s18886_s19 + $0xd0] sm:$0xff] }
 0x7de   : > { %v23683_v9 = vadd.f32 %v18202_v30, %v14361_v33  ;;  %v14365_v42 = vadd.f32 %v14364_v60, %v23594_v2 }
 0x7df   : > { %v23687_v53 = vadd.f32 %v18203_v21, %v14363_v31  ;;  %v18212_v31 = vld [vmem:[%s18886_s19 + $0xd8] sm:$0xff] }
 0x7e0   : > { %v23690_v63 = vadd.f32 %v18204_v34, %v14365_v42  ;;  %v14453_v43 = vadd.f32 %v23683_v9, %v23679_v40 }
 0x7e2   : > { %v14368_v6 = vpop.f32.mrb[180].mxu1  ;;  %14454 = vadd.xlane.f32.xlu0 %v14453_v43  ;;  %v14456_v45 = vadd.f32 %v23690_v63, %v23687_v53 }
 0x7e3   : > { %v14369_v8 = vadd.f32 %v14368_v6, %v23591_v28  ;;  %v14370_v56 = vpop.f32.mrb[181].mxu1 }
 0x7e4   : > { %v14371_v14 = vadd.f32 %v14370_v56, %v23594_v2  ;;  %v14372_v52 = vpop.f32.mrb[182].mxu1  ;;  %14457 = vadd.xlane.f32.xlu1 %v14456_v45 }
 0x7e5   : > { %v23699_v62 = vadd.f32 %v18205_v7, %v14369_v8  ;;  %v14373_v20 = vadd.f32 %v14372_v52, %v23591_v28  ;;  %v14374_v48 = vpop.f32.mrb[183].mxu1  ;;  %v18213_v8 = vld [vmem:[%s18886_s19 + $0xe0] sm:$0xff]  ;;  %v18214_v7 = vld [vmem:[%s18886_s19 + $0xe8] sm:$0xff] }
 0x7e6   : > { %v23703_v19 = vadd.f32 %v18206_v55, %v14371_v14  ;;  %v14375_v15 = vadd.f32 %v14374_v48, %v23594_v2  ;;  %v18215_v55 = vld [vmem:[%s18886_s19 + $0xf0] sm:$0xff] }
 0x7e7   : > { %v23707_v57 = vadd.f32 %v18207_v61, %v14373_v20  ;;  %v18216_v61 = vld [vmem:[%s18886_s19 + $0xf8] sm:$0xff] }
 0x7e8   : > { %v23710_v50 = vadd.f32 %v18208_v27, %v14375_v15  ;;  %v14459_v29 = vadd.f32 %v23703_v19, %v23699_v62 }
 0x7ea   : > { %v14378_v32 = vpop.f32.mrb[184].mxu1  ;;  %14460 = vadd.xlane.f32.xlu0 %v14459_v29  ;;  %v14462_v16 = vadd.f32 %v23710_v50, %v23707_v57 }
 0x7eb   : > { %v14379_v41 = vadd.f32 %v14378_v32, %v23591_v28  ;;  %v14380_v35 = vpop.f32.mrb[185].mxu1 }
 0x7ec   : > { %v14381_v38 = vadd.f32 %v14380_v35, %v23594_v2  ;;  %v14382_v49 = vpop.f32.mrb[186].mxu1  ;;  %14463 = vadd.xlane.f32.xlu1 %v14462_v16  ;;  %v17739_v16 = vld [vmem:[#allocation11 + $0x4] ss:$16 sps:$4 sm:$0xff]   ;;  %v17742_v35 = vld [vmem:[#allocation11 + $0xc] ss:$16 sps:$4 sm:$0xff]  }
 0x7ed   : > { %v23719_v22 = vadd.f32 %v18209_v59, %v14379_v41  ;;  %v14383_v0 = vadd.f32 %v14382_v49, %v23591_v28  ;;  %v14384_v3 = vpop.f32.mrb[187].mxu1  ;;  %v17740_v41 = vld [vmem:[#allocation11 + $0x8] ss:$16 sps:$4 sm:$0xff]   ;;  %15196 = vmatprep.subr.bf16.mxu0 %v17739_v16  ;;  %15309 = vmatprep.subr.bf16.mxu1 %v17742_v35  ;;  %v17743_v49 = vld [vmem:[#allocation11 + $0x20] ss:$16 sps:$4 sm:$0xff]  }
 0x7ee   : > { %v23723_v25 = vadd.f32 %v18210_v12, %v14381_v38  ;;  %v14385_v33 = vadd.f32 %v14384_v3, %v23594_v2  ;;  %v17745_v38 = vld [vmem:[#allocation11 + $0x24] ss:$16 sps:$4 sm:$0xff]   ;;  %15310 = vmatpush1.bf16.msra.mxu1 %v17740_v41  ;;  %v17746_v59 = vld [vmem:[#allocation11 + $0x28] ss:$16 sps:$4 sm:$0xff]   ;;  %v17754_v3 = vld [vmem:[#allocation11 + $0x4c] ss:$16 sps:$4 sm:$0xff]  }
 0x7ef   : > { %v23727_v26 = vadd.f32 %v18211_v5, %v14383_v0  ;;  %v17751_v0 = vld [vmem:[#allocation11 + $0x44] ss:$16 sps:$4 sm:$0xff]   ;;  %v17749_v12 = vld [vmem:[#allocation11 + $0x40] ss:$16 sps:$4 sm:$0xff]   ;;  %v17782_v16 = vld [vmem:[#allocation11 + $0xe8] ss:$16 sps:$4 sm:$0xff]  }
 0x7f0   : > { %v23730_v60 = vadd.f32 %v18212_v31, %v14385_v33  ;;  %v14465_v30 = vadd.f32 %v23723_v25, %v23719_v22  ;;  %v17752_v33 = vld [vmem:[#allocation11 + $0x48] ss:$16 sps:$4 sm:$0xff]   ;;  %v17757_v5 = vld [vmem:[#allocation11 + $0x64] ss:$16 sps:$4 sm:$0xff]   ;;  %v17760_v31 = vld [vmem:[#allocation11 + $0x6c] ss:$16 sps:$4 sm:$0xff]  }
 0x7f1   : > { %v17787_v41 = vld [vmem:[#allocation11 + $0x104] ss:$16 sps:$4 sm:$0xff]  }
 0x7f2   : > { %14466 = vadd.xlane.f32.xlu0 %v14465_v30  ;;  %v14388_v42 = vpop.f32.mrb[188].mxu1  ;;  %v14468_v21 = vadd.f32 %v23730_v60, %v23727_v26  ;;  %v17755_v30 = vld [vmem:[#allocation11 + $0x60] ss:$16 sps:$4 sm:$0xff]  }
 0x7f3   : > { %v14389_v34 = vadd.f32 %v14388_v42, %v23591_v28  ;;  %v14390_v43 = vpop.f32.mrb[189].mxu1  ;;  %v17758_v42 = vld [vmem:[#allocation11 + $0x68] ss:$16 sps:$4 sm:$0xff]  }
 0x7f4   : > { %v14391_v6 = vadd.f32 %v14390_v43, %v23594_v2  ;;  %14469 = vadd.xlane.f32.xlu1 %v14468_v21  ;;  %v14392_v45 = vpop.f32.mrb[190].mxu1  ;;  %v17763_v21 = vld [vmem:[#allocation11 + $0x84] ss:$16 sps:$4 sm:$0xff]   ;;  %v17761_v43 = vld [vmem:[#allocation11 + $0x80] ss:$16 sps:$4 sm:$0xff]  }
 0x7f5   : > { %v23739_v56 = vadd.f32 %v18213_v8, %v14389_v34  ;;  %v14393_v14 = vadd.f32 %v14392_v45, %v23591_v28  ;;  %v14394_v52 = vpop.f32.mrb[191].mxu1  ;;  %v17737_v28 = vld [vmem:[#allocation11] ss:$16 sps:$4 sm:$0xff]   ;;  %v17766_v34 = vld [vmem:[#allocation11 + $0x8c] ss:$16 sps:$4 sm:$0xff]  }
 0x7f6   : > { %v23743_v20 = vadd.f32 %v18214_v7, %v14391_v6  ;;  %v14395_v48 = vadd.f32 %v14394_v52, %v23594_v2  ;;  %v17748_v2 = vld [vmem:[#allocation11 + $0x2c] ss:$16 sps:$4 sm:$0xff]   ;;  %15197 = vmatpush1.bf16.msra.mxu0 %v17737_v28  ;;  %v17764_v6 = vld [vmem:[#allocation11 + $0x88] ss:$16 sps:$4 sm:$0xff]   ;;  %v17769_v45 = vld [vmem:[#allocation11 + $0xa4] ss:$16 sps:$4 sm:$0xff]  }
 0x7f7   : > { %v23747_v15 = vadd.f32 %v18215_v55, %v14393_v14  ;;  %15198 = vmatprep.subr.bf16.mxu0 %v17745_v38  ;;  %15311 = vmatprep.subr.bf16.mxu1 %v17748_v2  ;;  %v17772_v8 = vld [vmem:[#allocation11 + $0xac] ss:$16 sps:$4 sm:$0xff]   ;;  %v17767_v14 = vld [vmem:[#allocation11 + $0xa0] ss:$16 sps:$4 sm:$0xff]   ;;  %v17770_v52 = vld [vmem:[#allocation11 + $0xa8] ss:$16 sps:$4 sm:$0xff]  }
 0x7f8   : > { %v23750_v27 = vadd.f32 %v18216_v61, %v14395_v48  ;;  %v14471_v29 = vadd.f32 %v23743_v20, %v23739_v56  ;;  %15312 = vmatpush1.bf16.msra.mxu1 %v17746_v59  ;;  %v17775_v7 = vld [vmem:[#allocation11 + $0xc4] ss:$16 sps:$4 sm:$0xff]   ;;  %v17778_v48 = vld [vmem:[#allocation11 + $0xcc] ss:$16 sps:$4 sm:$0xff]   ;;  %v17773_v55 = vld [vmem:[#allocation11 + $0xc0] ss:$16 sps:$4 sm:$0xff]  }
 0x7f9   : > { %15313 = vmatprep.subr.bf16.mxu1 %v17754_v3  ;;  %v17776_v61 = vld [vmem:[#allocation11 + $0xc8] ss:$16 sps:$4 sm:$0xff]   ;;  %v17779_v28 = vld [vmem:[#allocation11 + $0xe0] ss:$16 sps:$4 sm:$0xff]   ;;  %v17790_v38 = vld [vmem:[#allocation11 + $0x10c] ss:$16 sps:$4 sm:$0xff]  }
 0x7fa   : > { %14472 = vadd.xlane.f32.xlu0 %v14471_v29  ;;  %v14474_v32 = vadd.f32 %v23750_v27, %v23747_v15  ;;  %15199 = vmatpush1.bf16.msra.mxu0 %v17743_v49  ;;  %v17781_v29 = vld [vmem:[#allocation11 + $0xe4] ss:$16 sps:$4 sm:$0xff]   ;;  %v17785_v59 = vld [vmem:[#allocation11 + $0x100] ss:$16 sps:$4 sm:$0xff]  }
 0x7fb   : > { %15200 = vmatprep.subr.bf16.mxu0 %v17751_v0 }
 0x7fc   : > { %14475 = vadd.xlane.f32.xlu1 %v14474_v32  ;;  %15314 = vmatpush1.bf16.msra.mxu1 %v17752_v33  ;;  %v17784_v32 = vld [vmem:[#allocation11 + $0xec] ss:$16 sps:$4 sm:$0xff]   ;;  %v17788_v33 = vld [vmem:[#allocation11 + $0x108] ss:$16 sps:$4 sm:$0xff]  }
 0x7fd   : > { %15315 = vmatprep.subr.bf16.mxu1 %v17760_v31  ;;  %v17796_v31 = vld [vmem:[#allocation11 + $0x12c] ss:$16 sps:$4 sm:$0xff]  }
 0x7fe   : > { %15201 = vmatpush1.bf16.msra.mxu0 %v17749_v12 }
 0x7ff   : > { %15202 = vmatprep.subr.bf16.mxu0 %v17757_v5  ;;  %v17793_v5 = vld [vmem:[#allocation11 + $0x124] ss:$16 sps:$4 sm:$0xff]  }
 0x800   : > { %15316 = vmatpush1.bf16.msra.mxu1 %v17758_v42 }
 0x801   : > { %15317 = vmatprep.subr.bf16.mxu1 %v17766_v34 }
 0x802   : > { %15203 = vmatpush1.bf16.msra.mxu0 %v17755_v30 }
 0x803   : > { %15204 = vmatprep.subr.bf16.mxu0 %v17763_v21  ;;  %v17791_v21 = vld [vmem:[#allocation11 + $0x120] ss:$16 sps:$4 sm:$0xff]  }
 0x804   : > { %15318 = vmatpush1.bf16.msra.mxu1 %v17764_v6 }
 0x805   : > { %15319 = vmatprep.subr.bf16.mxu1 %v17772_v8 }
 0x806   : > { %15205 = vmatpush1.bf16.msra.mxu0 %v17761_v43 }
 0x807   : > { %15206 = vmatprep.subr.bf16.mxu0 %v17769_v45 }
 0x808   : > { %15320 = vmatpush1.bf16.msra.mxu1 %v17770_v52 }
 0x809   : > { %15321 = vmatprep.subr.bf16.mxu1 %v17778_v48 }
 0x80a   : > { %15207 = vmatpush1.bf16.msra.mxu0 %v17767_v14 }
 0x80b   : > { %15208 = vmatprep.subr.bf16.mxu0 %v17775_v7 }
 0x80c   : > { %15322 = vmatpush1.bf16.msra.mxu1 %v17776_v61 }
 0x80d   : > { %15323 = vmatprep.subr.bf16.mxu1 %v17784_v32 }
 0x80e   : > { %15209 = vmatpush1.bf16.msra.mxu0 %v17773_v55 }
 0x80f   : > { %15210 = vmatprep.subr.bf16.mxu0 %v17781_v29 }
 0x810   : > { %15324 = vmatpush1.bf16.msra.mxu1 %v17782_v16 }
 0x811   : > { %15325 = vmatprep.subr.bf16.mxu1 %v17790_v38 }
 0x812   : > { %15211 = vmatpush1.bf16.msra.mxu0 %v17779_v28 }
 0x813   : > { %15212 = vmatprep.subr.bf16.mxu0 %v17787_v41 }
 0x814   : > { %15326 = vmatpush1.bf16.msra.mxu1 %v17788_v33 }
 0x815   : > { %15327 = vmatprep.subr.bf16.mxu1 %v17796_v31 }
 0x816   : > { %15213 = vmatpush1.bf16.msra.mxu0 %v17785_v59 }
 0x817   : > { %15214 = vmatprep.subr.bf16.mxu0 %v17793_v5 }
 0x81a   : > { %15215 = vmatpush1.bf16.msra.mxu0 %v17791_v21  ;;  %v17805_v21 = vld [vmem:[#allocation11 + $0x164] ss:$16 sps:$4 sm:$0xff]  }
 0x82d   : > { %v14431_v35 = vpop.xlane.xlu0 %14430 }
 0x82e   : > { %v14478_v2 = vmul.f32 0.00390625, %v14431_v35 }
 0x82f   : > { %v14434_v49 = vpop.xlane.xlu1 %14433 }
 0x830   : > { %v23757_v0 = vsub.f32 %v23599_v13, %v14478_v2  ;;  %v23760_v3 = vsub.f32 %v23603_v37, %v14478_v2  ;;  %v14479_v12 = vmul.f32 0.00390625, %v14434_v49 }
 0x832   : > { %v23763_v30 = vsub.f32 %v23607_v46, %v14479_v12  ;;  %v23766_v42 = vsub.f32 %v23610_v51, %v14479_v12  ;;  %v14526_v13 = vmul.f32 %v23757_v0, %v23757_v0  ;;  %v14527_v37 = vmul.f32 %v23760_v3, %v23760_v3  ;;  %v17794_v46 = vld [vmem:[#allocation11 + $0x128] ss:$16 sps:$4 sm:$0xff]  }
 0x833   : > { %15328 = vmatpush1.bf16.msra.mxu1 %v17794_v46  ;;  %v17811_v46 = vld [vmem:[#allocation11 + $0x184] ss:$16 sps:$4 sm:$0xff]  }
 0x834   : > { %v14558_v34 = vadd.f32 %v14527_v37, %v14526_v13  ;;  %v14528_v43 = vmul.f32 %v23763_v30, %v23763_v30  ;;  %v14529_v6 = vmul.f32 %v23766_v42, %v23766_v42  ;;  %v17799_v13 = vld [vmem:[#allocation11 + $0x144] ss:$16 sps:$4 sm:$0xff]   ;;  %v17800_v37 = vld [vmem:[#allocation11 + $0x148] ss:$16 sps:$4 sm:$0xff]  }
 0x835   : > { %15216 = vmatprep.subr.bf16.mxu0 %v17799_v13 }
 0x836   : > { %14559 = vadd.xlane.f32.xlu0 %v14558_v34  ;;  %v14561_v51 = vadd.f32 %v14529_v6, %v14528_v43  ;;  %v17808_v34 = vld [vmem:[#allocation11 + $0x16c] ss:$16 sps:$4 sm:$0xff]   ;;  %v17803_v43 = vld [vmem:[#allocation11 + $0x160] ss:$16 sps:$4 sm:$0xff]   ;;  %v17806_v6 = vld [vmem:[#allocation11 + $0x168] ss:$16 sps:$4 sm:$0xff]  }
 0x838   : > { %14562 = vadd.xlane.f32.xlu1 %v14561_v51  ;;  %v17814_v51 = vld [vmem:[#allocation11 + $0x18c] ss:$16 sps:$4 sm:$0xff]  }
 0x83f   : > { %v14437_v45 = vpop.xlane.xlu0 %14436 }
 0x840   : > { %v14480_v8 = vmul.f32 0.00390625, %v14437_v45 }
 0x841   : > { %v14440_v14 = vpop.xlane.xlu1 %14439 }
 0x842   : > { %v23777_v52 = vsub.f32 %v23619_v11, %v14480_v8  ;;  %v23780_v7 = vsub.f32 %v23623_v17, %v14480_v8  ;;  %v14481_v48 = vmul.f32 0.00390625, %v14440_v14  ;;  %v17809_v14 = vld [vmem:[#allocation11 + $0x180] ss:$16 sps:$4 sm:$0xff]  }
 0x844   : > { %v23783_v55 = vsub.f32 %v23627_v24, %v14481_v48  ;;  %v23786_v61 = vsub.f32 %v23630_v4, %v14481_v48  ;;  %v14530_v29 = vmul.f32 %v23777_v52, %v23777_v52  ;;  %v14531_v32 = vmul.f32 %v23780_v7, %v23780_v7 }
 0x846   : > { %v14564_v28 = vadd.f32 %v14531_v32, %v14530_v29  ;;  %v14532_v11 = vmul.f32 %v23783_v55, %v23783_v55  ;;  %v14533_v17 = vmul.f32 %v23786_v61, %v23786_v61  ;;  %v17812_v29 = vld [vmem:[#allocation11 + $0x188] ss:$16 sps:$4 sm:$0xff]   ;;  %v17817_v32 = vld [vmem:[#allocation11 + $0x1a4] ss:$16 sps:$4 sm:$0xff]  }
 0x848   : > { %14565 = vadd.xlane.f32.xlu0 %v14564_v28  ;;  %v14567_v16 = vadd.f32 %v14533_v17, %v14532_v11 }
 0x84a   : > { %14568 = vadd.xlane.f32.xlu1 %v14567_v16  ;;  %v17820_v16 = vld [vmem:[#allocation11 + $0x1ac] ss:$16 sps:$4 sm:$0xff]  }
 0x850   : > { %v14443_v24 = vpop.xlane.xlu0 %14442 }
 0x851   : > { %v14482_v41 = vmul.f32 0.00390625, %v14443_v24 }
 0x852   : > { %v14446_v4 = vpop.xlane.xlu1 %14445 }
 0x853   : > { %v23797_v35 = vsub.f32 %v23639_v36, %v14482_v41  ;;  %v23800_v38 = vsub.f32 %v23643_v23, %v14482_v41  ;;  %v14483_v2 = vmul.f32 0.00390625, %v14446_v4 }
 0x855   : > { %v23803_v49 = vsub.f32 %v23647_v1, %v14483_v2  ;;  %v23806_v59 = vsub.f32 %v23650_v47, %v14483_v2  ;;  %v14534_v12 = vmul.f32 %v23797_v35, %v23797_v35  ;;  %v14535_v33 = vmul.f32 %v23800_v38, %v23800_v38  ;;  %v17797_v1 = vld [vmem:[#allocation11 + $0x140] ss:$16 sps:$4 sm:$0xff]   ;;  %v17802_v47 = vld [vmem:[#allocation11 + $0x14c] ss:$16 sps:$4 sm:$0xff]  }
 0x856   : > { %15329 = vmatprep.subr.bf16.mxu1 %v17802_v47  ;;  %15217 = vmatpush1.bf16.msra.mxu0 %v17797_v1  ;;  %v17829_v1 = vld [vmem:[#allocation11 + $0x1e4] ss:$16 sps:$4 sm:$0xff]  }
 0x857   : > { %v14570_v5 = vadd.f32 %v14535_v33, %v14534_v12  ;;  %v14536_v36 = vmul.f32 %v23803_v49, %v23803_v49  ;;  %v14537_v23 = vmul.f32 %v23806_v59, %v23806_v59  ;;  %15330 = vmatpush1.bf16.msra.mxu1 %v17800_v37  ;;  %15218 = vmatprep.subr.bf16.mxu0 %v17805_v21  ;;  %v17832_v37 = vld [vmem:[#allocation11 + $0x1ec] ss:$16 sps:$4 sm:$0xff]   ;;  %v17827_v21 = vld [vmem:[#allocation11 + $0x1e0] ss:$16 sps:$4 sm:$0xff]  }
 0x858   : > { %15331 = vmatprep.subr.bf16.mxu1 %v17808_v34 }
 0x859   : > { %14571 = vadd.xlane.f32.xlu0 %v14570_v5  ;;  %v14573_v31 = vadd.f32 %v14537_v23, %v14536_v36  ;;  %v17821_v5 = vld [vmem:[#allocation11 + $0x1c0] ss:$16 sps:$4 sm:$0xff]   ;;  %v17823_v36 = vld [vmem:[#allocation11 + $0x1c4] ss:$16 sps:$4 sm:$0xff]   ;;  %v17824_v23 = vld [vmem:[#allocation11 + $0x1c8] ss:$16 sps:$4 sm:$0xff]  }
 0x85a   : > { %15219 = vmatpush1.bf16.msra.mxu0 %v17803_v43  ;;  %v17830_v43 = vld [vmem:[#allocation11 + $0x1e8] ss:$16 sps:$4 sm:$0xff]  }
 0x85b   : > { %14574 = vadd.xlane.f32.xlu1 %v14573_v31  ;;  %15332 = vmatpush1.bf16.msra.mxu1 %v17806_v6  ;;  %v17826_v31 = vld [vmem:[#allocation11 + $0x1cc] ss:$16 sps:$4 sm:$0xff]  }
 0x85c   : > { %15220 = vmatprep.subr.bf16.mxu0 %v17811_v46  ;;  %15333 = vmatprep.subr.bf16.mxu1 %v17814_v51 }
 0x85e   : > { %15221 = vmatpush1.bf16.msra.mxu0 %v17809_v14 }
 0x85f   : > { %15334 = vmatpush1.bf16.msra.mxu1 %v17812_v29  ;;  %15222 = vmatprep.subr.bf16.mxu0 %v17817_v32 }
 0x860   : > { %v14449_v45 = vpop.xlane.xlu0 %14448  ;;  %15335 = vmatprep.subr.bf16.mxu1 %v17820_v16 }
 0x861   : > { %v14484_v8 = vmul.f32 0.00390625, %v14449_v45 }
 0x862   : > { %v14452_v48 = vpop.xlane.xlu1 %14451 }
 0x863   : > { %v23817_v28 = vsub.f32 %v23659_v18, %v14484_v8  ;;  %v23820_v11 = vsub.f32 %v23663_v44, %v14484_v8  ;;  %v14485_v17 = vmul.f32 0.00390625, %v14452_v48  ;;  %v17815_v18 = vld [vmem:[#allocation11 + $0x1a0] ss:$16 sps:$4 sm:$0xff]   ;;  %v17818_v44 = vld [vmem:[#allocation11 + $0x1a8] ss:$16 sps:$4 sm:$0xff]  }
 0x864   : > { %15223 = vmatpush1.bf16.msra.mxu0 %v17815_v18  ;;  %15336 = vmatpush1.bf16.msra.mxu1 %v17818_v44 }
 0x865   : > { %v23823_v24 = vsub.f32 %v23667_v10, %v14485_v17  ;;  %v23826_v41 = vsub.f32 %v23670_v54, %v14485_v17  ;;  %v14538_v4 = vmul.f32 %v23817_v28, %v23817_v28  ;;  %v14539_v2 = vmul.f32 %v23820_v11, %v23820_v11  ;;  %15224 = vmatprep.subr.bf16.mxu0 %v17823_v36 }
 0x866   : > { %15337 = vmatprep.subr.bf16.mxu1 %v17826_v31 }
 0x867   : > { %v14576_v12 = vadd.f32 %v14539_v2, %v14538_v4  ;;  %v14540_v33 = vmul.f32 %v23823_v24, %v23823_v24  ;;  %v14541_v10 = vmul.f32 %v23826_v41, %v23826_v41 }
 0x868   : > { %15225 = vmatpush1.bf16.msra.mxu0 %v17821_v5  ;;  %15338 = vmatpush1.bf16.msra.mxu1 %v17824_v23 }
 0x869   : > { %14577 = vadd.xlane.f32.xlu0 %v14576_v12  ;;  %v14579_v54 = vadd.f32 %v14541_v10, %v14540_v33  ;;  %15226 = vmatprep.subr.bf16.mxu0 %v17829_v1 }
 0x86a   : > { %15339 = vmatprep.subr.bf16.mxu1 %v17832_v37 }
 0x86b   : > { %14580 = vadd.xlane.f32.xlu1 %v14579_v54 }
 0x86c   : > { %15227 = vmatpush1.bf16.msra.mxu0 %v17827_v21  ;;  %15340 = vmatpush1.bf16.msra.mxu1 %v17830_v43 }
 0x86f   : > { %v14455_v13 = vpop.xlane.xlu0 %14454 }
 0x870   : > { %v14486_v47 = vmul.f32 0.00390625, %v14455_v13 }
 0x871   : > { %v14458_v34 = vpop.xlane.xlu1 %14457 }
 0x872   : > { %v23837_v6 = vsub.f32 %v23679_v40, %v14486_v47  ;;  %v23840_v46 = vsub.f32 %v23683_v9, %v14486_v47  ;;  %v14487_v51 = vmul.f32 0.00390625, %v14458_v34 }
 0x874   : > { %v23843_v45 = vsub.f32 %v23687_v53, %v14487_v51  ;;  %v23846_v8 = vsub.f32 %v23690_v63, %v14487_v51  ;;  %v14542_v14 = vmul.f32 %v23837_v6, %v23837_v6  ;;  %v14543_v48 = vmul.f32 %v23840_v46, %v23840_v46 }
 0x876   : > { %v14582_v40 = vadd.f32 %v14543_v48, %v14542_v14  ;;  %v14544_v9 = vmul.f32 %v23843_v45, %v23843_v45  ;;  %v14545_v29 = vmul.f32 %v23846_v8, %v23846_v8 }
 0x877   : > { %v14461_v53 = vpop.xlane.xlu0 %14460 }
 0x878   : > { %v14488_v32 = vmul.f32 0.00390625, %v14461_v53  ;;  %14583 = vadd.xlane.f32.xlu0 %v14582_v40  ;;  %v14585_v63 = vadd.f32 %v14545_v29, %v14544_v9 }
 0x879   : > { %v14464_v17 = vpop.xlane.xlu1 %14463 }
 0x87a   : > { %v23857_v16 = vsub.f32 %v23699_v62, %v14488_v32  ;;  %v23860_v4 = vsub.f32 %v23703_v19, %v14488_v32  ;;  %v14489_v2 = vmul.f32 0.00390625, %v14464_v17  ;;  %14586 = vadd.xlane.f32.xlu1 %v14585_v63 }
 0x87c   : > { %v23863_v18 = vsub.f32 %v23707_v57, %v14489_v2  ;;  %v23866_v44 = vsub.f32 %v23710_v50, %v14489_v2  ;;  %v14546_v12 = vmul.f32 %v23857_v16, %v23857_v16  ;;  %v14547_v33 = vmul.f32 %v23860_v4, %v23860_v4 }
 0x87e   : > { %v14588_v10 = vadd.f32 %v14547_v33, %v14546_v12  ;;  %v14548_v62 = vmul.f32 %v23863_v18, %v23863_v18  ;;  %v14549_v19 = vmul.f32 %v23866_v44, %v23866_v44 }
 0x87f   : > { %v14467_v54 = vpop.xlane.xlu0 %14466 }
 0x880   : > { %v14490_v5 = vmul.f32 0.00390625, %v14467_v54  ;;  %14589 = vadd.xlane.f32.xlu0 %v14588_v10  ;;  %v14591_v57 = vadd.f32 %v14549_v19, %v14548_v62  ;;  %v14686_v62 = vld [vmem:[%s25672_s15] sm:$0x3] }
 0x881   : > { %v14470_v36 = vpop.xlane.xlu1 %14469  ;;  %v23920_v19 = vrot.slane %v14686_v62, %v25670_v58  ;;  %v14730_v54 = vld [vmem:[%s25673_s1] sm:$0x3] }
 0x882   : > { %v23877_v50 = vsub.f32 %v23719_v22, %v14490_v5  ;;  %v23880_v23 = vsub.f32 %v23723_v25, %v14490_v5  ;;  %v14491_v31 = vmul.f32 0.00390625, %v14470_v36  ;;  %14592 = vadd.xlane.f32.xlu1 %v14591_v57  ;;  %v23926_v57 = vrot.slane %v14686_v62, %v25671_v39 }
 0x884   : > { %v23883_v1 = vsub.f32 %v23727_v26, %v14491_v31  ;;  %v23886_v13 = vsub.f32 %v23730_v60, %v14491_v31  ;;  %v14550_v37 = vmul.f32 %v23877_v50, %v23877_v50  ;;  %v14551_v47 = vmul.f32 %v23880_v23, %v23880_v23 }
 0x886   : > { %v14594_v21 = vadd.f32 %v14551_v47, %v14550_v37  ;;  %v14552_v22 = vmul.f32 %v23883_v1, %v23883_v1  ;;  %v14553_v25 = vmul.f32 %v23886_v13, %v23886_v13 }
 0x887   : > { %v14473_v34 = vpop.xlane.xlu0 %14472 }
 0x888   : > { %v14492_v43 = vmul.f32 0.00390625, %v14473_v34  ;;  %14595 = vadd.xlane.f32.xlu0 %v14594_v21  ;;  %v14597_v26 = vadd.f32 %v14553_v25, %v14552_v22  ;;  %v23931_v21 = vrot.slane %v14730_v54, %v25670_v58  ;;  %v23934_v22 = vrot.slane %v14730_v54, %v25671_v39 }
 0x889   : > { %v14476_v51 = vpop.xlane.xlu1 %14475 }
 0x88a   : > { %v23897_v60 = vsub.f32 %v23739_v56, %v14492_v43  ;;  %v23900_v14 = vsub.f32 %v23743_v20, %v14492_v43  ;;  %v14493_v48 = vmul.f32 0.00390625, %v14476_v51  ;;  %14598 = vadd.xlane.f32.xlu1 %v14597_v26 }
 0x88c   : > { %v23903_v40 = vsub.f32 %v23747_v15, %v14493_v48  ;;  %v23906_v9 = vsub.f32 %v23750_v27, %v14493_v48  ;;  %v14554_v29 = vmul.f32 %v23897_v60, %v23897_v60  ;;  %v14555_v53 = vmul.f32 %v23900_v14, %v23900_v14  ;;  %v17835_v15 = vld [vmem:[#allocation13 + $0x4] ss:$8 sps:$4 sm:$0xff]  }
 0x88d   : > { %15914 = vmatprep.subr.bf16.mxu0 %v17835_v15 }
 0x88e   : > { %v14600_v32 = vadd.f32 %v14555_v53, %v14554_v29  ;;  %v14556_v56 = vmul.f32 %v23903_v40, %v23903_v40  ;;  %v14557_v20 = vmul.f32 %v23906_v9, %v23906_v9 }
 0x890   : > { %14601 = vadd.xlane.f32.xlu0 %v14600_v32  ;;  %v14603_v63 = vadd.f32 %v14557_v20, %v14556_v56 }
 0x892   : > { %14604 = vadd.xlane.f32.xlu1 %v14603_v63 }
 0x8c3   : > { %v14560_v27 = vpop.xlane.xlu0 %14559 }
 0x8c4   : > { %v14606_v17 = vmul.f32 0.00390625, %v14560_v27  ;;  %v17833_v27 = vld [vmem:[#allocation13] ss:$8 sps:$4 sm:$0xff]  }
 0x8c5   : > { %v14563_v2 = vpop.xlane.xlu1 %14562 }
 0x8c6   : > { %v14622_v12 = vadd.f32 1e-05, %v14606_v17  ;;  %v14607_v33 = vmul.f32 0.00390625, %v14563_v2  ;;  %v17838_v17 = vld [vmem:[#allocation13 + $0x14] ss:$8 sps:$4 sm:$0xff]  }
 0x8c7   : > { %v17836_v2 = vld [vmem:[#allocation13 + $0x10] ss:$8 sps:$4 sm:$0xff]  }
 0x8c8   : > { %18121 = vrsqrt.f32 %v14622_v12  ;;  %v14623_v10 = vadd.f32 1e-05, %v14607_v33  ;;  %v17841_v12 = vld [vmem:[#allocation13 + $0x24] ss:$8 sps:$4 sm:$0xff]  }
 0x8ca   : > { %18123 = vrsqrt.f32 %v14623_v10  ;;  %v17839_v10 = vld [vmem:[#allocation13 + $0x20] ss:$8 sps:$4 sm:$0xff]  }
 0x8d2   : > { %v18122_v5 = vpop.eup %18121 }
 0x8d3   : > { %v14654_v36 = vmul.f32 %v18122_v5, %v23757_v0  ;;  %v14655_v31 = vmul.f32 %v18122_v5, %v23760_v3 }
 0x8d4   : > { %v18124_v37 = vpop.eup %18123 }
 0x8d5   : > { %v14566_v47 = vpop.xlane.xlu0 %14565  ;;  %v14698_v25 = vmul.f32 %v23920_v19, %v14654_v36  ;;  %v14656_v34 = vmul.f32 %v18124_v37, %v23763_v30  ;;  %v14657_v26 = vmul.f32 %v18124_v37, %v23766_v42  ;;  %v14699_v0 = vmul.f32 %v23926_v57, %v14655_v31  ;;  %v17844_v36 = vld [vmem:[#allocation13 + $0x34] ss:$8 sps:$4 sm:$0xff]  }
 0x8d6   : > { %v14608_v43 = vmul.f32 0.00390625, %v14566_v47 }
 0x8d7   : > { %v14569_v51 = vpop.xlane.xlu1 %14568  ;;  %v14700_v3 = vmul.f32 %v23920_v19, %v14656_v34  ;;  %v14701_v53 = vmul.f32 %v23926_v57, %v14657_v26  ;;  %v23943_v32 = vadd.f32 %v23934_v22, %v14699_v0  ;;  %v23946_v56 = vadd.f32 %v23931_v21, %v14698_v25 }
 0x8d8   : > { %v14624_v48 = vadd.f32 1e-05, %v14608_v43  ;;  %v14609_v29 = vmul.f32 0.00390625, %v14569_v51 }
 0x8d9   : > { %v23949_v20 = vadd.f32 %v23934_v22, %v14701_v53  ;;  %v23952_v42 = vadd.f32 %v23931_v21, %v14700_v3  ;;  %v17842_v3 = vld [vmem:[#allocation13 + $0x30] ss:$8 sps:$4 sm:$0xff]  }
 0x8da   : > { %18125 = vrsqrt.f32 %v14624_v48  ;;  %v14625_v30 = vadd.f32 1e-05, %v14609_v29  ;;  %v17847_v48 = vld [vmem:[#allocation13 + $0x44] ss:$8 sps:$4 sm:$0xff]  }
 0x8db   : > { %v14775_v63 = vpack.c.bf16 %v23949_v20, %v23943_v32  ;;  %v14774_v15 = vpack.c.bf16 %v23952_v42, %v23946_v56 }
 0x8dc   : > { %18127 = vrsqrt.f32 %v14625_v30 }
 0x8dd   : > { %15228 = vmatprep.mubr.bf16.mxu0 %v14775_v63  ;;  %15341 = vmatprep.mubr.bf16.mxu1 %v14775_v63 }
 0x8de   : > { %15229 = vmatmul.mubr.bf16.vlgmr.msra.gmra.mrb[128].mxu0 %v14774_v15  ;;  %15342 = vmatmul.mubr.bf16.vlgmr.msra.gmra.mrb[192].mxu1 %v14774_v15 }
 0x8df   : > { %15915 = vmatpush1.bf16.msra.mxu0 %v17833_v27  ;;  %v17845_v27 = vld [vmem:[#allocation13 + $0x40] ss:$8 sps:$4 sm:$0xff]  }
 0x8e0   : > { %15916 = vmatprep.subr.bf16.mxu0 %v17838_v17  ;;  %v17850_v17 = vld [vmem:[#allocation13 + $0x54] ss:$8 sps:$4 sm:$0xff]  }
 0x8e3   : > { %15917 = vmatpush1.bf16.msra.mxu0 %v17836_v2  ;;  %v17848_v2 = vld [vmem:[#allocation13 + $0x50] ss:$8 sps:$4 sm:$0xff]  }
 0x8e4   : > { %v18126_v33 = vpop.eup %18125  ;;  %15918 = vmatprep.subr.bf16.mxu0 %v17841_v12  ;;  %v17853_v12 = vld [vmem:[#allocation13 + $0x64] ss:$8 sps:$4 sm:$0xff]  }
 0x8e5   : > { %v14659_v54 = vmul.f32 %v18126_v33, %v23780_v7  ;;  %v14658_v5 = vmul.f32 %v18126_v33, %v23777_v52 }
 0x8e6   : > { %v14572_v62 = vpop.xlane.xlu0 %14571  ;;  %v18128_v31 = vpop.eup %18127 }
 0x8e7   : > { %v14610_v37 = vmul.f32 0.00390625, %v14572_v62  ;;  %v14661_v25 = vmul.f32 %v18128_v31, %v23786_v61  ;;  %v14703_v34 = vmul.f32 %v23926_v57, %v14659_v54  ;;  %v14660_v43 = vmul.f32 %v18128_v31, %v23783_v55  ;;  %15919 = vmatpush1.bf16.msra.mxu0 %v17839_v10 }
 0x8e8   : > { %v14575_v47 = vpop.xlane.xlu1 %14574  ;;  %v14702_v26 = vmul.f32 %v23920_v19, %v14658_v5  ;;  %15920 = vmatprep.subr.bf16.mxu0 %v17844_v36  ;;  %v17851_v36 = vld [vmem:[#allocation13 + $0x60] ss:$8 sps:$4 sm:$0xff]  }
 0x8e9   : > { %v14626_v51 = vadd.f32 1e-05, %v14610_v37  ;;  %v14611_v0 = vmul.f32 0.00390625, %v14575_v47  ;;  %v14705_v7 = vmul.f32 %v23926_v57, %v14661_v25  ;;  %v14704_v52 = vmul.f32 %v23920_v19, %v14660_v43  ;;  %v17856_v47 = vld [vmem:[#allocation13 + $0x74] ss:$8 sps:$4 sm:$0xff]  }
 0x8ea   : > { %v23967_v61 = vadd.f32 %v23934_v22, %v14703_v34  ;;  %v23973_v55 = vadd.f32 %v23931_v21, %v14702_v26 }
 0x8eb   : > { %18129 = vrsqrt.f32 %v14626_v51  ;;  %v14627_v29 = vadd.f32 1e-05, %v14611_v0  ;;  %v23970_v53 = vadd.f32 %v23934_v22, %v14705_v7  ;;  %v23976_v30 = vadd.f32 %v23931_v21, %v14704_v52  ;;  %15921 = vmatpush1.bf16.msra.mxu0 %v17842_v3  ;;  %v17854_v3 = vld [vmem:[#allocation13 + $0x70] ss:$8 sps:$4 sm:$0xff]   ;;  %v17859_v52 = vld [vmem:[#allocation13 + $0x84] ss:$8 sps:$4 sm:$0xff]  }
 0x8ec   : > { %15922 = vmatprep.subr.bf16.mxu0 %v17847_v48 }
 0x8ed   : > { %18131 = vrsqrt.f32 %v14627_v29  ;;  %v14777_v63 = vpack.c.bf16 %v23970_v53, %v23967_v61  ;;  %v14776_v15 = vpack.c.bf16 %v23976_v30, %v23973_v55 }
 0x8ef   : > { %15238 = vmatprep.mubr.bf16.mxu0 %v14777_v63  ;;  %15351 = vmatprep.mubr.bf16.mxu1 %v14777_v63 }
 0x8f0   : > { %15239 = vmatmul.mubr.bf16.gmra.mrb[132].mxu0 %v14776_v15  ;;  %15352 = vmatmul.mubr.bf16.gmra.mrb[196].mxu1 %v14776_v15  ;;  %v17857_v15 = vld [vmem:[#allocation13 + $0x80] ss:$8 sps:$4 sm:$0xff]  }
 0x8f1   : > { %15923 = vmatpush1.bf16.msra.mxu0 %v17845_v27 }
 0x8f2   : > { %15924 = vmatprep.subr.bf16.mxu0 %v17850_v17  ;;  %v17862_v17 = vld [vmem:[#allocation13 + $0x94] ss:$8 sps:$4 sm:$0xff]  }
 0x8f5   : > { %v18130_v33 = vpop.eup %18129  ;;  %15925 = vmatpush1.bf16.msra.mxu0 %v17848_v2  ;;  %v17860_v2 = vld [vmem:[#allocation13 + $0x90] ss:$8 sps:$4 sm:$0xff]  }
 0x8f6   : > { %v14578_v10 = vpop.xlane.xlu0 %14577  ;;  %v14663_v54 = vmul.f32 %v18130_v33, %v23800_v38  ;;  %v14662_v5 = vmul.f32 %v18130_v33, %v23797_v35  ;;  %15926 = vmatprep.subr.bf16.mxu0 %v17853_v12  ;;  %v17865_v12 = vld [vmem:[#allocation13 + $0xa4] ss:$8 sps:$4 sm:$0xff]  }
 0x8f7   : > { %v14612_v62 = vmul.f32 0.00390625, %v14578_v10  ;;  %v18132_v31 = vpop.eup %18131 }
 0x8f8   : > { %v14581_v37 = vpop.xlane.xlu1 %14580  ;;  %v14665_v43 = vmul.f32 %v18132_v31, %v23806_v59  ;;  %v14707_v26 = vmul.f32 %v23926_v57, %v14663_v54  ;;  %v14664_v51 = vmul.f32 %v18132_v31, %v23803_v49  ;;  %v14706_v0 = vmul.f32 %v23920_v19, %v14662_v5  ;;  %v17863_v31 = vld [vmem:[#allocation13 + $0xa0] ss:$8 sps:$4 sm:$0xff]  }
 0x8f9   : > { %v14628_v25 = vadd.f32 1e-05, %v14612_v62  ;;  %v14613_v34 = vmul.f32 0.00390625, %v14581_v37  ;;  %15927 = vmatpush1.bf16.msra.mxu0 %v17851_v36 }
 0x8fa   : > { %v14709_v35 = vmul.f32 %v23926_v57, %v14665_v43  ;;  %v14708_v7 = vmul.f32 %v23920_v19, %v14664_v51  ;;  %15928 = vmatprep.subr.bf16.mxu0 %v17856_v47  ;;  %v23991_v48 = vadd.f32 %v23934_v22, %v14707_v26  ;;  %v23997_v49 = vadd.f32 %v23931_v21, %v14706_v0  ;;  %v17868_v26 = vld [vmem:[#allocation13 + $0xb4] ss:$8 sps:$4 sm:$0xff]  }
 0x8fb   : > { %18133 = vrsqrt.f32 %v14628_v25  ;;  %v14629_v38 = vadd.f32 1e-05, %v14613_v34 }
 0x8fc   : > { %v23994_v59 = vadd.f32 %v23934_v22, %v14709_v35  ;;  %v24000_v29 = vadd.f32 %v23931_v21, %v14708_v7  ;;  %v17866_v35 = vld [vmem:[#allocation13 + $0xb0] ss:$8 sps:$4 sm:$0xff]  }
 0x8fd   : > { %18135 = vrsqrt.f32 %v14629_v38  ;;  %15929 = vmatpush1.bf16.msra.mxu0 %v17854_v3 }
 0x8fe   : > { %v14779_v63 = vpack.c.bf16 %v23994_v59, %v23991_v48  ;;  %v14778_v27 = vpack.c.bf16 %v24000_v29, %v23997_v49  ;;  %15930 = vmatprep.subr.bf16.mxu0 %v17859_v52 }
 0x900   : > { %15248 = vmatprep.mubr.bf16.mxu0 %v14779_v63  ;;  %15361 = vmatprep.mubr.bf16.mxu1 %v14779_v63 }
 0x901   : > { %15249 = vmatmul.mubr.bf16.gmra.mrb[136].mxu0 %v14778_v27  ;;  %15362 = vmatmul.mubr.bf16.gmra.mrb[200].mxu1 %v14778_v27  ;;  %v17871_v27 = vld [vmem:[#allocation13 + $0xc4] ss:$8 sps:$4 sm:$0xff]  }
 0x902   : > { %15931 = vmatpush1.bf16.msra.mxu0 %v17857_v15 }
 0x903   : > { %15932 = vmatprep.subr.bf16.mxu0 %v17862_v17 }
 0x905   : > { %v18134_v33 = vpop.eup %18133  ;;  %v14584_v10 = vpop.xlane.xlu0 %14583 }
 0x906   : > { %v14667_v62 = vmul.f32 %v18134_v33, %v23820_v11  ;;  %v14666_v54 = vmul.f32 %v18134_v33, %v23817_v28  ;;  %v14614_v36 = vmul.f32 0.00390625, %v14584_v10  ;;  %15933 = vmatpush1.bf16.msra.mxu0 %v17860_v2  ;;  %v17869_v2 = vld [vmem:[#allocation13 + $0xc0] ss:$8 sps:$4 sm:$0xff]   ;;  %v17874_v33 = vld [vmem:[#allocation13 + $0xd4] ss:$8 sps:$4 sm:$0xff]  }
 0x907   : > { %v18136_v5 = vpop.eup %18135  ;;  %v14587_v37 = vpop.xlane.xlu1 %14586  ;;  %15934 = vmatprep.subr.bf16.mxu0 %v17865_v12 }
 0x908   : > { %v14669_v47 = vmul.f32 %v18136_v5, %v23826_v41  ;;  %v14711_v25 = vmul.f32 %v23926_v57, %v14667_v62  ;;  %v14668_v34 = vmul.f32 %v18136_v5, %v23823_v24  ;;  %v14710_v43 = vmul.f32 %v23920_v19, %v14666_v54  ;;  %v17872_v5 = vld [vmem:[#allocation13 + $0xd0] ss:$8 sps:$4 sm:$0xff]  }
 0x909   : > { %v14630_v51 = vadd.f32 1e-05, %v14614_v36  ;;  %v14615_v0 = vmul.f32 0.00390625, %v14587_v37 }
 0x90a   : > { %v14713_v11 = vmul.f32 %v23926_v57, %v14669_v47  ;;  %v14712_v28 = vmul.f32 %v23920_v19, %v14668_v34  ;;  %15935 = vmatpush1.bf16.msra.mxu0 %v17863_v31  ;;  %v24015_v41 = vadd.f32 %v23934_v22, %v14711_v25  ;;  %v24021_v24 = vadd.f32 %v23931_v21, %v14710_v43 }
 0x90b   : > { %18137 = vrsqrt.f32 %v14630_v51  ;;  %v14631_v38 = vadd.f32 1e-05, %v14615_v0  ;;  %15936 = vmatprep.subr.bf16.mxu0 %v17868_v26 }
 0x90c   : > { %v24018_v3 = vadd.f32 %v23934_v22, %v14713_v11  ;;  %v24024_v7 = vadd.f32 %v23931_v21, %v14712_v28 }
 0x90d   : > { %18139 = vrsqrt.f32 %v14631_v38  ;;  %v14590_v52 = vpop.xlane.xlu0 %14589 }
 0x90e   : > { %v14781_v63 = vpack.c.bf16 %v24018_v3, %v24015_v41  ;;  %v14780_v15 = vpack.c.bf16 %v24024_v7, %v24021_v24  ;;  %v14616_v17 = vmul.f32 0.00390625, %v14590_v52  ;;  %15937 = vmatpush1.bf16.msra.mxu0 %v17866_v35 }
 0x90f   : > { %v14593_v12 = vpop.xlane.xlu1 %14592  ;;  %15938 = vmatprep.subr.bf16.mxu0 %v17871_v27 }
 0x910   : > { %15258 = vmatprep.mubr.bf16.mxu0 %v14781_v63  ;;  %15371 = vmatprep.mubr.bf16.mxu1 %v14781_v63  ;;  %v14632_v10 = vadd.f32 1e-05, %v14616_v17  ;;  %v14617_v62 = vmul.f32 0.00390625, %v14593_v12 }
 0x911   : > { %15259 = vmatmul.mubr.bf16.gmra.mrb[140].mxu0 %v14780_v15  ;;  %15372 = vmatmul.mubr.bf16.gmra.mrb[204].mxu1 %v14780_v15 }
 0x912   : > { %18141 = vrsqrt.f32 %v14632_v10  ;;  %v14633_v54 = vadd.f32 1e-05, %v14617_v62  ;;  %15939 = vmatpush1.bf16.msra.mxu0 %v17869_v2 }
 0x913   : > { %15940 = vmatprep.subr.bf16.mxu0 %v17874_v33 }
 0x914   : > { %18143 = vrsqrt.f32 %v14633_v54 }
 0x915   : > { %v18138_v36 = vpop.eup %18137  ;;  %v14596_v31 = vpop.xlane.xlu0 %14595 }
 0x916   : > { %v14671_v37 = vmul.f32 %v18138_v36, %v23840_v46  ;;  %v14670_v47 = vmul.f32 %v18138_v36, %v23837_v6  ;;  %v14618_v34 = vmul.f32 0.00390625, %v14596_v31  ;;  %15941 = vmatpush1.bf16.msra.mxu0 %v17872_v5 }
 0x917   : > { %v18140_v25 = vpop.eup %18139  ;;  %v14599_v43 = vpop.xlane.xlu1 %14598 }
 0x918   : > { %v14673_v26 = vmul.f32 %v18140_v25, %v23846_v8  ;;  %v14715_v51 = vmul.f32 %v23926_v57, %v14671_v37  ;;  %v14672_v0 = vmul.f32 %v18140_v25, %v23843_v45  ;;  %v14714_v11 = vmul.f32 %v23920_v19, %v14670_v47 }
 0x919   : > { %v14634_v28 = vadd.f32 1e-05, %v14618_v34  ;;  %v14619_v38 = vmul.f32 0.00390625, %v14599_v43 }
 0x91a   : > { %v14717_v35 = vmul.f32 %v23926_v57, %v14673_v26  ;;  %v14716_v46 = vmul.f32 %v23920_v19, %v14672_v0  ;;  %v24039_v52 = vadd.f32 %v23934_v22, %v14715_v51  ;;  %v24045_v8 = vadd.f32 %v23931_v21, %v14714_v11 }
 0x91b   : > { %18145 = vrsqrt.f32 %v14634_v28  ;;  %v14635_v6 = vadd.f32 1e-05, %v14619_v38 }
 0x91c   : > { %v24042_v63 = vadd.f32 %v23934_v22, %v14717_v35  ;;  %v24048_v45 = vadd.f32 %v23931_v21, %v14716_v46  ;;  %v18142_v15 = vpop.eup %18141 }
 0x91d   : > { %18147 = vrsqrt.f32 %v14635_v6  ;;  %v14602_v27 = vpop.xlane.xlu0 %14601  ;;  %v14675_v12 = vmul.f32 %v18142_v15, %v23860_v4  ;;  %v14674_v33 = vmul.f32 %v18142_v15, %v23857_v16 }
 0x91e   : > { %v14783_v17 = vpack.c.bf16 %v24042_v63, %v24039_v52  ;;  %v14782_v2 = vpack.c.bf16 %v24048_v45, %v24045_v8  ;;  %v18144_v10 = vpop.eup %18143  ;;  %v14620_v62 = vmul.f32 0.00390625, %v14602_v27 }
 0x91f   : > { %v14605_v54 = vpop.xlane.xlu1 %14604  ;;  %v14677_v5 = vmul.f32 %v18144_v10, %v23866_v44  ;;  %v14719_v36 = vmul.f32 %v23926_v57, %v14675_v12  ;;  %v14676_v31 = vmul.f32 %v18144_v10, %v23863_v18  ;;  %v14718_v25 = vmul.f32 %v23920_v19, %v14674_v33 }
 0x920   : > { %15268 = vmatprep.mubr.bf16.mxu0 %v14783_v17  ;;  %15381 = vmatprep.mubr.bf16.mxu1 %v14783_v17  ;;  %v14636_v37 = vadd.f32 1e-05, %v14620_v62  ;;  %v14621_v47 = vmul.f32 0.00390625, %v14605_v54 }
 0x921   : > { %15269 = vmatmul.mubr.bf16.gmra.mrb[144].mxu0 %v14782_v2  ;;  %15382 = vmatmul.mubr.bf16.gmra.mrb[208].mxu1 %v14782_v2  ;;  %v14721_v4 = vmul.f32 %v23926_v57, %v14677_v5  ;;  %v14720_v16 = vmul.f32 %v23920_v19, %v14676_v31  ;;  %v24063_v43 = vadd.f32 %v23934_v22, %v14719_v36 }
 0x922   : > { %18149 = vrsqrt.f32 %v14636_v37  ;;  %v14637_v34 = vadd.f32 1e-05, %v14621_v47  ;;  %v24069_v18 = vadd.f32 %v23931_v21, %v14718_v25 }
 0x923   : > { %25674 = vst [vmem:[#allocation87_spill] sm:$0xff] %v24063_v43  ;;  %v24066_v44 = vadd.f32 %v23934_v22, %v14721_v4  ;;  %v24072_v26 = vadd.f32 %v23931_v21, %v14720_v16 }
 0x924   : > { %25676 = vst [vmem:[#allocation90_spill] sm:$0xff] %v24069_v18  ;;  %18151 = vrsqrt.f32 %v14637_v34  ;;  %v17877_v34 = vld [vmem:[#allocation13 + $0xe4] ss:$8 sps:$4 sm:$0xff]  }
 0x925   : > { %25675 = vst [vmem:[#allocation89_spill] sm:$0xff] %v24066_v44  ;;  %25677 = vst [vmem:[#allocation92_spill] sm:$0xff] %v24072_v26  ;;  %v18146_v51 = vpop.eup %18145  ;;  %v14785_v0 = vpack.c.bf16 %v24066_v44, %v24063_v43  ;;  %v14784_v11 = vpack.c.bf16 %v24072_v26, %v24069_v18  ;;  %15942 = vmatprep.subr.bf16.mxu0 %v17877_v34 }
 0x926   : > { %v14679_v28 = vmul.f32 %v18146_v51, %v23880_v23  ;;  %v14678_v38 = vmul.f32 %v18146_v51, %v23877_v50  ;;  %v17878_v51 = vld [vmem:[#allocation13 + $0xf0] ss:$8 sps:$4 sm:$0xff]  }
 0x927   : > { %v18148_v35 = vpop.eup %18147  ;;  %15278 = vmatprep.mubr.bf16.mxu0 %v14785_v0  ;;  %15391 = vmatprep.mubr.bf16.mxu1 %v14785_v0  ;;  %v14854_v0 = vld [vmem:[%s25686_s16] sm:$0xf]  ;;  %s16563_s16 = sshll.u32 %s24602_s26, 4  ;;  %s24723_s16 = int_to_ptr.vmem [resolvable:$true] %s16563_s16 }
 0x928   : > { %v14681_v46 = vmul.f32 %v18148_v35, %v23886_v13  ;;  %v14723_v6 = vmul.f32 %v23926_v57, %v14679_v28  ;;  %v14680_v15 = vmul.f32 %v18148_v35, %v23883_v1  ;;  %v14722_v27 = vmul.f32 %v23920_v19, %v14678_v38  ;;  %v25687_v28 = vld [vmem:[#allocation20_spill] sm:$0xff]  ;;  %s18415_s15 = scalar_lea.vmem %s24723_s16, 4096 }
 0x929   : > { %15279 = vmatmul.mubr.bf16.gmra.mrb[148].mxu0 %v14784_v11  ;;  %15392 = vmatmul.mubr.bf16.gmra.mrb[212].mxu1 %v14784_v11  ;;  %v24130_v11 = vrot.slane %v14854_v0, %v25670_v58  ;;  %v25688_v38 = vsub.s32 2, %v25687_v28  ;;  %p18416_p6 = scmp.ne.s32.totalorder %s24723_s16, %s18415_s15 }
 0x92a   : > { %v14725_v17 = vmul.f32 %v23926_v57, %v14681_v46  ;;  %v14724_v2 = vmul.f32 %v23920_v19, %v14680_v15  ;;  %v24087_v23 = vadd.f32 %v23934_v22, %v14723_v6  ;;  %v24093_v13 = vadd.f32 %v23931_v21, %v14722_v27 }
 0x92b   : > { %v24134_v35 = vrot.slane %v14854_v0, %v25688_v38  ;;  %v24137_v46 = vrot.slane %v14854_v0, %v25671_v39  ;;  %v25689_v6 = vsub.s32 3, %v25687_v28  ;;  %p18417_p12 = pnand %p18416_p6, %p25706_p9 }
 0x92c   : > { %25678 = vst [vmem:[#allocation91_spill] sm:$0xff] %v24087_v23  ;;  %v24090_v50 = vadd.f32 %v23934_v22, %v14725_v17  ;;  %25680 = vst [vmem:[#allocation93_spill] sm:$0xff] %v24093_v13  ;;  %v24096_v12 = vadd.f32 %v23931_v21, %v14724_v2  ;;  %v18150_v1 = vpop.eup %18149 }
 0x92d   : > { %v14683_v62 = vmul.f32 %v18150_v1, %v23900_v14  ;;  %v14682_v54 = vmul.f32 %v18150_v1, %v23897_v60  ;;  %v24141_v15 = vrot.slane %v14854_v0, %v25689_v6  ;;  %p18418_p1 = pneg %p18417_p12 }
 0x92e   : > { %25679 = vst [vmem:[#allocation118_spill] sm:$0xff] %v24090_v50  ;;  %25681 = vst [vmem:[#allocation94_spill] sm:$0xff] %v24096_v12  ;;  %v14787_v33 = vpack.c.bf16 %v24090_v50, %v24087_v23  ;;  %v14786_v10 = vpack.c.bf16 %v24096_v12, %v24093_v13  ;;  %v18152_v5 = vpop.eup %18151 }
 0x92f   : > { %v14685_v36 = vmul.f32 %v18152_v5, %v23906_v9  ;;  %v14727_v31 = vmul.f32 %v23926_v57, %v14683_v62  ;;  %v14684_v37 = vmul.f32 %v18152_v5, %v23903_v40  ;;  %v14726_v47 = vmul.f32 %v23920_v19, %v14682_v54 }
 0x930   : > { %15288 = vmatprep.mubr.bf16.mxu0 %v14787_v33  ;;  %15401 = vmatprep.mubr.bf16.mxu1 %v14787_v33 }
 0x931   : > { %15289 = vmatmul.mubr.bf16.gmra.mrb[152].mxu0 %v14786_v10  ;;  %15402 = vmatmul.mubr.bf16.gmra.mrb[216].mxu1 %v14786_v10  ;;  %v14729_v25 = vmul.f32 %v23926_v57, %v14685_v36  ;;  %v14728_v4 = vmul.f32 %v23920_v19, %v14684_v37  ;;  %v24111_v14 = vadd.f32 %v23934_v22, %v14727_v31  ;;  %v17875_v19 = vld [vmem:[#allocation13 + $0xe0] ss:$8 sps:$4 sm:$0xff]  }
 0x932   : > { %v24117_v9 = vadd.f32 %v23931_v21, %v14726_v47  ;;  %15943 = vmatpush1.bf16.msra.mxu0 %v17875_v19 }
 0x933   : > { %25682 = vst [vmem:[#allocation95_spill] sm:$0xff] %v24111_v14  ;;  %v24114_v60 = vadd.f32 %v23934_v22, %v14729_v25  ;;  %v24120_v16 = vadd.f32 %v23931_v21, %v14728_v4  ;;  %v17880_v22 = vld [vmem:[#allocation13 + $0xf4] ss:$8 sps:$4 sm:$0xff]   ;;  %v17883_v21 = vld [vmem:[#allocation13 + $0x104] ss:$8 sps:$4 sm:$0xff]  }
 0x934   : > { %25684 = vst [vmem:[#allocation97_spill] sm:$0xff] %v24117_v9  ;;  %15944 = vmatprep.subr.bf16.mxu0 %v17880_v22 }
 0x935   : > { %25683 = vst [vmem:[#allocation96_spill] sm:$0xff] %v24114_v60  ;;  %25685 = vst [vmem:[#allocation98_spill] sm:$0xff] %v24120_v16  ;;  %v14789_v40 = vpack.c.bf16 %v24114_v60, %v24111_v14  ;;  %v14788_v57 = vpack.c.bf16 %v24120_v16, %v24117_v9 }
 0x936   : > { %15945 = vmatpush1.bf16.msra.mxu0 %v17878_v51 }
 0x937   : > { %15298 = vmatprep.mubr.bf16.mxu0 %v14789_v40  ;;  %15411 = vmatprep.mubr.bf16.mxu1 %v14789_v40 }
 0x938   : > { %16027 = vmatprep.subr.bf16.mxu0 %v17883_v21 }
 0x939   : > { %15299 = vmatmul.mubr.bf16.gmra.mrb[156].mxu0 %v14788_v57  ;;  %15412 = vmatmul.mubr.bf16.gmra.mrb[220].mxu1 %v14788_v57 }
 0x9b1   : > { %v15230_v27 = vpop.f32.mrb[128].mxu0  ;;  %v15343_v17 = vpop.f32.mrb[192].mxu1 }
 0x9b2   : > { %v15231_v2 = vadd.f32 %v15230_v27, %v24130_v11  ;;  %v15344_v1 = vadd.f32 %v15343_v17, %v24134_v35  ;;  %v15232_v33 = vpop.f32.mrb[129].mxu0  ;;  %v15345_v10 = vpop.f32.mrb[193].mxu1 }
 0x9b3   : > { %v15233_v62 = vadd.f32 %v15232_v33, %v24137_v46  ;;  %v15346_v54 = vadd.f32 %v15345_v10, %v24141_v15  ;;  %v15234_v5 = vpop.f32.mrb[130].mxu0  ;;  %v15347_v36 = vpop.f32.mrb[194].mxu1  ;;  %v17881_v33 = vld [vmem:[#allocation13 + $0x100] ss:$8 sps:$4 sm:$0xff]   ;;  %v17886_v10 = vld [vmem:[#allocation13 + $0x114] ss:$8 sps:$4 sm:$0xff]  }
 0x9b4   : > { %v15235_v31 = vadd.f32 %v15234_v5, %v24130_v11  ;;  %v15348_v37 = vadd.f32 %v15347_v36, %v24134_v35  ;;  %v15236_v47 = vpop.f32.mrb[131].mxu0  ;;  %v15349_v25 = vpop.f32.mrb[195].mxu1  ;;  %v15422_v57 = vmax.f32 %v15231_v2, 0.0  ;;  %v15424_v19 = vmax.f32 %v15344_v1, 0.0  ;;  %v17884_v5 = vld [vmem:[#allocation13 + $0x110] ss:$8 sps:$4 sm:$0xff]  }
 0x9b5   : > { %v15237_v4 = vadd.f32 %v15236_v47, %v24137_v46  ;;  %v15350_v40 = vadd.f32 %v15349_v25, %v24141_v15  ;;  %v15423_v51 = vmax.f32 %v15233_v62, 0.0  ;;  %v15425_v21 = vmax.f32 %v15346_v54, 0.0  ;;  %v17889_v2 = vld [vmem:[#allocation13 + $0x124] ss:$8 sps:$4 sm:$0xff]   ;;  %v17887_v1 = vld [vmem:[#allocation13 + $0x120] ss:$8 sps:$4 sm:$0xff]  }
 0x9b6   : > { %v15426_v34 = vmax.f32 %v15235_v31, 0.0  ;;  %v15428_v22 = vmax.f32 %v15348_v37, 0.0  ;;  %v17892_v36 = vld [vmem:[#allocation13 + $0x134] ss:$8 sps:$4 sm:$0xff]  }
 0x9b7   : > { %v15427_v0 = vmax.f32 %v15237_v4, 0.0  ;;  %v15429_v28 = vmax.f32 %v15350_v40, 0.0 }
 0x9b8   : > { %v15486_v38 = vpack.c.bf16 %v15426_v34, %v15422_v57  ;;  %v24151_v6 = vpack.c.bf16 %v15428_v22, %v15424_v19 }
 0x9b9   : > { %v15487_v27 = vpack.c.bf16 %v15427_v0, %v15423_v51  ;;  %v24153_v17 = vpack.c.bf16 %v15429_v28, %v15425_v21  ;;  %v17890_v0 = vld [vmem:[#allocation13 + $0x130] ss:$8 sps:$4 sm:$0xff]  }
 0x9bb   : > { %15946 = vmatprep.mubr.bf16.mxu0 %v15487_v27  ;;  %v17895_v27 = vld [vmem:[#allocation13 + $0x144] ss:$8 sps:$4 sm:$0xff]  }
 0x9bc   : > { %15947 = vmatmul.mubr.bf16.vlgmr.msra.gmra.mrb[160].mxu0 %v15486_v38 }
 0x9bd   : > { %16028 = vmatpush1.bf16.msra.mxu0 %v17881_v33 }
 0x9be   : > { %16029 = vmatprep.subr.bf16.mxu0 %v17886_v10 }
 0x9c1   : > { %16030 = vmatpush1.bf16.msra.mxu0 %v17884_v5 }
 0x9c2   : > { %16031 = vmatprep.subr.bf16.mxu0 %v17889_v2 }
 0x9c3   : > { %v15240_v62 = vpop.f32.mrb[132].mxu0  ;;  %v15353_v54 = vpop.f32.mrb[196].mxu1 }
 0x9c4   : > { %v15241_v31 = vadd.f32 %v15240_v62, %v24130_v11  ;;  %v15354_v37 = vadd.f32 %v15353_v54, %v24134_v35  ;;  %v15242_v47 = vpop.f32.mrb[133].mxu0  ;;  %v15355_v25 = vpop.f32.mrb[197].mxu1 }
 0x9c5   : > { %v15243_v4 = vadd.f32 %v15242_v47, %v24137_v46  ;;  %v15356_v40 = vadd.f32 %v15355_v25, %v24141_v15  ;;  %v15244_v57 = vpop.f32.mrb[134].mxu0  ;;  %v15357_v19 = vpop.f32.mrb[198].mxu1  ;;  %16032 = vmatpush1.bf16.msra.mxu0 %v17887_v1 }
 0x9c6   : > { %v15245_v34 = vadd.f32 %v15244_v57, %v24130_v11  ;;  %v15358_v22 = vadd.f32 %v15357_v19, %v24134_v35  ;;  %v15246_v51 = vpop.f32.mrb[135].mxu0  ;;  %v15359_v21 = vpop.f32.mrb[199].mxu1  ;;  %16033 = vmatprep.subr.bf16.mxu0 %v17892_v36  ;;  %v15430_v33 = vmax.f32 %v15241_v31, 0.0  ;;  %v15432_v10 = vmax.f32 %v15354_v37, 0.0  ;;  %v17896_v36 = vld [vmem:[#allocation13 + $0x150] ss:$8 sps:$4 sm:$0xff]  }
 0x9c7   : > { %v15247_v28 = vadd.f32 %v15246_v51, %v24137_v46  ;;  %v15360_v38 = vadd.f32 %v15359_v21, %v24141_v15  ;;  %v15431_v62 = vmax.f32 %v15243_v4, 0.0  ;;  %v15433_v54 = vmax.f32 %v15356_v40, 0.0  ;;  %v17893_v51 = vld [vmem:[#allocation13 + $0x140] ss:$8 sps:$4 sm:$0xff]   ;;  %v17898_v21 = vld [vmem:[#allocation13 + $0x154] ss:$8 sps:$4 sm:$0xff]  }
 0x9c8   : > { %v15434_v5 = vmax.f32 %v15245_v34, 0.0  ;;  %v15436_v2 = vmax.f32 %v15358_v22, 0.0  ;;  %v17901_v31 = vld [vmem:[#allocation13 + $0x164] ss:$8 sps:$4 sm:$0xff]   ;;  %v17899_v40 = vld [vmem:[#allocation13 + $0x160] ss:$8 sps:$4 sm:$0xff]  }
 0x9c9   : > { %v15435_v47 = vmax.f32 %v15247_v28, 0.0  ;;  %v15437_v25 = vmax.f32 %v15360_v38, 0.0  ;;  %16034 = vmatpush1.bf16.msra.mxu0 %v17890_v0  ;;  %v17904_v38 = vld [vmem:[#allocation13 + $0x174] ss:$8 sps:$4 sm:$0xff]  }
 0x9ca   : > { %v15490_v57 = vpack.c.bf16 %v15434_v5, %v15430_v33  ;;  %v24163_v19 = vpack.c.bf16 %v15436_v2, %v15432_v10  ;;  %16035 = vmatprep.subr.bf16.mxu0 %v17895_v27 }
 0x9cb   : > { %v15491_v1 = vpack.c.bf16 %v15435_v47, %v15431_v62  ;;  %v24165_v60 = vpack.c.bf16 %v15437_v25, %v15433_v54 }
 0x9cd   : > { %15956 = vmatprep.mubr.bf16.mxu0 %v15491_v1  ;;  %16036 = vmatpush1.bf16.msra.mxu0 %v17893_v51  ;;  %v17902_v1 = vld [vmem:[#allocation13 + $0x170] ss:$8 sps:$4 sm:$0xff]  }
 0x9ce   : > { %15957 = vmatmul.mubr.bf16.gmra.mrb[164].mxu0 %v15490_v57  ;;  %16037 = vmatprep.subr.bf16.mxu0 %v17898_v21 }
 0x9d1   : > { %16038 = vmatpush1.bf16.msra.mxu0 %v17896_v36 }
 0x9d2   : > { %16039 = vmatprep.subr.bf16.mxu0 %v17901_v31 }
 0x9d4   : > { %v15250_v37 = vpop.f32.mrb[136].mxu0  ;;  %v15363_v4 = vpop.f32.mrb[200].mxu1 }
 0x9d5   : > { %v15251_v34 = vadd.f32 %v15250_v37, %v24130_v11  ;;  %v15364_v22 = vadd.f32 %v15363_v4, %v24134_v35  ;;  %v15252_v0 = vpop.f32.mrb[137].mxu0  ;;  %v15365_v28 = vpop.f32.mrb[201].mxu1  ;;  %16040 = vmatpush1.bf16.msra.mxu0 %v17899_v40  ;;  %v17907_v37 = vld [vmem:[#allocation13 + $0x184] ss:$8 sps:$4 sm:$0xff]   ;;  %v17910_v40 = vld [vmem:[#allocation13 + $0x194] ss:$8 sps:$4 sm:$0xff]  }
 0x9d6   : > { %v15253_v27 = vadd.f32 %v15252_v0, %v24137_v46  ;;  %v15366_v33 = vadd.f32 %v15365_v28, %v24141_v15  ;;  %v15254_v10 = vpop.f32.mrb[138].mxu0  ;;  %v15367_v5 = vpop.f32.mrb[202].mxu1  ;;  %16041 = vmatprep.subr.bf16.mxu0 %v17904_v38 }
 0x9d7   : > { %v15255_v2 = vadd.f32 %v15254_v10, %v24130_v11  ;;  %v15368_v62 = vadd.f32 %v15367_v5, %v24134_v35  ;;  %v15256_v54 = vpop.f32.mrb[139].mxu0  ;;  %v15369_v47 = vpop.f32.mrb[203].mxu1  ;;  %v15438_v51 = vmax.f32 %v15251_v34, 0.0  ;;  %v15440_v21 = vmax.f32 %v15364_v22, 0.0  ;;  %v17908_v34 = vld [vmem:[#allocation13 + $0x190] ss:$8 sps:$4 sm:$0xff]  }
 0x9d8   : > { %v15257_v25 = vadd.f32 %v15256_v54, %v24137_v46  ;;  %v15370_v57 = vadd.f32 %v15369_v47, %v24141_v15  ;;  %v15439_v4 = vmax.f32 %v15253_v27, 0.0  ;;  %v15441_v0 = vmax.f32 %v15366_v33, 0.0  ;;  %v17905_v54 = vld [vmem:[#allocation13 + $0x180] ss:$8 sps:$4 sm:$0xff]   ;;  %v17913_v22 = vld [vmem:[#allocation13 + $0x1a4] ss:$8 sps:$4 sm:$0xff]  }
 0x9d9   : > { %v15442_v36 = vmax.f32 %v15255_v2, 0.0  ;;  %v15444_v31 = vmax.f32 %v15368_v62, 0.0  ;;  %16042 = vmatpush1.bf16.msra.mxu0 %v17902_v1 }
 0x9da   : > { %v15443_v28 = vmax.f32 %v15257_v25, 0.0  ;;  %v15445_v10 = vmax.f32 %v15370_v57, 0.0  ;;  %16043 = vmatprep.subr.bf16.mxu0 %v17907_v37  ;;  %v17911_v25 = vld [vmem:[#allocation13 + $0x1a0] ss:$8 sps:$4 sm:$0xff]  }
 0x9db   : > { %v15494_v16 = vpack.c.bf16 %v15442_v36, %v15438_v51  ;;  %v24175_v5 = vpack.c.bf16 %v15444_v31, %v15440_v21  ;;  %v17916_v51 = vld [vmem:[#allocation13 + $0x1b4] ss:$8 sps:$4 sm:$0xff]  }
 0x9dc   : > { %v15495_v14 = vpack.c.bf16 %v15443_v28, %v15439_v4  ;;  %v24177_v9 = vpack.c.bf16 %v15445_v10, %v15441_v0 }
 0x9dd   : > { %16044 = vmatpush1.bf16.msra.mxu0 %v17905_v54 }
 0x9de   : > { %15966 = vmatprep.mubr.bf16.mxu0 %v15495_v14  ;;  %16045 = vmatprep.subr.bf16.mxu0 %v17910_v40 }
 0x9df   : > { %15967 = vmatmul.mubr.bf16.gmra.mrb[168].mxu0 %v15494_v16 }
 0x9e1   : > { %16046 = vmatpush1.bf16.msra.mxu0 %v17908_v34  ;;  %v17914_v34 = vld [vmem:[#allocation13 + $0x1b0] ss:$8 sps:$4 sm:$0xff]  }
 0x9e2   : > { %16047 = vmatprep.subr.bf16.mxu0 %v17913_v22 }
 0x9e4   : > { %v15260_v38 = vpop.f32.mrb[140].mxu0  ;;  %v15373_v27 = vpop.f32.mrb[204].mxu1 }
 0x9e5   : > { %v15261_v33 = vadd.f32 %v15260_v38, %v24130_v11  ;;  %v15374_v2 = vadd.f32 %v15373_v27, %v24134_v35  ;;  %v15262_v62 = vpop.f32.mrb[141].mxu0  ;;  %v15375_v47 = vpop.f32.mrb[205].mxu1  ;;  %16048 = vmatpush1.bf16.msra.mxu0 %v17911_v25  ;;  %v17925_v25 = vld [vmem:[#allocation13 + $0x1e4] ss:$8 sps:$4 sm:$0xff]  }
 0x9e6   : > { %v15263_v57 = vadd.f32 %v15262_v62, %v24137_v46  ;;  %v15376_v1 = vadd.f32 %v15375_v47, %v24141_v15  ;;  %v15264_v14 = vpop.f32.mrb[142].mxu0  ;;  %v15377_v16 = vpop.f32.mrb[206].mxu1  ;;  %16049 = vmatprep.subr.bf16.mxu0 %v17916_v51  ;;  %v17919_v47 = vld [vmem:[#allocation13 + $0x1c4] ss:$8 sps:$4 sm:$0xff]  }
 0x9e7   : > { %v15265_v21 = vadd.f32 %v15264_v14, %v24130_v11  ;;  %v15378_v36 = vadd.f32 %v15377_v16, %v24134_v35  ;;  %v15266_v31 = vpop.f32.mrb[143].mxu0  ;;  %v15379_v37 = vpop.f32.mrb[207].mxu1  ;;  %v15446_v28 = vmax.f32 %v15261_v33, 0.0  ;;  %v15448_v10 = vmax.f32 %v15374_v2, 0.0  ;;  %v17922_v33 = vld [vmem:[#allocation13 + $0x1d4] ss:$8 sps:$4 sm:$0xff]  }
 0x9e8   : > { %v15267_v4 = vadd.f32 %v15266_v31, %v24137_v46  ;;  %v15380_v0 = vadd.f32 %v15379_v37, %v24141_v15  ;;  %v15447_v38 = vmax.f32 %v15263_v57, 0.0  ;;  %v15449_v27 = vmax.f32 %v15376_v1, 0.0  ;;  %v17917_v31 = vld [vmem:[#allocation13 + $0x1c0] ss:$8 sps:$4 sm:$0xff]   ;;  %v17920_v2 = vld [vmem:[#allocation13 + $0x1d0] ss:$8 sps:$4 sm:$0xff]  }
 0x9e9   : > { %v15450_v54 = vmax.f32 %v15265_v21, 0.0  ;;  %v15452_v40 = vmax.f32 %v15378_v36, 0.0  ;;  %16050 = vmatpush1.bf16.msra.mxu0 %v17914_v34 }
 0x9ea   : > { %v15451_v22 = vmax.f32 %v15267_v4, 0.0  ;;  %v15453_v62 = vmax.f32 %v15380_v0, 0.0  ;;  %16051 = vmatprep.subr.bf16.mxu0 %v17919_v47  ;;  %v17923_v4 = vld [vmem:[#allocation13 + $0x1e0] ss:$8 sps:$4 sm:$0xff]  }
 0x9eb   : > { %v15498_v14 = vpack.c.bf16 %v15450_v54, %v15446_v28  ;;  %v24187_v16 = vpack.c.bf16 %v15452_v40, %v15448_v10  ;;  %v17928_v54 = vld [vmem:[#allocation13 + $0x1f4] ss:$8 sps:$4 sm:$0xff]  }
 0x9ec   : > { %v15499_v50 = vpack.c.bf16 %v15451_v22, %v15447_v38  ;;  %v24189_v12 = vpack.c.bf16 %v15453_v62, %v15449_v27 }
 0x9ed   : > { %16052 = vmatpush1.bf16.msra.mxu0 %v17917_v31 }
 0x9ee   : > { %15976 = vmatprep.mubr.bf16.mxu0 %v15499_v50  ;;  %16053 = vmatprep.subr.bf16.mxu0 %v17922_v33 }
 0x9ef   : > { %15977 = vmatmul.mubr.bf16.gmra.mrb[172].mxu0 %v15498_v14 }
 0x9f1   : > { %16054 = vmatpush1.bf16.msra.mxu0 %v17920_v2  ;;  %v17926_v2 = vld [vmem:[#allocation13 + $0x1f0] ss:$8 sps:$4 sm:$0xff]  }
 0x9f2   : > { %16055 = vmatprep.subr.bf16.mxu0 %v17925_v25 }
 0x9f4   : > { %v15270_v57 = vpop.f32.mrb[144].mxu0  ;;  %v15383_v1 = vpop.f32.mrb[208].mxu1 }
 0x9f5   : > { %v15271_v51 = vadd.f32 %v15270_v57, %v24130_v11  ;;  %v15384_v21 = vadd.f32 %v15383_v1, %v24134_v35  ;;  %v15272_v36 = vpop.f32.mrb[145].mxu0  ;;  %v15385_v37 = vpop.f32.mrb[209].mxu1  ;;  %16056 = vmatpush1.bf16.msra.mxu0 %v17923_v4 }
 0x9f6   : > { %v15273_v0 = vadd.f32 %v15272_v36, %v24137_v46  ;;  %v15386_v50 = vadd.f32 %v15385_v37, %v24141_v15  ;;  %v15274_v28 = vpop.f32.mrb[146].mxu0  ;;  %v15387_v10 = vpop.f32.mrb[210].mxu1  ;;  %16057 = vmatprep.subr.bf16.mxu0 %v17928_v54 }
 0x9f7   : > { %v15275_v40 = vadd.f32 %v15274_v28, %v24130_v11  ;;  %v15388_v34 = vadd.f32 %v15387_v10, %v24134_v35  ;;  %v15276_v38 = vpop.f32.mrb[147].mxu0  ;;  %v15389_v27 = vpop.f32.mrb[211].mxu1  ;;  %v15454_v47 = vmax.f32 %v15271_v51, 0.0  ;;  %v15456_v14 = vmax.f32 %v15384_v21, 0.0 }
 0x9f8   : > { %v15277_v22 = vadd.f32 %v15276_v38, %v24137_v46  ;;  %v15390_v62 = vadd.f32 %v15389_v27, %v24141_v15  ;;  %v15455_v57 = vmax.f32 %v15273_v0, 0.0  ;;  %v15457_v1 = vmax.f32 %v15386_v50, 0.0 }
 0x9f9   : > { %v15458_v31 = vmax.f32 %v15275_v40, 0.0  ;;  %v15460_v33 = vmax.f32 %v15388_v34, 0.0  ;;  %16058 = vmatpush1.bf16.msra.mxu0 %v17926_v2 }
 0x9fa   : > { %v15459_v25 = vmax.f32 %v15277_v22, 0.0  ;;  %v15461_v36 = vmax.f32 %v15390_v62, 0.0 }
 0x9fb   : > { %v15502_v37 = vpack.c.bf16 %v15458_v31, %v15454_v47  ;;  %v24199_v28 = vpack.c.bf16 %v15460_v33, %v15456_v14 }
 0x9fc   : > { %v15503_v10 = vpack.c.bf16 %v15459_v25, %v15455_v57  ;;  %v24201_v23 = vpack.c.bf16 %v15461_v36, %v15457_v1  ;;  %v15280_v38 = vpop.f32.mrb[148].mxu0  ;;  %v15393_v13 = vpop.f32.mrb[212].mxu1 }
 0x9fd   : > { %v15281_v51 = vadd.f32 %v15280_v38, %v24130_v11  ;;  %v15394_v21 = vadd.f32 %v15393_v13, %v24134_v35  ;;  %v15282_v40 = vpop.f32.mrb[149].mxu0  ;;  %v15395_v4 = vpop.f32.mrb[213].mxu1 }
 0x9fe   : > { %v15283_v0 = vadd.f32 %v15282_v40, %v24137_v46  ;;  %v15396_v50 = vadd.f32 %v15395_v4, %v24141_v15  ;;  %v15284_v54 = vpop.f32.mrb[150].mxu0  ;;  %v15397_v34 = vpop.f32.mrb[214].mxu1  ;;  %15986 = vmatprep.mubr.bf16.mxu0 %v15503_v10 }
 0x9ff   : > { %v15285_v27 = vadd.f32 %v15284_v54, %v24130_v11  ;;  %v15398_v22 = vadd.f32 %v15397_v34, %v24134_v35  ;;  %v15286_v62 = vpop.f32.mrb[151].mxu0  ;;  %v15399_v47 = vpop.f32.mrb[215].mxu1  ;;  %15987 = vmatmul.mubr.bf16.gmra.mrb[176].mxu0 %v15502_v37  ;;  %v15462_v31 = vmax.f32 %v15281_v51, 0.0  ;;  %v15464_v33 = vmax.f32 %v15394_v21, 0.0 }
 0xa00   : > { %v15287_v14 = vadd.f32 %v15286_v62, %v24137_v46  ;;  %v15400_v13 = vadd.f32 %v15399_v47, %v24141_v15  ;;  %v15463_v1 = vmax.f32 %v15283_v0, 0.0  ;;  %v15465_v25 = vmax.f32 %v15396_v50, 0.0 }
 0xa01   : > { %v15466_v2 = vmax.f32 %v15285_v27, 0.0  ;;  %v15468_v57 = vmax.f32 %v15398_v22, 0.0 }
 0xa02   : > { %v15467_v36 = vmax.f32 %v15287_v14, 0.0  ;;  %v15469_v38 = vmax.f32 %v15400_v13, 0.0 }
 0xa03   : > { %v15506_v10 = vpack.c.bf16 %v15466_v2, %v15462_v31  ;;  %v24211_v40 = vpack.c.bf16 %v15468_v57, %v15464_v33 }
 0xa04   : > { %v15507_v4 = vpack.c.bf16 %v15467_v36, %v15463_v1  ;;  %v24213_v54 = vpack.c.bf16 %v15469_v38, %v15465_v25  ;;  %v15290_v34 = vpop.f32.mrb[152].mxu0  ;;  %v15403_v37 = vpop.f32.mrb[216].mxu1 }
 0xa05   : > { %v15291_v62 = vadd.f32 %v15290_v34, %v24130_v11  ;;  %v15404_v47 = vadd.f32 %v15403_v37, %v24134_v35  ;;  %v15292_v51 = vpop.f32.mrb[153].mxu0  ;;  %v15405_v21 = vpop.f32.mrb[217].mxu1 }
 0xa06   : > { %v15293_v27 = vadd.f32 %v15292_v51, %v24137_v46  ;;  %v15406_v0 = vadd.f32 %v15405_v21, %v24141_v15  ;;  %v15294_v50 = vpop.f32.mrb[154].mxu0  ;;  %v15407_v22 = vpop.f32.mrb[218].mxu1  ;;  %15996 = vmatprep.mubr.bf16.mxu0 %v15507_v4 }
 0xa07   : > { %v15295_v14 = vadd.f32 %v15294_v50, %v24130_v11  ;;  %v15408_v13 = vadd.f32 %v15407_v22, %v24134_v35  ;;  %v15296_v31 = vpop.f32.mrb[155].mxu0  ;;  %v15409_v33 = vpop.f32.mrb[219].mxu1  ;;  %15997 = vmatmul.mubr.bf16.gmra.mrb[180].mxu0 %v15506_v10  ;;  %v15470_v1 = vmax.f32 %v15291_v62, 0.0  ;;  %v15472_v25 = vmax.f32 %v15404_v47, 0.0 }
 0xa08   : > { %v15297_v2 = vadd.f32 %v15296_v31, %v24137_v46  ;;  %v15410_v57 = vadd.f32 %v15409_v33, %v24141_v15  ;;  %v15471_v34 = vmax.f32 %v15293_v27, 0.0  ;;  %v15473_v37 = vmax.f32 %v15406_v0, 0.0 }
 0xa09   : > { %v15474_v36 = vmax.f32 %v15295_v14, 0.0  ;;  %v15476_v38 = vmax.f32 %v15408_v13, 0.0 }
 0xa0a   : > { %v15475_v51 = vmax.f32 %v15297_v2, 0.0  ;;  %v15477_v21 = vmax.f32 %v15410_v57, 0.0 }
 0xa0b   : > { %v15510_v4 = vpack.c.bf16 %v15474_v36, %v15470_v1  ;;  %v15512_v44 = vpack.c.bf16 %v15476_v38, %v15472_v25 }
 0xa0c   : > { %v15511_v50 = vpack.c.bf16 %v15475_v51, %v15471_v34  ;;  %v15513_v26 = vpack.c.bf16 %v15477_v21, %v15473_v37  ;;  %v15300_v22 = vpop.f32.mrb[156].mxu0  ;;  %v15413_v43 = vpop.f32.mrb[220].mxu1 }
 0xa0d   : > { %v15301_v10 = vadd.f32 %v15300_v22, %v24130_v11  ;;  %v15414_v31 = vadd.f32 %v15413_v43, %v24134_v35  ;;  %v15302_v18 = vpop.f32.mrb[157].mxu0  ;;  %v15415_v33 = vpop.f32.mrb[221].mxu1 }
 0xa0e   : > { %v15303_v62 = vadd.f32 %v15302_v18, %v24137_v46  ;;  %v15416_v47 = vadd.f32 %v15415_v33, %v24141_v15  ;;  %v15304_v27 = vpop.f32.mrb[158].mxu0  ;;  %v15417_v0 = vpop.f32.mrb[222].mxu1  ;;  %16006 = vmatprep.mubr.bf16.mxu0 %v15511_v50 }
 0xa0f   : > { %v15305_v14 = vadd.f32 %v15304_v27, %v24130_v11  ;;  %v15418_v13 = vadd.f32 %v15417_v0, %v24134_v35  ;;  %v15306_v2 = vpop.f32.mrb[159].mxu0  ;;  %v15419_v57 = vpop.f32.mrb[223].mxu1  ;;  %16007 = vmatmul.mubr.bf16.gmra.mrb[184].mxu0 %v15510_v4  ;;  %v15478_v25 = vmax.f32 %v15301_v10, 0.0  ;;  %v15480_v36 = vmax.f32 %v15414_v31, 0.0 }
 0xa10   : > { %v15307_v1 = vadd.f32 %v15306_v2, %v24137_v46  ;;  %v15420_v43 = vadd.f32 %v15419_v57, %v24141_v15  ;;  %v15479_v34 = vmax.f32 %v15303_v62, 0.0  ;;  %v15481_v37 = vmax.f32 %v15416_v47, 0.0 }
 0xa11   : > { %v15482_v38 = vmax.f32 %v15305_v14, 0.0  ;;  %v15484_v18 = vmax.f32 %v15418_v13, 0.0 }
 0xa12   : > { %v15483_v51 = vmax.f32 %v15307_v1, 0.0  ;;  %v15485_v21 = vmax.f32 %v15420_v43, 0.0 }
 0xa13   : > { %v15514_v50 = vpack.c.bf16 %v15482_v38, %v15478_v25  ;;  %v15516_v22 = vpack.c.bf16 %v15484_v18, %v15480_v36 }
 0xa14   : > { %v15515_v11 = vpack.c.bf16 %v15483_v51, %v15479_v34  ;;  %v15517_v33 = vpack.c.bf16 %v15485_v21, %v15481_v37 }
 0xa16   : > { %16016 = vmatprep.mubr.bf16.mxu0 %v15515_v11 }
 0xa17   : > { %16017 = vmatmul.mubr.bf16.gmra.mrb[188].mxu0 %v15514_v50 }
 0xa18   : > { %16059 = vmatprep.mubr.bf16.mxu0 %v24153_v17 }
 0xa1f   : > { %16060 = vmatmul.mubr.bf16.vlgmr.msra.gmra.mrb[160].mxu0 %v24151_v6 }
 0xa20   : > { %16069 = vmatprep.mubr.bf16.mxu0 %v24165_v60  ;;  %v15582_v60 = vld [vmem:[%s25690_s20] sm:$0x3]  ;;  %s25705_s20 = sld [smem:[#allocation156_spill]] }
 0xa26   : > { %s24721_s11 = scalar_lea.hbm %s25705_s20, %s17172_s8 }
 0xa27   : > { %16070 = vmatmul.mubr.bf16.gmra.mrb[164].mxu0 %v24163_v19 }
 0xa28   : > { %16079 = vmatprep.mubr.bf16.mxu0 %v24177_v9  ;;  %v24250_v9 = vrot.slane %v15582_v60, %v25671_v39 }
 0xa2f   : > { %16080 = vmatmul.mubr.bf16.gmra.mrb[168].mxu0 %v24175_v5 }
 0xa30   : > { %16089 = vmatprep.mubr.bf16.mxu0 %v24189_v12  ;;  %v24247_v12 = vrot.slane %v15582_v60, %v25670_v58 }
 0xa37   : > { %16090 = vmatmul.mubr.bf16.gmra.mrb[172].mxu0 %v24187_v16 }
 0xa38   : > { %16099 = vmatprep.mubr.bf16.mxu0 %v24201_v23 }
 0xa3f   : > { %16100 = vmatmul.mubr.bf16.gmra.mrb[176].mxu0 %v24199_v28 }
 0xa40   : > { %16109 = vmatprep.mubr.bf16.mxu0 %v24213_v54 }
 0xa47   : > { %16110 = vmatmul.mubr.bf16.gmra.mrb[180].mxu0 %v24211_v40 }
 0xa48   : > { %16119 = vmatprep.mubr.bf16.mxu0 %v15513_v26 }
 0xa4f   : > { %16120 = vmatmul.mubr.bf16.gmra.mrb[184].mxu0 %v15512_v44 }
 0xa50   : > { %16129 = vmatprep.mubr.bf16.mxu0 %v15517_v33 }
 0xa57   : > { %16130 = vmatmul.mubr.bf16.gmra.mrb[188].mxu0 %v15516_v22 }
 0xaf2   : > { %v16061_v23 = vpop.f32.mrb[160].mxu0 }
 0xaf3   : > { %v17365_v35 = vadd.f32 %v16061_v23, %v24247_v12  ;;  %v16063_v46 = vpop.f32.mrb[161].mxu0 }
 0xaf4   : > { %v17366_v15 = vadd.f32 %v16063_v46, %v24250_v9  ;;  %v16065_v26 = vpop.f32.mrb[162].mxu0 }
 0xaf5   : > { %v24255_v44 = vadd.f32 %v17365_v35, %v23946_v56  ;;  %v17367_v6 = vadd.f32 %v16065_v26, %v24247_v12  ;;  %v16067_v17 = vpop.f32.mrb[163].mxu0 }
 0xaf6   : > { %v24259_v19 = vadd.f32 %v17366_v15, %v23943_v32  ;;  %v17368_v5 = vadd.f32 %v16067_v17, %v24250_v9 }
 0xaf7   : > { %v24263_v16 = vadd.f32 %v17367_v6, %v23952_v42 }
 0xaf8   : > { %v24266_v28 = vadd.f32 %v17368_v5, %v23949_v20  ;;  %v16172_v40 = vadd.f32 %v24259_v19, %v24255_v44 }
 0xafa   : > { %v16071_v54 = vpop.f32.mrb[164].mxu0  ;;  %16173 = vadd.xlane.f32.xlu0 %v16172_v40  ;;  %v16175_v56 = vadd.f32 %v24266_v28, %v24263_v16 }
 0xafb   : > { %v17369_v4 = vadd.f32 %v16071_v54, %v24247_v12  ;;  %v16073_v32 = vpop.f32.mrb[165].mxu0 }
 0xafc   : > { %v17370_v10 = vadd.f32 %v16073_v32, %v24250_v9  ;;  %v16075_v31 = vpop.f32.mrb[166].mxu0  ;;  %16176 = vadd.xlane.f32.xlu1 %v16175_v56 }
 0xafd   : > { %v24275_v42 = vadd.f32 %v17369_v4, %v23973_v55  ;;  %v17371_v20 = vadd.f32 %v16075_v31, %v24247_v12  ;;  %v16077_v62 = vpop.f32.mrb[167].mxu0 }
 0xafe   : > { %v24279_v47 = vadd.f32 %v17370_v10, %v23967_v61  ;;  %v17372_v27 = vadd.f32 %v16077_v62, %v24250_v9 }
 0xaff   : > { %v24283_v0 = vadd.f32 %v17371_v20, %v23976_v30 }
 0xb00   : > { %v24286_v14 = vadd.f32 %v17372_v27, %v23970_v53  ;;  %v16178_v13 = vadd.f32 %v24279_v47, %v24275_v42 }
 0xb02   : > { %v16081_v2 = vpop.f32.mrb[168].mxu0  ;;  %16179 = vadd.xlane.f32.xlu0 %v16178_v13  ;;  %v16181_v55 = vadd.f32 %v24286_v14, %v24283_v0 }
 0xb03   : > { %v17373_v57 = vadd.f32 %v16081_v2, %v24247_v12  ;;  %v16083_v61 = vpop.f32.mrb[169].mxu0  ;;  %v25692_v2 = vld [vmem:[#allocation87_spill] sm:$0xff] }
 0xb04   : > { %v17374_v1 = vadd.f32 %v16083_v61, %v24250_v9  ;;  %v16085_v43 = vpop.f32.mrb[170].mxu0  ;;  %16182 = vadd.xlane.f32.xlu1 %v16181_v55  ;;  %v25693_v61 = vld [vmem:[#allocation92_spill] sm:$0xff] }
 0xb05   : > { %v24295_v30 = vadd.f32 %v17373_v57, %v23997_v49  ;;  %v17375_v53 = vadd.f32 %v16085_v43, %v24247_v12  ;;  %v16087_v25 = vpop.f32.mrb[171].mxu0  ;;  %v25694_v43 = vld [vmem:[#allocation89_spill] sm:$0xff] }
 0xb06   : > { %v24299_v36 = vadd.f32 %v17374_v1, %v23991_v48  ;;  %v17376_v38 = vadd.f32 %v16087_v25, %v24250_v9 }
 0xb07   : > { %v24303_v18 = vadd.f32 %v17375_v53, %v24000_v29 }
 0xb08   : > { %v24306_v34 = vadd.f32 %v17376_v38, %v23994_v59  ;;  %v16184_v37 = vadd.f32 %v24299_v36, %v24295_v30 }
 0xb0a   : > { %v16091_v51 = vpop.f32.mrb[172].mxu0  ;;  %16185 = vadd.xlane.f32.xlu0 %v16184_v37  ;;  %v16187_v49 = vadd.f32 %v24306_v34, %v24303_v18 }
 0xb0b   : > { %v17377_v21 = vadd.f32 %v16091_v51, %v24247_v12  ;;  %v16093_v48 = vpop.f32.mrb[173].mxu0 }
 0xb0c   : > { %v17378_v50 = vadd.f32 %v16093_v48, %v24250_v9  ;;  %v16095_v22 = vpop.f32.mrb[174].mxu0  ;;  %16188 = vadd.xlane.f32.xlu1 %v16187_v49 }
 0xb0d   : > { %v24315_v29 = vadd.f32 %v17377_v21, %v24021_v24  ;;  %v17379_v59 = vadd.f32 %v16095_v22, %v24247_v12  ;;  %v16097_v11 = vpop.f32.mrb[175].mxu0 }
 0xb0e   : > { %v24319_v33 = vadd.f32 %v17378_v50, %v24015_v41  ;;  %v17380_v60 = vadd.f32 %v16097_v11, %v24250_v9  ;;  %v25695_v50 = vld [vmem:[#allocation93_spill] sm:$0xff] }
 0xb0f   : > { %v24323_v23 = vadd.f32 %v17379_v59, %v24024_v7 }
 0xb10   : > { %v24326_v35 = vadd.f32 %v17380_v60, %v24018_v3  ;;  %v16190_v46 = vadd.f32 %v24319_v33, %v24315_v29  ;;  %v25696_v60 = vld [vmem:[#allocation91_spill] sm:$0xff] }
 0xb12   : > { %v16101_v15 = vpop.f32.mrb[176].mxu0  ;;  %16191 = vadd.xlane.f32.xlu0 %v16190_v46  ;;  %v16193_v24 = vadd.f32 %v24326_v35, %v24323_v23 }
 0xb13   : > { %v17381_v26 = vadd.f32 %v16101_v15, %v24247_v12  ;;  %v16103_v41 = vpop.f32.mrb[177].mxu0 }
 0xb14   : > { %v17382_v6 = vadd.f32 %v16103_v41, %v24250_v9  ;;  %v16105_v17 = vpop.f32.mrb[178].mxu0  ;;  %16194 = vadd.xlane.f32.xlu1 %v16193_v24  ;;  %v25697_v24 = vld [vmem:[#allocation94_spill] sm:$0xff] }
 0xb15   : > { %v24335_v7 = vadd.f32 %v17381_v26, %v24045_v8  ;;  %v17383_v3 = vadd.f32 %v16105_v17, %v24247_v12  ;;  %v16107_v5 = vpop.f32.mrb[179].mxu0  ;;  %v25698_v41 = vld [vmem:[#allocation118_spill] sm:$0xff] }
 0xb16   : > { %v24339_v40 = vadd.f32 %v17382_v6, %v24039_v52  ;;  %v17384_v54 = vadd.f32 %v16107_v5, %v24250_v9 }
 0xb17   : > { %v24343_v56 = vadd.f32 %v17383_v3, %v24048_v45  ;;  %v25691_v45 = vld [vmem:[#allocation90_spill] sm:$0xff] }
 0xb18   : > { %v24346_v4 = vadd.f32 %v17384_v54, %v24042_v63  ;;  %v16196_v32 = vadd.f32 %v24339_v40, %v24335_v7 }
 0xb1a   : > { %v16111_v10 = vpop.f32.mrb[180].mxu0  ;;  %16197 = vadd.xlane.f32.xlu0 %v16196_v32  ;;  %v16199_v8 = vadd.f32 %v24346_v4, %v24343_v56 }
 0xb1b   : > { %v17385_v31 = vadd.f32 %v16111_v10, %v24247_v12  ;;  %v16113_v52 = vpop.f32.mrb[181].mxu0 }
 0xb1c   : > { %v17386_v20 = vadd.f32 %v16113_v52, %v24250_v9  ;;  %v16115_v62 = vpop.f32.mrb[182].mxu0  ;;  %16200 = vadd.xlane.f32.xlu1 %v16199_v8 }
 0xb1d   : > { %v24355_v27 = vadd.f32 %v17385_v31, %v25691_v45  ;;  %v17387_v63 = vadd.f32 %v16115_v62, %v24247_v12  ;;  %v16117_v13 = vpop.f32.mrb[183].mxu0  ;;  %v25699_v31 = vld [vmem:[#allocation97_spill] sm:$0xff]  ;;  %v25700_v45 = vld [vmem:[#allocation95_spill] sm:$0xff] }
 0xb1e   : > { %v24359_v55 = vadd.f32 %v17386_v20, %v25692_v2  ;;  %v17388_v57 = vadd.f32 %v16117_v13, %v24250_v9  ;;  %v25701_v2 = vld [vmem:[#allocation98_spill] sm:$0xff] }
 0xb1f   : > { %v24363_v1 = vadd.f32 %v17387_v63, %v25693_v61  ;;  %v25702_v61 = vld [vmem:[#allocation96_spill] sm:$0xff] }
 0xb20   : > { %v24366_v53 = vadd.f32 %v17388_v57, %v25694_v43  ;;  %v16202_v25 = vadd.f32 %v24359_v55, %v24355_v27 }
 0xb22   : > { %v16121_v38 = vpop.f32.mrb[184].mxu0  ;;  %16203 = vadd.xlane.f32.xlu0 %v16202_v25  ;;  %v16205_v37 = vadd.f32 %v24366_v53, %v24363_v1 }
 0xb23   : > { %v17389_v51 = vadd.f32 %v16121_v38, %v24247_v12  ;;  %v16123_v49 = vpop.f32.mrb[185].mxu0 }
 0xb24   : > { %v17390_v21 = vadd.f32 %v16123_v49, %v24250_v9  ;;  %v16125_v48 = vpop.f32.mrb[186].mxu0  ;;  %16206 = vadd.xlane.f32.xlu1 %v16205_v37 }
 0xb25   : > { %v24375_v22 = vadd.f32 %v17389_v51, %v25695_v50  ;;  %v17391_v59 = vadd.f32 %v16125_v48, %v24247_v12  ;;  %v16127_v11 = vpop.f32.mrb[187].mxu0 }
 0xb26   : > { %v24379_v46 = vadd.f32 %v17390_v21, %v25696_v60  ;;  %v17392_v15 = vadd.f32 %v16127_v11, %v24250_v9 }
 0xb27   : > { %v24383_v26 = vadd.f32 %v17391_v59, %v25697_v24 }
 0xb28   : > { %v24386_v6 = vadd.f32 %v17392_v15, %v25698_v41  ;;  %v16208_v17 = vadd.f32 %v24379_v46, %v24375_v22 }
 0xb2a   : > { %v16131_v3 = vpop.f32.mrb[188].mxu0  ;;  %16209 = vadd.xlane.f32.xlu0 %v16208_v17  ;;  %v16211_v5 = vadd.f32 %v24386_v6, %v24383_v26 }
 0xb2b   : > { %v17393_v54 = vadd.f32 %v16131_v3, %v24247_v12  ;;  %v16133_v32 = vpop.f32.mrb[189].mxu0 }
 0xb2c   : > { %v17394_v10 = vadd.f32 %v16133_v32, %v24250_v9  ;;  %v16135_v8 = vpop.f32.mrb[190].mxu0  ;;  %16212 = vadd.xlane.f32.xlu1 %v16211_v5 }
 0xb2d   : > { %v24395_v52 = vadd.f32 %v17393_v54, %v25699_v31  ;;  %v17395_v20 = vadd.f32 %v16135_v8, %v24247_v12  ;;  %v16137_v62 = vpop.f32.mrb[191].mxu0 }
 0xb2e   : > { %v24399_v63 = vadd.f32 %v17394_v10, %v25700_v45  ;;  %v17396_v13 = vadd.f32 %v16137_v62, %v24250_v9 }
 0xb2f   : > { %v24403_v57 = vadd.f32 %v17395_v20, %v25701_v2 }
 0xb30   : > { %v24406_v43 = vadd.f32 %v17396_v13, %v25702_v61  ;;  %v16214_v25 = vadd.f32 %v24399_v63, %v24395_v52 }
 0xb32   : > { %16215 = vadd.xlane.f32.xlu0 %v16214_v25  ;;  %v16217_v38 = vadd.f32 %v24406_v43, %v24403_v57 }
 0xb34   : > { %16218 = vadd.xlane.f32.xlu1 %v16217_v38 }
 0xb87   : > { %v16174_v12 = vpop.xlane.xlu0 %16173 }
 0xb88   : > { %v16220_v37 = vmul.f32 0.00390625, %v16174_v12 }
 0xb89   : > { %v16177_v51 = vpop.xlane.xlu1 %16176 }
 0xb8a   : > { %v24413_v49 = vsub.f32 %v24255_v44, %v16220_v37  ;;  %v24416_v9 = vsub.f32 %v24259_v19, %v16220_v37  ;;  %v16221_v21 = vmul.f32 0.00390625, %v16177_v51 }
 0xb8c   : > { %v16268_v48 = vmul.f32 %v24413_v49, %v24413_v49  ;;  %v16269_v50 = vmul.f32 %v24416_v9, %v24416_v9  ;;  %v24423_v59 = vsub.f32 %v24263_v16, %v16221_v21  ;;  %v24426_v11 = vsub.f32 %v24266_v28, %v16221_v21 }
 0xb8e   : > { %v16270_v44 = vmul.f32 %v24423_v59, %v24423_v59  ;;  %v16271_v19 = vmul.f32 %v24426_v11, %v24426_v11  ;;  %v16300_v60 = vadd.f32 %v16269_v50, %v16268_v48 }
 0xb8f   : > { %v16180_v15 = vpop.xlane.xlu0 %16179 }
 0xb90   : > { %v16222_v24 = vmul.f32 0.00390625, %v16180_v15  ;;  %16301 = vadd.xlane.f32.xlu0 %v16300_v60  ;;  %v16303_v41 = vadd.f32 %v16271_v19, %v16270_v44 }
 0xb91   : > { %v16183_v17 = vpop.xlane.xlu1 %16182 }
 0xb92   : > { %v24433_v3 = vsub.f32 %v24275_v42, %v16222_v24  ;;  %v24436_v16 = vsub.f32 %v24279_v47, %v16222_v24  ;;  %v16223_v28 = vmul.f32 0.00390625, %v16183_v17  ;;  %16304 = vadd.xlane.f32.xlu1 %v16303_v41 }
 0xb94   : > { %v16272_v5 = vmul.f32 %v24433_v3, %v24433_v3  ;;  %v16273_v54 = vmul.f32 %v24436_v16, %v24436_v16  ;;  %v24443_v32 = vsub.f32 %v24283_v0, %v16223_v28  ;;  %v24446_v10 = vsub.f32 %v24286_v14, %v16223_v28 }
 0xb96   : > { %v16274_v42 = vmul.f32 %v24443_v32, %v24443_v32  ;;  %v16275_v47 = vmul.f32 %v24446_v10, %v24446_v10  ;;  %v16306_v8 = vadd.f32 %v16273_v54, %v16272_v5 }
 0xb97   : > { %v16186_v31 = vpop.xlane.xlu0 %16185 }
 0xb98   : > { %v16224_v20 = vmul.f32 0.00390625, %v16186_v31  ;;  %16307 = vadd.xlane.f32.xlu0 %v16306_v8  ;;  %v16309_v62 = vadd.f32 %v16275_v47, %v16274_v42 }
 0xb99   : > { %v16189_v45 = vpop.xlane.xlu1 %16188 }
 0xb9a   : > { %v24453_v13 = vsub.f32 %v24295_v30, %v16224_v20  ;;  %v24456_v0 = vsub.f32 %v24299_v36, %v16224_v20  ;;  %v16225_v14 = vmul.f32 0.00390625, %v16189_v45  ;;  %16310 = vadd.xlane.f32.xlu1 %v16309_v62 }
 0xb9c   : > { %v16276_v2 = vmul.f32 %v24453_v13, %v24453_v13  ;;  %v16277_v61 = vmul.f32 %v24456_v0, %v24456_v0  ;;  %v24463_v25 = vsub.f32 %v24303_v18, %v16225_v14  ;;  %v24466_v38 = vsub.f32 %v24306_v34, %v16225_v14 }
 0xb9e   : > { %v16278_v30 = vmul.f32 %v24463_v25, %v24463_v25  ;;  %v16279_v36 = vmul.f32 %v24466_v38, %v24466_v38  ;;  %v16312_v12 = vadd.f32 %v16277_v61, %v16276_v2 }
 0xb9f   : > { %v16192_v37 = vpop.xlane.xlu0 %16191 }
 0xba0   : > { %v16226_v51 = vmul.f32 0.00390625, %v16192_v37  ;;  %16313 = vadd.xlane.f32.xlu0 %v16312_v12  ;;  %v16315_v21 = vadd.f32 %v16279_v36, %v16278_v30 }
 0xba1   : > { %v16195_v48 = vpop.xlane.xlu1 %16194 }
 0xba2   : > { %v24473_v50 = vsub.f32 %v24315_v29, %v16226_v51  ;;  %v24476_v18 = vsub.f32 %v24319_v33, %v16226_v51  ;;  %v16227_v34 = vmul.f32 0.00390625, %v16195_v48  ;;  %16316 = vadd.xlane.f32.xlu1 %v16315_v21 }
 0xba4   : > { %v16280_v44 = vmul.f32 %v24473_v50, %v24473_v50  ;;  %v16281_v19 = vmul.f32 %v24476_v18, %v24476_v18  ;;  %v24483_v60 = vsub.f32 %v24323_v23, %v16227_v34  ;;  %v24486_v15 = vsub.f32 %v24326_v35, %v16227_v34 }
 0xba6   : > { %v16282_v29 = vmul.f32 %v24483_v60, %v24483_v60  ;;  %v16283_v33 = vmul.f32 %v24486_v15, %v24486_v15  ;;  %v16318_v24 = vadd.f32 %v16281_v19, %v16280_v44 }
 0xba7   : > { %v16198_v41 = vpop.xlane.xlu0 %16197 }
 0xba8   : > { %v16228_v17 = vmul.f32 0.00390625, %v16198_v41  ;;  %16319 = vadd.xlane.f32.xlu0 %v16318_v24  ;;  %v16321_v28 = vadd.f32 %v16283_v33, %v16282_v29 }
 0xba9   : > { %v16201_v5 = vpop.xlane.xlu1 %16200 }
 0xbaa   : > { %v24493_v54 = vsub.f32 %v24335_v7, %v16228_v17  ;;  %v24496_v23 = vsub.f32 %v24339_v40, %v16228_v17  ;;  %v16229_v35 = vmul.f32 0.00390625, %v16201_v5  ;;  %16322 = vadd.xlane.f32.xlu1 %v16321_v28 }
 0xbac   : > { %v16284_v42 = vmul.f32 %v24493_v54, %v24493_v54  ;;  %v16285_v47 = vmul.f32 %v24496_v23, %v24496_v23  ;;  %v24503_v8 = vsub.f32 %v24343_v56, %v16229_v35  ;;  %v24506_v31 = vsub.f32 %v24346_v4, %v16229_v35 }
 0xbae   : > { %v16286_v7 = vmul.f32 %v24503_v8, %v24503_v8  ;;  %v16287_v40 = vmul.f32 %v24506_v31, %v24506_v31  ;;  %v16324_v20 = vadd.f32 %v16285_v47, %v16284_v42 }
 0xbaf   : > { %v16204_v62 = vpop.xlane.xlu0 %16203 }
 0xbb0   : > { %v16230_v45 = vmul.f32 0.00390625, %v16204_v62  ;;  %16325 = vadd.xlane.f32.xlu0 %v16324_v20  ;;  %v16327_v14 = vadd.f32 %v16287_v40, %v16286_v7 }
 0xbb1   : > { %v16207_v2 = vpop.xlane.xlu1 %16206 }
 0xbb2   : > { %v24513_v61 = vsub.f32 %v24355_v27, %v16230_v45  ;;  %v24516_v56 = vsub.f32 %v24359_v55, %v16230_v45  ;;  %v16231_v4 = vmul.f32 0.00390625, %v16207_v2  ;;  %16328 = vadd.xlane.f32.xlu1 %v16327_v14 }
 0xbb4   : > { %v16288_v30 = vmul.f32 %v24513_v61, %v24513_v61  ;;  %v16289_v36 = vmul.f32 %v24516_v56, %v24516_v56  ;;  %v24523_v12 = vsub.f32 %v24363_v1, %v16231_v4  ;;  %v24526_v37 = vsub.f32 %v24366_v53, %v16231_v4 }
 0xbb6   : > { %v16290_v27 = vmul.f32 %v24523_v12, %v24523_v12  ;;  %v16291_v55 = vmul.f32 %v24526_v37, %v24526_v37  ;;  %v16330_v51 = vadd.f32 %v16289_v36, %v16288_v30 }
 0xbb7   : > { %v16210_v21 = vpop.xlane.xlu0 %16209 }
 0xbb8   : > { %v16232_v48 = vmul.f32 0.00390625, %v16210_v21  ;;  %16331 = vadd.xlane.f32.xlu0 %v16330_v51  ;;  %v16333_v34 = vadd.f32 %v16291_v55, %v16290_v27  ;;  %v16428_v21 = vld [vmem:[%s25703_s18] sm:$0x3]  ;;  %s18509_s18 = smov [#allocation14]  }
 0xbb9   : > { %v16213_v44 = vpop.xlane.xlu1 %16212  ;;  %s18419_s19 = sshll.u32 %s18509_s18, 4  ;;  %s18420_s19 = int_to_ptr.vmem [resolvable:$false] %s18419_s19 }
 0xbba   : > { %v24533_v19 = vsub.f32 %v24375_v22, %v16232_v48  ;;  %v24536_v1 = vsub.f32 %v24379_v46, %v16232_v48  ;;  %v16233_v53 = vmul.f32 0.00390625, %v16213_v44  ;;  %16334 = vadd.xlane.f32.xlu1 %v16333_v34  ;;  %v16472_v44 = vld [vmem:[%s25704_s28] sm:$0x3]  ;;  %s18421_s1 = scalar_lea.vmem %s18420_s19, 8192  ;;  %p18422_p13 = scmp.lt.s32.totalorder %s24723_s16, %s18420_s19 }
 0xbbb   : > { %p18423_p0 = scmp.lt.s32.totalorder %s18421_s1, %s18415_s15 }
 0xbbc   : > { %v16292_v29 = vmul.f32 %v24533_v19, %v24533_v19  ;;  %v16293_v33 = vmul.f32 %v24536_v1, %v24536_v1  ;;  %v24543_v24 = vsub.f32 %v24383_v26, %v16233_v53  ;;  %v24546_v41 = vsub.f32 %v24386_v6, %v16233_v53 }
 0xbbd   : > { %p18424_p2 = por %p18423_p0, %p18422_p13 }
 0xbbe   : > { %v16294_v22 = vmul.f32 %v24543_v24, %v24543_v24  ;;  %v16295_v46 = vmul.f32 %v24546_v41, %v24546_v41  ;;  %v16336_v17 = vadd.f32 %v16293_v33, %v16292_v29  ;;  %v24579_v29 = vrot.slane %v16428_v21, %v25670_v58 }
 0xbbf   : > { %v16216_v28 = vpop.xlane.xlu0 %16215  ;;  %v24582_v33 = vrot.slane %v16428_v21, %v25671_v39  ;;  %p18425_p8 = pnand %p18424_p2, %p18418_p1 }
 0xbc0   : > { %v16234_v5 = vmul.f32 0.00390625, %v16216_v28  ;;  %16337 = vadd.xlane.f32.xlu0 %v16336_v17  ;;  %v16339_v35 = vadd.f32 %v16295_v46, %v16294_v22  ;;  %v24585_v46 = vrot.slane %v16472_v44, %v25670_v58  ;;  %v24588_v17 = vrot.slane %v16472_v44, %v25671_v39 }
 0xbc1   : > { %v16219_v42 = vpop.xlane.xlu1 %16218 }
 0xbc2   : > { %v24553_v47 = vsub.f32 %v24395_v52, %v16234_v5  ;;  %v24556_v26 = vsub.f32 %v24399_v63, %v16234_v5  ;;  %v16235_v6 = vmul.f32 0.00390625, %v16219_v42  ;;  %16340 = vadd.xlane.f32.xlu1 %v16339_v35 }
 0xbc4   : > { %v16296_v7 = vmul.f32 %v24553_v47, %v24553_v47  ;;  %v16297_v40 = vmul.f32 %v24556_v26, %v24556_v26  ;;  %v24563_v20 = vsub.f32 %v24403_v57, %v16235_v6  ;;  %v24566_v62 = vsub.f32 %v24406_v43, %v16235_v6 }
 0xbc6   : > { %v16298_v52 = vmul.f32 %v24563_v20, %v24563_v20  ;;  %v16299_v63 = vmul.f32 %v24566_v62, %v24566_v62  ;;  %v16342_v45 = vadd.f32 %v16297_v40, %v16296_v7 }
 0xbc8   : > { %16343 = vadd.xlane.f32.xlu0 %v16342_v45  ;;  %v16345_v14 = vadd.f32 %v16299_v63, %v16298_v52 }
 0xbca   : > { %16346 = vadd.xlane.f32.xlu1 %v16345_v14 }
 0xc1d   : > { %v16302_v2 = vpop.xlane.xlu0 %16301 }
 0xc1e   : > { %v16348_v4 = vmul.f32 0.00390625, %v16302_v2 }
 0xc1f   : > { %v16305_v30 = vpop.xlane.xlu1 %16304 }
 0xc20   : > { %v16364_v36 = vadd.f32 1e-05, %v16348_v4  ;;  %v16349_v27 = vmul.f32 0.00390625, %v16305_v30 }
 0xc22   : > { %18153 = vrsqrt.f32 %v16364_v36  ;;  %v16365_v57 = vadd.f32 1e-05, %v16349_v27 }
 0xc24   : > { %18155 = vrsqrt.f32 %v16365_v57 }
 0xc25   : > { %v16308_v43 = vpop.xlane.xlu0 %16307 }
 0xc26   : > { %v16350_v55 = vmul.f32 0.00390625, %v16308_v43 }
 0xc27   : > { %v16311_v51 = vpop.xlane.xlu1 %16310 }
 0xc28   : > { %v16366_v48 = vadd.f32 1e-05, %v16350_v55  ;;  %v16351_v34 = vmul.f32 0.00390625, %v16311_v51 }
 0xc2a   : > { %18157 = vrsqrt.f32 %v16366_v48  ;;  %v16367_v53 = vadd.f32 1e-05, %v16351_v34 }
 0xc2c   : > { %v18154_v22 = vpop.eup %18153  ;;  %18159 = vrsqrt.f32 %v16367_v53 }
 0xc2d   : > { %v16396_v28 = vmul.f32 %v18154_v22, %v24413_v49  ;;  %v16397_v5 = vmul.f32 %v18154_v22, %v24416_v9  ;;  %v16314_v35 = vpop.xlane.xlu0 %16313 }
 0xc2e   : > { %v18156_v42 = vpop.eup %18155  ;;  %v16352_v6 = vmul.f32 0.00390625, %v16314_v35 }
 0xc2f   : > { %v16440_v7 = vmul.f32 %v24579_v29, %v16396_v28  ;;  %v16441_v40 = vmul.f32 %v24582_v33, %v16397_v5  ;;  %v16398_v52 = vmul.f32 %v18156_v42, %v24423_v59  ;;  %v16399_v58 = vmul.f32 %v18156_v42, %v24426_v11  ;;  %v16317_v63 = vpop.xlane.xlu1 %16316 }
 0xc30   : > { %v16368_v45 = vadd.f32 1e-05, %v16352_v6  ;;  %v16353_v39 = vmul.f32 0.00390625, %v16317_v63 }
 0xc31   : > { %v16484_v14 = vadd.f32 %v24585_v46, %v16440_v7  ;;  %v16485_v49 = vadd.f32 %v24588_v17, %v16441_v40  ;;  %v16442_v9 = vmul.f32 %v24579_v29, %v16398_v52  ;;  %v16443_v2 = vmul.f32 %v24582_v33, %v16399_v58 }
 0xc32   : > { %18161 = vrsqrt.f32 %v16368_v45  ;;  %v16369_v4 = vadd.f32 1e-05, %v16353_v39 }
 0xc33   : > { %16516 = vst [vmem:[%s24602_s26] sm:$0xff] %v16484_v14  ;;  %16517 = vst [vmem:[%s24602_s26 + $0x8] sm:$0xff] %v16485_v49  ;;  %v16486_v59 = vadd.f32 %v24585_v46, %v16442_v9  ;;  %v16487_v11 = vadd.f32 %v24588_v17, %v16443_v2 }
 0xc34   : > { %v18158_v30 = vpop.eup %18157  ;;  %18163 = vrsqrt.f32 %v16369_v4 }
 0xc35   : > { %16518 = vst [vmem:[%s24602_s26 + $0x10] sm:$0xff] %v16486_v59  ;;  %16519 = vst [vmem:[%s24602_s26 + $0x18] sm:$0xff] %v16487_v11  ;;  %v16400_v36 = vmul.f32 %v18158_v30, %v24433_v3  ;;  %v16401_v27 = vmul.f32 %v18158_v30, %v24436_v16  ;;  %v16320_v57 = vpop.xlane.xlu0 %16319 }
 0xc36   : > { %v18160_v43 = vpop.eup %18159  ;;  %v16354_v55 = vmul.f32 0.00390625, %v16320_v57 }
 0xc37   : > { %v16444_v51 = vmul.f32 %v24579_v29, %v16400_v36  ;;  %v16445_v21 = vmul.f32 %v24582_v33, %v16401_v27  ;;  %v16402_v48 = vmul.f32 %v18160_v43, %v24443_v32  ;;  %v16403_v34 = vmul.f32 %v18160_v43, %v24446_v10  ;;  %v16323_v44 = vpop.xlane.xlu1 %16322 }
 0xc38   : > { %v16370_v53 = vadd.f32 1e-05, %v16354_v55  ;;  %v16355_v3 = vmul.f32 0.00390625, %v16323_v44 }
 0xc39   : > { %v16488_v16 = vadd.f32 %v24585_v46, %v16444_v51  ;;  %v16489_v22 = vadd.f32 %v24588_v17, %v16445_v21  ;;  %v16446_v28 = vmul.f32 %v24579_v29, %v16402_v48  ;;  %v16447_v5 = vmul.f32 %v24582_v33, %v16403_v34 }
 0xc3a   : > { %18165 = vrsqrt.f32 %v16370_v53  ;;  %v16371_v35 = vadd.f32 1e-05, %v16355_v3 }
 0xc3b   : > { %16520 = vst [vmem:[%s24602_s26 + $0x20] sm:$0xff] %v16488_v16  ;;  %16521 = vst [vmem:[%s24602_s26 + $0x28] sm:$0xff] %v16489_v22  ;;  %v16490_v32 = vadd.f32 %v24585_v46, %v16446_v28  ;;  %v16491_v10 = vadd.f32 %v24588_v17, %v16447_v5 }
 0xc3c   : > { %v18162_v42 = vpop.eup %18161  ;;  %18167 = vrsqrt.f32 %v16371_v35 }
 0xc3d   : > { %16522 = vst [vmem:[%s24602_s26 + $0x30] sm:$0xff] %v16490_v32  ;;  %16523 = vst [vmem:[%s24602_s26 + $0x38] sm:$0xff] %v16491_v10  ;;  %v16404_v6 = vmul.f32 %v18162_v42, %v24453_v13  ;;  %v16405_v7 = vmul.f32 %v18162_v42, %v24456_v0  ;;  %v16326_v40 = vpop.xlane.xlu0 %16325 }
 0xc3e   : > { %v18164_v52 = vpop.eup %18163  ;;  %v16356_v58 = vmul.f32 0.00390625, %v16326_v40 }
 0xc3f   : > { %v16448_v63 = vmul.f32 %v24579_v29, %v16404_v6  ;;  %v16449_v45 = vmul.f32 %v24582_v33, %v16405_v7  ;;  %v16406_v39 = vmul.f32 %v18164_v52, %v24463_v25  ;;  %v16407_v14 = vmul.f32 %v18164_v52, %v24466_v38  ;;  %v16329_v49 = vpop.xlane.xlu1 %16328 }
 0xc40   : > { %v16372_v9 = vadd.f32 1e-05, %v16356_v58  ;;  %v16357_v13 = vmul.f32 0.00390625, %v16329_v49 }
 0xc41   : > { %v16492_v0 = vadd.f32 %v24585_v46, %v16448_v63  ;;  %v16493_v2 = vadd.f32 %v24588_v17, %v16449_v45  ;;  %v16450_v4 = vmul.f32 %v24579_v29, %v16406_v39  ;;  %v16451_v59 = vmul.f32 %v24582_v33, %v16407_v14 }
 0xc42   : > { %18169 = vrsqrt.f32 %v16372_v9  ;;  %v16373_v11 = vadd.f32 1e-05, %v16357_v13 }
 0xc43   : > { %16524 = vst [vmem:[%s24602_s26 + $0x40] sm:$0xff] %v16492_v0  ;;  %16525 = vst [vmem:[%s24602_s26 + $0x48] sm:$0xff] %v16493_v2  ;;  %v16494_v25 = vadd.f32 %v24585_v46, %v16450_v4  ;;  %v16495_v38 = vadd.f32 %v24588_v17, %v16451_v59 }
 0xc44   : > { %v18166_v30 = vpop.eup %18165  ;;  %18171 = vrsqrt.f32 %v16373_v11 }
 0xc45   : > { %16526 = vst [vmem:[%s24602_s26 + $0x50] sm:$0xff] %v16494_v25  ;;  %16527 = vst [vmem:[%s24602_s26 + $0x58] sm:$0xff] %v16495_v38  ;;  %v16408_v36 = vmul.f32 %v18166_v30, %v24473_v50  ;;  %v16409_v27 = vmul.f32 %v18166_v30, %v24476_v18  ;;  %v16332_v57 = vpop.xlane.xlu0 %16331 }
 0xc46   : > { %v18168_v43 = vpop.eup %18167  ;;  %v16358_v55 = vmul.f32 0.00390625, %v16332_v57 }
 0xc47   : > { %v16452_v51 = vmul.f32 %v24579_v29, %v16408_v36  ;;  %v16453_v21 = vmul.f32 %v24582_v33, %v16409_v27  ;;  %v16410_v48 = vmul.f32 %v18168_v43, %v24483_v60  ;;  %v16411_v34 = vmul.f32 %v18168_v43, %v24486_v15  ;;  %v16335_v44 = vpop.xlane.xlu1 %16334 }
 0xc48   : > { %v16374_v53 = vadd.f32 1e-05, %v16358_v55  ;;  %v16359_v50 = vmul.f32 0.00390625, %v16335_v44 }
 0xc49   : > { %v16496_v18 = vadd.f32 %v24585_v46, %v16452_v51  ;;  %v16497_v3 = vadd.f32 %v24588_v17, %v16453_v21  ;;  %v16454_v16 = vmul.f32 %v24579_v29, %v16410_v48  ;;  %v16455_v22 = vmul.f32 %v24582_v33, %v16411_v34 }
 0xc4a   : > { %18173 = vrsqrt.f32 %v16374_v53  ;;  %v16375_v28 = vadd.f32 1e-05, %v16359_v50 }
 0xc4b   : > { %16528 = vst [vmem:[%s24602_s26 + $0x60] sm:$0xff] %v16496_v18  ;;  %16529 = vst [vmem:[%s24602_s26 + $0x68] sm:$0xff] %v16497_v3  ;;  %v16498_v60 = vadd.f32 %v24585_v46, %v16454_v16  ;;  %v16499_v15 = vadd.f32 %v24588_v17, %v16455_v22 }
 0xc4c   : > { %v18170_v5 = vpop.eup %18169  ;;  %18175 = vrsqrt.f32 %v16375_v28 }
 0xc4d   : > { %16530 = vst [vmem:[%s24602_s26 + $0x70] sm:$0xff] %v16498_v60  ;;  %16531 = vst [vmem:[%s24602_s26 + $0x78] sm:$0xff] %v16499_v15  ;;  %v16412_v35 = vmul.f32 %v18170_v5, %v24493_v54  ;;  %v16413_v32 = vmul.f32 %v18170_v5, %v24496_v23  ;;  %v16338_v10 = vpop.xlane.xlu0 %16337 }
 0xc4e   : > { %v18172_v42 = vpop.eup %18171  ;;  %v16360_v6 = vmul.f32 0.00390625, %v16338_v10 }
 0xc4f   : > { %v16456_v7 = vmul.f32 %v24579_v29, %v16412_v35  ;;  %v16457_v40 = vmul.f32 %v24582_v33, %v16413_v32  ;;  %v16414_v52 = vmul.f32 %v18172_v42, %v24503_v8  ;;  %v16415_v58 = vmul.f32 %v18172_v42, %v24506_v31  ;;  %v16341_v63 = vpop.xlane.xlu1 %16340 }
 0xc50   : > { %v16376_v45 = vadd.f32 1e-05, %v16360_v6  ;;  %v16361_v54 = vmul.f32 0.00390625, %v16341_v63 }
 0xc51   : > { %v16500_v23 = vadd.f32 %v24585_v46, %v16456_v7  ;;  %v16501_v39 = vadd.f32 %v24588_v17, %v16457_v40  ;;  %v16458_v14 = vmul.f32 %v24579_v29, %v16414_v52  ;;  %v16459_v49 = vmul.f32 %v24582_v33, %v16415_v58 }
 0xc52   : > { %18177 = vrsqrt.f32 %v16376_v45  ;;  %v16377_v9 = vadd.f32 1e-05, %v16361_v54 }
 0xc53   : > { %16532 = vst [vmem:[%s24602_s26 + $0x80] sm:$0xff] %v16500_v23  ;;  %16533 = vst [vmem:[%s24602_s26 + $0x88] sm:$0xff] %v16501_v39  ;;  %v16502_v8 = vadd.f32 %v24585_v46, %v16458_v14  ;;  %v16503_v31 = vadd.f32 %v24588_v17, %v16459_v49 }
 0xc54   : > { %v18174_v13 = vpop.eup %18173  ;;  %18179 = vrsqrt.f32 %v16377_v9 }
 0xc55   : > { %16534 = vst [vmem:[%s24602_s26 + $0x90] sm:$0xff] %v16502_v8  ;;  %16535 = vst [vmem:[%s24602_s26 + $0x98] sm:$0xff] %v16503_v31  ;;  %v16416_v0 = vmul.f32 %v18174_v13, %v24513_v61  ;;  %v16417_v2 = vmul.f32 %v18174_v13, %v24516_v56  ;;  %v16344_v4 = vpop.xlane.xlu0 %16343 }
 0xc56   : > { %v18176_v59 = vpop.eup %18175  ;;  %v16362_v11 = vmul.f32 0.00390625, %v16344_v4 }
 0xc57   : > { %v16460_v25 = vmul.f32 %v24579_v29, %v16416_v0  ;;  %v16461_v38 = vmul.f32 %v24582_v33, %v16417_v2  ;;  %v16418_v30 = vmul.f32 %v18176_v59, %v24523_v12  ;;  %v16419_v36 = vmul.f32 %v18176_v59, %v24526_v37  ;;  %v16347_v27 = vpop.xlane.xlu1 %16346 }
 0xc58   : > { %v16378_v57 = vadd.f32 1e-05, %v16362_v11  ;;  %v16363_v61 = vmul.f32 0.00390625, %v16347_v27 }
 0xc59   : > { %v16504_v56 = vadd.f32 %v24585_v46, %v16460_v25  ;;  %v16505_v43 = vadd.f32 %v24588_v17, %v16461_v38  ;;  %v16462_v55 = vmul.f32 %v24579_v29, %v16418_v30  ;;  %v16463_v51 = vmul.f32 %v24582_v33, %v16419_v36 }
 0xc5a   : > { %18181 = vrsqrt.f32 %v16378_v57  ;;  %v16379_v21 = vadd.f32 1e-05, %v16363_v61 }
 0xc5b   : > { %16536 = vst [vmem:[%s24602_s26 + $0xa0] sm:$0xff] %v16504_v56  ;;  %16537 = vst [vmem:[%s24602_s26 + $0xa8] sm:$0xff] %v16505_v43  ;;  %v16506_v12 = vadd.f32 %v24585_v46, %v16462_v55  ;;  %v16507_v37 = vadd.f32 %v24588_v17, %v16463_v51 }
 0xc5c   : > { %v18178_v48 = vpop.eup %18177  ;;  %18183 = vrsqrt.f32 %v16379_v21 }
 0xc5d   : > { %16538 = vst [vmem:[%s24602_s26 + $0xb0] sm:$0xff] %v16506_v12  ;;  %16539 = vst [vmem:[%s24602_s26 + $0xb8] sm:$0xff] %v16507_v37  ;;  %v16420_v34 = vmul.f32 %v18178_v48, %v24533_v19  ;;  %v16421_v44 = vmul.f32 %v18178_v48, %v24536_v1 }
 0xc5e   : > { %v18180_v53 = vpop.eup %18179 }
 0xc5f   : > { %v16464_v50 = vmul.f32 %v24579_v29, %v16420_v34  ;;  %v16465_v18 = vmul.f32 %v24582_v33, %v16421_v44  ;;  %v16422_v3 = vmul.f32 %v18180_v53, %v24543_v24  ;;  %v16423_v16 = vmul.f32 %v18180_v53, %v24546_v41 }
 0xc61   : > { %v16508_v22 = vadd.f32 %v24585_v46, %v16464_v50  ;;  %v16509_v28 = vadd.f32 %v24588_v17, %v16465_v18  ;;  %v16466_v60 = vmul.f32 %v24579_v29, %v16422_v3  ;;  %v16467_v19 = vmul.f32 %v24582_v33, %v16423_v16 }
 0xc63   : > { %16540 = vst [vmem:[%s24602_s26 + $0xc0] sm:$0xff] %v16508_v22  ;;  %16541 = vst [vmem:[%s24602_s26 + $0xc8] sm:$0xff] %v16509_v28  ;;  %v16510_v1 = vadd.f32 %v24585_v46, %v16466_v60  ;;  %v16511_v15 = vadd.f32 %v24588_v17, %v16467_v19 }
 0xc64   : > { %v18182_v5 = vpop.eup %18181 }
 0xc65   : > { %16542 = vst [vmem:[%s24602_s26 + $0xd0] sm:$0xff] %v16510_v1  ;;  %16543 = vst [vmem:[%s24602_s26 + $0xd8] sm:$0xff] %v16511_v15  ;;  %v16424_v24 = vmul.f32 %v18182_v5, %v24553_v47  ;;  %v16425_v41 = vmul.f32 %v18182_v5, %v24556_v26 }
 0xc66   : > { %v18184_v35 = vpop.eup %18183 }
 0xc67   : > { %v16468_v32 = vmul.f32 %v24579_v29, %v16424_v24  ;;  %v16469_v10 = vmul.f32 %v24582_v33, %v16425_v41  ;;  %v16426_v42 = vmul.f32 %v18184_v35, %v24563_v20  ;;  %v16427_v6 = vmul.f32 %v18184_v35, %v24566_v62 }
 0xc69   : > { %v16512_v47 = vadd.f32 %v24585_v46, %v16468_v32  ;;  %v16513_v7 = vadd.f32 %v24588_v17, %v16469_v10  ;;  %v16470_v26 = vmul.f32 %v24579_v29, %v16426_v42  ;;  %v16471_v40 = vmul.f32 %v24582_v33, %v16427_v6 }
 0xc6b   : > { %16544 = vst [vmem:[%s24602_s26 + $0xe0] sm:$0xff] %v16512_v47  ;;  %16545 = vst [vmem:[%s24602_s26 + $0xe8] sm:$0xff] %v16513_v7  ;;  %v16514_v20 = vadd.f32 %v24585_v46, %v16470_v26  ;;  %v16515_v62 = vadd.f32 %v24588_v17, %v16471_v40 }
 0xc6d   : > { %16546 = vst [vmem:[%s24602_s26 + $0xf0] sm:$0xff] %v16514_v20  ;;  %16547 = vst [vmem:[%s24602_s26 + $0xf8] sm:$0xff] %v16515_v62 }
 0xc6e   : > { %18428 = shalt.err (!%p18425_p8)
}
 0xc6f   : > { %s18429_s28 = scalar_lea.hbm %s24721_s11, 4096  ;;  %s18433_s14 = scalar_lea.hbm %s25705_s20, 8192 }
 0xc70   : > { %p18430_p4 = scmp.ne.s32.totalorder %s24721_s11, %s18429_s28  ;;  %p18434_p3 = scmp.lt.u32.totalorder %s24721_s11, %s25705_s20 }
 0xc71   : > { %p18435_p5 = scmp.lt.u32.totalorder %s18433_s14, %s18429_s28  ;;  %p18437_p6 = scmp.lt.u32.totalorder %s18429_s28, %s24721_s11 }
 0xc72   : > { %p18431_p10 = pnand %p18430_p4, %p25706_p9 }
 0xc73   : > { %p18436_p7 = por %p18435_p5, %p18434_p3 }
 0xc74   : > { %p18432_p11 = pneg %p18431_p10 }
 0xc75   : > { %p18438_p12 = por %p18437_p6, %p18436_p7 }
 0xc77   : > { %p18439_p1 = pnand %p18438_p12, %p18432_p11 }
 0xc79   : > { %18442 = shalt.err (!%p18439_p1)
}
 0xc7a   : > { %s18510_s15 = smov 256   ;;  %s18511_s19 = smov 16  }
 0xc7b   : > { %17455 = dma.vmem_to_hbm [thread:$0]  (%p25706_p9), %s24723_s16, 4096, %s24721_s11, %s16549_s27, %s18510_s15, %s18510_s15, %s18511_s19  }
 0xc7c PF: > { %s16578_s1 = sand.u32 1, %s18481_s21   ;;  %p25707_p13 = scmp.ne.s32.totalorder %s25008_s30, 0 }
 0xc7d   : > { %p25708_p0 = scmp.ge.s32.totalorder %s18493_s24, 2  ;;  %s16579_s28 = scalar_lea.sflag [#allocation4], %s16578_s1 }
 0xc7f   : > { %p17481_p2 = pnand %p25708_p0, %p25707_p13 }
 0xc81   : > { %18476 = dma.done.wait (!%p17481_p2), %s16579_s28, 4096  }
 0xc82   : > { %18478 = vsyncadd (!%p17481_p2), %s16579_s28, 4294963200  ;;  %p32_p8 = scmp.ge.s32.totalorder %s18798_s29, 4   ;;  %s25709_s21 = smov %s18485_s22 }
 0xc83   : > { %s25710_s22 = smov %s18489_s23  ;;  %s25711_s23 = smov %s18809_s25 }
 0xc84   : > { %s25712_s24 = smov %s18798_s29  ;;  %34 = sbr.rel (!%p32_p8) target bundleno = 18 (0x12), region = 153 }
 0xc8b   :  { %16584 = vsyncpa [#allocation3], 1 }
 0xc8c   :  { %16586 = vsyncpa [#allocation3 + $0x1], 1 }
 0xc8d   :  { %16587 = vsyncpa [#allocation6], 1 }
 0xc8e   :  { %16588 = vsyncpa [#allocation9], 1 }
 0xc8f   :  { %16589 = vsyncpa [#allocation12], 1 }
 0xc90   :  { %16590 = vsyncpa [#allocation4], 1 }
 0xc91   :  { %16592 = vsyncpa [#allocation4 + $0x1], 1 }

</bundles_post_ra>
